<compile_context>
chip_gen: v5e
topology: v5e:2x2
jax: 0.10.0
libtpu: 0.0.40
codegen_flags: <defaults>
</compile_context>

<pallas_src>
import functools

import numpy as np
import jax
import jax.numpy as jnp
from jax import lax
from jax.experimental import pallas as pl
from jax.experimental.pallas import tpu as pltpu


# ---------------------------------------------------------------------------
# The fused kernel (one grid step == one image).
# Activation row layout: rows = y, columns = (x, c).
# "Padded row-pair" buffers P hold [padded row 2i | padded row 2i+1] per row.
# ---------------------------------------------------------------------------
def _aeconv_kernel(
    p1_ref,
    ta1, tb1, bc1, ta2, tb2, bc2, ta3, tb3, bc3,
    w1, b1, w2, b2, w3, b3, w4, b4,
    v10, v11, v12, bd1, v20, v21, v22, bd2, v30, v31, v32, bd3,
    enc_ref, dec_ref,
    p2_s, p3_s, e1_s, e2_s, e3_s,
):
    f32 = jnp.float32

    def mm(a, w):
        return jnp.dot(a.astype(jnp.bfloat16), w, preferred_element_type=f32)

    zrow = jnp.zeros((1, 192), f32)

    # ---------------- encoder ----------------
    # conv1: 32x32x3 -> 16x16x12
    p1 = p1_ref[0]                                              # (17, 192)
    out1 = mm(p1[0:16, :], ta1[...]) + mm(p1[1:17, :], tb1[...]) + bc1[...]
    out1 = jnp.maximum(out1, 0.0)                               # (16, 192)

    # repack out1 rows into conv2's padded row-pair buffer (9, 384)
    p2_s[0:1, 0:192] = zrow
    p2_s[8:9, 192:384] = zrow
    for j in range(8):
        p2_s[j + 1:j + 2, 0:192] = out1[2 * j + 1:2 * j + 2, :]
        p2_s[j:j + 1, 192:384] = out1[2 * j:2 * j + 1, :]

    # conv2: 16x16x12 -> 8x8x24
    p2 = p2_s[...]
    out2 = mm(p2[0:8, :], ta2[...]) + mm(p2[1:9, :], tb2[...]) + bc2[...]
    out2 = jnp.maximum(out2, 0.0)                               # (8, 192)

    p3_s[0:1, 0:192] = zrow
    p3_s[4:5, 192:384] = zrow
    for j in range(4):
        p3_s[j + 1:j + 2, 0:192] = out2[2 * j + 1:2 * j + 2, :]
        p3_s[j:j + 1, 192:384] = out2[2 * j:2 * j + 1, :]

    # conv3: 8x8x24 -> 4x4x48
    p3 = p3_s[...]
    out3 = mm(p3[0:4, :], ta3[...]) + mm(p3[1:5, :], tb3[...]) + bc3[...]
    out3 = jnp.maximum(out3, 0.0)                               # (4, 192)

    # ---------------- MLP (no inter-layer activations, as in the spec) -----
    # fc1 consumes conv3 row-by-row (no in-kernel flatten needed).
    h1 = b1[...]                                                # (1, 192)
    for y in range(4):
        h1 = h1 + mm(out3[y:y + 1, :], w1[y])                   # Linear(768->192)
    h2 = mm(h1, w2[...]) + b2[...]                              # Linear(192->48)
    enc = mm(h2, w3[...]) + b3[...]                             # Linear(48->16)
    enc_ref[0] = enc

    # fc_dec (16 -> 768) emitted directly as deconv1's padded input rows.
    e1_s[0:1, :] = zrow
    e1_s[5:6, :] = zrow
    for y in range(4):
        e1_s[1 + y:2 + y, :] = mm(enc, w4[y]) + b4[y]           # (1, 192)

    # ---------------- decoder (sub-pixel ConvTranspose) ----------------
    # deconv1: 4x4x48 -> 8x8x24 ; output row-pairs [row 2m | row 2m+1]
    e1 = e1_s[...]                                              # (6, 192)
    rp1 = (mm(e1[0:4, :], v10[...]) + mm(e1[1:5, :], v11[...])
           + mm(e1[2:6, :], v12[...]) + bd1[...])
    rp1 = jnp.maximum(rp1, 0.0)                                 # (4, 384)

    e2_s[0:1, :] = zrow
    e2_s[9:10, :] = zrow
    for m in range(4):
        e2_s[1 + 2 * m:2 + 2 * m, :] = rp1[m:m + 1, 0:192]
        e2_s[2 + 2 * m:3 + 2 * m, :] = rp1[m:m + 1, 192:384]

    # deconv2: 8x8x24 -> 16x16x12
    e2 = e2_s[...]                                              # (10, 192)
    rp2 = (mm(e2[0:8, :], v20[...]) + mm(e2[1:9, :], v21[...])
           + mm(e2[2:10, :], v22[...]) + bd2[...])
    rp2 = jnp.maximum(rp2, 0.0)                                 # (8, 384)

    e3_s[0:1, :] = zrow
    e3_s[17:18, :] = zrow
    for m in range(8):
        e3_s[1 + 2 * m:2 + 2 * m, :] = rp2[m:m + 1, 0:192]
        e3_s[2 + 2 * m:3 + 2 * m, :] = rp2[m:m + 1, 192:384]

    # deconv3: 16x16x12 -> 32x32x3 with fused sigmoid epilogue
    e3 = e3_s[...]                                              # (18, 192)
    y3 = (mm(e3[0:16, :], v30[...]) + mm(e3[1:17, :], v31[...])
          + mm(e3[2:18, :], v32[...]) + bd3[...])               # (16, 192)
    sig = pl.reciprocal(1.0 + jnp.exp(-y3), approx=True)        # EUP, off the VALU
    dec_ref[0] = jnp.minimum(sig, 1.0)


# ---------------------------------------------------------------------------
# pallas_call wrapper
# ---------------------------------------------------------------------------
def _const_map(b, *, n):
    return (0,) * n


def _wspec(arr):
    return pl.BlockSpec(arr.shape, functools.partial(_const_map, n=arr.ndim))


_WEIGHT_ORDER = (
    "ta1", "tb1", "bc1", "ta2", "tb2", "bc2", "ta3", "tb3", "bc3",
    "w1", "b1", "w2", "b2", "w3", "b3", "w4", "b4",
    "v10", "v11", "v12", "bd1", "v20", "v21", "v22", "bd2",
    "v30", "v31", "v32", "bd3",
)


def aeconv_forward(params, x):
    """x: (B, 3, 32, 32) f32 -> (encoded (B, 16), decoded (B, 3, 32, 32))."""
    B = x.shape[0]
    # Thin XLA layout glue on the tiny input: NCHW->NHWC, 1-row H pad, fold
    # row pairs into lanes. No per-layer HBM traffic, no im2col blow-up.
    xn = jnp.transpose(x, (0, 2, 3, 1))                         # (B, 32, 32, 3)
    xp = jnp.pad(xn, ((0, 0), (1, 1), (0, 0), (0, 0)))          # (B, 34, 32, 3)
    p1 = xp.reshape(B, 17, 192)                                 # padded row pairs

    weights = [params[k] for k in _WEIGHT_ORDER]

    grid_spec = pltpu.PrefetchScalarGridSpec(
        num_scalar_prefetch=0,
        grid=(B,),
        in_specs=[pl.BlockSpec((1, 17, 192), lambda b: (b, 0, 0))]
        + [_wspec(w) for w in weights],
        out_specs=(
            pl.BlockSpec((1, 1, 16), lambda b: (b, 0, 0)),
            pl.BlockSpec((1, 16, 192), lambda b: (b, 0, 0)),
        ),
        scratch_shapes=[
            pltpu.VMEM((9, 384), jnp.float32),    # conv2 padded row pairs
            pltpu.VMEM((5, 384), jnp.float32),    # conv3 padded row pairs
            pltpu.VMEM((6, 192), jnp.float32),    # deconv1 padded input rows
            pltpu.VMEM((10, 192), jnp.float32),   # deconv2 padded input rows
            pltpu.VMEM((18, 192), jnp.float32),   # deconv3 padded input rows
        ],
    )

    enc, dec_rp = pl.pallas_call(
        _aeconv_kernel,
        out_shape=(
            jax.ShapeDtypeStruct((B, 1, 16), jnp.float32),
            jax.ShapeDtypeStruct((B, 16, 192), jnp.float32),
        ),
        grid_spec=grid_spec,
        compiler_params=pltpu.CompilerParams(
            dimension_semantics=("parallel",)),
    )(p1, *weights)

    encoded = enc.reshape(B, 16)
    # dec_rp row m holds [output row 2m | row 2m+1] in (x, c) order.
    decoded = jnp.transpose(dec_rp.reshape(B, 32, 32, 3), (0, 3, 1, 2))
    return encoded, decoded


# ---------------------------------------------------------------------------
# One-time parameter preprocessing: PyTorch-style init, converted to
# matmul-ready bf16 block-Toeplitz layout (x-taps and x-padding folded in).
# ---------------------------------------------------------------------------
def _conv_to_row_toeplitz(w, b, w_in):
    """Conv2d(k=4, s=2, p=1) -> (TA, TB, bias_row) for the row-pair matmuls."""
    w = np.asarray(w, np.float32)
    b = np.asarray(b, np.float32)
    cout, cin, k, _ = w.shape
    wo = w_in // 2
    t = np.zeros((k, w_in * cin, wo * cout), np.float32)
    for ox in range(wo):
        for kx in range(k):
            ix = 2 * ox + kx - 1                 # x-padding folded in
            if 0 <= ix < w_in:
                for ky in range(k):
                    t[ky, ix * cin:(ix + 1) * cin,
                      ox * cout:(ox + 1) * cout] = w[:, :, ky, kx].T
    ta = np.concatenate([t[0], t[1]], axis=0)    # padded rows 2*oy, 2*oy+1
    tb = np.concatenate([t[2], t[3]], axis=0)    # padded rows 2*oy+2, 2*oy+3
    bias = np.tile(b, wo)[None, :]
    return (jnp.asarray(ta, jnp.bfloat16), jnp.asarray(tb, jnp.bfloat16),
            jnp.asarray(bias, jnp.float32))


def _deconv_to_row_toeplitz(w, b, w_in):
    """ConvTranspose2d(k=4, s=2, p=1) -> (V0, V1, V2, bias) sub-pixel matmuls."""
    w = np.asarray(w, np.float32)
    b = np.asarray(b, np.float32)
    cin, cout, k, _ = w.shape
    w_out = 2 * w_in
    u = np.zeros((k, w_in * cin, w_out * cout), np.float32)
    for ox in range(w_out):
        for ix in range(w_in):
            kx = ox + 1 - 2 * ix
            if 0 <= kx < k:
                for ky in range(k):
                    u[ky, ix * cin:(ix + 1) * cin,
                      ox * cout:(ox + 1) * cout] = w[:, :, ky, kx]
    zero = np.zeros_like(u[0])
    v0 = np.concatenate([u[3], zero], axis=1)    # pairs with input row m-1
    v1 = np.concatenate([u[1], u[2]], axis=1)    # pairs with input row m
    v2 = np.concatenate([zero, u[0]], axis=1)    # pairs with input row m+1
    bias = np.tile(b, 2 * w_out)[None, :]
    return (jnp.asarray(v0, jnp.bfloat16), jnp.asarray(v1, jnp.bfloat16),
            jnp.asarray(v2, jnp.bfloat16), jnp.asarray(bias, jnp.float32))


def init_params(key, channel=3, input_dim=32):
    assert channel == 3 and input_dim == 32, "kernel specialised to module defaults"
    k = 4
    keys = iter(jax.random.split(key, 20))

    def unif(shape, fan_in):
        bound = 1.0 / float(np.sqrt(fan_in))
        return jax.random.uniform(next(keys), shape, jnp.float32, -bound, bound)

    # PyTorch defaults: Conv/Linear use the layer fan_in; ConvTranspose2d uses
    # fan_in = out_channels * k * k (per _calculate_fan_in_and_fan_out).
    raw = {}
    raw["c1w"], raw["c1b"] = unif((12, 3, k, k), 3 * k * k), unif((12,), 3 * k * k)
    raw["c2w"], raw["c2b"] = unif((24, 12, k, k), 12 * k * k), unif((24,), 12 * k * k)
    raw["c3w"], raw["c3b"] = unif((48, 24, k, k), 24 * k * k), unif((48,), 24 * k * k)
    raw["l1w"], raw["l1b"] = unif((192, 768), 768), unif((192,), 768)
    raw["l2w"], raw["l2b"] = unif((48, 192), 192), unif((48,), 192)
    raw["l3w"], raw["l3b"] = unif((16, 48), 48), unif((16,), 48)
    raw["l4w"], raw["l4b"] = unif((768, 16), 16), unif((768,), 16)
    raw["d1w"], raw["d1b"] = unif((48, 24, k, k), 24 * k * k), unif((24,), 24 * k * k)
    raw["d2w"], raw["d2b"] = unif((24, 12, k, k), 12 * k * k), unif((12,), 12 * k * k)
    raw["d3w"], raw["d3b"] = unif((12, 3, k, k), 3 * k * k), unif((3,), 3 * k * k)

    p = {}
    p["ta1"], p["tb1"], p["bc1"] = _conv_to_row_toeplitz(raw["c1w"], raw["c1b"], 32)
    p["ta2"], p["tb2"], p["bc2"] = _conv_to_row_toeplitz(raw["c2w"], raw["c2b"], 16)
    p["ta3"], p["tb3"], p["bc3"] = _conv_to_row_toeplitz(raw["c3w"], raw["c3b"], 8)

    # fc1: permute NCHW-flat (c,y,x) input columns to the kernel's (y, x, c)
    # row layout and split into 4 per-row chunks (no in-kernel flatten).
    w1 = np.asarray(raw["l1w"], np.float32).T                   # (768, 192)
    w1 = w1.reshape(48, 4, 4, 192).transpose(1, 2, 0, 3).reshape(4, 192, 192)
    p["w1"] = jnp.asarray(w1, jnp.bfloat16)
    p["b1"] = jnp.asarray(np.asarray(raw["l1b"])[None, :], jnp.float32)
    p["w2"] = jnp.asarray(np.asarray(raw["l2w"]).T, jnp.bfloat16)       # (192, 48)
    p["b2"] = jnp.asarray(np.asarray(raw["l2b"])[None, :], jnp.float32)
    p["w3"] = jnp.asarray(np.asarray(raw["l3w"]).T, jnp.bfloat16)       # (48, 16)
    p["b3"] = jnp.asarray(np.asarray(raw["l3b"])[None, :], jnp.float32)
    # fc_dec: permute NCHW-flat output columns to (y, x, c), split per row.
    w4 = np.asarray(raw["l4w"], np.float32).T                   # (16, 768)
    w4 = w4.reshape(16, 48, 4, 4).transpose(2, 0, 3, 1).reshape(4, 16, 192)
    p["w4"] = jnp.asarray(w4, jnp.bfloat16)
    b4 = np.asarray(raw["l4b"], np.float32).reshape(48, 4, 4).transpose(1, 2, 0)
    p["b4"] = jnp.asarray(b4.reshape(4, 1, 192), jnp.float32)

    p["v10"], p["v11"], p["v12"], p["bd1"] = _deconv_to_row_toeplitz(raw["d1w"], raw["d1b"], 4)
    p["v20"], p["v21"], p["v22"], p["bd2"] = _deconv_to_row_toeplitz(raw["d2w"], raw["d2b"], 8)
    p["v30"], p["v31"], p["v32"], p["bd3"] = _deconv_to_row_toeplitz(raw["d3w"], raw["d3b"], 16)
    return p, raw


# ---------------------------------------------------------------------------
# Pure-JAX f32 reference mirroring the PyTorch module (for validation).
# ---------------------------------------------------------------------------
def reference_forward(raw, x):
    def conv(h, w, b):
        y = lax.conv_general_dilated(
            h, w, window_strides=(2, 2), padding=((1, 1), (1, 1)),
            dimension_numbers=("NCHW", "OIHW", "NCHW"))
        return y + b.reshape(1, -1, 1, 1)

    def deconv(h, w, b):
        wk = jnp.flip(jnp.transpose(w, (1, 0, 2, 3)), axis=(2, 3))
        y = lax.conv_general_dilated(
            h, wk, window_strides=(1, 1), padding=((2, 2), (2, 2)),
            lhs_dilation=(2, 2), dimension_numbers=("NCHW", "OIHW", "NCHW"))
        return y + b.reshape(1, -1, 1, 1)

    B = x.shape[0]
    h = jax.nn.relu(conv(x, raw["c1w"], raw["c1b"]))
    h = jax.nn.relu(conv(h, raw["c2w"], raw["c2b"]))
    h = jax.nn.relu(conv(h, raw["c3w"], raw["c3b"]))
    f = h.reshape(B, -1)
    f = f @ raw["l1w"].T + raw["l1b"]
    f = f @ raw["l2w"].T + raw["l2b"]
    enc = f @ raw["l3w"].T + raw["l3b"]
    g = (enc @ raw["l4w"].T + raw["l4b"]).reshape(B, 48, 4, 4)
    g = jax.nn.relu(deconv(g, raw["d1w"], raw["d1b"]))
    g = jax.nn.relu(deconv(g, raw["d2w"], raw["d2b"]))
    dec = jax.nn.sigmoid(deconv(g, raw["d3w"], raw["d3b"]))
    return enc, dec


if __name__ == "__main__":
    key = jax.random.PRNGKey(0)
    kp, kx = jax.random.split(key)

    batch, channel, input_dim = 2, 3, 32
    params, raw = init_params(kp, channel=channel, input_dim=input_dim)
    x = jax.random.normal(kx, (batch, channel, input_dim, input_dim),
                          dtype=jnp.float32)

    fwd = jax.jit(aeconv_forward)
    encoded, decoded = fwd(params, x)
    jax.block_until_ready((encoded, decoded))

    assert encoded.shape == (batch, 16)
    assert decoded.shape == (batch, channel, input_dim, input_dim)
    assert bool(jnp.all(jnp.isfinite(encoded)))
    assert bool(jnp.all((decoded >= 0.0) & (decoded <= 1.0)))   # Sigmoid output

    # Loose tolerances: kernel runs bf16 x bf16 matmuls with f32 accumulation.
    enc_want, dec_want = reference_forward(raw, x)
    enc_err = float(jnp.max(jnp.abs(encoded - enc_want)))
    dec_err = float(jnp.max(jnp.abs(decoded - dec_want)))
    assert enc_err < 5e-2, f"encoded mismatch: {enc_err}"
    assert dec_err < 2e-2, f"decoded mismatch: {dec_err}"

    print("KERNEL_OK")
</pallas_src>

<mosaic_0001>
module attributes {stable_mosaic.version = 11 : i64} {
  func.func @_aeconv_kernel(%arg0: i32, %arg1: memref<1x17x192xf32, #tpu.memory_space<vmem>>, %arg2: memref<192x192xbf16, #tpu.memory_space<vmem>>, %arg3: memref<192x192xbf16, #tpu.memory_space<vmem>>, %arg4: memref<1x192xf32, #tpu.memory_space<vmem>>, %arg5: memref<384x192xbf16, #tpu.memory_space<vmem>>, %arg6: memref<384x192xbf16, #tpu.memory_space<vmem>>, %arg7: memref<1x192xf32, #tpu.memory_space<vmem>>, %arg8: memref<384x192xbf16, #tpu.memory_space<vmem>>, %arg9: memref<384x192xbf16, #tpu.memory_space<vmem>>, %arg10: memref<1x192xf32, #tpu.memory_space<vmem>>, %arg11: memref<4x192x192xbf16, #tpu.memory_space<vmem>>, %arg12: memref<1x192xf32, #tpu.memory_space<vmem>>, %arg13: memref<192x48xbf16, #tpu.memory_space<vmem>>, %arg14: memref<1x48xf32, #tpu.memory_space<vmem>>, %arg15: memref<48x16xbf16, #tpu.memory_space<vmem>>, %arg16: memref<1x16xf32, #tpu.memory_space<vmem>>, %arg17: memref<4x16x192xbf16, #tpu.memory_space<vmem>>, %arg18: memref<4x1x192xf32, #tpu.memory_space<vmem>>, %arg19: memref<192x384xbf16, #tpu.memory_space<vmem>>, %arg20: memref<192x384xbf16, #tpu.memory_space<vmem>>, %arg21: memref<192x384xbf16, #tpu.memory_space<vmem>>, %arg22: memref<1x384xf32, #tpu.memory_space<vmem>>, %arg23: memref<192x384xbf16, #tpu.memory_space<vmem>>, %arg24: memref<192x384xbf16, #tpu.memory_space<vmem>>, %arg25: memref<192x384xbf16, #tpu.memory_space<vmem>>, %arg26: memref<1x384xf32, #tpu.memory_space<vmem>>, %arg27: memref<192x192xbf16, #tpu.memory_space<vmem>>, %arg28: memref<192x192xbf16, #tpu.memory_space<vmem>>, %arg29: memref<192x192xbf16, #tpu.memory_space<vmem>>, %arg30: memref<1x192xf32, #tpu.memory_space<vmem>>, %arg31: memref<1x1x16xf32, #tpu.memory_space<vmem>>, %arg32: memref<1x16x192xf32, #tpu.memory_space<vmem>>, %arg33: memref<9x384xf32, #tpu.memory_space<vmem>>, %arg34: memref<5x384xf32, #tpu.memory_space<vmem>>, %arg35: memref<6x192xf32, #tpu.memory_space<vmem>>, %arg36: memref<10x192xf32, #tpu.memory_space<vmem>>, %arg37: memref<18x192xf32, #tpu.memory_space<vmem>>) attributes {dimension_semantics = [#tpu.dimension_semantics<parallel>], iteration_bounds = array<i64: 2>, scalar_prefetch = 0 : i64, scratch_operands = 5 : i64, tpu.core_type = #tpu.core_type<tc>, window_params = [{transform_indices = @transform_0, window_bounds = array<i64: 1, 17, 192>}, {pipeline_mode = #tpu.pipeline_mode<synchronous>, transform_indices = @transform_1, window_bounds = array<i64: 192, 192>}, {pipeline_mode = #tpu.pipeline_mode<synchronous>, transform_indices = @transform_2, window_bounds = array<i64: 192, 192>}, {pipeline_mode = #tpu.pipeline_mode<synchronous>, transform_indices = @transform_3, window_bounds = array<i64: 1, 192>}, {pipeline_mode = #tpu.pipeline_mode<synchronous>, transform_indices = @transform_4, window_bounds = array<i64: 384, 192>}, {pipeline_mode = #tpu.pipeline_mode<synchronous>, transform_indices = @transform_5, window_bounds = array<i64: 384, 192>}, {pipeline_mode = #tpu.pipeline_mode<synchronous>, transform_indices = @transform_6, window_bounds = array<i64: 1, 192>}, {pipeline_mode = #tpu.pipeline_mode<synchronous>, transform_indices = @transform_7, window_bounds = array<i64: 384, 192>}, {pipeline_mode = #tpu.pipeline_mode<synchronous>, transform_indices = @transform_8, window_bounds = array<i64: 384, 192>}, {pipeline_mode = #tpu.pipeline_mode<synchronous>, transform_indices = @transform_9, window_bounds = array<i64: 1, 192>}, {pipeline_mode = #tpu.pipeline_mode<synchronous>, transform_indices = @transform_10, window_bounds = array<i64: 4, 192, 192>}, {pipeline_mode = #tpu.pipeline_mode<synchronous>, transform_indices = @transform_11, window_bounds = array<i64: 1, 192>}, {pipeline_mode = #tpu.pipeline_mode<synchronous>, transform_indices = @transform_12, window_bounds = array<i64: 192, 48>}, {pipeline_mode = #tpu.pipeline_mode<synchronous>, transform_indices = @transform_13, window_bounds = array<i64: 1, 48>}, {pipeline_mode = #tpu.pipeline_mode<synchronous>, transform_indices = @transform_14, window_bounds = array<i64: 48, 16>}, {pipeline_mode = #tpu.pipeline_mode<synchronous>, transform_indices = @transform_15, window_bounds = array<i64: 1, 16>}, {pipeline_mode = #tpu.pipeline_mode<synchronous>, transform_indices = @transform_16, window_bounds = array<i64: 4, 16, 192>}, {pipeline_mode = #tpu.pipeline_mode<synchronous>, transform_indices = @transform_17, window_bounds = array<i64: 4, 1, 192>}, {pipeline_mode = #tpu.pipeline_mode<synchronous>, transform_indices = @transform_18, window_bounds = array<i64: 192, 384>}, {pipeline_mode = #tpu.pipeline_mode<synchronous>, transform_indices = @transform_19, window_bounds = array<i64: 192, 384>}, {pipeline_mode = #tpu.pipeline_mode<synchronous>, transform_indices = @transform_20, window_bounds = array<i64: 192, 384>}, {pipeline_mode = #tpu.pipeline_mode<synchronous>, transform_indices = @transform_21, window_bounds = array<i64: 1, 384>}, {pipeline_mode = #tpu.pipeline_mode<synchronous>, transform_indices = @transform_22, window_bounds = array<i64: 192, 384>}, {pipeline_mode = #tpu.pipeline_mode<synchronous>, transform_indices = @transform_23, window_bounds = array<i64: 192, 384>}, {pipeline_mode = #tpu.pipeline_mode<synchronous>, transform_indices = @transform_24, window_bounds = array<i64: 192, 384>}, {pipeline_mode = #tpu.pipeline_mode<synchronous>, transform_indices = @transform_25, window_bounds = array<i64: 1, 384>}, {pipeline_mode = #tpu.pipeline_mode<synchronous>, transform_indices = @transform_26, window_bounds = array<i64: 192, 192>}, {pipeline_mode = #tpu.pipeline_mode<synchronous>, transform_indices = @transform_27, window_bounds = array<i64: 192, 192>}, {pipeline_mode = #tpu.pipeline_mode<synchronous>, transform_indices = @transform_28, window_bounds = array<i64: 192, 192>}, {pipeline_mode = #tpu.pipeline_mode<synchronous>, transform_indices = @transform_29, window_bounds = array<i64: 1, 192>}, {transform_indices = @transform_30, window_bounds = array<i64: 1, 1, 16>}, {transform_indices = @transform_31, window_bounds = array<i64: 1, 16, 192>}]} {
    %cst = arith.constant 0.000000e+00 : f32
    %0 = vector.broadcast %cst : f32 to vector<1x192xf32>
    %c0 = arith.constant 0 : index
    %c0_0 = arith.constant 0 : index
    %c0_1 = arith.constant 0 : index
    %1 = vector.load %arg1[%c0, %c0_0, %c0_1] : memref<1x17x192xf32, #tpu.memory_space<vmem>>, vector<1x17x192xf32>
    %2 = vector.shape_cast %1 : vector<1x17x192xf32> to vector<17x192xf32>
    %3 = vector.extract_strided_slice %2 {offsets = [0, 0], sizes = [16, 192], strides = [1, 1]} : vector<17x192xf32> to vector<16x192xf32>
    %c0_2 = arith.constant 0 : index
    %c0_3 = arith.constant 0 : index
    %4 = vector.load %arg2[%c0_2, %c0_3] : memref<192x192xbf16, #tpu.memory_space<vmem>>, vector<192x192xbf16>
    %5 = arith.truncf %3 : vector<16x192xf32> to vector<16x192xbf16>
    %cst_4 = arith.constant dense<0.000000e+00> : vector<16x192xf32>
    %6 = tpu.matmul %5, %4, %cst_4 {dimension_numbers = #tpu.dot_dimension_numbers<[1], [0], [0], [1], [0, 0, 1, 1], [], []>} : vector<16x192xbf16>, vector<192x192xbf16>, vector<16x192xf32> -> vector<16x192xf32>
    %7 = vector.extract_strided_slice %2 {offsets = [1, 0], sizes = [16, 192], strides = [1, 1]} : vector<17x192xf32> to vector<16x192xf32>
    %c0_5 = arith.constant 0 : index
    %c0_6 = arith.constant 0 : index
    %8 = vector.load %arg3[%c0_5, %c0_6] : memref<192x192xbf16, #tpu.memory_space<vmem>>, vector<192x192xbf16>
    %9 = arith.truncf %7 : vector<16x192xf32> to vector<16x192xbf16>
    %cst_7 = arith.constant dense<0.000000e+00> : vector<16x192xf32>
    %10 = tpu.matmul %9, %8, %cst_7 {dimension_numbers = #tpu.dot_dimension_numbers<[1], [0], [0], [1], [0, 0, 1, 1], [], []>} : vector<16x192xbf16>, vector<192x192xbf16>, vector<16x192xf32> -> vector<16x192xf32>
    %11 = arith.addf %6, %10 : vector<16x192xf32>
    %c0_8 = arith.constant 0 : index
    %c0_9 = arith.constant 0 : index
    %12 = vector.load %arg4[%c0_8, %c0_9] : memref<1x192xf32, #tpu.memory_space<vmem>>, vector<1x192xf32>
    %13 = vector.broadcast %12 : vector<1x192xf32> to vector<16x192xf32>
    %14 = arith.addf %11, %13 : vector<16x192xf32>
    %cst_10 = arith.constant 0.000000e+00 : f32
    %15 = vector.broadcast %cst_10 : f32 to vector<16x192xf32>
    %16 = arith.maximumf %14, %15 : vector<16x192xf32>
    %c0_11 = arith.constant 0 : index
    %c0_12 = arith.constant 0 : index
    %17 = vector.load %arg33[%c0_11, %c0_12] : memref<9x384xf32, #tpu.memory_space<vmem>>, vector<1x192xf32>
    tpu.vector_store %arg33[%c0_11, %c0_12], %0 {strides = array<i32>} : memref<9x384xf32, #tpu.memory_space<vmem>>, vector<1x192xf32>,
    %c8 = arith.constant 8 : index
    %c192 = arith.constant 192 : index
    %18 = vector.load %arg33[%c8, %c192] : memref<9x384xf32, #tpu.memory_space<vmem>>, vector<1x192xf32>
    tpu.vector_store %arg33[%c8, %c192], %0 {strides = array<i32>} : memref<9x384xf32, #tpu.memory_space<vmem>>, vector<1x192xf32>,
    %19 = vector.extract_strided_slice %16 {offsets = [1, 0], sizes = [1, 192], strides = [1, 1]} : vector<16x192xf32> to vector<1x192xf32>
    %c1 = arith.constant 1 : index
    %c0_13 = arith.constant 0 : index
    %20 = vector.load %arg33[%c1, %c0_13] : memref<9x384xf32, #tpu.memory_space<vmem>>, vector<1x192xf32>
    tpu.vector_store %arg33[%c1, %c0_13], %19 {strides = array<i32>} : memref<9x384xf32, #tpu.memory_space<vmem>>, vector<1x192xf32>,
    %21 = vector.extract_strided_slice %16 {offsets = [0, 0], sizes = [1, 192], strides = [1, 1]} : vector<16x192xf32> to vector<1x192xf32>
    %c0_14 = arith.constant 0 : index
    %c192_15 = arith.constant 192 : index
    %22 = vector.load %arg33[%c0_14, %c192_15] : memref<9x384xf32, #tpu.memory_space<vmem>>, vector<1x192xf32>
    tpu.vector_store %arg33[%c0_14, %c192_15], %21 {strides = array<i32>} : memref<9x384xf32, #tpu.memory_space<vmem>>, vector<1x192xf32>,
    %23 = vector.extract_strided_slice %16 {offsets = [3, 0], sizes = [1, 192], strides = [1, 1]} : vector<16x192xf32> to vector<1x192xf32>
    %c2 = arith.constant 2 : index
    %c0_16 = arith.constant 0 : index
    %24 = vector.load %arg33[%c2, %c0_16] : memref<9x384xf32, #tpu.memory_space<vmem>>, vector<1x192xf32>
    tpu.vector_store %arg33[%c2, %c0_16], %23 {strides = array<i32>} : memref<9x384xf32, #tpu.memory_space<vmem>>, vector<1x192xf32>,
    %25 = vector.extract_strided_slice %16 {offsets = [2, 0], sizes = [1, 192], strides = [1, 1]} : vector<16x192xf32> to vector<1x192xf32>
    %c1_17 = arith.constant 1 : index
    %c192_18 = arith.constant 192 : index
    %26 = vector.load %arg33[%c1_17, %c192_18] : memref<9x384xf32, #tpu.memory_space<vmem>>, vector<1x192xf32>
    tpu.vector_store %arg33[%c1_17, %c192_18], %25 {strides = array<i32>} : memref<9x384xf32, #tpu.memory_space<vmem>>, vector<1x192xf32>,
    %27 = vector.extract_strided_slice %16 {offsets = [5, 0], sizes = [1, 192], strides = [1, 1]} : vector<16x192xf32> to vector<1x192xf32>
    %c3 = arith.constant 3 : index
    %c0_19 = arith.constant 0 : index
    %28 = vector.load %arg33[%c3, %c0_19] : memref<9x384xf32, #tpu.memory_space<vmem>>, vector<1x192xf32>
    tpu.vector_store %arg33[%c3, %c0_19], %27 {strides = array<i32>} : memref<9x384xf32, #tpu.memory_space<vmem>>, vector<1x192xf32>,
    %29 = vector.extract_strided_slice %16 {offsets = [4, 0], sizes = [1, 192], strides = [1, 1]} : vector<16x192xf32> to vector<1x192xf32>
    %c2_20 = arith.constant 2 : index
    %c192_21 = arith.constant 192 : index
    %30 = vector.load %arg33[%c2_20, %c192_21] : memref<9x384xf32, #tpu.memory_space<vmem>>, vector<1x192xf32>
    tpu.vector_store %arg33[%c2_20, %c192_21], %29 {strides = array<i32>} : memref<9x384xf32, #tpu.memory_space<vmem>>, vector<1x192xf32>,
    %31 = vector.extract_strided_slice %16 {offsets = [7, 0], sizes = [1, 192], strides = [1, 1]} : vector<16x192xf32> to vector<1x192xf32>
    %c4 = arith.constant 4 : index
    %c0_22 = arith.constant 0 : index
    %32 = vector.load %arg33[%c4, %c0_22] : memref<9x384xf32, #tpu.memory_space<vmem>>, vector<1x192xf32>
    tpu.vector_store %arg33[%c4, %c0_22], %31 {strides = array<i32>} : memref<9x384xf32, #tpu.memory_space<vmem>>, vector<1x192xf32>,
    %33 = vector.extract_strided_slice %16 {offsets = [6, 0], sizes = [1, 192], strides = [1, 1]} : vector<16x192xf32> to vector<1x192xf32>
    %c3_23 = arith.constant 3 : index
    %c192_24 = arith.constant 192 : index
    %34 = vector.load %arg33[%c3_23, %c192_24] : memref<9x384xf32, #tpu.memory_space<vmem>>, vector<1x192xf32>
    tpu.vector_store %arg33[%c3_23, %c192_24], %33 {strides = array<i32>} : memref<9x384xf32, #tpu.memory_space<vmem>>, vector<1x192xf32>,
    %35 = vector.extract_strided_slice %16 {offsets = [9, 0], sizes = [1, 192], strides = [1, 1]} : vector<16x192xf32> to vector<1x192xf32>
    %c5 = arith.constant 5 : index
    %c0_25 = arith.constant 0 : index
    %36 = vector.load %arg33[%c5, %c0_25] : memref<9x384xf32, #tpu.memory_space<vmem>>, vector<1x192xf32>
    tpu.vector_store %arg33[%c5, %c0_25], %35 {strides = array<i32>} : memref<9x384xf32, #tpu.memory_space<vmem>>, vector<1x192xf32>,
    %37 = vector.extract_strided_slice %16 {offsets = [8, 0], sizes = [1, 192], strides = [1, 1]} : vector<16x192xf32> to vector<1x192xf32>
    %c4_26 = arith.constant 4 : index
    %c192_27 = arith.constant 192 : index
    %38 = vector.load %arg33[%c4_26, %c192_27] : memref<9x384xf32, #tpu.memory_space<vmem>>, vector<1x192xf32>
    tpu.vector_store %arg33[%c4_26, %c192_27], %37 {strides = array<i32>} : memref<9x384xf32, #tpu.memory_space<vmem>>, vector<1x192xf32>,
    %39 = vector.extract_strided_slice %16 {offsets = [11, 0], sizes = [1, 192], strides = [1, 1]} : vector<16x192xf32> to vector<1x192xf32>
    %c6 = arith.constant 6 : index
    %c0_28 = arith.constant 0 : index
    %40 = vector.load %arg33[%c6, %c0_28] : memref<9x384xf32, #tpu.memory_space<vmem>>, vector<1x192xf32>
    tpu.vector_store %arg33[%c6, %c0_28], %39 {strides = array<i32>} : memref<9x384xf32, #tpu.memory_space<vmem>>, vector<1x192xf32>,
    %41 = vector.extract_strided_slice %16 {offsets = [10, 0], sizes = [1, 192], strides = [1, 1]} : vector<16x192xf32> to vector<1x192xf32>
    %c5_29 = arith.constant 5 : index
    %c192_30 = arith.constant 192 : index
    %42 = vector.load %arg33[%c5_29, %c192_30] : memref<9x384xf32, #tpu.memory_space<vmem>>, vector<1x192xf32>
    tpu.vector_store %arg33[%c5_29, %c192_30], %41 {strides = array<i32>} : memref<9x384xf32, #tpu.memory_space<vmem>>, vector<1x192xf32>,
    %43 = vector.extract_strided_slice %16 {offsets = [13, 0], sizes = [1, 192], strides = [1, 1]} : vector<16x192xf32> to vector<1x192xf32>
    %c7 = arith.constant 7 : index
    %c0_31 = arith.constant 0 : index
    %44 = vector.load %arg33[%c7, %c0_31] : memref<9x384xf32, #tpu.memory_space<vmem>>, vector<1x192xf32>
    tpu.vector_store %arg33[%c7, %c0_31], %43 {strides = array<i32>} : memref<9x384xf32, #tpu.memory_space<vmem>>, vector<1x192xf32>,
    %45 = vector.extract_strided_slice %16 {offsets = [12, 0], sizes = [1, 192], strides = [1, 1]} : vector<16x192xf32> to vector<1x192xf32>
    %c6_32 = arith.constant 6 : index
    %c192_33 = arith.constant 192 : index
    %46 = vector.load %arg33[%c6_32, %c192_33] : memref<9x384xf32, #tpu.memory_space<vmem>>, vector<1x192xf32>
    tpu.vector_store %arg33[%c6_32, %c192_33], %45 {strides = array<i32>} : memref<9x384xf32, #tpu.memory_space<vmem>>, vector<1x192xf32>,
    %47 = vector.extract_strided_slice %16 {offsets = [15, 0], sizes = [1, 192], strides = [1, 1]} : vector<16x192xf32> to vector<1x192xf32>
    %c8_34 = arith.constant 8 : index
    %c0_35 = arith.constant 0 : index
    %48 = vector.load %arg33[%c8_34, %c0_35] : memref<9x384xf32, #tpu.memory_space<vmem>>, vector<1x192xf32>
    tpu.vector_store %arg33[%c8_34, %c0_35], %47 {strides = array<i32>} : memref<9x384xf32, #tpu.memory_space<vmem>>, vector<1x192xf32>,
    %49 = vector.extract_strided_slice %16 {offsets = [14, 0], sizes = [1, 192], strides = [1, 1]} : vector<16x192xf32> to vector<1x192xf32>
    %c7_36 = arith.constant 7 : index
    %c192_37 = arith.constant 192 : index
    %50 = vector.load %arg33[%c7_36, %c192_37] : memref<9x384xf32, #tpu.memory_space<vmem>>, vector<1x192xf32>
    tpu.vector_store %arg33[%c7_36, %c192_37], %49 {strides = array<i32>} : memref<9x384xf32, #tpu.memory_space<vmem>>, vector<1x192xf32>,
    %c0_38 = arith.constant 0 : index
    %c0_39 = arith.constant 0 : index
    %51 = vector.load %arg33[%c0_38, %c0_39] : memref<9x384xf32, #tpu.memory_space<vmem>>, vector<9x384xf32>
    %52 = vector.extract_strided_slice %51 {offsets = [0, 0], sizes = [8, 384], strides = [1, 1]} : vector<9x384xf32> to vector<8x384xf32>
    %c0_40 = arith.constant 0 : index
    %c0_41 = arith.constant 0 : index
    %53 = vector.load %arg5[%c0_40, %c0_41] : memref<384x192xbf16, #tpu.memory_space<vmem>>, vector<384x192xbf16>
    %54 = arith.truncf %52 : vector<8x384xf32> to vector<8x384xbf16>
    %cst_42 = arith.constant dense<0.000000e+00> : vector<8x192xf32>
    %55 = tpu.matmul %54, %53, %cst_42 {dimension_numbers = #tpu.dot_dimension_numbers<[1], [0], [0], [1], [0, 0, 1, 1], [], []>} : vector<8x384xbf16>, vector<384x192xbf16>, vector<8x192xf32> -> vector<8x192xf32>
    %56 = vector.extract_strided_slice %51 {offsets = [1, 0], sizes = [8, 384], strides = [1, 1]} : vector<9x384xf32> to vector<8x384xf32>
    %c0_43 = arith.constant 0 : index
    %c0_44 = arith.constant 0 : index
    %57 = vector.load %arg6[%c0_43, %c0_44] : memref<384x192xbf16, #tpu.memory_space<vmem>>, vector<384x192xbf16>
    %58 = arith.truncf %56 : vector<8x384xf32> to vector<8x384xbf16>
    %cst_45 = arith.constant dense<0.000000e+00> : vector<8x192xf32>
    %59 = tpu.matmul %58, %57, %cst_45 {dimension_numbers = #tpu.dot_dimension_numbers<[1], [0], [0], [1], [0, 0, 1, 1], [], []>} : vector<8x384xbf16>, vector<384x192xbf16>, vector<8x192xf32> -> vector<8x192xf32>
    %60 = arith.addf %55, %59 : vector<8x192xf32>
    %c0_46 = arith.constant 0 : index
    %c0_47 = arith.constant 0 : index
    %61 = vector.load %arg7[%c0_46, %c0_47] : memref<1x192xf32, #tpu.memory_space<vmem>>, vector<1x192xf32>
    %62 = vector.broadcast %61 : vector<1x192xf32> to vector<8x192xf32>
    %63 = arith.addf %60, %62 : vector<8x192xf32>
    %cst_48 = arith.constant 0.000000e+00 : f32
    %64 = vector.broadcast %cst_48 : f32 to vector<8x192xf32>
    %65 = arith.maximumf %63, %64 : vector<8x192xf32>
    %c0_49 = arith.constant 0 : index
    %c0_50 = arith.constant 0 : index
    %66 = vector.load %arg34[%c0_49, %c0_50] : memref<5x384xf32, #tpu.memory_space<vmem>>, vector<1x192xf32>
    tpu.vector_store %arg34[%c0_49, %c0_50], %0 {strides = array<i32>} : memref<5x384xf32, #tpu.memory_space<vmem>>, vector<1x192xf32>,
    %c4_51 = arith.constant 4 : index
    %c192_52 = arith.constant 192 : index
    %67 = vector.load %arg34[%c4_51, %c192_52] : memref<5x384xf32, #tpu.memory_space<vmem>>, vector<1x192xf32>
    tpu.vector_store %arg34[%c4_51, %c192_52], %0 {strides = array<i32>} : memref<5x384xf32, #tpu.memory_space<vmem>>, vector<1x192xf32>,
    %68 = vector.extract_strided_slice %65 {offsets = [1, 0], sizes = [1, 192], strides = [1, 1]} : vector<8x192xf32> to vector<1x192xf32>
    %c1_53 = arith.constant 1 : index
    %c0_54 = arith.constant 0 : index
    %69 = vector.load %arg34[%c1_53, %c0_54] : memref<5x384xf32, #tpu.memory_space<vmem>>, vector<1x192xf32>
    tpu.vector_store %arg34[%c1_53, %c0_54], %68 {strides = array<i32>} : memref<5x384xf32, #tpu.memory_space<vmem>>, vector<1x192xf32>,
    %70 = vector.extract_strided_slice %65 {offsets = [0, 0], sizes = [1, 192], strides = [1, 1]} : vector<8x192xf32> to vector<1x192xf32>
    %c0_55 = arith.constant 0 : index
    %c192_56 = arith.constant 192 : index
    %71 = vector.load %arg34[%c0_55, %c192_56] : memref<5x384xf32, #tpu.memory_space<vmem>>, vector<1x192xf32>
    tpu.vector_store %arg34[%c0_55, %c192_56], %70 {strides = array<i32>} : memref<5x384xf32, #tpu.memory_space<vmem>>, vector<1x192xf32>,
    %72 = vector.extract_strided_slice %65 {offsets = [3, 0], sizes = [1, 192], strides = [1, 1]} : vector<8x192xf32> to vector<1x192xf32>
    %c2_57 = arith.constant 2 : index
    %c0_58 = arith.constant 0 : index
    %73 = vector.load %arg34[%c2_57, %c0_58] : memref<5x384xf32, #tpu.memory_space<vmem>>, vector<1x192xf32>
    tpu.vector_store %arg34[%c2_57, %c0_58], %72 {strides = array<i32>} : memref<5x384xf32, #tpu.memory_space<vmem>>, vector<1x192xf32>,
    %74 = vector.extract_strided_slice %65 {offsets = [2, 0], sizes = [1, 192], strides = [1, 1]} : vector<8x192xf32> to vector<1x192xf32>
    %c1_59 = arith.constant 1 : index
    %c192_60 = arith.constant 192 : index
    %75 = vector.load %arg34[%c1_59, %c192_60] : memref<5x384xf32, #tpu.memory_space<vmem>>, vector<1x192xf32>
    tpu.vector_store %arg34[%c1_59, %c192_60], %74 {strides = array<i32>} : memref<5x384xf32, #tpu.memory_space<vmem>>, vector<1x192xf32>,
    %76 = vector.extract_strided_slice %65 {offsets = [5, 0], sizes = [1, 192], strides = [1, 1]} : vector<8x192xf32> to vector<1x192xf32>
    %c3_61 = arith.constant 3 : index
    %c0_62 = arith.constant 0 : index
    %77 = vector.load %arg34[%c3_61, %c0_62] : memref<5x384xf32, #tpu.memory_space<vmem>>, vector<1x192xf32>
    tpu.vector_store %arg34[%c3_61, %c0_62], %76 {strides = array<i32>} : memref<5x384xf32, #tpu.memory_space<vmem>>, vector<1x192xf32>,
    %78 = vector.extract_strided_slice %65 {offsets = [4, 0], sizes = [1, 192], strides = [1, 1]} : vector<8x192xf32> to vector<1x192xf32>
    %c2_63 = arith.constant 2 : index
    %c192_64 = arith.constant 192 : index
    %79 = vector.load %arg34[%c2_63, %c192_64] : memref<5x384xf32, #tpu.memory_space<vmem>>, vector<1x192xf32>
    tpu.vector_store %arg34[%c2_63, %c192_64], %78 {strides = array<i32>} : memref<5x384xf32, #tpu.memory_space<vmem>>, vector<1x192xf32>,
    %80 = vector.extract_strided_slice %65 {offsets = [7, 0], sizes = [1, 192], strides = [1, 1]} : vector<8x192xf32> to vector<1x192xf32>
    %c4_65 = arith.constant 4 : index
    %c0_66 = arith.constant 0 : index
    %81 = vector.load %arg34[%c4_65, %c0_66] : memref<5x384xf32, #tpu.memory_space<vmem>>, vector<1x192xf32>
    tpu.vector_store %arg34[%c4_65, %c0_66], %80 {strides = array<i32>} : memref<5x384xf32, #tpu.memory_space<vmem>>, vector<1x192xf32>,
    %82 = vector.extract_strided_slice %65 {offsets = [6, 0], sizes = [1, 192], strides = [1, 1]} : vector<8x192xf32> to vector<1x192xf32>
    %c3_67 = arith.constant 3 : index
    %c192_68 = arith.constant 192 : index
    %83 = vector.load %arg34[%c3_67, %c192_68] : memref<5x384xf32, #tpu.memory_space<vmem>>, vector<1x192xf32>
    tpu.vector_store %arg34[%c3_67, %c192_68], %82 {strides = array<i32>} : memref<5x384xf32, #tpu.memory_space<vmem>>, vector<1x192xf32>,
    %c0_69 = arith.constant 0 : index
    %c0_70 = arith.constant 0 : index
    %84 = vector.load %arg34[%c0_69, %c0_70] : memref<5x384xf32, #tpu.memory_space<vmem>>, vector<5x384xf32>
    %85 = vector.extract_strided_slice %84 {offsets = [0, 0], sizes = [4, 384], strides = [1, 1]} : vector<5x384xf32> to vector<4x384xf32>
    %c0_71 = arith.constant 0 : index
    %c0_72 = arith.constant 0 : index
    %86 = vector.load %arg8[%c0_71, %c0_72] : memref<384x192xbf16, #tpu.memory_space<vmem>>, vector<384x192xbf16>
    %87 = arith.truncf %85 : vector<4x384xf32> to vector<4x384xbf16>
    %cst_73 = arith.constant dense<0.000000e+00> : vector<4x192xf32>
    %88 = tpu.matmul %87, %86, %cst_73 {dimension_numbers = #tpu.dot_dimension_numbers<[1], [0], [0], [1], [0, 0, 1, 1], [], []>} : vector<4x384xbf16>, vector<384x192xbf16>, vector<4x192xf32> -> vector<4x192xf32>
    %89 = vector.extract_strided_slice %84 {offsets = [1, 0], sizes = [4, 384], strides = [1, 1]} : vector<5x384xf32> to vector<4x384xf32>
    %c0_74 = arith.constant 0 : index
    %c0_75 = arith.constant 0 : index
    %90 = vector.load %arg9[%c0_74, %c0_75] : memref<384x192xbf16, #tpu.memory_space<vmem>>, vector<384x192xbf16>
    %91 = arith.truncf %89 : vector<4x384xf32> to vector<4x384xbf16>
    %cst_76 = arith.constant dense<0.000000e+00> : vector<4x192xf32>
    %92 = tpu.matmul %91, %90, %cst_76 {dimension_numbers = #tpu.dot_dimension_numbers<[1], [0], [0], [1], [0, 0, 1, 1], [], []>} : vector<4x384xbf16>, vector<384x192xbf16>, vector<4x192xf32> -> vector<4x192xf32>
    %93 = arith.addf %88, %92 : vector<4x192xf32>
    %c0_77 = arith.constant 0 : index
    %c0_78 = arith.constant 0 : index
    %94 = vector.load %arg10[%c0_77, %c0_78] : memref<1x192xf32, #tpu.memory_space<vmem>>, vector<1x192xf32>
    %95 = vector.broadcast %94 : vector<1x192xf32> to vector<4x192xf32>
    %96 = arith.addf %93, %95 : vector<4x192xf32>
    %cst_79 = arith.constant 0.000000e+00 : f32
    %97 = vector.broadcast %cst_79 : f32 to vector<4x192xf32>
    %98 = arith.maximumf %96, %97 : vector<4x192xf32>
    %c0_80 = arith.constant 0 : index
    %c0_81 = arith.constant 0 : index
    %99 = vector.load %arg12[%c0_80, %c0_81] : memref<1x192xf32, #tpu.memory_space<vmem>>, vector<1x192xf32>
    %100 = vector.extract_strided_slice %98 {offsets = [0, 0], sizes = [1, 192], strides = [1, 1]} : vector<4x192xf32> to vector<1x192xf32>
    %c0_82 = arith.constant 0 : index
    %c0_83 = arith.constant 0 : index
    %c0_84 = arith.constant 0 : index
    %101 = vector.load %arg11[%c0_82, %c0_83, %c0_84] : memref<4x192x192xbf16, #tpu.memory_space<vmem>>, vector<1x192x192xbf16>
    %102 = vector.shape_cast %101 : vector<1x192x192xbf16> to vector<192x192xbf16>
    %103 = arith.truncf %100 : vector<1x192xf32> to vector<1x192xbf16>
    %cst_85 = arith.constant dense<0.000000e+00> : vector<1x192xf32>
    %104 = tpu.matmul %103, %102, %cst_85 {dimension_numbers = #tpu.dot_dimension_numbers<[1], [0], [0], [1], [0, 0, 1, 1], [], []>} : vector<1x192xbf16>, vector<192x192xbf16>, vector<1x192xf32> -> vector<1x192xf32>
    %105 = arith.addf %99, %104 : vector<1x192xf32>
    %106 = vector.extract_strided_slice %98 {offsets = [1, 0], sizes = [1, 192], strides = [1, 1]} : vector<4x192xf32> to vector<1x192xf32>
    %c1_86 = arith.constant 1 : index
    %c0_87 = arith.constant 0 : index
    %c0_88 = arith.constant 0 : index
    %107 = vector.load %arg11[%c1_86, %c0_87, %c0_88] : memref<4x192x192xbf16, #tpu.memory_space<vmem>>, vector<1x192x192xbf16>
    %108 = vector.shape_cast %107 : vector<1x192x192xbf16> to vector<192x192xbf16>
    %109 = arith.truncf %106 : vector<1x192xf32> to vector<1x192xbf16>
    %cst_89 = arith.constant dense<0.000000e+00> : vector<1x192xf32>
    %110 = tpu.matmul %109, %108, %cst_89 {dimension_numbers = #tpu.dot_dimension_numbers<[1], [0], [0], [1], [0, 0, 1, 1], [], []>} : vector<1x192xbf16>, vector<192x192xbf16>, vector<1x192xf32> -> vector<1x192xf32>
    %111 = arith.addf %105, %110 : vector<1x192xf32>
    %112 = vector.extract_strided_slice %98 {offsets = [2, 0], sizes = [1, 192], strides = [1, 1]} : vector<4x192xf32> to vector<1x192xf32>
    %c2_90 = arith.constant 2 : index
    %c0_91 = arith.constant 0 : index
    %c0_92 = arith.constant 0 : index
    %113 = vector.load %arg11[%c2_90, %c0_91, %c0_92] : memref<4x192x192xbf16, #tpu.memory_space<vmem>>, vector<1x192x192xbf16>
    %114 = vector.shape_cast %113 : vector<1x192x192xbf16> to vector<192x192xbf16>
    %115 = arith.truncf %112 : vector<1x192xf32> to vector<1x192xbf16>
    %cst_93 = arith.constant dense<0.000000e+00> : vector<1x192xf32>
    %116 = tpu.matmul %115, %114, %cst_93 {dimension_numbers = #tpu.dot_dimension_numbers<[1], [0], [0], [1], [0, 0, 1, 1], [], []>} : vector<1x192xbf16>, vector<192x192xbf16>, vector<1x192xf32> -> vector<1x192xf32>
    %117 = arith.addf %111, %116 : vector<1x192xf32>
    %118 = vector.extract_strided_slice %98 {offsets = [3, 0], sizes = [1, 192], strides = [1, 1]} : vector<4x192xf32> to vector<1x192xf32>
    %c3_94 = arith.constant 3 : index
    %c0_95 = arith.constant 0 : index
    %c0_96 = arith.constant 0 : index
    %119 = vector.load %arg11[%c3_94, %c0_95, %c0_96] : memref<4x192x192xbf16, #tpu.memory_space<vmem>>, vector<1x192x192xbf16>
    %120 = vector.shape_cast %119 : vector<1x192x192xbf16> to vector<192x192xbf16>
    %121 = arith.truncf %118 : vector<1x192xf32> to vector<1x192xbf16>
    %cst_97 = arith.constant dense<0.000000e+00> : vector<1x192xf32>
    %122 = tpu.matmul %121, %120, %cst_97 {dimension_numbers = #tpu.dot_dimension_numbers<[1], [0], [0], [1], [0, 0, 1, 1], [], []>} : vector<1x192xbf16>, vector<192x192xbf16>, vector<1x192xf32> -> vector<1x192xf32>
    %123 = arith.addf %117, %122 : vector<1x192xf32>
    %c0_98 = arith.constant 0 : index
    %c0_99 = arith.constant 0 : index
    %124 = vector.load %arg13[%c0_98, %c0_99] : memref<192x48xbf16, #tpu.memory_space<vmem>>, vector<192x48xbf16>
    %125 = arith.truncf %123 : vector<1x192xf32> to vector<1x192xbf16>
    %cst_100 = arith.constant dense<0.000000e+00> : vector<1x48xf32>
    %126 = tpu.matmul %125, %124, %cst_100 {dimension_numbers = #tpu.dot_dimension_numbers<[1], [0], [0], [1], [0, 0, 1, 1], [], []>} : vector<1x192xbf16>, vector<192x48xbf16>, vector<1x48xf32> -> vector<1x48xf32>
    %c0_101 = arith.constant 0 : index
    %c0_102 = arith.constant 0 : index
    %127 = vector.load %arg14[%c0_101, %c0_102] : memref<1x48xf32, #tpu.memory_space<vmem>>, vector<1x48xf32>
    %128 = arith.addf %126, %127 : vector<1x48xf32>
    %c0_103 = arith.constant 0 : index
    %c0_104 = arith.constant 0 : index
    %129 = vector.load %arg15[%c0_103, %c0_104] : memref<48x16xbf16, #tpu.memory_space<vmem>>, vector<48x16xbf16>
    %130 = arith.truncf %128 : vector<1x48xf32> to vector<1x48xbf16>
    %cst_105 = arith.constant dense<0.000000e+00> : vector<1x16xf32>
    %131 = tpu.matmul %130, %129, %cst_105 {dimension_numbers = #tpu.dot_dimension_numbers<[1], [0], [0], [1], [0, 0, 1, 1], [], []>} : vector<1x48xbf16>, vector<48x16xbf16>, vector<1x16xf32> -> vector<1x16xf32>
    %c0_106 = arith.constant 0 : index
    %c0_107 = arith.constant 0 : index
    %132 = vector.load %arg16[%c0_106, %c0_107] : memref<1x16xf32, #tpu.memory_space<vmem>>, vector<1x16xf32>
    %133 = arith.addf %131, %132 : vector<1x16xf32>
    %c0_108 = arith.constant 0 : index
    %c0_109 = arith.constant 0 : index
    %c0_110 = arith.constant 0 : index
    %134 = vector.load %arg31[%c0_108, %c0_109, %c0_110] : memref<1x1x16xf32, #tpu.memory_space<vmem>>, vector<1x1x16xf32>
    %135 = vector.shape_cast %134 : vector<1x1x16xf32> to vector<1x16xf32>
    %136 = vector.shape_cast %133 : vector<1x16xf32> to vector<1x1x16xf32>
    tpu.vector_store %arg31[%c0_108, %c0_109, %c0_110], %136 {strides = array<i32>} : memref<1x1x16xf32, #tpu.memory_space<vmem>>, vector<1x1x16xf32>,
    %c0_111 = arith.constant 0 : index
    %c0_112 = arith.constant 0 : index
    %137 = vector.load %arg35[%c0_111, %c0_112] : memref<6x192xf32, #tpu.memory_space<vmem>>, vector<1x192xf32>
    tpu.vector_store %arg35[%c0_111, %c0_112], %0 {strides = array<i32>} : memref<6x192xf32, #tpu.memory_space<vmem>>, vector<1x192xf32>,
    %c5_113 = arith.constant 5 : index
    %c0_114 = arith.constant 0 : index
    %138 = vector.load %arg35[%c5_113, %c0_114] : memref<6x192xf32, #tpu.memory_space<vmem>>, vector<1x192xf32>
    tpu.vector_store %arg35[%c5_113, %c0_114], %0 {strides = array<i32>} : memref<6x192xf32, #tpu.memory_space<vmem>>, vector<1x192xf32>,
    %c0_115 = arith.constant 0 : index
    %c0_116 = arith.constant 0 : index
    %c0_117 = arith.constant 0 : index
    %139 = vector.load %arg17[%c0_115, %c0_116, %c0_117] : memref<4x16x192xbf16, #tpu.memory_space<vmem>>, vector<1x16x192xbf16>
    %140 = vector.shape_cast %139 : vector<1x16x192xbf16> to vector<16x192xbf16>
    %141 = arith.truncf %133 : vector<1x16xf32> to vector<1x16xbf16>
    %cst_118 = arith.constant dense<0.000000e+00> : vector<1x192xf32>
    %142 = tpu.matmul %141, %140, %cst_118 {dimension_numbers = #tpu.dot_dimension_numbers<[1], [0], [0], [1], [0, 0, 1, 1], [], []>} : vector<1x16xbf16>, vector<16x192xbf16>, vector<1x192xf32> -> vector<1x192xf32>
    %c0_119 = arith.constant 0 : index
    %c0_120 = arith.constant 0 : index
    %c0_121 = arith.constant 0 : index
    %143 = vector.load %arg18[%c0_119, %c0_120, %c0_121] : memref<4x1x192xf32, #tpu.memory_space<vmem>>, vector<1x1x192xf32>
    %144 = vector.shape_cast %143 : vector<1x1x192xf32> to vector<1x192xf32>
    %145 = arith.addf %142, %144 : vector<1x192xf32>
    %c1_122 = arith.constant 1 : index
    %c0_123 = arith.constant 0 : index
    %146 = vector.load %arg35[%c1_122, %c0_123] : memref<6x192xf32, #tpu.memory_space<vmem>>, vector<1x192xf32>
    tpu.vector_store %arg35[%c1_122, %c0_123], %145 {strides = array<i32>} : memref<6x192xf32, #tpu.memory_space<vmem>>, vector<1x192xf32>,
    %c1_124 = arith.constant 1 : index
    %c0_125 = arith.constant 0 : index
    %c0_126 = arith.constant 0 : index
    %147 = vector.load %arg17[%c1_124, %c0_125, %c0_126] : memref<4x16x192xbf16, #tpu.memory_space<vmem>>, vector<1x16x192xbf16>
    %148 = vector.shape_cast %147 : vector<1x16x192xbf16> to vector<16x192xbf16>
    %149 = arith.truncf %133 : vector<1x16xf32> to vector<1x16xbf16>
    %cst_127 = arith.constant dense<0.000000e+00> : vector<1x192xf32>
    %150 = tpu.matmul %149, %148, %cst_127 {dimension_numbers = #tpu.dot_dimension_numbers<[1], [0], [0], [1], [0, 0, 1, 1], [], []>} : vector<1x16xbf16>, vector<16x192xbf16>, vector<1x192xf32> -> vector<1x192xf32>
    %c1_128 = arith.constant 1 : index
    %c0_129 = arith.constant 0 : index
    %c0_130 = arith.constant 0 : index
    %151 = vector.load %arg18[%c1_128, %c0_129, %c0_130] : memref<4x1x192xf32, #tpu.memory_space<vmem>>, vector<1x1x192xf32>
    %152 = vector.shape_cast %151 : vector<1x1x192xf32> to vector<1x192xf32>
    %153 = arith.addf %150, %152 : vector<1x192xf32>
    %c2_131 = arith.constant 2 : index
    %c0_132 = arith.constant 0 : index
    %154 = vector.load %arg35[%c2_131, %c0_132] : memref<6x192xf32, #tpu.memory_space<vmem>>, vector<1x192xf32>
    tpu.vector_store %arg35[%c2_131, %c0_132], %153 {strides = array<i32>} : memref<6x192xf32, #tpu.memory_space<vmem>>, vector<1x192xf32>,
    %c2_133 = arith.constant 2 : index
    %c0_134 = arith.constant 0 : index
    %c0_135 = arith.constant 0 : index
    %155 = vector.load %arg17[%c2_133, %c0_134, %c0_135] : memref<4x16x192xbf16, #tpu.memory_space<vmem>>, vector<1x16x192xbf16>
    %156 = vector.shape_cast %155 : vector<1x16x192xbf16> to vector<16x192xbf16>
    %157 = arith.truncf %133 : vector<1x16xf32> to vector<1x16xbf16>
    %cst_136 = arith.constant dense<0.000000e+00> : vector<1x192xf32>
    %158 = tpu.matmul %157, %156, %cst_136 {dimension_numbers = #tpu.dot_dimension_numbers<[1], [0], [0], [1], [0, 0, 1, 1], [], []>} : vector<1x16xbf16>, vector<16x192xbf16>, vector<1x192xf32> -> vector<1x192xf32>
    %c2_137 = arith.constant 2 : index
    %c0_138 = arith.constant 0 : index
    %c0_139 = arith.constant 0 : index
    %159 = vector.load %arg18[%c2_137, %c0_138, %c0_139] : memref<4x1x192xf32, #tpu.memory_space<vmem>>, vector<1x1x192xf32>
    %160 = vector.shape_cast %159 : vector<1x1x192xf32> to vector<1x192xf32>
    %161 = arith.addf %158, %160 : vector<1x192xf32>
    %c3_140 = arith.constant 3 : index
    %c0_141 = arith.constant 0 : index
    %162 = vector.load %arg35[%c3_140, %c0_141] : memref<6x192xf32, #tpu.memory_space<vmem>>, vector<1x192xf32>
    tpu.vector_store %arg35[%c3_140, %c0_141], %161 {strides = array<i32>} : memref<6x192xf32, #tpu.memory_space<vmem>>, vector<1x192xf32>,
    %c3_142 = arith.constant 3 : index
    %c0_143 = arith.constant 0 : index
    %c0_144 = arith.constant 0 : index
    %163 = vector.load %arg17[%c3_142, %c0_143, %c0_144] : memref<4x16x192xbf16, #tpu.memory_space<vmem>>, vector<1x16x192xbf16>
    %164 = vector.shape_cast %163 : vector<1x16x192xbf16> to vector<16x192xbf16>
    %165 = arith.truncf %133 : vector<1x16xf32> to vector<1x16xbf16>
    %cst_145 = arith.constant dense<0.000000e+00> : vector<1x192xf32>
    %166 = tpu.matmul %165, %164, %cst_145 {dimension_numbers = #tpu.dot_dimension_numbers<[1], [0], [0], [1], [0, 0, 1, 1], [], []>} : vector<1x16xbf16>, vector<16x192xbf16>, vector<1x192xf32> -> vector<1x192xf32>
    %c3_146 = arith.constant 3 : index
    %c0_147 = arith.constant 0 : index
    %c0_148 = arith.constant 0 : index
    %167 = vector.load %arg18[%c3_146, %c0_147, %c0_148] : memref<4x1x192xf32, #tpu.memory_space<vmem>>, vector<1x1x192xf32>
    %168 = vector.shape_cast %167 : vector<1x1x192xf32> to vector<1x192xf32>
    %169 = arith.addf %166, %168 : vector<1x192xf32>
    %c4_149 = arith.constant 4 : index
    %c0_150 = arith.constant 0 : index
    %170 = vector.load %arg35[%c4_149, %c0_150] : memref<6x192xf32, #tpu.memory_space<vmem>>, vector<1x192xf32>
    tpu.vector_store %arg35[%c4_149, %c0_150], %169 {strides = array<i32>} : memref<6x192xf32, #tpu.memory_space<vmem>>, vector<1x192xf32>,
    %c0_151 = arith.constant 0 : index
    %c0_152 = arith.constant 0 : index
    %171 = vector.load %arg35[%c0_151, %c0_152] : memref<6x192xf32, #tpu.memory_space<vmem>>, vector<6x192xf32>
    %172 = vector.extract_strided_slice %171 {offsets = [0, 0], sizes = [4, 192], strides = [1, 1]} : vector<6x192xf32> to vector<4x192xf32>
    %c0_153 = arith.constant 0 : index
    %c0_154 = arith.constant 0 : index
    %173 = vector.load %arg19[%c0_153, %c0_154] : memref<192x384xbf16, #tpu.memory_space<vmem>>, vector<192x384xbf16>
    %174 = arith.truncf %172 : vector<4x192xf32> to vector<4x192xbf16>
    %cst_155 = arith.constant dense<0.000000e+00> : vector<4x384xf32>
    %175 = tpu.matmul %174, %173, %cst_155 {dimension_numbers = #tpu.dot_dimension_numbers<[1], [0], [0], [1], [0, 0, 1, 1], [], []>} : vector<4x192xbf16>, vector<192x384xbf16>, vector<4x384xf32> -> vector<4x384xf32>
    %176 = vector.extract_strided_slice %171 {offsets = [1, 0], sizes = [4, 192], strides = [1, 1]} : vector<6x192xf32> to vector<4x192xf32>
    %c0_156 = arith.constant 0 : index
    %c0_157 = arith.constant 0 : index
    %177 = vector.load %arg20[%c0_156, %c0_157] : memref<192x384xbf16, #tpu.memory_space<vmem>>, vector<192x384xbf16>
    %178 = arith.truncf %176 : vector<4x192xf32> to vector<4x192xbf16>
    %cst_158 = arith.constant dense<0.000000e+00> : vector<4x384xf32>
    %179 = tpu.matmul %178, %177, %cst_158 {dimension_numbers = #tpu.dot_dimension_numbers<[1], [0], [0], [1], [0, 0, 1, 1], [], []>} : vector<4x192xbf16>, vector<192x384xbf16>, vector<4x384xf32> -> vector<4x384xf32>
    %180 = arith.addf %175, %179 : vector<4x384xf32>
    %181 = vector.extract_strided_slice %171 {offsets = [2, 0], sizes = [4, 192], strides = [1, 1]} : vector<6x192xf32> to vector<4x192xf32>
    %c0_159 = arith.constant 0 : index
    %c0_160 = arith.constant 0 : index
    %182 = vector.load %arg21[%c0_159, %c0_160] : memref<192x384xbf16, #tpu.memory_space<vmem>>, vector<192x384xbf16>
    %183 = arith.truncf %181 : vector<4x192xf32> to vector<4x192xbf16>
    %cst_161 = arith.constant dense<0.000000e+00> : vector<4x384xf32>
    %184 = tpu.matmul %183, %182, %cst_161 {dimension_numbers = #tpu.dot_dimension_numbers<[1], [0], [0], [1], [0, 0, 1, 1], [], []>} : vector<4x192xbf16>, vector<192x384xbf16>, vector<4x384xf32> -> vector<4x384xf32>
    %185 = arith.addf %180, %184 : vector<4x384xf32>
    %c0_162 = arith.constant 0 : index
    %c0_163 = arith.constant 0 : index
    %186 = vector.load %arg22[%c0_162, %c0_163] : memref<1x384xf32, #tpu.memory_space<vmem>>, vector<1x384xf32>
    %187 = vector.broadcast %186 : vector<1x384xf32> to vector<4x384xf32>
    %188 = arith.addf %185, %187 : vector<4x384xf32>
    %cst_164 = arith.constant 0.000000e+00 : f32
    %189 = vector.broadcast %cst_164 : f32 to vector<4x384xf32>
    %190 = arith.maximumf %188, %189 : vector<4x384xf32>
    %c0_165 = arith.constant 0 : index
    %c0_166 = arith.constant 0 : index
    %191 = vector.load %arg36[%c0_165, %c0_166] : memref<10x192xf32, #tpu.memory_space<vmem>>, vector<1x192xf32>
    tpu.vector_store %arg36[%c0_165, %c0_166], %0 {strides = array<i32>} : memref<10x192xf32, #tpu.memory_space<vmem>>, vector<1x192xf32>,
    %c9 = arith.constant 9 : index
    %c0_167 = arith.constant 0 : index
    %192 = vector.load %arg36[%c9, %c0_167] : memref<10x192xf32, #tpu.memory_space<vmem>>, vector<1x192xf32>
    tpu.vector_store %arg36[%c9, %c0_167], %0 {strides = array<i32>} : memref<10x192xf32, #tpu.memory_space<vmem>>, vector<1x192xf32>,
    %193 = vector.extract_strided_slice %190 {offsets = [0, 0], sizes = [1, 192], strides = [1, 1]} : vector<4x384xf32> to vector<1x192xf32>
    %c1_168 = arith.constant 1 : index
    %c0_169 = arith.constant 0 : index
    %194 = vector.load %arg36[%c1_168, %c0_169] : memref<10x192xf32, #tpu.memory_space<vmem>>, vector<1x192xf32>
    tpu.vector_store %arg36[%c1_168, %c0_169], %193 {strides = array<i32>} : memref<10x192xf32, #tpu.memory_space<vmem>>, vector<1x192xf32>,
    %195 = vector.extract_strided_slice %190 {offsets = [0, 192], sizes = [1, 192], strides = [1, 1]} : vector<4x384xf32> to vector<1x192xf32>
    %c2_170 = arith.constant 2 : index
    %c0_171 = arith.constant 0 : index
    %196 = vector.load %arg36[%c2_170, %c0_171] : memref<10x192xf32, #tpu.memory_space<vmem>>, vector<1x192xf32>
    tpu.vector_store %arg36[%c2_170, %c0_171], %195 {strides = array<i32>} : memref<10x192xf32, #tpu.memory_space<vmem>>, vector<1x192xf32>,
    %197 = vector.extract_strided_slice %190 {offsets = [1, 0], sizes = [1, 192], strides = [1, 1]} : vector<4x384xf32> to vector<1x192xf32>
    %c3_172 = arith.constant 3 : index
    %c0_173 = arith.constant 0 : index
    %198 = vector.load %arg36[%c3_172, %c0_173] : memref<10x192xf32, #tpu.memory_space<vmem>>, vector<1x192xf32>
    tpu.vector_store %arg36[%c3_172, %c0_173], %197 {strides = array<i32>} : memref<10x192xf32, #tpu.memory_space<vmem>>, vector<1x192xf32>,
    %199 = vector.extract_strided_slice %190 {offsets = [1, 192], sizes = [1, 192], strides = [1, 1]} : vector<4x384xf32> to vector<1x192xf32>
    %c4_174 = arith.constant 4 : index
    %c0_175 = arith.constant 0 : index
    %200 = vector.load %arg36[%c4_174, %c0_175] : memref<10x192xf32, #tpu.memory_space<vmem>>, vector<1x192xf32>
    tpu.vector_store %arg36[%c4_174, %c0_175], %199 {strides = array<i32>} : memref<10x192xf32, #tpu.memory_space<vmem>>, vector<1x192xf32>,
    %201 = vector.extract_strided_slice %190 {offsets = [2, 0], sizes = [1, 192], strides = [1, 1]} : vector<4x384xf32> to vector<1x192xf32>
    %c5_176 = arith.constant 5 : index
    %c0_177 = arith.constant 0 : index
    %202 = vector.load %arg36[%c5_176, %c0_177] : memref<10x192xf32, #tpu.memory_space<vmem>>, vector<1x192xf32>
    tpu.vector_store %arg36[%c5_176, %c0_177], %201 {strides = array<i32>} : memref<10x192xf32, #tpu.memory_space<vmem>>, vector<1x192xf32>,
    %203 = vector.extract_strided_slice %190 {offsets = [2, 192], sizes = [1, 192], strides = [1, 1]} : vector<4x384xf32> to vector<1x192xf32>
    %c6_178 = arith.constant 6 : index
    %c0_179 = arith.constant 0 : index
    %204 = vector.load %arg36[%c6_178, %c0_179] : memref<10x192xf32, #tpu.memory_space<vmem>>, vector<1x192xf32>
    tpu.vector_store %arg36[%c6_178, %c0_179], %203 {strides = array<i32>} : memref<10x192xf32, #tpu.memory_space<vmem>>, vector<1x192xf32>,
    %205 = vector.extract_strided_slice %190 {offsets = [3, 0], sizes = [1, 192], strides = [1, 1]} : vector<4x384xf32> to vector<1x192xf32>
    %c7_180 = arith.constant 7 : index
    %c0_181 = arith.constant 0 : index
    %206 = vector.load %arg36[%c7_180, %c0_181] : memref<10x192xf32, #tpu.memory_space<vmem>>, vector<1x192xf32>
    tpu.vector_store %arg36[%c7_180, %c0_181], %205 {strides = array<i32>} : memref<10x192xf32, #tpu.memory_space<vmem>>, vector<1x192xf32>,
    %207 = vector.extract_strided_slice %190 {offsets = [3, 192], sizes = [1, 192], strides = [1, 1]} : vector<4x384xf32> to vector<1x192xf32>
    %c8_182 = arith.constant 8 : index
    %c0_183 = arith.constant 0 : index
    %208 = vector.load %arg36[%c8_182, %c0_183] : memref<10x192xf32, #tpu.memory_space<vmem>>, vector<1x192xf32>
    tpu.vector_store %arg36[%c8_182, %c0_183], %207 {strides = array<i32>} : memref<10x192xf32, #tpu.memory_space<vmem>>, vector<1x192xf32>,
    %c0_184 = arith.constant 0 : index
    %c0_185 = arith.constant 0 : index
    %209 = vector.load %arg36[%c0_184, %c0_185] : memref<10x192xf32, #tpu.memory_space<vmem>>, vector<10x192xf32>
    %210 = vector.extract_strided_slice %209 {offsets = [0, 0], sizes = [8, 192], strides = [1, 1]} : vector<10x192xf32> to vector<8x192xf32>
    %c0_186 = arith.constant 0 : index
    %c0_187 = arith.constant 0 : index
    %211 = vector.load %arg23[%c0_186, %c0_187] : memref<192x384xbf16, #tpu.memory_space<vmem>>, vector<192x384xbf16>
    %212 = arith.truncf %210 : vector<8x192xf32> to vector<8x192xbf16>
    %cst_188 = arith.constant dense<0.000000e+00> : vector<8x384xf32>
    %213 = tpu.matmul %212, %211, %cst_188 {dimension_numbers = #tpu.dot_dimension_numbers<[1], [0], [0], [1], [0, 0, 1, 1], [], []>} : vector<8x192xbf16>, vector<192x384xbf16>, vector<8x384xf32> -> vector<8x384xf32>
    %214 = vector.extract_strided_slice %209 {offsets = [1, 0], sizes = [8, 192], strides = [1, 1]} : vector<10x192xf32> to vector<8x192xf32>
    %c0_189 = arith.constant 0 : index
    %c0_190 = arith.constant 0 : index
    %215 = vector.load %arg24[%c0_189, %c0_190] : memref<192x384xbf16, #tpu.memory_space<vmem>>, vector<192x384xbf16>
    %216 = arith.truncf %214 : vector<8x192xf32> to vector<8x192xbf16>
    %cst_191 = arith.constant dense<0.000000e+00> : vector<8x384xf32>
    %217 = tpu.matmul %216, %215, %cst_191 {dimension_numbers = #tpu.dot_dimension_numbers<[1], [0], [0], [1], [0, 0, 1, 1], [], []>} : vector<8x192xbf16>, vector<192x384xbf16>, vector<8x384xf32> -> vector<8x384xf32>
    %218 = arith.addf %213, %217 : vector<8x384xf32>
    %219 = vector.extract_strided_slice %209 {offsets = [2, 0], sizes = [8, 192], strides = [1, 1]} : vector<10x192xf32> to vector<8x192xf32>
    %c0_192 = arith.constant 0 : index
    %c0_193 = arith.constant 0 : index
    %220 = vector.load %arg25[%c0_192, %c0_193] : memref<192x384xbf16, #tpu.memory_space<vmem>>, vector<192x384xbf16>
    %221 = arith.truncf %219 : vector<8x192xf32> to vector<8x192xbf16>
    %cst_194 = arith.constant dense<0.000000e+00> : vector<8x384xf32>
    %222 = tpu.matmul %221, %220, %cst_194 {dimension_numbers = #tpu.dot_dimension_numbers<[1], [0], [0], [1], [0, 0, 1, 1], [], []>} : vector<8x192xbf16>, vector<192x384xbf16>, vector<8x384xf32> -> vector<8x384xf32>
    %223 = arith.addf %218, %222 : vector<8x384xf32>
    %c0_195 = arith.constant 0 : index
    %c0_196 = arith.constant 0 : index
    %224 = vector.load %arg26[%c0_195, %c0_196] : memref<1x384xf32, #tpu.memory_space<vmem>>, vector<1x384xf32>
    %225 = vector.broadcast %224 : vector<1x384xf32> to vector<8x384xf32>
    %226 = arith.addf %223, %225 : vector<8x384xf32>
    %cst_197 = arith.constant 0.000000e+00 : f32
    %227 = vector.broadcast %cst_197 : f32 to vector<8x384xf32>
    %228 = arith.maximumf %226, %227 : vector<8x384xf32>
    %c0_198 = arith.constant 0 : index
    %c0_199 = arith.constant 0 : index
    %229 = vector.load %arg37[%c0_198, %c0_199] : memref<18x192xf32, #tpu.memory_space<vmem>>, vector<1x192xf32>
    tpu.vector_store %arg37[%c0_198, %c0_199], %0 {strides = array<i32>} : memref<18x192xf32, #tpu.memory_space<vmem>>, vector<1x192xf32>,
    %c17 = arith.constant 17 : index
    %c0_200 = arith.constant 0 : index
    %230 = vector.load %arg37[%c17, %c0_200] : memref<18x192xf32, #tpu.memory_space<vmem>>, vector<1x192xf32>
    tpu.vector_store %arg37[%c17, %c0_200], %0 {strides = array<i32>} : memref<18x192xf32, #tpu.memory_space<vmem>>, vector<1x192xf32>,
    %231 = vector.extract_strided_slice %228 {offsets = [0, 0], sizes = [1, 192], strides = [1, 1]} : vector<8x384xf32> to vector<1x192xf32>
    %c1_201 = arith.constant 1 : index
    %c0_202 = arith.constant 0 : index
    %232 = vector.load %arg37[%c1_201, %c0_202] : memref<18x192xf32, #tpu.memory_space<vmem>>, vector<1x192xf32>
    tpu.vector_store %arg37[%c1_201, %c0_202], %231 {strides = array<i32>} : memref<18x192xf32, #tpu.memory_space<vmem>>, vector<1x192xf32>,
    %233 = vector.extract_strided_slice %228 {offsets = [0, 192], sizes = [1, 192], strides = [1, 1]} : vector<8x384xf32> to vector<1x192xf32>
    %c2_203 = arith.constant 2 : index
    %c0_204 = arith.constant 0 : index
    %234 = vector.load %arg37[%c2_203, %c0_204] : memref<18x192xf32, #tpu.memory_space<vmem>>, vector<1x192xf32>
    tpu.vector_store %arg37[%c2_203, %c0_204], %233 {strides = array<i32>} : memref<18x192xf32, #tpu.memory_space<vmem>>, vector<1x192xf32>,
    %235 = vector.extract_strided_slice %228 {offsets = [1, 0], sizes = [1, 192], strides = [1, 1]} : vector<8x384xf32> to vector<1x192xf32>
    %c3_205 = arith.constant 3 : index
    %c0_206 = arith.constant 0 : index
    %236 = vector.load %arg37[%c3_205, %c0_206] : memref<18x192xf32, #tpu.memory_space<vmem>>, vector<1x192xf32>
    tpu.vector_store %arg37[%c3_205, %c0_206], %235 {strides = array<i32>} : memref<18x192xf32, #tpu.memory_space<vmem>>, vector<1x192xf32>,
    %237 = vector.extract_strided_slice %228 {offsets = [1, 192], sizes = [1, 192], strides = [1, 1]} : vector<8x384xf32> to vector<1x192xf32>
    %c4_207 = arith.constant 4 : index
    %c0_208 = arith.constant 0 : index
    %238 = vector.load %arg37[%c4_207, %c0_208] : memref<18x192xf32, #tpu.memory_space<vmem>>, vector<1x192xf32>
    tpu.vector_store %arg37[%c4_207, %c0_208], %237 {strides = array<i32>} : memref<18x192xf32, #tpu.memory_space<vmem>>, vector<1x192xf32>,
    %239 = vector.extract_strided_slice %228 {offsets = [2, 0], sizes = [1, 192], strides = [1, 1]} : vector<8x384xf32> to vector<1x192xf32>
    %c5_209 = arith.constant 5 : index
    %c0_210 = arith.constant 0 : index
    %240 = vector.load %arg37[%c5_209, %c0_210] : memref<18x192xf32, #tpu.memory_space<vmem>>, vector<1x192xf32>
    tpu.vector_store %arg37[%c5_209, %c0_210], %239 {strides = array<i32>} : memref<18x192xf32, #tpu.memory_space<vmem>>, vector<1x192xf32>,
    %241 = vector.extract_strided_slice %228 {offsets = [2, 192], sizes = [1, 192], strides = [1, 1]} : vector<8x384xf32> to vector<1x192xf32>
    %c6_211 = arith.constant 6 : index
    %c0_212 = arith.constant 0 : index
    %242 = vector.load %arg37[%c6_211, %c0_212] : memref<18x192xf32, #tpu.memory_space<vmem>>, vector<1x192xf32>
    tpu.vector_store %arg37[%c6_211, %c0_212], %241 {strides = array<i32>} : memref<18x192xf32, #tpu.memory_space<vmem>>, vector<1x192xf32>,
    %243 = vector.extract_strided_slice %228 {offsets = [3, 0], sizes = [1, 192], strides = [1, 1]} : vector<8x384xf32> to vector<1x192xf32>
    %c7_213 = arith.constant 7 : index
    %c0_214 = arith.constant 0 : index
    %244 = vector.load %arg37[%c7_213, %c0_214] : memref<18x192xf32, #tpu.memory_space<vmem>>, vector<1x192xf32>
    tpu.vector_store %arg37[%c7_213, %c0_214], %243 {strides = array<i32>} : memref<18x192xf32, #tpu.memory_space<vmem>>, vector<1x192xf32>,
    %245 = vector.extract_strided_slice %228 {offsets = [3, 192], sizes = [1, 192], strides = [1, 1]} : vector<8x384xf32> to vector<1x192xf32>
    %c8_215 = arith.constant 8 : index
    %c0_216 = arith.constant 0 : index
    %246 = vector.load %arg37[%c8_215, %c0_216] : memref<18x192xf32, #tpu.memory_space<vmem>>, vector<1x192xf32>
    tpu.vector_store %arg37[%c8_215, %c0_216], %245 {strides = array<i32>} : memref<18x192xf32, #tpu.memory_space<vmem>>, vector<1x192xf32>,
    %247 = vector.extract_strided_slice %228 {offsets = [4, 0], sizes = [1, 192], strides = [1, 1]} : vector<8x384xf32> to vector<1x192xf32>
    %c9_217 = arith.constant 9 : index
    %c0_218 = arith.constant 0 : index
    %248 = vector.load %arg37[%c9_217, %c0_218] : memref<18x192xf32, #tpu.memory_space<vmem>>, vector<1x192xf32>
    tpu.vector_store %arg37[%c9_217, %c0_218], %247 {strides = array<i32>} : memref<18x192xf32, #tpu.memory_space<vmem>>, vector<1x192xf32>,
    %249 = vector.extract_strided_slice %228 {offsets = [4, 192], sizes = [1, 192], strides = [1, 1]} : vector<8x384xf32> to vector<1x192xf32>
    %c10 = arith.constant 10 : index
    %c0_219 = arith.constant 0 : index
    %250 = vector.load %arg37[%c10, %c0_219] : memref<18x192xf32, #tpu.memory_space<vmem>>, vector<1x192xf32>
    tpu.vector_store %arg37[%c10, %c0_219], %249 {strides = array<i32>} : memref<18x192xf32, #tpu.memory_space<vmem>>, vector<1x192xf32>,
    %251 = vector.extract_strided_slice %228 {offsets = [5, 0], sizes = [1, 192], strides = [1, 1]} : vector<8x384xf32> to vector<1x192xf32>
    %c11 = arith.constant 11 : index
    %c0_220 = arith.constant 0 : index
    %252 = vector.load %arg37[%c11, %c0_220] : memref<18x192xf32, #tpu.memory_space<vmem>>, vector<1x192xf32>
    tpu.vector_store %arg37[%c11, %c0_220], %251 {strides = array<i32>} : memref<18x192xf32, #tpu.memory_space<vmem>>, vector<1x192xf32>,
    %253 = vector.extract_strided_slice %228 {offsets = [5, 192], sizes = [1, 192], strides = [1, 1]} : vector<8x384xf32> to vector<1x192xf32>
    %c12 = arith.constant 12 : index
    %c0_221 = arith.constant 0 : index
    %254 = vector.load %arg37[%c12, %c0_221] : memref<18x192xf32, #tpu.memory_space<vmem>>, vector<1x192xf32>
    tpu.vector_store %arg37[%c12, %c0_221], %253 {strides = array<i32>} : memref<18x192xf32, #tpu.memory_space<vmem>>, vector<1x192xf32>,
    %255 = vector.extract_strided_slice %228 {offsets = [6, 0], sizes = [1, 192], strides = [1, 1]} : vector<8x384xf32> to vector<1x192xf32>
    %c13 = arith.constant 13 : index
    %c0_222 = arith.constant 0 : index
    %256 = vector.load %arg37[%c13, %c0_222] : memref<18x192xf32, #tpu.memory_space<vmem>>, vector<1x192xf32>
    tpu.vector_store %arg37[%c13, %c0_222], %255 {strides = array<i32>} : memref<18x192xf32, #tpu.memory_space<vmem>>, vector<1x192xf32>,
    %257 = vector.extract_strided_slice %228 {offsets = [6, 192], sizes = [1, 192], strides = [1, 1]} : vector<8x384xf32> to vector<1x192xf32>
    %c14 = arith.constant 14 : index
    %c0_223 = arith.constant 0 : index
    %258 = vector.load %arg37[%c14, %c0_223] : memref<18x192xf32, #tpu.memory_space<vmem>>, vector<1x192xf32>
    tpu.vector_store %arg37[%c14, %c0_223], %257 {strides = array<i32>} : memref<18x192xf32, #tpu.memory_space<vmem>>, vector<1x192xf32>,
    %259 = vector.extract_strided_slice %228 {offsets = [7, 0], sizes = [1, 192], strides = [1, 1]} : vector<8x384xf32> to vector<1x192xf32>
    %c15 = arith.constant 15 : index
    %c0_224 = arith.constant 0 : index
    %260 = vector.load %arg37[%c15, %c0_224] : memref<18x192xf32, #tpu.memory_space<vmem>>, vector<1x192xf32>
    tpu.vector_store %arg37[%c15, %c0_224], %259 {strides = array<i32>} : memref<18x192xf32, #tpu.memory_space<vmem>>, vector<1x192xf32>,
    %261 = vector.extract_strided_slice %228 {offsets = [7, 192], sizes = [1, 192], strides = [1, 1]} : vector<8x384xf32> to vector<1x192xf32>
    %c16 = arith.constant 16 : index
    %c0_225 = arith.constant 0 : index
    %262 = vector.load %arg37[%c16, %c0_225] : memref<18x192xf32, #tpu.memory_space<vmem>>, vector<1x192xf32>
    tpu.vector_store %arg37[%c16, %c0_225], %261 {strides = array<i32>} : memref<18x192xf32, #tpu.memory_space<vmem>>, vector<1x192xf32>,
    %c0_226 = arith.constant 0 : index
    %c0_227 = arith.constant 0 : index
    %263 = vector.load %arg37[%c0_226, %c0_227] : memref<18x192xf32, #tpu.memory_space<vmem>>, vector<18x192xf32>
    %264 = vector.extract_strided_slice %263 {offsets = [0, 0], sizes = [16, 192], strides = [1, 1]} : vector<18x192xf32> to vector<16x192xf32>
    %c0_228 = arith.constant 0 : index
    %c0_229 = arith.constant 0 : index
    %265 = vector.load %arg27[%c0_228, %c0_229] : memref<192x192xbf16, #tpu.memory_space<vmem>>, vector<192x192xbf16>
    %266 = arith.truncf %264 : vector<16x192xf32> to vector<16x192xbf16>
    %cst_230 = arith.constant dense<0.000000e+00> : vector<16x192xf32>
    %267 = tpu.matmul %266, %265, %cst_230 {dimension_numbers = #tpu.dot_dimension_numbers<[1], [0], [0], [1], [0, 0, 1, 1], [], []>} : vector<16x192xbf16>, vector<192x192xbf16>, vector<16x192xf32> -> vector<16x192xf32>
    %268 = vector.extract_strided_slice %263 {offsets = [1, 0], sizes = [16, 192], strides = [1, 1]} : vector<18x192xf32> to vector<16x192xf32>
    %c0_231 = arith.constant 0 : index
    %c0_232 = arith.constant 0 : index
    %269 = vector.load %arg28[%c0_231, %c0_232] : memref<192x192xbf16, #tpu.memory_space<vmem>>, vector<192x192xbf16>
    %270 = arith.truncf %268 : vector<16x192xf32> to vector<16x192xbf16>
    %cst_233 = arith.constant dense<0.000000e+00> : vector<16x192xf32>
    %271 = tpu.matmul %270, %269, %cst_233 {dimension_numbers = #tpu.dot_dimension_numbers<[1], [0], [0], [1], [0, 0, 1, 1], [], []>} : vector<16x192xbf16>, vector<192x192xbf16>, vector<16x192xf32> -> vector<16x192xf32>
    %272 = arith.addf %267, %271 : vector<16x192xf32>
    %273 = vector.extract_strided_slice %263 {offsets = [2, 0], sizes = [16, 192], strides = [1, 1]} : vector<18x192xf32> to vector<16x192xf32>
    %c0_234 = arith.constant 0 : index
    %c0_235 = arith.constant 0 : index
    %274 = vector.load %arg29[%c0_234, %c0_235] : memref<192x192xbf16, #tpu.memory_space<vmem>>, vector<192x192xbf16>
    %275 = arith.truncf %273 : vector<16x192xf32> to vector<16x192xbf16>
    %cst_236 = arith.constant dense<0.000000e+00> : vector<16x192xf32>
    %276 = tpu.matmul %275, %274, %cst_236 {dimension_numbers = #tpu.dot_dimension_numbers<[1], [0], [0], [1], [0, 0, 1, 1], [], []>} : vector<16x192xbf16>, vector<192x192xbf16>, vector<16x192xf32> -> vector<16x192xf32>
    %277 = arith.addf %272, %276 : vector<16x192xf32>
    %c0_237 = arith.constant 0 : index
    %c0_238 = arith.constant 0 : index
    %278 = vector.load %arg30[%c0_237, %c0_238] : memref<1x192xf32, #tpu.memory_space<vmem>>, vector<1x192xf32>
    %279 = vector.broadcast %278 : vector<1x192xf32> to vector<16x192xf32>
    %280 = arith.addf %277, %279 : vector<16x192xf32>
    %cst_239 = arith.constant 0.000000e+00 : f32
    %281 = vector.broadcast %cst_239 : f32 to vector<16x192xf32>
    %282 = arith.subf %281, %280 : vector<16x192xf32>
    %283 = math.exp %282 : vector<16x192xf32>
    %cst_240 = arith.constant 1.000000e+00 : f32
    %284 = vector.broadcast %cst_240 : f32 to vector<16x192xf32>
    %285 = arith.addf %284, %283 : vector<16x192xf32>
    %286 = tpu.reciprocal %285 {approx = true} : vector<16x192xf32> -> vector<16x192xf32>
    %cst_241 = arith.constant 1.000000e+00 : f32
    %287 = vector.broadcast %cst_241 : f32 to vector<16x192xf32>
    %288 = arith.minimumf %286, %287 : vector<16x192xf32>
    %c0_242 = arith.constant 0 : index
    %c0_243 = arith.constant 0 : index
    %c0_244 = arith.constant 0 : index
    %289 = vector.load %arg32[%c0_242, %c0_243, %c0_244] : memref<1x16x192xf32, #tpu.memory_space<vmem>>, vector<1x16x192xf32>
    %290 = vector.shape_cast %289 : vector<1x16x192xf32> to vector<16x192xf32>
    %291 = vector.shape_cast %288 : vector<16x192xf32> to vector<1x16x192xf32>
    tpu.vector_store %arg32[%c0_242, %c0_243, %c0_244], %291 {strides = array<i32>} : memref<1x16x192xf32, #tpu.memory_space<vmem>>, vector<1x16x192xf32>,
    return
  }
  func.func @transform_0(%arg0: i32) -> (i32, i32, i32) {
    %c0_i32 = arith.constant 0 : i32
    %c0_i32_0 = arith.constant 0 : i32
    %c0_i32_1 = arith.constant 0 : i32
    return %arg0, %c0_i32, %c0_i32_0 : i32, i32, i32
  }
  func.func @transform_1(%arg0: i32) -> (i32, i32) {
    %c0_i32 = arith.constant 0 : i32
    %c0_i32_0 = arith.constant 0 : i32
    %c0_i32_1 = arith.constant 0 : i32
    return %c0_i32, %c0_i32_0 : i32, i32
  }
  func.func @transform_2(%arg0: i32) -> (i32, i32) {
    %c0_i32 = arith.constant 0 : i32
    %c0_i32_0 = arith.constant 0 : i32
    %c0_i32_1 = arith.constant 0 : i32
    return %c0_i32, %c0_i32_0 : i32, i32
  }
  func.func @transform_3(%arg0: i32) -> (i32, i32) {
    %c0_i32 = arith.constant 0 : i32
    %c0_i32_0 = arith.constant 0 : i32
    %c0_i32_1 = arith.constant 0 : i32
    return %c0_i32, %c0_i32_0 : i32, i32
  }
  func.func @transform_4(%arg0: i32) -> (i32, i32) {
    %c0_i32 = arith.constant 0 : i32
    %c0_i32_0 = arith.constant 0 : i32
    %c0_i32_1 = arith.constant 0 : i32
    return %c0_i32, %c0_i32_0 : i32, i32
  }
  func.func @transform_5(%arg0: i32) -> (i32, i32) {
    %c0_i32 = arith.constant 0 : i32
    %c0_i32_0 = arith.constant 0 : i32
    %c0_i32_1 = arith.constant 0 : i32
    return %c0_i32, %c0_i32_0 : i32, i32
  }
  func.func @transform_6(%arg0: i32) -> (i32, i32) {
    %c0_i32 = arith.constant 0 : i32
    %c0_i32_0 = arith.constant 0 : i32
    %c0_i32_1 = arith.constant 0 : i32
    return %c0_i32, %c0_i32_0 : i32, i32
  }
  func.func @transform_7(%arg0: i32) -> (i32, i32) {
    %c0_i32 = arith.constant 0 : i32
    %c0_i32_0 = arith.constant 0 : i32
    %c0_i32_1 = arith.constant 0 : i32
    return %c0_i32, %c0_i32_0 : i32, i32
  }
  func.func @transform_8(%arg0: i32) -> (i32, i32) {
    %c0_i32 = arith.constant 0 : i32
    %c0_i32_0 = arith.constant 0 : i32
    %c0_i32_1 = arith.constant 0 : i32
    return %c0_i32, %c0_i32_0 : i32, i32
  }
  func.func @transform_9(%arg0: i32) -> (i32, i32) {
    %c0_i32 = arith.constant 0 : i32
    %c0_i32_0 = arith.constant 0 : i32
    %c0_i32_1 = arith.constant 0 : i32
    return %c0_i32, %c0_i32_0 : i32, i32
  }
  func.func @transform_10(%arg0: i32) -> (i32, i32, i32) {
    %c0_i32 = arith.constant 0 : i32
    %c0_i32_0 = arith.constant 0 : i32
    %c0_i32_1 = arith.constant 0 : i32
    %c0_i32_2 = arith.constant 0 : i32
    return %c0_i32, %c0_i32_0, %c0_i32_1 : i32, i32, i32
  }
  func.func @transform_11(%arg0: i32) -> (i32, i32) {
    %c0_i32 = arith.constant 0 : i32
    %c0_i32_0 = arith.constant 0 : i32
    %c0_i32_1 = arith.constant 0 : i32
    return %c0_i32, %c0_i32_0 : i32, i32
  }
  func.func @transform_12(%arg0: i32) -> (i32, i32) {
    %c0_i32 = arith.constant 0 : i32
    %c0_i32_0 = arith.constant 0 : i32
    %c0_i32_1 = arith.constant 0 : i32
    return %c0_i32, %c0_i32_0 : i32, i32
  }
  func.func @transform_13(%arg0: i32) -> (i32, i32) {
    %c0_i32 = arith.constant 0 : i32
    %c0_i32_0 = arith.constant 0 : i32
    %c0_i32_1 = arith.constant 0 : i32
    return %c0_i32, %c0_i32_0 : i32, i32
  }
  func.func @transform_14(%arg0: i32) -> (i32, i32) {
    %c0_i32 = arith.constant 0 : i32
    %c0_i32_0 = arith.constant 0 : i32
    %c0_i32_1 = arith.constant 0 : i32
    return %c0_i32, %c0_i32_0 : i32, i32
  }
  func.func @transform_15(%arg0: i32) -> (i32, i32) {
    %c0_i32 = arith.constant 0 : i32
    %c0_i32_0 = arith.constant 0 : i32
    %c0_i32_1 = arith.constant 0 : i32
    return %c0_i32, %c0_i32_0 : i32, i32
  }
  func.func @transform_16(%arg0: i32) -> (i32, i32, i32) {
    %c0_i32 = arith.constant 0 : i32
    %c0_i32_0 = arith.constant 0 : i32
    %c0_i32_1 = arith.constant 0 : i32
    %c0_i32_2 = arith.constant 0 : i32
    return %c0_i32, %c0_i32_0, %c0_i32_1 : i32, i32, i32
  }
  func.func @transform_17(%arg0: i32) -> (i32, i32, i32) {
    %c0_i32 = arith.constant 0 : i32
    %c0_i32_0 = arith.constant 0 : i32
    %c0_i32_1 = arith.constant 0 : i32
    %c0_i32_2 = arith.constant 0 : i32
    return %c0_i32, %c0_i32_0, %c0_i32_1 : i32, i32, i32
  }
  func.func @transform_18(%arg0: i32) -> (i32, i32) {
    %c0_i32 = arith.constant 0 : i32
    %c0_i32_0 = arith.constant 0 : i32
    %c0_i32_1 = arith.constant 0 : i32
    return %c0_i32, %c0_i32_0 : i32, i32
  }
  func.func @transform_19(%arg0: i32) -> (i32, i32) {
    %c0_i32 = arith.constant 0 : i32
    %c0_i32_0 = arith.constant 0 : i32
    %c0_i32_1 = arith.constant 0 : i32
    return %c0_i32, %c0_i32_0 : i32, i32
  }
  func.func @transform_20(%arg0: i32) -> (i32, i32) {
    %c0_i32 = arith.constant 0 : i32
    %c0_i32_0 = arith.constant 0 : i32
    %c0_i32_1 = arith.constant 0 : i32
    return %c0_i32, %c0_i32_0 : i32, i32
  }
  func.func @transform_21(%arg0: i32) -> (i32, i32) {
    %c0_i32 = arith.constant 0 : i32
    %c0_i32_0 = arith.constant 0 : i32
    %c0_i32_1 = arith.constant 0 : i32
    return %c0_i32, %c0_i32_0 : i32, i32
  }
  func.func @transform_22(%arg0: i32) -> (i32, i32) {
    %c0_i32 = arith.constant 0 : i32
    %c0_i32_0 = arith.constant 0 : i32
    %c0_i32_1 = arith.constant 0 : i32
    return %c0_i32, %c0_i32_0 : i32, i32
  }
  func.func @transform_23(%arg0: i32) -> (i32, i32) {
    %c0_i32 = arith.constant 0 : i32
    %c0_i32_0 = arith.constant 0 : i32
    %c0_i32_1 = arith.constant 0 : i32
    return %c0_i32, %c0_i32_0 : i32, i32
  }
  func.func @transform_24(%arg0: i32) -> (i32, i32) {
    %c0_i32 = arith.constant 0 : i32
    %c0_i32_0 = arith.constant 0 : i32
    %c0_i32_1 = arith.constant 0 : i32
    return %c0_i32, %c0_i32_0 : i32, i32
  }
  func.func @transform_25(%arg0: i32) -> (i32, i32) {
    %c0_i32 = arith.constant 0 : i32
    %c0_i32_0 = arith.constant 0 : i32
    %c0_i32_1 = arith.constant 0 : i32
    return %c0_i32, %c0_i32_0 : i32, i32
  }
  func.func @transform_26(%arg0: i32) -> (i32, i32) {
    %c0_i32 = arith.constant 0 : i32
    %c0_i32_0 = arith.constant 0 : i32
    %c0_i32_1 = arith.constant 0 : i32
    return %c0_i32, %c0_i32_0 : i32, i32
  }
  func.func @transform_27(%arg0: i32) -> (i32, i32) {
    %c0_i32 = arith.constant 0 : i32
    %c0_i32_0 = arith.constant 0 : i32
    %c0_i32_1 = arith.constant 0 : i32
    return %c0_i32, %c0_i32_0 : i32, i32
  }
  func.func @transform_28(%arg0: i32) -> (i32, i32) {
    %c0_i32 = arith.constant 0 : i32
    %c0_i32_0 = arith.constant 0 : i32
    %c0_i32_1 = arith.constant 0 : i32
    return %c0_i32, %c0_i32_0 : i32, i32
  }
  func.func @transform_29(%arg0: i32) -> (i32, i32) {
    %c0_i32 = arith.constant 0 : i32
    %c0_i32_0 = arith.constant 0 : i32
    %c0_i32_1 = arith.constant 0 : i32
    return %c0_i32, %c0_i32_0 : i32, i32
  }
  func.func @transform_30(%arg0: i32) -> (i32, i32, i32) {
    %c0_i32 = arith.constant 0 : i32
    %c0_i32_0 = arith.constant 0 : i32
    %c0_i32_1 = arith.constant 0 : i32
    return %arg0, %c0_i32, %c0_i32_0 : i32, i32, i32
  }
  func.func @transform_31(%arg0: i32) -> (i32, i32, i32) {
    %c0_i32 = arith.constant 0 : i32
    %c0_i32_0 = arith.constant 0 : i32
    %c0_i32_1 = arith.constant 0 : i32
    return %arg0, %c0_i32, %c0_i32_0 : i32, i32, i32
  }
}

</mosaic_0001>

<bundles_post_ra>
// kernel: aeconv_forward.1
= control target key start
LH: loop header
LB: loop body
LE: loop exit
PB: predicated region body
PF: predicated region fallthrough
CT: control target
= control target key end

     0   :  { %s11089_s6 = smov 1   ;;  %s11090_s10 = smov 2   ;;  %s13173_s0 = inlined_call_operand.smem [shape: u32[32], index: -1, kind: input, shape index: {}] }
   0x1   :  { %s11130_s5 = sld [smem:[%s13173_s0]]   ;;  %s11091_s14 = smov 3  }
   0x2   :  { %s11135_s9 = sld [smem:[%s13173_s0 + %s11089_s6]]   ;;  %s11092_s18 = smov 4  }
   0x3   :  { %s11140_s13 = sld [smem:[%s13173_s0 + %s11090_s10]]   ;;  %s11093_s22 = smov 5  }
   0x4   :  { %s11145_s17 = sld [smem:[%s13173_s0 + %s11091_s14]]   ;;  %s11094_s26 = smov 6  }
   0x5   :  { %s11150_s21 = sld [smem:[%s13173_s0 + %s11092_s18]]   ;;  %s11095_s30 = smov 7  }
   0x6   :  { %s11155_s25 = sld [smem:[%s13173_s0 + %s11093_s22]]   ;;  %s11096_s4 = smov 8  }
   0x7   :  { %13202 = sst [smem:[#allocation10_spill]] %s11130_s5  ;;  %s11097_s10 = smov 9  }
   0x8   :  { %13203 = sst [smem:[#allocation11_spill]] %s11135_s9  ;;  %s11098_s15 = smov 10  }
   0x9   :  { %13204 = sst [smem:[#allocation12_spill]] %s11140_s13  ;;  %s11099_s20 = smov 11  }
   0xa   :  { %s11160_s29 = sld [smem:[%s13173_s0 + %s11094_s26]]   ;;  %s11100_s26 = smov 12  }
   0xb   :  { %s11165_s3 = sld [smem:[%s13173_s0 + %s11095_s30]]   ;;  %s11101_s1 = smov 13  }
   0xc   :  { %s11170_s8 = sld [smem:[%s13173_s0 + %s11096_s4]]   ;;  %s11102_s7 = smov 14  }
   0xd   :  { %s11175_s14 = sld [smem:[%s13173_s0 + %s11097_s10]]   ;;  %s11104_s22 = smov 16  }
   0xe   :  { %s11180_s19 = sld [smem:[%s13173_s0 + %s11098_s15]]   ;;  %s11103_s15 = smov 15  }
   0xf   :  { %s11185_s24 = sld [smem:[%s13173_s0 + %s11099_s20]]   ;;  %s11105_s28 = smov 17  }
  0x10   :  { %s11190_s30 = sld [smem:[%s13173_s0 + %s11100_s26]]  }
  0x11   :  { %13205 = sst [smem:[#allocation13_spill]] %s11165_s3 }
  0x12   :  { %13206 = sst [smem:[#allocation14_spill]] %s11170_s8 }
  0x13   :  { %s11195_s6 = sld [smem:[%s13173_s0 + %s11101_s1]]  }
  0x14   :  { %s11200_s12 = sld [smem:[%s13173_s0 + %s11102_s7]]   ;;  %s11106_s7 = smov 18  }
  0x15   :  { %s11205_s20 = sld [smem:[%s13173_s0 + %s11103_s15]]   ;;  %s11107_s15 = smov 19  }
  0x16   :  { %s11210_s27 = sld [smem:[%s13173_s0 + %s11104_s22]]   ;;  %s11108_s22 = smov 20  }
  0x17   :  { %s11215_s4 = sld [smem:[%s13173_s0 + %s11105_s28]]   ;;  %s11109_s28 = smov 21  }
  0x19   :  { %13207 = sst [smem:[#allocation15_spill]] %s11195_s6 }
  0x1a   :  { %13208 = sst [smem:[#allocation16_spill]] %s11200_s12 }
  0x1b   :  { %13209 = sst [smem:[#allocation17_spill]] %s11205_s20 }
  0x1c   :  { %13210 = sst [smem:[#allocation18_spill]] %s11210_s27 }
  0x1d   :  { %13211 = sst [smem:[#allocation19_spill]] %s11215_s4 }
  0x1e   :  { %s11220_s6 = sld [smem:[%s13173_s0 + %s11106_s7]]   ;;  %s11110_s7 = smov 22  }
  0x1f   :  { %s11225_s20 = sld [smem:[%s13173_s0 + %s11107_s15]]   ;;  %s11111_s15 = smov 23  }
  0x20   :  { %s11230_s27 = sld [smem:[%s13173_s0 + %s11108_s22]]   ;;  %s11112_s22 = smov 24  }
  0x21   :  { %s11235_s4 = sld [smem:[%s13173_s0 + %s11109_s28]]   ;;  %s11113_s28 = smov 25  }
  0x24   :  { %13212 = sst [smem:[#allocation20_spill]] %s11220_s6 }
  0x25   :  { %13213 = sst [smem:[#allocation21_spill]] %s11225_s20 }
  0x26   :  { %13214 = sst [smem:[#allocation22_spill]] %s11230_s27 }
  0x27   :  { %13215 = sst [smem:[#allocation23_spill]] %s11235_s4 }
  0x28   :  { %s11240_s6 = sld [smem:[%s13173_s0 + %s11110_s7]]   ;;  %s11114_s7 = smov 26  }
  0x29   :  { %s11245_s20 = sld [smem:[%s13173_s0 + %s11111_s15]]   ;;  %s11115_s15 = smov 27  }
  0x2a   :  { %s11250_s27 = sld [smem:[%s13173_s0 + %s11112_s22]]   ;;  %s11116_s22 = smov 28  }
  0x2b   :  { %s11255_s4 = sld [smem:[%s13173_s0 + %s11113_s28]]   ;;  %s11117_s28 = smov 29  }
  0x2e   :  { %13216 = sst [smem:[#allocation24_spill]] %s11240_s6 }
  0x2f   :  { %13217 = sst [smem:[#allocation25_spill]] %s11245_s20 }
  0x30   :  { %13218 = sst [smem:[#allocation26_spill]] %s11250_s27 }
  0x31   :  { %13219 = sst [smem:[#allocation27_spill]] %s11255_s4 }
  0x32   :  { %s11260_s6 = sld [smem:[%s13173_s0 + %s11114_s7]]   ;;  %s11118_s7 = smov 30  }
  0x33   :  { %s11265_s20 = sld [smem:[%s13173_s0 + %s11115_s15]]   ;;  %s11119_s15 = smov 31  }
  0x34   :  { %s11270_s27 = sld [smem:[%s13173_s0 + %s11116_s22]]  }
  0x35   :  { %s11275_s4 = sld [smem:[%s13173_s0 + %s11117_s28]]  }
  0x38   :  { %13220 = sst [smem:[#allocation28_spill]] %s11260_s6 }
  0x39   :  { %13221 = sst [smem:[#allocation29_spill]] %s11265_s20 }
  0x3a   :  { %s11280_s6 = sld [smem:[%s13173_s0 + %s11118_s7]]  }
  0x3b   :  { %s11285_s20 = sld [smem:[%s13173_s0 + %s11119_s15]]  }
  0x3c   :  { %69 = vsyncpa [#allocation8], 0 }
  0x3d   :  { %71 = vsyncpa [#allocation8 + $0x1], 0  ;;  %s11287_s22 = smov 0   ;;  %s11289_s23 = smov 0  }
  0x3e   :  { %s11291_s26 = smov 0   ;;  %s11293_s28 = smov 0  }
  0x3f LB: > { %s13222_s13 = sld [smem:[#allocation12_spill]]  ;;  %s11308_s0 = sadd.s32 4294967295, %s11087_s28   ;;  %s11075_s22 = sphi %s11287_s22, %s13250_s22   ;;  %s11087_s28 = sphi %s11293_s28, %s13253_s28   ;;  %s11083_s26 = sphi %s11291_s26, %s13252_s26   ;;  %s11079_s23 = sphi %s11289_s23, %s13251_s23  }
  0x40   : > { %s13223_s12 = sld [smem:[#allocation16_spill]]  ;;  %s7564_s1 = sadd.s32 4294967294, %s11087_s28  }
  0x41   : > { %s13224_s9 = sld [smem:[#allocation11_spill]]  ;;  %s11312_s2 = sadd.s32 1, %s11087_s28  }
  0x42   : > { %s13225_s8 = sld [smem:[#allocation14_spill]]  ;;  %s719_s7 = sadd.s32 1, %s11083_s26 }
  0x43   : > { %s13226_s3 = sld [smem:[#allocation13_spill]]  ;;  %s716_s10 = ssub.s32 %s11087_s28, %s11312_s2 }
  0x44   : > { %p729_p0 = scmp.ne.s32.totalorder %s11083_s26, %s11079_s23  ;;  %p717_p1 = scmp.eq.s32.totalorder %s716_s10, 0 }
  0x45   : > { %p730_p2 = scmp.eq.s32.totalorder %s11308_s0, 1  ;;  %p735_p3 = scmp.ne.s32.totalorder %s11079_s23, %s11075_s22 }
  0x46   : > { %p736_p4 = scmp.eq.s32.totalorder %s7564_s1, 1  ;;  %p7567_p7 = scmp.ge.s32.totalorder %s11087_s28, 1 }
  0x47   : > { %s11323_s11 = scalar_select %p717_p1, %s11083_s26, %s719_s7  }
  0x48   : > { %p11325_p5 = por %p730_p2, %p729_p0  ;;  %p11329_p6 = por %p736_p4, %p735_p3 }
  0x49   : > { %p875_p8 = scmp.lt.s32.totalorder %s11087_s28, 3 }
  0x4b   : > { %p876_p9 = pnand %p7567_p7, %p875_p8 }
  0x4c   : > { %p959_p10 = scmp.lt.s32.totalorder (!%p876_p9), %s11308_s0, 1  ;;  %s13229_s5 = sld [smem:[#allocation10_spill]] (!%p876_p9) }
  0x4d   : > { %879 = sbr.rel (%p876_p9) target bundleno = 2759 (0xac7), region = 140  ;;  %s13184_s10 = smov (!%p876_p9), 64  }
  0x52   : > { %v7629_v0 = vld [vmem:[%s13222_s13 + $0x70] sm:$0xf]  ;;  %v10328_v1 = vld [vmem:[%s13222_s13 + $0x74] sm:$0xf0]  ;;  %v10327_v5 = vld [vmem:[%s13222_s13 + $0x74] sm:$0xf] }
  0x53   : > { %v7661_v2 = vld [vmem:[%s13222_s13 + $0xb0] sm:$0xf]  ;;  %v7630_v3 = vor.u32 %v10328_v1, %v7629_v0  ;;  %v10336_v4 = vld [vmem:[%s13222_s13 + $0xb4] sm:$0xf0]  ;;  %v7631_v6 = vld [vmem:[%s13222_s13 + $0x78] sm:$0xf0] }
  0x54   : > { %v7662_v7 = vor.u32 %v10336_v4, %v7661_v2  ;;  %v7634_v8 = vor.u32 %v10327_v5, %v7631_v6  ;;  %v7621_v9 = vld [vmem:[%s13222_s13 + $0x60] sm:$0xf]  ;;  %v10326_v10 = vld [vmem:[%s13222_s13 + $0x64] sm:$0xf0]  ;;  %v10325_v14 = vld [vmem:[%s13222_s13 + $0x64] sm:$0xf] }
  0x55   : > { %v7653_v11 = vld [vmem:[%s13222_s13 + $0xa0] sm:$0xf]  ;;  %1178 = vmatpush.bf16.msra.mxu0 %v7630_v3  ;;  %v7622_v12 = vor.u32 %v10326_v10, %v7621_v9  ;;  %v10334_v13 = vld [vmem:[%s13222_s13 + $0xa4] sm:$0xf0]  ;;  %v7623_v15 = vld [vmem:[%s13222_s13 + $0x68] sm:$0xf0] }
  0x56   : > { %1196 = vmatpush.bf16.msra.mxu1 %v7662_v7  ;;  %1206 = vmatpush.bf16.msra.mxu2 %v7634_v8  ;;  %v7654_v16 = vor.u32 %v10334_v13, %v7653_v11  ;;  %v7626_v17 = vor.u32 %v10325_v14, %v7623_v15  ;;  %v7613_v18 = vld [vmem:[%s13222_s13 + $0x50] sm:$0xf]  ;;  %v10324_v19 = vld [vmem:[%s13222_s13 + $0x54] sm:$0xf0]  ;;  %v10323_v22 = vld [vmem:[%s13222_s13 + $0x54] sm:$0xf] }
  0x57   : > { %v7645_v20 = vld [vmem:[%s13222_s13 + $0x90] sm:$0xf]  ;;  %v10332_v21 = vld [vmem:[%s13222_s13 + $0x94] sm:$0xf0]  ;;  %v7615_v23 = vld [vmem:[%s13222_s13 + $0x58] sm:$0xf0]  ;;  %v7614_v26 = vor.u32 %v10324_v19, %v7613_v18 }
  0x58   : > { %v10335_v24 = vld [vmem:[%s13222_s13 + $0xb4] sm:$0xf]  ;;  %v7663_v25 = vld [vmem:[%s13222_s13 + $0xb8] sm:$0xf0]  ;;  %v7605_v28 = vld [vmem:[%s13222_s13 + $0x40] sm:$0xf]  ;;  %v7646_v30 = vor.u32 %v10332_v21, %v7645_v20  ;;  %v7618_v31 = vor.u32 %v10323_v22, %v7615_v23 }
  0x59   : > { %1179 = vmatpush.bf16.msra.mxu0 %v7622_v12  ;;  %v7666_v27 = vor.u32 %v10335_v24, %v7663_v25  ;;  %v10322_v29 = vld [vmem:[%s13222_s13 + $0x44] sm:$0xf0]  ;;  %v7637_v32 = vld [vmem:[%s13222_s13 + $0x80] sm:$0xf]  ;;  %v10333_v34 = vld [vmem:[%s13222_s13 + $0xa4] sm:$0xf] }
  0x5a   : > { %1197 = vmatpush.bf16.msra.mxu1 %v7654_v16  ;;  %1207 = vmatpush.bf16.msra.mxu2 %v7626_v17  ;;  %v10330_v33 = vld [vmem:[%s13222_s13 + $0x84] sm:$0xf0]  ;;  %v10321_v35 = vld [vmem:[%s13222_s13 + $0x44] sm:$0xf]  ;;  %v7607_v36 = vld [vmem:[%s13222_s13 + $0x48] sm:$0xf0]  ;;  %v7606_v41 = vor.u32 %v10322_v29, %v7605_v28 }
  0x5b   : > { %1224 = vmatpush.bf16.msra.mxu3 %v7666_v27  ;;  %v7655_v37 = vld [vmem:[%s13222_s13 + $0xa8] sm:$0xf0]  ;;  %v7727_v39 = vld [vmem:[%s13224_s9 + $0x70] sm:$0xf]  ;;  %v10304_v40 = vld [vmem:[%s13224_s9 + $0x74] sm:$0xf0]  ;;  %v7638_v44 = vor.u32 %v10330_v33, %v7637_v32  ;;  %v7610_v45 = vor.u32 %v10321_v35, %v7607_v36 }
  0x5c   : > { %v7658_v38 = vor.u32 %v10333_v34, %v7655_v37  ;;  %v10331_v42 = vld [vmem:[%s13222_s13 + $0x94] sm:$0xf]  ;;  %v7647_v43 = vld [vmem:[%s13222_s13 + $0x98] sm:$0xf0]  ;;  %v7597_v46 = vld [vmem:[%s13222_s13 + $0x30] sm:$0xf]  ;;  %v7728_v48 = vor.u32 %v10304_v40, %v7727_v39 }
  0x5d   : > { %1180 = vmatpush.bf16.msra.mxu0 %v7614_v26  ;;  %v10320_v47 = vld [vmem:[%s13222_s13 + $0x34] sm:$0xf0]  ;;  %v10319_v49 = vld [vmem:[%s13222_s13 + $0x34] sm:$0xf]  ;;  %v7599_v50 = vld [vmem:[%s13222_s13 + $0x38] sm:$0xf0]  ;;  %v7650_v51 = vor.u32 %v10331_v42, %v7647_v43 }
  0x5e   : > { %1198 = vmatpush.bf16.msra.mxu1 %v7646_v30  ;;  %1208 = vmatpush.bf16.msra.mxu2 %v7618_v31  ;;  %v7719_v52 = vld [vmem:[%s13224_s9 + $0x60] sm:$0xf]  ;;  %v10302_v53 = vld [vmem:[%s13224_s9 + $0x64] sm:$0xf0]  ;;  %v10329_v54 = vld [vmem:[%s13222_s13 + $0x84] sm:$0xf]  ;;  %v7598_v56 = vor.u32 %v10320_v47, %v7597_v46  ;;  %v7602_v58 = vor.u32 %v10319_v49, %v7599_v50 }
  0x5f   : > { %1225 = vmatpush.bf16.msra.mxu3 %v7658_v38  ;;  %v7639_v55 = vld [vmem:[%s13222_s13 + $0x88] sm:$0xf0]  ;;  %v7589_v57 = vld [vmem:[%s13222_s13 + $0x20] sm:$0xf]  ;;  %v10318_v59 = vld [vmem:[%s13222_s13 + $0x24] sm:$0xf0]  ;;  %v7720_v61 = vor.u32 %v10302_v53, %v7719_v52 }
  0x60   : > { %v10317_v60 = vld [vmem:[%s13222_s13 + $0x24] sm:$0xf]  ;;  %v7591_v62 = vld [vmem:[%s13222_s13 + $0x28] sm:$0xf0]  ;;  %v7642_v63 = vor.u32 %v10329_v54, %v7639_v55  ;;  %v7711_v0 = vld [vmem:[%s13224_s9 + $0x50] sm:$0xf]  ;;  %v7590_v4 = vor.u32 %v10318_v59, %v7589_v57 }
  0x61   : > { %1181 = vmatpush.bf16.msra.mxu0 %v7606_v41  ;;  %v10300_v1 = vld [vmem:[%s13224_s9 + $0x54] sm:$0xf0]  ;;  %s11383_s18 = scalar_select %p959_p10, %s11308_s0, 1  ;;  %v7759_v2 = vld [vmem:[%s13224_s9 + $0xb0] sm:$0xf]  ;;  %v7594_v8 = vor.u32 %v10317_v60, %v7591_v62  ;;  %vm1174_vm1 = vcmask 523264  }
  0x62   : > { %1199 = vmatpush.bf16.msra.mxu1 %v7638_v44  ;;  %1209 = vmatpush.bf16.msra.mxu2 %v7610_v45  ;;  %v10312_v3 = vld [vmem:[%s13224_s9 + $0xb4] sm:$0xf0]  ;;  %v7581_v5 = vld [vmem:[%s13222_s13 + $0x10] sm:$0xf]  ;;  %v10315_v9 = vld [vmem:[%s13222_s13 + $0x14] sm:$0xf]  ;;  %v7712_v11 = vor.u32 %v10300_v1, %v7711_v0 }
  0x63   : > { %1226 = vmatpush.bf16.msra.mxu3 %v7650_v51  ;;  %v10316_v6 = vld [vmem:[%s13222_s13 + $0x14] sm:$0xf0]  ;;  %v7760_v7 = vor.u32 %v10312_v3, %v7759_v2  ;;  %s10936_s1 = smul.u32 48, %s11383_s18  ;;  %v7583_v10 = vld [vmem:[%s13222_s13 + $0x18] sm:$0xf0]  ;;  %vm1449_vm2 = vcmask 1040384  }
  0x64   : > { %v7703_v12 = vld [vmem:[%s13224_s9 + $0x40] sm:$0xf]  ;;  %v10310_v14 = vld [vmem:[%s13224_s9 + $0xa4] sm:$0xf0]  ;;  %v7582_v19 = vor.u32 %v10316_v6, %v7581_v5  ;;  %vm1028_vm0 = vsmask.f32 7424  ;;  %v7586_v28 = vor.u32 %v10315_v9, %v7583_v10 }
  0x65   : > { %1182 = vmatpush.bf16.msra.mxu0 %v7598_v56  ;;  %v7751_v13 = vld [vmem:[%s13224_s9 + $0xa0] sm:$0xf]  ;;  %s963_s7 = scalar_lea.vmem %s13229_s5, %s10936_s1  ;;  %v10298_v15 = vld [vmem:[%s13224_s9 + $0x44] sm:$0xf0]  ;;  %v10313_v23 = vld [vmem:[%s13222_s13 + $0x4] sm:$0xf] }
  0x66   : > { %1356 = vmatpush.bf16.msrb.mxu1 %v7728_v48  ;;  %1210 = vmatpush.bf16.msra.mxu2 %v7602_v58  ;;  %v7573_v16 = vld [vmem:[%s13222_s13] sm:$0xf]  ;;  %v10314_v17 = vld [vmem:[%s13222_s13 + $0x4] sm:$0xf0]  ;;  %v7752_v18 = vor.u32 %v10310_v14, %v7751_v13  ;;  %v973_v21 = vld [vmem:[%s963_s7 + $0x18] sm:$0xff]  ;;  %v7704_v32 = vor.u32 %v10298_v15, %v7703_v12  ;;  %s13234_s1 = sld [smem:[#allocation15_spill]] }
  0x67   : > { %1227 = vmatpush.bf16.msra.mxu3 %v7642_v63  ;;  %v971_v20 = vld [vmem:[%s963_s7 + $0x8] sm:$0xff]  ;;  %v10303_v25 = vld [vmem:[%s13224_s9 + $0x74] sm:$0xf]  ;;  %v970_v29 = vld [vmem:[%s963_s7] sm:$0xff]  ;;  %v7574_v41 = vor.u32 %v10314_v17, %v7573_v16  ;;  %vm4233_vm7 = vcmask 392192   ;;  %vm4276_vm8 = vcmask 130048  }
  0x68   : > { %v975_v22 = vld [vmem:[%s963_s7 + $0x28] sm:$0x1]  ;;  %v7575_v24 = vld [vmem:[%s13222_s13 + $0x8] sm:$0xf0]  ;;  %v11402_v26 = vpack.c.bf16 %v973_v21, %v971_v20  ;;  %v972_v30 = vld [vmem:[%s963_s7 + $0x10] sm:$0xff]  ;;  %vm4250_vm9 = vcmask 122880  }
  0x69   : > { %1183 = vmatpush.bf16.msra.mxu0 %v7590_v4  ;;  %v1027_v27 = vpack.c.bf16 %v975_v22, %v975_v22  ;;  %v974_v31 = vld [vmem:[%s963_s7 + $0x20] sm:$0x1]  ;;  %v7729_v33 = vld [vmem:[%s13224_s9 + $0x78] sm:$0xf0]  ;;  %v11405_v34 = vpack.c.bf16 %v972_v30, %v970_v29  ;;  %v7743_v36 = vld [vmem:[%s13224_s9 + $0x90] sm:$0xf]  ;;  %v7578_v50 = vor.u32 %v10313_v23, %v7575_v24 }
  0x6a   : > { %1357 = vmatpush.bf16.msrb.mxu1 %v7720_v61  ;;  %1211 = vmatpush.bf16.msra.mxu2 %v7594_v8  ;;  %v1026_v35 = vpack.c.bf16 %v974_v31, %v974_v31  ;;  %v10308_v37 = vld [vmem:[%s13224_s9 + $0x94] sm:$0xf0]  ;;  %v1042_v38 = vshrl.u32 %v11402_v26, 16  ;;  %v1044_v39 = vshll.u32 %v11402_v26, 16  ;;  %v7695_v42 = vld [vmem:[%s13224_s9 + $0x30] sm:$0xf]  ;;  %v7732_v51 = vor.u32 %v10303_v25, %v7729_v33 }
  0x6b   : > { %1374 = vmatpush.bf16.msrb.mxu3 %v7760_v7  ;;  %v1049_v40 = vshll.u32 %v1027_v27, 16  ;;  %v10296_v43 = vld [vmem:[%s13224_s9 + $0x34] sm:$0xf0]  ;;  %v1030_v44 = vshrl.u32 %v11405_v34, 16  ;;  %v1032_v45 = vshll.u32 %v11405_v34, 16  ;;  %v7744_v47 = vor.u32 %v10308_v37, %v7743_v36  ;;  %s13235_s7 = sld [smem:[#allocation18_spill]] }
  0x6c   : > { %v1037_v46 = vshll.u32 %v1026_v35, 16  ;;  %v1046_v48 = vrot.slane %v1044_v39, 1  ;;  %v10311_v52 = vld [vmem:[%s13224_s9 + $0xb4] sm:$0xf]  ;;  %v7761_v53 = vld [vmem:[%s13224_s9 + $0xb8] sm:$0xf0]  ;;  %v7696_v59 = vor.u32 %v10296_v43, %v7695_v42 }
  0x6d   : > { %1184 = vmatpush.bf16.msra.mxu0 %v7582_v19  ;;  %v1051_v49 = vrot.slane %v1049_v40, 1  ;;  %v1034_v54 = vrot.slane %v1032_v45, 1  ;;  %v10301_v56 = vld [vmem:[%s13224_s9 + $0x64] sm:$0xf]  ;;  %v7721_v57 = vld [vmem:[%s13224_s9 + $0x68] sm:$0xf0]  ;;  %v7764_v61 = vor.u32 %v10311_v52, %v7761_v53 }
  0x6e   : > { %1358 = vmatpush.bf16.msrb.mxu1 %v7712_v11  ;;  %1212 = vmatpush.bf16.msra.mxu2 %v7586_v28  ;;  %v1039_v55 = vrot.slane %v1037_v46, 1  ;;  %v1047_v58 = vor.u32 %v1046_v48, %v1042_v38  ;;  %v7687_v60 = vld [vmem:[%s13224_s9 + $0x20] sm:$0xf]  ;;  %v10306_v63 = vld [vmem:[%s13224_s9 + $0x84] sm:$0xf0]  ;;  %v7724_v5 = vor.u32 %v10301_v56, %v7721_v57  ;;  %s13239_s5 = sld [smem:[#allocation19_spill]] }
  0x6f   : > { %1375 = vmatpush.bf16.msrb.mxu3 %v7752_v18  ;;  %v7735_v62 = vld [vmem:[%s13224_s9 + $0x80] sm:$0xf]  ;;  %v1035_v0 = vor.u32 %v1034_v54, %v1030_v44  ;;  %v10294_v1 = vld [vmem:[%s13224_s9 + $0x24] sm:$0xf0]  ;;  %v10309_v2 = vld [vmem:[%s13224_s9 + $0xa4] sm:$0xf] }
  0x70   : > { %v7753_v3 = vld [vmem:[%s13224_s9 + $0xa8] sm:$0xf0]  ;;  %v1052_v4 = vsel %vm1028_vm0, %v1047_v58, %v1051_v49  ;;  %v7736_v6 = vor.u32 %v10306_v63, %v7735_v62  ;;  %v10299_v8 = vld [vmem:[%s13224_s9 + $0x54] sm:$0xf]  ;;  %v7713_v9 = vld [vmem:[%s13224_s9 + $0x58] sm:$0xf0]  ;;  %v7688_v10 = vor.u32 %v10294_v1, %v7687_v60 }
  0x71   : > { %1185 = vmatpush.bf16.msra.mxu0 %v7574_v41  ;;  %7668 = vmatmul.msk.bf16.vlgmr.msra.gmra.mxu3 %vm1174_vm1, %v1052_v4  ;;  %v1040_v7 = vsel %vm1028_vm0, %v1035_v0, %v1039_v55  ;;  %v7679_v11 = vld [vmem:[%s13224_s9 + $0x10] sm:$0xf]  ;;  %v7756_v12 = vor.u32 %v10309_v2, %v7753_v3  ;;  %v10292_v13 = vld [vmem:[%s13224_s9 + $0x14] sm:$0xf0]  ;;  %v10307_v14 = vld [vmem:[%s13224_s9 + $0x94] sm:$0xf]  ;;  %v7716_v16 = vor.u32 %v10299_v8, %v7713_v9 }
  0x72   : > { %1359 = vmatpush.bf16.msrb.mxu1 %v7704_v32  ;;  %1213 = vmatpush.bf16.msra.mxu2 %v7578_v50  ;;  %v7745_v15 = vld [vmem:[%s13224_s9 + $0x98] sm:$0xf0]  ;;  %v10297_v17 = vld [vmem:[%s13224_s9 + $0x44] sm:$0xf]  ;;  %v7705_v18 = vld [vmem:[%s13224_s9 + $0x48] sm:$0xf0]  ;;  %v7680_v19 = vor.u32 %v10292_v13, %v7679_v11  ;;  %v1426_v13 = vlaneseq }
  0x73   : > { %1376 = vmatpush.bf16.msrb.mxu3 %v7744_v47  ;;  %7667 = vmatmul.msk.bf16.vlgmr.msra.gmra.mxu1 %vm1174_vm1, %v1052_v4  ;;  %v7671_v20 = vld [vmem:[%s13224_s9] sm:$0xf]  ;;  %v7748_v21 = vor.u32 %v10307_v14, %v7745_v15  ;;  %v10290_v22 = vld [vmem:[%s13224_s9 + $0x4] sm:$0xf0]  ;;  %v10305_v23 = vld [vmem:[%s13224_s9 + $0x84] sm:$0xf]  ;;  %v7708_v25 = vor.u32 %v10297_v17, %v7705_v18 }
  0x74   : > { %1186 = vmatmul.bf16.vlgmr.msra.gmra.mxu0 %v1040_v7  ;;  %v7737_v24 = vld [vmem:[%s13224_s9 + $0x88] sm:$0xf0]  ;;  %v10295_v27 = vld [vmem:[%s13224_s9 + $0x34] sm:$0xf]  ;;  %v7697_v28 = vld [vmem:[%s13224_s9 + $0x38] sm:$0xf0]  ;;  %v7672_v29 = vor.u32 %v10290_v22, %v7671_v20 }
  0x75   : > { %1384 = vmatpush.bf16.msrb.mxu0 %v7732_v51  ;;  %1214 = vmatmul.bf16.vlgmr.msra.gmra.mxu2 %v1040_v7  ;;  %v7740_v30 = vor.u32 %v10305_v23, %v7737_v24  ;;  %v7700_v31 = vor.u32 %v10295_v27, %v7697_v28  ;;  %v10293_v32 = vld [vmem:[%s13224_s9 + $0x24] sm:$0xf]  ;;  %v7689_v33 = vld [vmem:[%s13224_s9 + $0x28] sm:$0xf0]  ;;  %v10291_v36 = vld [vmem:[%s13224_s9 + $0x14] sm:$0xf] }
  0x76   : > { %1360 = vmatpush.bf16.msrb.mxu1 %v7696_v59  ;;  %1402 = vmatpush.bf16.msrb.mxu2 %v7764_v61  ;;  %v7692_v35 = vor.u32 %v10293_v32, %v7689_v33  ;;  %v7681_v37 = vld [vmem:[%s13224_s9 + $0x18] sm:$0xf0]  ;;  %v10289_v39 = vld [vmem:[%s13224_s9 + $0x4] sm:$0xf]  ;;  %v7673_v40 = vld [vmem:[%s13224_s9 + $0x8] sm:$0xf0] }
  0x77   : > { %1377 = vmatpush.bf16.msrb.mxu3 %v7736_v6  ;;  %v7684_v38 = vor.u32 %v10291_v36, %v7681_v37  ;;  %v7676_v41 = vor.u32 %v10289_v39, %v7673_v40  ;;  %v1412_v50 = vld [vmem:[%s11145_s17] sm:$0x3]  ;;  %vm11461_vm3 = vcmp.lt.s32.totalorder %v1426_v13, 192  ;;  %v7827_v33 = vld [vmem:[%s11155_s25 + $0x78] sm:$0xf0]  ;;  %v11121_v36 = vmov 0.0  }
  0x78   : > { %v1414_v52 = vperm.slane %v1412_v50, 0  ;;  %v1415_v61 = vperm.slane %v1412_v50, 1  ;;  %1430 = vst.msk [vmem:[#allocation2] ss:$8 sm:$0x3] %vm11461_vm3, %v11121_v36  ;;  %vm1432_vm4 = vcmp.ge.s32.totalorder %v1426_v13, 64 }
  0x79   : > { %1385 = vmatpush.bf16.msrb.mxu0 %v7724_v5  ;;  %4252 = vst.msk [vmem:[#allocation4] ss:$8 sm:$0x3] %vm11461_vm3, %v11121_v36  ;;  %v10398_v39 = vld [vmem:[%s11155_s25 + $0x64] sm:$0xf0]  ;;  %vm1433_vm5 = vcmp.lt.s32.totalorder %v1426_v13, 256 }
  0x7a   : > { %1361 = vmatpush.bf16.msrb.mxu1 %v7688_v10  ;;  %1403 = vmatpush.bf16.msrb.mxu2 %v7756_v12  ;;  %4255 = vst.msk [vmem:[#allocation4 + $0x5] ss:$8 sm:$0x3] %vm11461_vm3, %v11121_v36  ;;  %vm11528_vm6 = vmand %vm1432_vm4, %vm1433_vm5  ;;  %v10385_v13 = vld [vmem:[%s11155_s25 + $0x4] sm:$0xf]  ;;  %vm7203_vm10 = vcmask 1046528  }
  0x7b   : > { %6571 = vst.msk [vmem:[#allocation6] ss:$8 sm:$0x3] %vm11461_vm3, %v11121_v36  ;;  %s11045_s13 = scalar_lea.hbm %s11280_s6, 2 }
  0x7c   : > { %2377 = vst.msk [vmem:[#allocation3] ss:$8 sm:$0x3] %vm11461_vm3, %v11121_v36 }
  0x7d   : > { %1386 = vmatpush.bf16.msrb.mxu0 %v7716_v16  ;;  %5479 = vst.msk [vmem:[#allocation5] ss:$8 sm:$0x3] %vm11461_vm3, %v11121_v36 }
  0x7e   : > { %1362 = vmatpush.bf16.msrb.mxu1 %v7680_v19  ;;  %1404 = vmatpush.bf16.msrb.mxu2 %v7748_v21  ;;  %1436 = vst.msk [vmem:[#allocation2 + $0x20] ss:$8 sm:$0x3] %vm11528_vm6, %v11121_v36 }
  0x7f   : > { %2380 = vst.msk [vmem:[#allocation3 + $0xc] ss:$8 sm:$0x3] %vm11528_vm6, %v11121_v36 }
  0x80   : > { %5482 = vst.msk [vmem:[#allocation5 + $0x11] ss:$8 sm:$0x3] %vm11461_vm3, %v11121_v36 }
  0x81   : > { %1387 = vmatpush.bf16.msrb.mxu0 %v7708_v25  ;;  %7765 = vmatmul.msk.bf16.vlgmr.msrb.gmra.mxu3 %vm1174_vm1, %v11402_v26  ;;  %6574 = vst.msk [vmem:[#allocation6 + $0x21] ss:$8 sm:$0x3] %vm11461_vm3, %v11121_v36 }
  0x82   : > { %1363 = vmatpush.bf16.msrb.mxu1 %v7672_v29  ;;  %1405 = vmatpush.bf16.msrb.mxu2 %v7740_v30  ;;  %v7825_v29 = vld [vmem:[%s11155_s25 + $0x70] sm:$0xf]  ;;  %v10400_v30 = vld [vmem:[%s11155_s25 + $0x74] sm:$0xf0] }
  0x83   : > { %v7826_v32 = vor.u32 %v10400_v30, %v7825_v29 }
  0x85   : > { %1388 = vmatpush.bf16.msrb.mxu0 %v7700_v31  ;;  %1364 = vmatmul.bf16.vlgmr.msrb.gmra.mxu1 %v11405_v34  ;;  %v10399_v31 = vld [vmem:[%s11155_s25 + $0x74] sm:$0xf] }
  0x86   : > { %7766 = vmatmul.msk.bf16.vlgmr.msrb.gmra.mxu2 %vm1174_vm1, %v11402_v26  ;;  %1971 = vmatpush.bf16.msra.mxu3 %v7826_v32 }
  0x89   : > { %1389 = vmatpush.bf16.msrb.mxu0 %v7692_v35  ;;  %v7830_v35 = vor.u32 %v10399_v31, %v7827_v33 }
  0x8d   : > { %1390 = vmatpush.bf16.msrb.mxu0 %v7684_v38  ;;  %v7817_v38 = vld [vmem:[%s11155_s25 + $0x60] sm:$0xf] }
  0x8e   : > { %v7818_v40 = vor.u32 %v10398_v39, %v7817_v38 }
  0x90   : > { %1972 = vmatpush.bf16.msra.mxu3 %v7818_v40  ;;  %v7889_v40 = vld [vmem:[%s11155_s25 + $0xf0] sm:$0xf] }
  0x91   : > { %1391 = vmatpush.bf16.msrb.mxu0 %v7676_v41  ;;  %v10397_v41 = vld [vmem:[%s11155_s25 + $0x64] sm:$0xf] }
  0x94   : > { %1392 = vmatmul.bf16.vlgmr.msrb.gmra.mxu0 %v11405_v34 }
  0x95   : > { %2010 = vmatpush.bf16.msra.mxu0 %v7830_v35 }
  0xf0   : > { %v1201_v42 = vpop.f32.mrf.mxu1 }
  0xf1   : > { %v1187_v46 = vpop.f32.mrf.mxu0 }
  0xf2   : > { %v1202_v48 = vadd.f32 %v1201_v42, %v1187_v46  ;;  %v7819_v42 = vld [vmem:[%s11155_s25 + $0x68] sm:$0xf0]  ;;  %v10395_v46 = vld [vmem:[%s11155_s25 + $0x54] sm:$0xf] }
  0xf4   : > { %v1229_v43 = vpop.f32.mrf.mxu3 }
  0xf8   : > { %v1203_v44 = vpop.f32.mrf.mxu1  ;;  %v1215_v45 = vpop.f32.mrf.mxu2 }
  0xf9   : > { %v1189_v53 = vpop.f32.mrf.mxu0  ;;  %v1230_v58 = vadd.f32 %v1229_v43, %v1215_v45  ;;  %v7822_v43 = vor.u32 %v10397_v41, %v7819_v42  ;;  %v10396_v45 = vld [vmem:[%s11155_s25 + $0x54] sm:$0xf0]  ;;  %v7953_v42 = vld [vmem:[%s11155_s25 + $0x170] sm:$0xf] }
  0xfa   : > { %v1204_v63 = vadd.f32 %v1203_v44, %v1189_v53  ;;  %v7809_v44 = vld [vmem:[%s11155_s25 + $0x50] sm:$0xf]  ;;  %v10393_v53 = vld [vmem:[%s11155_s25 + $0x44] sm:$0xf]  ;;  %v10416_v41 = vld [vmem:[%s11155_s25 + $0xf4] sm:$0xf0] }
  0xfb   : > { %2011 = vmatpush.bf16.msra.mxu0 %v7822_v43  ;;  %v7890_v43 = vor.u32 %v10416_v41, %v7889_v40 }
  0xfc   : > { %v1231_v47 = vpop.f32.mrf.mxu3 }
  0xfd   : > { %1984 = vmatpush.bf16.msra.mxu1 %v7890_v43 }
 0x100   : > { %v1217_v51 = vpop.f32.mrf.mxu2 }
 0x101   : > { %v1232_v4 = vadd.f32 %v1231_v47, %v1217_v51  ;;  %v7810_v47 = vor.u32 %v10396_v45, %v7809_v44  ;;  %v10394_v51 = vld [vmem:[%s11155_s25 + $0x44] sm:$0xf0]  ;;  %v10432_v44 = vld [vmem:[%s11155_s25 + $0x174] sm:$0xf0]  ;;  %v7881_v45 = vld [vmem:[%s11155_s25 + $0xe0] sm:$0xf] }
 0x102   : > { %v1365_v49 = vpop.f32.mrf.mxu1 }
 0x103   : > { %v1366_v26 = vadd.f32 %v1365_v49, %v1202_v48  ;;  %v7811_v48 = vld [vmem:[%s11155_s25 + $0x58] sm:$0xf0]  ;;  %1973 = vmatpush.bf16.msra.mxu3 %v7810_v47  ;;  %v7954_v47 = vor.u32 %v10432_v44, %v7953_v42 }
 0x104   : > { %v1379_v54 = vpop.f32.mrf.mxu3  ;;  %v7814_v49 = vor.u32 %v10395_v46, %v7811_v48  ;;  %v10414_v46 = vld [vmem:[%s11155_s25 + $0xe4] sm:$0xf0]  ;;  %v7945_v48 = vld [vmem:[%s11155_s25 + $0x160] sm:$0xf] }
 0x105   : > { %v1380_v55 = vadd.f32 %v1379_v54, %v1366_v26  ;;  %v7801_v26 = vld [vmem:[%s11155_s25 + $0x40] sm:$0xf]  ;;  %v7803_v54 = vld [vmem:[%s11155_s25 + $0x48] sm:$0xf0]  ;;  %1997 = vmatpush.bf16.msra.mxu2 %v7954_v47 }
 0x106   : > { %2012 = vmatpush.bf16.msra.mxu0 %v7814_v49  ;;  %v10430_v49 = vld [vmem:[%s11155_s25 + $0x164] sm:$0xf0] }
 0x107   : > { %v1418_v56 = vadd.f32 %v1414_v52, %v1380_v55  ;;  %v7806_v55 = vor.u32 %v10393_v53, %v7803_v54  ;;  %v7873_v54 = vld [vmem:[%s11155_s25 + $0xd0] sm:$0xf] }
 0x109   : > { %v1422_v57 = vmax.f32 %v1418_v56, 0.0  ;;  %v1407_v34 = vpop.f32.mrf.mxu2  ;;  %v8467_v56 = vld [vmem:[%s13226_s3 + $0xf8] sm:$0xf0] }
 0x10a   : > { %v1367_v62 = vpop.f32.mrf.mxu1  ;;  %2013 = vmatpush.bf16.msra.mxu0 %v7806_v55  ;;  %v10412_v55 = vld [vmem:[%s11155_s25 + $0xd4] sm:$0xf0] }
 0x10b   : > { %1440 = vst [vmem:[#allocation1] sm:$0xff] %v1422_v57  ;;  %v1368_v1 = vadd.f32 %v1367_v62, %v1204_v63  ;;  %v7785_v62 = vld [vmem:[%s11155_s25 + $0x20] sm:$0xf]  ;;  %v10390_v63 = vld [vmem:[%s11155_s25 + $0x24] sm:$0xf0] }
 0x10c   : > { %v1381_v3 = vpop.f32.mrf.mxu3 }
 0x10d   : > { %v1382_v7 = vadd.f32 %v1381_v3, %v1368_v1  ;;  %v7787_v3 = vld [vmem:[%s11155_s25 + $0x28] sm:$0xf0] }
 0x10f   : > { %v1420_v14 = vadd.f32 %v1414_v52, %v1382_v7  ;;  %v7802_v52 = vor.u32 %v10394_v51, %v7801_v26  ;;  %v10387_v7 = vld [vmem:[%s11155_s25 + $0x14] sm:$0xf]  ;;  %v7882_v26 = vor.u32 %v10414_v46, %v7881_v45  ;;  %v10368_v51 = vld [vmem:[%s11150_s21 + $0xf4] sm:$0xf0]  ;;  %v8049_v45 = vld [vmem:[%s11150_s21 + $0xb0] sm:$0xf] }
 0x110   : > { %v10360_v46 = vld [vmem:[%s11150_s21 + $0xb4] sm:$0xf0] }
 0x111   : > { %v1393_v59 = vpop.f32.mrf.mxu0  ;;  %v1409_v10 = vpop.f32.mrf.mxu2  ;;  %v11465_v19 = vmax.f32 %v1420_v14, 0.0  ;;  %1974 = vmatpush.bf16.msra.mxu3 %v7802_v52  ;;  %v7946_v52 = vor.u32 %v10430_v49, %v7945_v48  ;;  %1985 = vmatpush.bf16.msra.mxu1 %v7882_v26  ;;  %v8050_v47 = vor.u32 %v10360_v46, %v8049_v45  ;;  %v7841_v48 = vld [vmem:[%s11155_s25 + $0x90] sm:$0xf]  ;;  %v10404_v49 = vld [vmem:[%s11155_s25 + $0x94] sm:$0xf0] }
 0x112   : > { %v1394_v60 = vadd.f32 %v1393_v59, %v1230_v58  ;;  %v10392_v58 = vld [vmem:[%s11155_s25 + $0x34] sm:$0xf0]  ;;  %v10391_v59 = vld [vmem:[%s11155_s25 + $0x34] sm:$0xf]  ;;  %v7842_v26 = vor.u32 %v10404_v49, %v7841_v48  ;;  %v7835_v45 = vld [vmem:[%s11155_s25 + $0x88] sm:$0xf0] }
 0x113   : > { %1998 = vmatpush.bf16.msra.mxu2 %v7946_v52  ;;  %v10409_v52 = vld [vmem:[%s11155_s25 + $0xc4] sm:$0xf]  ;;  %v7931_v48 = vld [vmem:[%s11155_s25 + $0x148] sm:$0xf0]  ;;  %v7993_v49 = vld [vmem:[%s11150_s21 + $0x40] sm:$0xf] }
 0x114   : > { %v1408_v0 = vadd.f32 %v1407_v34, %v1394_v60  ;;  %v7795_v60 = vld [vmem:[%s11155_s25 + $0x38] sm:$0xf0]  ;;  %v10425_v46 = vld [vmem:[%s11155_s25 + $0x144] sm:$0xf] }
 0x116   : > { %v1419_v2 = vadd.f32 %v1415_v61, %v1408_v0  ;;  %v10389_v0 = vld [vmem:[%s11155_s25 + $0x24] sm:$0xf] }
 0x118   : > { %v1423_v5 = vmax.f32 %v1419_v2, 0.0  ;;  %v7786_v2 = vor.u32 %v10390_v63, %v7785_v62  ;;  %v7874_v63 = vor.u32 %v10412_v55, %v7873_v54 }
 0x119   : > { %v1395_v6 = vpop.f32.mrf.mxu0 }
 0x11a   : > { %1441 = vst [vmem:[#allocation1 + $0x9] sm:$0xff] %v1423_v5  ;;  %v1396_v8 = vadd.f32 %v1395_v6, %v1232_v4  ;;  %v1448_v9 = vrot.slane %v1423_v5, 7  ;;  %v7790_v4 = vor.u32 %v10389_v0, %v7787_v3  ;;  %v10388_v6 = vld [vmem:[%s11155_s25 + $0x14] sm:$0xf0]  ;;  %v7891_v0 = vld [vmem:[%s11155_s25 + $0xf8] sm:$0xf0]  ;;  %1986 = vmatpush.bf16.msra.mxu1 %v7874_v63 }
 0x11c   : > { %v1410_v11 = vadd.f32 %v1409_v10, %v1396_v8  ;;  %v1450_v12 = vsel %vm1449_vm2, %v1422_v57, %v1448_v9  ;;  %v7779_v9 = vld [vmem:[%s11155_s25 + $0x18] sm:$0xf0] }
 0x11d   : > { %1451 = vrot.lane.b32.xlu0 %v1450_v12, %s13184_s10  ;;  %v7782_v10 = vor.u32 %v10387_v7, %v7779_v9  ;;  %v10386_v12 = vld [vmem:[%s11155_s25 + $0x4] sm:$0xf0] }
 0x11e   : > { %v1421_v15 = vadd.f32 %v1415_v61, %v1410_v11  ;;  %v7798_v61 = vor.u32 %v10391_v59, %v7795_v60  ;;  %v7769_v11 = vld [vmem:[%s11155_s25] sm:$0xf]  ;;  %v10366_v59 = vld [vmem:[%s11150_s21 + $0xe4] sm:$0xf0] }
 0x11f   : > { %v7770_v14 = vor.u32 %v10386_v12, %v7769_v11  ;;  %v10426_v9 = vld [vmem:[%s11155_s25 + $0x144] sm:$0xf0] }
 0x120   : > { %v11458_v16 = vmax.f32 %v1421_v15, 0.0  ;;  %2014 = vmatpush.bf16.msra.mxu0 %v7798_v61  ;;  %v7771_v15 = vld [vmem:[%s11155_s25 + $0x8] sm:$0xf0]  ;;  %v10415_v61 = vld [vmem:[%s11155_s25 + $0xf4] sm:$0xf] }
 0x121   : > { %v1443_v17 = vld [vmem:[#allocation1 + $0x1] ss:$9 sm:$0xff]  ;;  %v7894_v7 = vor.u32 %v10415_v61, %v7891_v0 }
 0x122   : > { %1459 = vst [vmem:[#allocation1] sm:$0xff] %v1422_v57  ;;  %v1529_v20 = vrot.slane %v11458_v16, 7  ;;  %v7897_v61 = vld [vmem:[%s11155_s25 + $0x100] sm:$0xf] }
 0x123   : > { %1460 = vst [vmem:[#allocation1 + $0x9] sm:$0xff] %v1423_v5 }
 0x124   : > { %v1530_v21 = vsel %vm1449_vm2, %v11465_v19, %v1529_v20  ;;  %1446 = vst.msk [vmem:[#allocation2 + $0x1] ss:$8 sm:$0x3] %vm11461_vm3, %v1443_v17  ;;  %2015 = vmatpush.bf16.msra.mxu0 %v7790_v4  ;;  %v7774_v17 = vor.u32 %v10385_v13, %v7771_v15  ;;  %v7883_v13 = vld [vmem:[%s11155_s25 + $0xe8] sm:$0xf0] }
 0x125   : > { %1531 = vrot.lane.b32.xlu2 %v1530_v21, %s13184_s10 }
 0x128   : > { %2016 = vmatpush.bf16.msra.mxu0 %v7782_v10  ;;  %v10413_v10 = vld [vmem:[%s11155_s25 + $0xe4] sm:$0xf] }
 0x12a   : > { %v1462_v22 = vld [vmem:[#allocation1 + $0x3] ss:$9 sm:$0xff] }
 0x12b   : > { %1467 = vst [vmem:[#allocation1] sm:$0xff] %v1422_v57 }
 0x12c   : > { %1468 = vst [vmem:[#allocation1 + $0x9] sm:$0xff] %v1423_v5  ;;  %2017 = vmatpush.bf16.msra.mxu0 %v7774_v17  ;;  %v7886_v17 = vor.u32 %v10413_v10, %v7883_v13  ;;  %v8033_v10 = vld [vmem:[%s11150_s21 + $0x90] sm:$0xf] }
 0x12d   : > { %1465 = vst.msk [vmem:[#allocation2 + $0x2] ss:$8 sm:$0x3] %vm11461_vm3, %v1462_v22 }
 0x133   : > { %v1470_v23 = vld [vmem:[#allocation1 + $0x2] ss:$9 sm:$0xff] }
 0x134   : > { %1479 = vst [vmem:[#allocation1] sm:$0xff] %v1422_v57  ;;  %1471 = vrot.lane.b32.xlu0 %v1470_v23, %s13184_s10 }
 0x135   : > { %1480 = vst [vmem:[#allocation1 + $0x9] sm:$0xff] %v1423_v5 }
 0x13c   : > { %v1482_v24 = vld [vmem:[#allocation1 + $0x5] ss:$9 sm:$0xff] }
 0x13d   : > { %1487 = vst [vmem:[#allocation1] sm:$0xff] %v1422_v57 }
 0x13e   : > { %1488 = vst [vmem:[#allocation1 + $0x9] sm:$0xff] %v1423_v5 }
 0x13f   : > { %1485 = vst.msk [vmem:[#allocation2 + $0x3] ss:$8 sm:$0x3] %vm11461_vm3, %v1482_v24 }
 0x145   : > { %v1490_v25 = vld [vmem:[#allocation1 + $0x4] ss:$9 sm:$0xff] }
 0x146   : > { %1499 = vst [vmem:[#allocation1] sm:$0xff] %v1422_v57  ;;  %1491 = vrot.lane.b32.xlu1 %v1490_v25, %s13184_s10 }
 0x147   : > { %1500 = vst [vmem:[#allocation1 + $0x9] sm:$0xff] %v1423_v5 }
 0x14e   : > { %v1502_v27 = vld [vmem:[#allocation1 + $0x7] ss:$9 sm:$0xff] }
 0x14f   : > { %1507 = vst [vmem:[#allocation1] sm:$0xff] %v1422_v57  ;;  %v7793_v57 = vld [vmem:[%s11155_s25 + $0x30] sm:$0xf] }
 0x150   : > { %1508 = vst [vmem:[#allocation1 + $0x9] sm:$0xff] %v1423_v5  ;;  %v7794_v34 = vor.u32 %v10392_v58, %v7793_v57  ;;  %v7777_v5 = vld [vmem:[%s11155_s25 + $0x10] sm:$0xf]  ;;  %v8073_v57 = vld [vmem:[%s11150_s21 + $0xe0] sm:$0xf] }
 0x151   : > { %1505 = vst.msk [vmem:[#allocation2 + $0x4] ss:$8 sm:$0x3] %vm11461_vm3, %v1502_v27  ;;  %v7778_v8 = vor.u32 %v10388_v6, %v7777_v5  ;;  %v7937_v58 = vld [vmem:[%s11155_s25 + $0x150] sm:$0xf]  ;;  %v8074_v60 = vor.u32 %v10366_v59, %v8073_v57 }
 0x152   : > { %1975 = vmatpush.bf16.msra.mxu3 %v7794_v34  ;;  %v10428_v34 = vld [vmem:[%s11155_s25 + $0x154] sm:$0xf0]  ;;  %v7865_v5 = vld [vmem:[%s11155_s25 + $0xc0] sm:$0xf]  ;;  %v10410_v6 = vld [vmem:[%s11155_s25 + $0xc4] sm:$0xf0] }
 0x153   : > { %v7938_v4 = vor.u32 %v10428_v34, %v7937_v58  ;;  %v7866_v15 = vor.u32 %v10410_v6, %v7865_v5  ;;  %v8041_v57 = vld [vmem:[%s11150_s21 + $0xa0] sm:$0xf]  ;;  %v10358_v58 = vld [vmem:[%s11150_s21 + $0xa4] sm:$0xf0]  ;;  %v7955_v5 = vld [vmem:[%s11155_s25 + $0x178] sm:$0xf0] }
 0x154   : > { %v7833_v34 = vld [vmem:[%s11155_s25 + $0x80] sm:$0xf]  ;;  %v8042_v59 = vor.u32 %v10358_v58, %v8041_v57  ;;  %v8017_v6 = vld [vmem:[%s11150_s21 + $0x70] sm:$0xf]  ;;  %v8131_v57 = vld [vmem:[%s11150_s21 + $0x158] sm:$0xf0] }
 0x155   : > { %1999 = vmatpush.bf16.msra.mxu2 %v7938_v4  ;;  %1987 = vmatpush.bf16.msra.mxu1 %v7866_v15  ;;  %v10429_v15 = vld [vmem:[%s11155_s25 + $0x164] sm:$0xf]  ;;  %v10423_v58 = vld [vmem:[%s11155_s25 + $0x134] sm:$0xf] }
 0x156   : > { %1976 = vmatpush.bf16.msra.mxu3 %v7786_v2  ;;  %v10364_v2 = vld [vmem:[%s11150_s21 + $0xd4] sm:$0xf0] }
 0x157   : > { %v1510_v28 = vld [vmem:[#allocation1 + $0x6] ss:$9 sm:$0xff] }
 0x158   : > { %1521 = vst [vmem:[#allocation1] sm:$0xff] %v11465_v19  ;;  %1511 = vrot.lane.b32.xlu1 %v1510_v28, %s13184_s10 }
 0x159   : > { %1522 = vst [vmem:[#allocation1 + $0x9] sm:$0xff] %v11458_v16 }
 0x15a   : > { %1977 = vmatpush.bf16.msra.mxu3 %v7778_v8  ;;  %v7929_v8 = vld [vmem:[%s11155_s25 + $0x140] sm:$0xf] }
 0x15e   : > { %1978 = vmatpush.bf16.msra.mxu3 %v7770_v14  ;;  %v8057_v14 = vld [vmem:[%s11150_s21 + $0xc0] sm:$0xf] }
 0x160   : > { %v1524_v37 = vld [vmem:[#allocation1 + $0x1] ss:$9 sm:$0xff] }
 0x161   : > { %1539 = vst [vmem:[#allocation1] sm:$0xff] %v11465_v19 }
 0x162   : > { %1540 = vst [vmem:[#allocation1 + $0x9] sm:$0xff] %v11458_v16  ;;  %2023 = vmatpush.bf16.msrb.mxu3 %v7894_v7  ;;  %v10352_v7 = vld [vmem:[%s11150_s21 + $0x74] sm:$0xf0] }
 0x163   : > { %1527 = vst.msk [vmem:[#allocation2 + $0x5] ss:$8 sm:$0x3] %vm11461_vm3, %v1524_v37 }
 0x166   : > { %2024 = vmatpush.bf16.msrb.mxu3 %v7886_v17  ;;  %v7947_v17 = vld [vmem:[%s11155_s25 + $0x168] sm:$0xf0] }
 0x169   : > { %v1542_v50 = vld [vmem:[#allocation1 + $0x3] ss:$9 sm:$0xff] }
 0x16a   : > { %1547 = vst [vmem:[#allocation1] sm:$0xff] %v11465_v19 }
 0x16b   : > { %1548 = vst [vmem:[#allocation1 + $0x9] sm:$0xff] %v11458_v16 }
 0x16c   : > { %1545 = vst.msk [vmem:[#allocation2 + $0x6] ss:$8 sm:$0x3] %vm11461_vm3, %v1542_v50  ;;  %v8081_v50 = vld [vmem:[%s11150_s21 + $0xf0] sm:$0xf] }
 0x16d   : > { %v8082_v53 = vor.u32 %v10368_v51, %v8081_v50  ;;  %v7905_v50 = vld [vmem:[%s11155_s25 + $0x110] sm:$0xf]  ;;  %v10420_v51 = vld [vmem:[%s11155_s25 + $0x114] sm:$0xf0] }
 0x16e   : > { %v7906_v54 = vor.u32 %v10420_v51, %v7905_v50  ;;  %v10346_v50 = vld [vmem:[%s11150_s21 + $0x44] sm:$0xf0] }
 0x16f   : > { %2302 = vmatpush.bf16.msrb.mxu0 %v8082_v53  ;;  %v7867_v53 = vld [vmem:[%s11155_s25 + $0xc8] sm:$0xf0]  ;;  %v7994_v51 = vor.u32 %v10346_v50, %v7993_v49  ;;  %v8105_v49 = vld [vmem:[%s11150_s21 + $0x120] sm:$0xf]  ;;  %v10374_v50 = vld [vmem:[%s11150_s21 + $0x124] sm:$0xf0] }
 0x170   : > { %v7870_v55 = vor.u32 %v10409_v52, %v7867_v53  ;;  %v8145_v52 = vld [vmem:[%s11150_s21 + $0x170] sm:$0xf]  ;;  %v10384_v53 = vld [vmem:[%s11150_s21 + $0x174] sm:$0xf0] }
 0x172   : > { %v1550_v1 = vld [vmem:[#allocation1 + $0x2] ss:$9 sm:$0xff] }
 0x173   : > { %1559 = vst [vmem:[#allocation1] sm:$0xff] %v11465_v19  ;;  %1551 = vrot.lane.b32.xlu2 %v1550_v1, %s13184_s10  ;;  %v8065_v1 = vld [vmem:[%s11150_s21 + $0xd0] sm:$0xf]  ;;  %2303 = vmatpush.bf16.msrb.mxu0 %v8074_v60  ;;  %v10402_v60 = vld [vmem:[%s11155_s25 + $0x84] sm:$0xf0] }
 0x174   : > { %1560 = vst [vmem:[#allocation1 + $0x9] sm:$0xff] %v11458_v16  ;;  %v8066_v12 = vor.u32 %v10364_v2, %v8065_v1  ;;  %v7834_v63 = vor.u32 %v10402_v60, %v7833_v34  ;;  %v10407_v1 = vld [vmem:[%s11155_s25 + $0xb4] sm:$0xf]  ;;  %v7859_v2 = vld [vmem:[%s11155_s25 + $0xb8] sm:$0xf0] }
 0x175   : > { %v7862_v4 = vor.u32 %v10407_v1, %v7859_v2  ;;  %v7923_v34 = vld [vmem:[%s11155_s25 + $0x138] sm:$0xf0]  ;;  %v10382_v1 = vld [vmem:[%s11150_s21 + $0x164] sm:$0xf0]  ;;  %v10377_v2 = vld [vmem:[%s11150_s21 + $0x144] sm:$0xf] }
 0x176   : > { %v7926_v60 = vor.u32 %v10423_v58, %v7923_v34  ;;  %v8089_v58 = vld [vmem:[%s11150_s21 + $0x100] sm:$0xf]  ;;  %v10370_v34 = vld [vmem:[%s11150_s21 + $0x104] sm:$0xf0] }
 0x177   : > { %2304 = vmatpush.bf16.msrb.mxu0 %v8066_v12  ;;  %v10405_v12 = vld [vmem:[%s11155_s25 + $0xa4] sm:$0xf] }
 0x17b   : > { %v1562_v20 = vld [vmem:[#allocation1 + $0x5] ss:$9 sm:$0xff] }
 0x17c   : > { %1567 = vst [vmem:[#allocation1] sm:$0xff] %v11465_v19 }
 0x17d   : > { %1568 = vst [vmem:[#allocation1 + $0x9] sm:$0xff] %v11458_v16 }
 0x17e   : > { %1565 = vst.msk [vmem:[#allocation2 + $0x7] ss:$8 sm:$0x3] %vm11461_vm3, %v1562_v20  ;;  %v10362_v20 = vld [vmem:[%s11150_s21 + $0xc4] sm:$0xf0] }
 0x17f   : > { %v1532_v21 = vpop.permute.xlu2 %1531 }
 0x180   : > { %v1533_v22 = vrot.slane %v1532_v21, 7 }
 0x182   : > { %v1534_v23 = vsel %vm1174_vm1, %v1533_v22, %v1532_v21  ;;  %v7930_v21 = vor.u32 %v10426_v9, %v7929_v8  ;;  %v7857_v22 = vld [vmem:[%s11155_s25 + $0xb0] sm:$0xf]  ;;  %v8018_v9 = vor.u32 %v10352_v7, %v8017_v6  ;;  %v10421_v6 = vld [vmem:[%s11155_s25 + $0x124] sm:$0xf]  ;;  %v7915_v7 = vld [vmem:[%s11155_s25 + $0x128] sm:$0xf0] }
 0x183   : > { %1537 = vst.msk [vmem:[#allocation2 + $0xc] ss:$8 sm:$0x3] %vm11528_vm6, %v1534_v23  ;;  %v10408_v23 = vld [vmem:[%s11155_s25 + $0xb4] sm:$0xf0] }
 0x184   : > { %v1570_v24 = vld [vmem:[#allocation1 + $0x4] ss:$9 sm:$0xff]  ;;  %2000 = vmatpush.bf16.msra.mxu2 %v7930_v21 }
 0x185   : > { %1579 = vst [vmem:[#allocation1] sm:$0xff] %v11465_v19  ;;  %1571 = vrot.lane.b32.xlu0 %v1570_v24, %s13184_s10  ;;  %v11581_v31 = vld [vmem:[#allocation2] sm:$0xff]  ;;  %v7921_v24 = vld [vmem:[%s11155_s25 + $0x130] sm:$0xf]  ;;  %v8009_v21 = vld [vmem:[%s11150_s21 + $0x60] sm:$0xf] }
 0x186   : > { %1580 = vst [vmem:[#allocation1 + $0x9] sm:$0xff] %v11458_v16 }
 0x18d   : > { %v1582_v25 = vld [vmem:[#allocation1 + $0x7] ss:$9 sm:$0xff] }
 0x18e   : > { %1587 = vst [vmem:[#allocation1] sm:$0xff] %v11465_v19 }
 0x18f   : > { %1588 = vst [vmem:[#allocation1 + $0x9] sm:$0xff] %v11458_v16  ;;  %v1452_v27 = vpop.permute.xlu0 %1451 }
 0x190   : > { %v1453_v28 = vrot.slane %v1452_v27, 7  ;;  %1585 = vst.msk [vmem:[#allocation2 + $0x18] ss:$8 sm:$0x3] %vm11461_vm3, %v1582_v25  ;;  %v10424_v25 = vld [vmem:[%s11155_s25 + $0x134] sm:$0xf0] }
 0x192   : > { %v1454_v29 = vsel %vm1174_vm1, %v1453_v28, %v1452_v27  ;;  %v10411_v27 = vld [vmem:[%s11155_s25 + $0xd4] sm:$0xf]  ;;  %v7875_v28 = vld [vmem:[%s11155_s25 + $0xd8] sm:$0xf0] }
 0x193   : > { %1457 = vst.msk [vmem:[#allocation2 + $0x8] ss:$8 sm:$0x3] %vm11528_vm6, %v1454_v29  ;;  %v8058_v29 = vor.u32 %v10362_v20, %v8057_v14  ;;  %v7851_v14 = vld [vmem:[%s11155_s25 + $0xa8] sm:$0xf0] }
 0x194   : > { %v7854_v20 = vor.u32 %v10405_v12, %v7851_v14  ;;  %v7918_v12 = vor.u32 %v10421_v6, %v7915_v7 }
 0x195   : > { %2305 = vmatpush.bf16.msrb.mxu0 %v8058_v29  ;;  %v8147_v29 = vld [vmem:[%s11150_s21 + $0x178] sm:$0xf0] }
 0x196   : > { %v1590_v30 = vld [vmem:[#allocation1 + $0x6] ss:$9 sm:$0xff] }
 0x197   : > { %1591 = vrot.lane.b32.xlu1 %v1590_v30, %s13184_s10  ;;  %v1602_v19 = vld [vmem:[#allocation2 + $0x18] sm:$0x1]  ;;  %v7878_v30 = vor.u32 %v10411_v27, %v7875_v28  ;;  %v10354_v27 = vld [vmem:[%s11150_s21 + $0x84] sm:$0xf0]  ;;  %v10383_v28 = vld [vmem:[%s11150_s21 + $0x174] sm:$0xf] }
 0x198   : > { %v1704_v16 = vpack.c.bf16 %v1602_v19, %v11581_v31  ;;  %v7858_v19 = vor.u32 %v10408_v23, %v7857_v22  ;;  %v10350_v22 = vld [vmem:[%s11150_s21 + $0x64] sm:$0xf0]  ;;  %v8025_v23 = vld [vmem:[%s11150_s21 + $0x80] sm:$0xf] }
 0x199   : > { %2025 = vmatpush.bf16.msrb.mxu3 %v7878_v30  ;;  %2306 = vmatpush.bf16.msrb.mxu0 %v8050_v47  ;;  %v8026_v30 = vor.u32 %v10354_v27, %v8025_v23  ;;  %v7907_v23 = vld [vmem:[%s11155_s25 + $0x118] sm:$0xf0] }
 0x19a   : > { %v1710_v32 = vshll.u32 %v1704_v16, 16  ;;  %v1708_v33 = vshrl.u32 %v1704_v16, 16  ;;  %v7922_v16 = vor.u32 %v10424_v25, %v7921_v24  ;;  %1988 = vmatpush.bf16.msra.mxu1 %v7858_v19  ;;  %v7950_v24 = vor.u32 %v10429_v15, %v7947_v17  ;;  %v10403_v19 = vld [vmem:[%s11155_s25 + $0x94] sm:$0xf]  ;;  %v8115_v17 = vld [vmem:[%s11150_s21 + $0x138] sm:$0xf0] }
 0x19b   : > { %v8010_v25 = vor.u32 %v10350_v22, %v8009_v21  ;;  %v10375_v15 = vld [vmem:[%s11150_s21 + $0x134] sm:$0xf] }
 0x19c   : > { %v1712_v35 = vrot.slane %v1710_v32, 1  ;;  %v7849_v32 = vld [vmem:[%s11155_s25 + $0xa0] sm:$0xf]  ;;  %2001 = vmatpush.bf16.msra.mxu2 %v7922_v16  ;;  %v7843_v16 = vld [vmem:[%s11155_s25 + $0x98] sm:$0xf0]  ;;  %v8118_v21 = vor.u32 %v10375_v15, %v8115_v17 }
 0x19d   : > { %2026 = vmatpush.bf16.msrb.mxu3 %v7870_v55  ;;  %2307 = vmatpush.bf16.msrb.mxu0 %v8042_v59  ;;  %v8146_v55 = vor.u32 %v10384_v53, %v8145_v52  ;;  %v10419_v22 = vld [vmem:[%s11155_s25 + $0x114] sm:$0xf]  ;;  %v8091_v52 = vld [vmem:[%s11150_s21 + $0x108] sm:$0xf0] }
 0x19e   : > { %v1713_v36 = vor.u32 %v1712_v35, %v1708_v33  ;;  %v10406_v33 = vld [vmem:[%s11155_s25 + $0xa4] sm:$0xf0]  ;;  %v7913_v35 = vld [vmem:[%s11155_s25 + $0x120] sm:$0xf]  ;;  %v7910_v27 = vor.u32 %v10419_v22, %v7907_v23  ;;  %v10349_v23 = vld [vmem:[%s11150_s21 + $0x64] sm:$0xf] }
 0x1a0   : > { %1979 = vmatmul.bf16.vlgmr.msra.gmra.mxu3 %v1713_v36  ;;  %2018 = vmatmul.bf16.vlgmr.msra.gmra.mxu0 %v1713_v36  ;;  %v10422_v36 = vld [vmem:[%s11155_s25 + $0x124] sm:$0xf0] }
 0x1a1   : > { %2027 = vmatpush.bf16.msrb.mxu3 %v7862_v4 }
 0x1a5   : > { %2028 = vmatpush.bf16.msrb.mxu3 %v7854_v20 }
 0x1a6   : > { %v1472_v37 = vpop.permute.xlu0 %1471 }
 0x1a7   : > { %v1473_v38 = vrot.slane %v1472_v37, 7 }
 0x1a9   : > { %v1474_v39 = vsel %vm1174_vm1, %v1473_v38, %v1472_v37  ;;  %v7850_v37 = vor.u32 %v10406_v33, %v7849_v32  ;;  %v7914_v38 = vor.u32 %v10422_v36, %v7913_v35  ;;  %v10427_v32 = vld [vmem:[%s11155_s25 + $0x154] sm:$0xf]  ;;  %v8150_v33 = vor.u32 %v10383_v28, %v8147_v29  ;;  %v7939_v35 = vld [vmem:[%s11155_s25 + $0x158] sm:$0xf0]  ;;  %v8001_v36 = vld [vmem:[%s11150_s21 + $0x50] sm:$0xf] }
 0x1aa   : > { %1477 = vst.msk [vmem:[#allocation2 + $0x9] ss:$8 sm:$0x3] %vm11528_vm6, %v1474_v39  ;;  %v10340_v28 = vld [vmem:[%s11150_s21 + $0x14] sm:$0xf0] }
 0x1ab   : > { %1989 = vmatpush.bf16.msra.mxu1 %v7850_v37  ;;  %2002 = vmatpush.bf16.msra.mxu2 %v7914_v38  ;;  %v10348_v37 = vld [vmem:[%s11150_s21 + $0x54] sm:$0xf0]  ;;  %v7846_v38 = vor.u32 %v10403_v19, %v7843_v16  ;;  %v8121_v29 = vld [vmem:[%s11150_s21 + $0x140] sm:$0xf]  ;;  %v10378_v19 = vld [vmem:[%s11150_s21 + $0x144] sm:$0xf0] }
 0x1ad   : > { %2029 = vmatpush.bf16.msrb.mxu3 %v7846_v38  ;;  %v7899_v38 = vld [vmem:[%s11155_s25 + $0x108] sm:$0xf0] }
 0x1af   : > { %1990 = vmatpush.bf16.msra.mxu1 %v7842_v26  ;;  %2003 = vmatpush.bf16.msra.mxu2 %v7906_v54  ;;  %v7934_v26 = vor.u32 %v10425_v46, %v7931_v48  ;;  %v10379_v54 = vld [vmem:[%s11150_s21 + $0x154] sm:$0xf] }
 0x1b0   : > { %v8134_v59 = vor.u32 %v10379_v54, %v8131_v57  ;;  %v10371_v46 = vld [vmem:[%s11150_s21 + $0x114] sm:$0xf]  ;;  %v8097_v54 = vld [vmem:[%s11150_s21 + $0x110] sm:$0xf] }
 0x1b3   : > { %1991 = vmatpush.bf16.msra.mxu1 %v7834_v63  ;;  %v8137_v63 = vld [vmem:[%s11150_s21 + $0x160] sm:$0xf] }
 0x1b4   : > { %v8138_v4 = vor.u32 %v10382_v1, %v8137_v63  ;;  %v1604_v63 = vld [vmem:[#allocation2 + $0x28] sm:$0x1]  ;;  %v1603_v1 = vld [vmem:[#allocation2 + $0x20] sm:$0x1] }
 0x1b8   : > { %v1492_v62 = vpop.permute.xlu1 %1491 }
 0x1b9   : > { %v1493_v3 = vrot.slane %v1492_v62, 7 }
 0x1bb   : > { %v1494_v11 = vsel %vm1174_vm1, %v1493_v3, %v1492_v62  ;;  %v10418_v62 = vld [vmem:[%s11155_s25 + $0x104] sm:$0xf0]  ;;  %v10431_v3 = vld [vmem:[%s11155_s25 + $0x174] sm:$0xf] }
 0x1bc   : > { %1497 = vst.msk [vmem:[#allocation2 + $0xa] ss:$8 sm:$0x3] %vm11528_vm6, %v1494_v11  ;;  %v7898_v0 = vor.u32 %v10418_v62, %v7897_v61  ;;  %v7958_v8 = vor.u32 %v10431_v3, %v7955_v5  ;;  %v10356_v11 = vld [vmem:[%s11150_s21 + $0x94] sm:$0xf0] }
 0x1bd   : > { %v8034_v13 = vor.u32 %v10356_v11, %v8033_v10  ;;  %v7985_v61 = vld [vmem:[%s11150_s21 + $0x30] sm:$0xf]  ;;  %v10344_v62 = vld [vmem:[%s11150_s21 + $0x34] sm:$0xf0]  ;;  %v8123_v3 = vld [vmem:[%s11150_s21 + $0x148] sm:$0xf0] }
 0x1be   : > { %2004 = vmatpush.bf16.msra.mxu2 %v7898_v0  ;;  %2036 = vmatpush.bf16.msrb.mxu1 %v7958_v8  ;;  %v7986_v0 = vor.u32 %v10344_v62, %v7985_v61  ;;  %v8126_v5 = vor.u32 %v10377_v2, %v8123_v3  ;;  %v7977_v8 = vld [vmem:[%s11150_s21 + $0x20] sm:$0xf]  ;;  %v8129_v10 = vld [vmem:[%s11150_s21 + $0x150] sm:$0xf]  ;;  %v10380_v11 = vld [vmem:[%s11150_s21 + $0x154] sm:$0xf0] }
 0x1bf   : > { %2308 = vmatpush.bf16.msrb.mxu0 %v8034_v13  ;;  %v8130_v14 = vor.u32 %v10380_v11, %v8129_v10  ;;  %v10367_v10 = vld [vmem:[%s11150_s21 + $0xf4] sm:$0xf]  ;;  %v8083_v11 = vld [vmem:[%s11150_s21 + $0xf8] sm:$0xf0] }
 0x1c0   : > { %v8086_v22 = vor.u32 %v10367_v10, %v8083_v11 }
 0x1c2   : > { %2289 = vmatpush.bf16.msrb.mxu2 %v8018_v9  ;;  %2037 = vmatpush.bf16.msrb.mxu1 %v7950_v24  ;;  %v10342_v9 = vld [vmem:[%s11150_s21 + $0x24] sm:$0xf0]  ;;  %v7969_v24 = vld [vmem:[%s11150_s21 + $0x10] sm:$0xf] }
 0x1c3   : > { %2309 = vmatpush.bf16.msrb.mxu0 %v8026_v30  ;;  %v7978_v13 = vor.u32 %v10342_v9, %v7977_v8  ;;  %v7970_v30 = vor.u32 %v10340_v28, %v7969_v24  ;;  %v10351_v8 = vld [vmem:[%s11150_s21 + $0x74] sm:$0xf]  ;;  %v8019_v9 = vld [vmem:[%s11150_s21 + $0x78] sm:$0xf0]  ;;  %v8011_v24 = vld [vmem:[%s11150_s21 + $0x68] sm:$0xf0] }
 0x1c4   : > { %v8022_v17 = vor.u32 %v10351_v8, %v8019_v9 }
 0x1c6   : > { %2290 = vmatpush.bf16.msrb.mxu2 %v8010_v25 }
 0x1c7   : > { %2354 = vmatpush.bf16.msra.mxu0 %v8150_v33  ;;  %v10373_v33 = vld [vmem:[%s11150_s21 + $0x124] sm:$0xf] }
 0x1ca   : > { %v1512_v39 = vpop.permute.xlu1 %1511 }
 0x1cb   : > { %v1513_v40 = vrot.slane %v1512_v39, 7 }
 0x1cd   : > { %v1514_v41 = vsel %vm1174_vm1, %v1513_v40, %v1512_v39  ;;  %v1552_v42 = vpop.permute.xlu2 %1551  ;;  %v7942_v39 = vor.u32 %v10427_v32, %v7939_v35  ;;  %v8002_v40 = vor.u32 %v10348_v37, %v8001_v36  ;;  %v8122_v32 = vor.u32 %v10378_v19, %v8121_v29  ;;  %v8107_v35 = vld [vmem:[%s11150_s21 + $0x128] sm:$0xf0]  ;;  %v10417_v37 = vld [vmem:[%s11155_s25 + $0x104] sm:$0xf]  ;;  %v10347_v19 = vld [vmem:[%s11150_s21 + $0x54] sm:$0xf] }
 0x1ce   : > { %1517 = vst.msk [vmem:[#allocation2 + $0xb] ss:$8 sm:$0x3] %vm11528_vm6, %v1514_v41  ;;  %v1553_v43 = vrot.slane %v1552_v42, 7  ;;  %v10381_v41 = vld [vmem:[%s11150_s21 + $0x164] sm:$0xf]  ;;  %v8110_v36 = vor.u32 %v10373_v33, %v8107_v35  ;;  %v8014_v29 = vor.u32 %v10349_v23, %v8011_v24 }
 0x1cf   : > { %2038 = vmatpush.bf16.msrb.mxu1 %v7942_v39  ;;  %2291 = vmatpush.bf16.msrb.mxu2 %v8002_v40  ;;  %v7961_v39 = vld [vmem:[%s11150_s21] sm:$0xf]  ;;  %v10338_v40 = vld [vmem:[%s11150_s21 + $0x4] sm:$0xf0]  ;;  %v8067_v33 = vld [vmem:[%s11150_s21 + $0xd8] sm:$0xf0] }
 0x1d0   : > { %v1554_v44 = vsel %vm1174_vm1, %v1553_v43, %v1552_v42  ;;  %v8139_v42 = vld [vmem:[%s11150_s21 + $0x168] sm:$0xf0]  ;;  %v2367_v24 = vld [vmem:[%s11160_s29] sm:$0x3] }
 0x1d1   : > { %1557 = vst.msk [vmem:[#allocation2 + $0xd] ss:$8 sm:$0x3] %vm11528_vm6, %v1554_v44  ;;  %v8142_v43 = vor.u32 %v10381_v41, %v8139_v42  ;;  %v10401_v44 = vld [vmem:[%s11155_s25 + $0x84] sm:$0xf]  ;;  %v7902_v41 = vor.u32 %v10417_v37, %v7899_v38  ;;  %v7962_v42 = vor.u32 %v10338_v40, %v7961_v39 }
 0x1d2   : > { %v7838_v47 = vor.u32 %v10401_v44, %v7835_v45  ;;  %v10376_v44 = vld [vmem:[%s11150_s21 + $0x134] sm:$0xf0]  ;;  %v10345_v38 = vld [vmem:[%s11150_s21 + $0x44] sm:$0xf]  ;;  %v7995_v39 = vld [vmem:[%s11150_s21 + $0x48] sm:$0xf0] }
 0x1d3   : > { %2355 = vmatpush.bf16.msra.mxu0 %v8142_v43  ;;  %2039 = vmatpush.bf16.msrb.mxu1 %v7934_v26  ;;  %v8113_v43 = vld [vmem:[%s11150_s21 + $0x130] sm:$0xf]  ;;  %v8106_v26 = vor.u32 %v10374_v50, %v8105_v49  ;;  %v10361_v40 = vld [vmem:[%s11150_s21 + $0xc4] sm:$0xf]  ;;  %v8051_v49 = vld [vmem:[%s11150_s21 + $0xb8] sm:$0xf0] }
 0x1d4   : > { %2030 = vmatpush.bf16.msrb.mxu3 %v7838_v47  ;;  %2292 = vmatpush.bf16.msrb.mxu2 %v7994_v51  ;;  %v8114_v45 = vor.u32 %v10376_v44, %v8113_v43  ;;  %v8099_v47 = vld [vmem:[%s11150_s21 + $0x118] sm:$0xf0]  ;;  %v10369_v51 = vld [vmem:[%s11150_s21 + $0x104] sm:$0xf]  ;;  %v7998_v44 = vor.u32 %v10345_v38, %v7995_v39 }
 0x1d5   : > { %v8102_v48 = vor.u32 %v10371_v46, %v8099_v47  ;;  %v8094_v53 = vor.u32 %v10369_v51, %v8091_v52  ;;  %v10343_v46 = vld [vmem:[%s11150_s21 + $0x34] sm:$0xf]  ;;  %v7987_v47 = vld [vmem:[%s11150_s21 + $0x38] sm:$0xf0]  ;;  %v1653_v51 = vpack.c.bf16 %v11581_v31, %v11581_v31 }
 0x1d6   : > { %v7990_v50 = vor.u32 %v10343_v46, %v7987_v47  ;;  %v10355_v31 = vld [vmem:[%s11150_s21 + $0x94] sm:$0xf] }
 0x1d7   : > { %2356 = vmatpush.bf16.msra.mxu0 %v8134_v59  ;;  %2040 = vmatpush.bf16.msrb.mxu1 %v7926_v60  ;;  %v8090_v60 = vor.u32 %v10370_v34, %v8089_v58 }
 0x1d8   : > { %2315 = vmatpush.bf16.msra.mxu3 %v8146_v55  ;;  %2293 = vmatpush.bf16.msrb.mxu2 %v7986_v0  ;;  %v10372_v55 = vld [vmem:[%s11150_s21 + $0x114] sm:$0xf0] }
 0x1d9   : > { %v8098_v57 = vor.u32 %v10372_v55, %v8097_v54  ;;  %v7979_v54 = vld [vmem:[%s11150_s21 + $0x28] sm:$0xf0]  ;;  %v10357_v55 = vld [vmem:[%s11150_s21 + $0xa4] sm:$0xf] }
 0x1db   : > { %2357 = vmatpush.bf16.msra.mxu0 %v8126_v5  ;;  %2041 = vmatpush.bf16.msrb.mxu1 %v7918_v12 }
 0x1dc   : > { %2316 = vmatpush.bf16.msra.mxu3 %v8138_v4  ;;  %2294 = vmatpush.bf16.msrb.mxu2 %v7978_v13 }
 0x1df   : > { %2358 = vmatpush.bf16.msra.mxu0 %v8118_v21  ;;  %2042 = vmatpush.bf16.msrb.mxu1 %v7910_v27  ;;  %v8075_v27 = vld [vmem:[%s11150_s21 + $0xe8] sm:$0xf0] }
 0x1e0   : > { %2317 = vmatpush.bf16.msra.mxu3 %v8130_v14  ;;  %2295 = vmatpush.bf16.msrb.mxu2 %v7970_v30 }
 0x1e3   : > { %2359 = vmatpush.bf16.msra.mxu0 %v8110_v36  ;;  %2043 = vmatpush.bf16.msrb.mxu1 %v7902_v41  ;;  %v8059_v41 = vld [vmem:[%s11150_s21 + $0xc8] sm:$0xf0] }
 0x1e4   : > { %2318 = vmatpush.bf16.msra.mxu3 %v8122_v32  ;;  %2296 = vmatpush.bf16.msrb.mxu2 %v7962_v42  ;;  %v10363_v32 = vld [vmem:[%s11150_s21 + $0xd4] sm:$0xf] }
 0x1e5   : > { %v8070_v37 = vor.u32 %v10363_v32, %v8067_v33 }
 0x1e7   : > { %2360 = vmatpush.bf16.msra.mxu0 %v8102_v48  ;;  %v10359_v48 = vld [vmem:[%s11150_s21 + $0xb4] sm:$0xf] }
 0x1e8   : > { %2319 = vmatpush.bf16.msra.mxu3 %v8114_v45  ;;  %v8062_v45 = vor.u32 %v10361_v40, %v8059_v41  ;;  %v8054_v52 = vor.u32 %v10359_v48, %v8051_v49  ;;  %v8209_v49 = vld [vmem:[%s13225_s8 + $0x70] sm:$0xf] }
 0x1eb   : > { %2361 = vmatpush.bf16.msra.mxu0 %v8094_v53  ;;  %v10341_v53 = vld [vmem:[%s11150_s21 + $0x24] sm:$0xf] }
 0x1ec   : > { %2320 = vmatpush.bf16.msra.mxu3 %v8106_v26  ;;  %v7982_v58 = vor.u32 %v10341_v53, %v7979_v54 }
 0x1f0   : > { %2321 = vmatpush.bf16.msra.mxu3 %v8098_v57  ;;  %v8043_v57 = vld [vmem:[%s11150_s21 + $0xa8] sm:$0xf0] }
 0x1f1   : > { %v8046_v34 = vor.u32 %v10357_v55, %v8043_v57  ;;  %v8201_v55 = vld [vmem:[%s13225_s8 + $0x60] sm:$0xf]  ;;  %v10494_v57 = vld [vmem:[%s13225_s8 + $0x64] sm:$0xf0] }
 0x1f4   : > { %2322 = vmatpush.bf16.msra.mxu3 %v8090_v60  ;;  %v7971_v60 = vld [vmem:[%s11150_s21 + $0x18] sm:$0xf0] }
 0x1f7   : > { %v1572_v20 = vpop.permute.xlu0 %1571 }
 0x1f8   : > { %v1573_v25 = vrot.slane %v1572_v20, 7 }
 0x1fa   : > { %v1574_v16 = vsel %vm1174_vm1, %v1573_v25, %v1572_v20  ;;  %v10365_v25 = vld [vmem:[%s11150_s21 + $0xe4] sm:$0xf] }
 0x1fb   : > { %1577 = vst.msk [vmem:[#allocation2 + $0xe] ss:$8 sm:$0x3] %vm11528_vm6, %v1574_v16  ;;  %v8078_v30 = vor.u32 %v10365_v25, %v8075_v27  ;;  %v8003_v16 = vld [vmem:[%s11150_s21 + $0x58] sm:$0xf0] }
 0x1fc   : > { %v8006_v35 = vor.u32 %v10347_v19, %v8003_v16 }
 0x209   : > { %v1592_v59 = vpop.permute.xlu1 %1591 }
 0x20a   : > { %v1593_v61 = vrot.slane %v1592_v59, 7 }
 0x20c   : > { %v1594_v62 = vsel %vm1174_vm1, %v1593_v61, %v1592_v59  ;;  %v10339_v59 = vld [vmem:[%s11150_s21 + $0x14] sm:$0xf]  ;;  %v8035_v61 = vld [vmem:[%s11150_s21 + $0x98] sm:$0xf0] }
 0x20d   : > { %1597 = vst.msk [vmem:[#allocation2 + $0xf] ss:$8 sm:$0x3] %vm11528_vm6, %v1594_v62  ;;  %v7974_v62 = vor.u32 %v10339_v59, %v7971_v60  ;;  %v8203_v59 = vld [vmem:[%s13225_s8 + $0x68] sm:$0xf0] }
 0x214   : > { %v1600_v0 = vld [vmem:[#allocation2 + $0x8] sm:$0xff]  ;;  %v1601_v2 = vld [vmem:[#allocation2 + $0x10] sm:$0xff] }
 0x215   : > { %v11730_v3 = vpack.c.bf16 %v1600_v0, %v1600_v0  ;;  %v1705_v4 = vpack.c.bf16 %v1603_v1, %v1600_v0  ;;  %v1706_v5 = vpack.c.bf16 %v1604_v63, %v1601_v2  ;;  %v1655_v43 = vpack.c.bf16 %v1601_v2, %v1601_v2  ;;  %v10337_v0 = vld [vmem:[%s11150_s21 + $0x4] sm:$0xf]  ;;  %v7963_v1 = vld [vmem:[%s11150_s21 + $0x8] sm:$0xf0] }
 0x216   : > { %v8038_v63 = vor.u32 %v10355_v31, %v8035_v61  ;;  %v10353_v2 = vld [vmem:[%s11150_s21 + $0x84] sm:$0xf]  ;;  %v8193_v31 = vld [vmem:[%s13225_s8 + $0x50] sm:$0xf]  ;;  %v10492_v61 = vld [vmem:[%s13225_s8 + $0x54] sm:$0xf0] }
 0x217   : > { %2310 = vmatmul.bf16.vlgmr.msrb.gmra.mxu0 %v11730_v3  ;;  %v1717_v6 = vshll.u32 %v1705_v4, 16  ;;  %v1724_v7 = vshll.u32 %v1706_v5, 16  ;;  %v1715_v12 = vshrl.u32 %v1705_v4, 16  ;;  %v1722_v14 = vshrl.u32 %v1706_v5, 16  ;;  %v8027_v4 = vld [vmem:[%s11150_s21 + $0x88] sm:$0xf0] }
 0x218   : > { %v7966_v5 = vor.u32 %v10337_v0, %v7963_v1  ;;  %v8195_v0 = vld [vmem:[%s13225_s8 + $0x58] sm:$0xf0] }
 0x219   : > { %v1719_v13 = vrot.slane %v1717_v6, 1  ;;  %v1726_v15 = vrot.slane %v1724_v7, 1  ;;  %v8030_v6 = vor.u32 %v10353_v2, %v8027_v4  ;;  %v8185_v4 = vld [vmem:[%s13225_s8 + $0x40] sm:$0xf] }
 0x21b   : > { %v1720_v20 = vor.u32 %v1719_v13, %v1715_v12  ;;  %v1727_v21 = vor.u32 %v1726_v15, %v1722_v14 }
 0x21d   : > { %v11741_v28 = vpop.f32.mrf.mxu0  ;;  %1992 = vmatmul.bf16.vlgmr.msra.gmra.mxu1 %v1720_v20  ;;  %2005 = vmatmul.bf16.vlgmr.msra.gmra.mxu2 %v1727_v21 }
 0x21e   : > { %2031 = vmatmul.bf16.vlgmr.msrb.gmra.mxu3 %v1720_v20  ;;  %2328 = vmatpush.bf16.msra.mxu1 %v8022_v17 }
 0x21f   : > { %2341 = vmatpush.bf16.msra.mxu2 %v8086_v22 }
 0x222   : > { %2329 = vmatpush.bf16.msra.mxu1 %v8014_v29 }
 0x223   : > { %v11747_v36 = vpop.f32.mrf.mxu3  ;;  %2342 = vmatpush.bf16.msra.mxu2 %v8078_v30  ;;  %v2369_v30 = vperm.slane %v2367_v24, 0 }
 0x225   : > { %v2021_v42 = vpop.f32.mrf.mxu0 }
 0x226   : > { %2330 = vmatpush.bf16.msra.mxu1 %v8006_v35  ;;  %v2370_v42 = vperm.slane %v2367_v24, 1  ;;  %v8171_v24 = vld [vmem:[%s13225_s8 + $0x28] sm:$0xf0] }
 0x227   : > { %2343 = vmatpush.bf16.msra.mxu2 %v8070_v37  ;;  %2362 = vmatmul.bf16.vlgmr.msra.gmra.mxu0 %v1655_v43 }
 0x22a   : > { %2331 = vmatpush.bf16.msra.mxu1 %v7998_v44 }
 0x22b   : > { %v1982_v26 = vpop.f32.mrf.mxu3  ;;  %2344 = vmatpush.bf16.msra.mxu2 %v8062_v45 }
 0x22c   : > { %v10495_v26 = vld [vmem:[%s13225_s8 + $0x74] sm:$0xf] }
 0x22d   : > { %2044 = vmatmul.bf16.vlgmr.msrb.gmra.mxu1 %v1727_v21  ;;  %2297 = vmatmul.bf16.vlgmr.msrb.gmra.mxu2 %v1653_v51 }
 0x22e   : > { %2323 = vmatmul.bf16.vlgmr.msra.gmra.mxu3 %v1655_v43  ;;  %2332 = vmatpush.bf16.msra.mxu1 %v7990_v50  ;;  %v10496_v50 = vld [vmem:[%s13225_s8 + $0x74] sm:$0xf0] }
 0x22f   : > { %2345 = vmatpush.bf16.msra.mxu2 %v8054_v52  ;;  %v8211_v52 = vld [vmem:[%s13225_s8 + $0x78] sm:$0xf0] }
 0x230   : > { %v8214_v54 = vor.u32 %v10495_v26, %v8211_v52 }
 0x232   : > { %2333 = vmatpush.bf16.msra.mxu1 %v7982_v58  ;;  %2867 = vmatpush.bf16.msrb.mxu0 %v8214_v54  ;;  %v8202_v58 = vor.u32 %v10494_v57, %v8201_v55  ;;  %v8329_v54 = vld [vmem:[%s13225_s8 + $0x160] sm:$0xf]  ;;  %v10526_v57 = vld [vmem:[%s13225_s8 + $0x164] sm:$0xf0] }
 0x233   : > { %2346 = vmatpush.bf16.msra.mxu2 %v8046_v34  ;;  %v10493_v34 = vld [vmem:[%s13225_s8 + $0x64] sm:$0xf] }
 0x234   : > { %v8206_v60 = vor.u32 %v10493_v34, %v8203_v59  ;;  %v10464_v34 = vld [vmem:[%s13226_s3 + $0xf4] sm:$0xf0] }
 0x236   : > { %2334 = vmatpush.bf16.msra.mxu1 %v7974_v62  ;;  %v10491_v62 = vld [vmem:[%s13225_s8 + $0x54] sm:$0xf]  ;;  %2868 = vmatpush.bf16.msrb.mxu0 %v8206_v60  ;;  %v8330_v60 = vor.u32 %v10526_v57, %v8329_v54  ;;  %v8251_v57 = vld [vmem:[%s13225_s8 + $0xc8] sm:$0xf0] }
 0x237   : > { %2347 = vmatpush.bf16.msra.mxu2 %v8038_v63  ;;  %v8194_v63 = vor.u32 %v10492_v61, %v8193_v31  ;;  %v8198_v1 = vor.u32 %v10491_v62, %v8195_v0  ;;  %v8257_v61 = vld [vmem:[%s13225_s8 + $0xd0] sm:$0xf]  ;;  %v10508_v62 = vld [vmem:[%s13225_s8 + $0xd4] sm:$0xf0] }
 0x238   : > { %v10524_v0 = vld [vmem:[%s13225_s8 + $0x154] sm:$0xf0] }
 0x23a   : > { %2335 = vmatpush.bf16.msra.mxu1 %v7966_v5  ;;  %v10490_v5 = vld [vmem:[%s13225_s8 + $0x44] sm:$0xf0]  ;;  %2869 = vmatpush.bf16.msrb.mxu0 %v8198_v1  ;;  %v8457_v1 = vld [vmem:[%s13226_s3 + $0xe0] sm:$0xf] }
 0x23b   : > { %2348 = vmatpush.bf16.msra.mxu2 %v8030_v6  ;;  %v8186_v6 = vor.u32 %v10490_v5, %v8185_v4  ;;  %v8258_v4 = vor.u32 %v10508_v62, %v8257_v61 }
 0x23d   : > { %2336 = vmatmul.bf16.vlgmr.msra.gmra.mxu1 %v1653_v51  ;;  %v8210_v51 = vor.u32 %v10496_v50, %v8209_v49  ;;  %v10528_v49 = vld [vmem:[%s13225_s8 + $0x174] sm:$0xf0]  ;;  %v8265_v50 = vld [vmem:[%s13225_s8 + $0xe0] sm:$0xf] }
 0x23e   : > { %2349 = vmatmul.bf16.vlgmr.msra.gmra.mxu2 %v11730_v3 }
 0x23f   : > { %2828 = vmatpush.bf16.msrb.mxu3 %v8210_v51 }
 0x243   : > { %2829 = vmatpush.bf16.msrb.mxu3 %v8202_v58  ;;  %v8465_v58 = vld [vmem:[%s13226_s3 + $0xf0] sm:$0xf] }
 0x244   : > { %v8466_v31 = vor.u32 %v10464_v34, %v8465_v58  ;;  %v8425_v58 = vld [vmem:[%s13226_s3 + $0xa0] sm:$0xf] }
 0x247   : > { %2830 = vmatpush.bf16.msrb.mxu3 %v8194_v63  ;;  %v8321_v63 = vld [vmem:[%s13225_s8 + $0x150] sm:$0xf] }
 0x24b   : > { %2831 = vmatpush.bf16.msrb.mxu3 %v8186_v6  ;;  %v8249_v6 = vld [vmem:[%s13225_s8 + $0xc0] sm:$0xf] }
 0x294   : > { %v2311_v7 = vpop.f32.mrf.mxu0 }
 0x29a   : > { %v1993_v8 = vpop.f32.mrf.mxu1 }
 0x29b   : > { %v1994_v21 = vadd.f32 %v1993_v8, %v11747_v36  ;;  %v8187_v8 = vld [vmem:[%s13225_s8 + $0x48] sm:$0xf0] }
 0x29c   : > { %v2313_v9 = vpop.f32.mrf.mxu0 }
 0x2a0   : > { %v2006_v10 = vpop.f32.mrf.mxu2 }
 0x2a1   : > { %v2032_v11 = vpop.f32.mrf.mxu3  ;;  %v2007_v22 = vadd.f32 %v2006_v10, %v1994_v21  ;;  %v8177_v10 = vld [vmem:[%s13225_s8 + $0x30] sm:$0xf]  ;;  %v10486_v21 = vld [vmem:[%s13225_s8 + $0x24] sm:$0xf0] }
 0x2a2   : > { %v1995_v12 = vpop.f32.mrf.mxu1  ;;  %v2033_v36 = vadd.f32 %v2032_v11, %v11741_v28  ;;  %v10488_v11 = vld [vmem:[%s13225_s8 + $0x34] sm:$0xf0] }
 0x2a3   : > { %v10487_v12 = vld [vmem:[%s13225_s8 + $0x34] sm:$0xf] }
 0x2a4   : > { %v2363_v13 = vpop.f32.mrf.mxu0 }
 0x2a8   : > { %v2008_v14 = vpop.f32.mrf.mxu2 }
 0x2a9   : > { %v2034_v15 = vpop.f32.mrf.mxu3  ;;  %v8179_v14 = vld [vmem:[%s13225_s8 + $0x38] sm:$0xf0] }
 0x2aa   : > { %v2045_v17 = vpop.f32.mrf.mxu1  ;;  %v8182_v15 = vor.u32 %v10487_v12, %v8179_v14  ;;  %v8449_v12 = vld [vmem:[%s13226_s3 + $0xd0] sm:$0xf]  ;;  %v8313_v14 = vld [vmem:[%s13225_s8 + $0x140] sm:$0xf] }
 0x2ab   : > { %v2046_v38 = vadd.f32 %v2045_v17, %v2033_v36  ;;  %v8155_v36 = vld [vmem:[%s13225_s8 + $0x8] sm:$0xf0] }
 0x2ac   : > { %v2365_v20 = vpop.f32.mrf.mxu0 }
 0x2ad   : > { %v8169_v20 = vld [vmem:[%s13225_s8 + $0x20] sm:$0xf] }
 0x2b0   : > { %v2298_v23 = vpop.f32.mrf.mxu2 }
 0x2b1   : > { %v2299_v25 = vadd.f32 %v2298_v23, %v2007_v22  ;;  %v2324_v27 = vpop.f32.mrf.mxu3  ;;  %v8170_v22 = vor.u32 %v10486_v21, %v8169_v20  ;;  %v10485_v23 = vld [vmem:[%s13225_s8 + $0x24] sm:$0xf]  ;;  %v8267_v20 = vld [vmem:[%s13225_s8 + $0xe8] sm:$0xf0] }
 0x2b2   : > { %v2047_v29 = vpop.f32.mrf.mxu1 }
 0x2b3   : > { %v2312_v3 = vadd.f32 %v2311_v7, %v2299_v25  ;;  %v10489_v7 = vld [vmem:[%s13225_s8 + $0x44] sm:$0xf]  ;;  %v8174_v25 = vor.u32 %v10485_v23, %v8171_v24  ;;  %v10484_v29 = vld [vmem:[%s13225_s8 + $0x14] sm:$0xf0]  ;;  %v8241_v23 = vld [vmem:[%s13225_s8 + $0xb0] sm:$0xf] }
 0x2b4   : > { %v8190_v9 = vor.u32 %v10489_v7, %v8187_v8  ;;  %v10511_v7 = vld [vmem:[%s13225_s8 + $0xf4] sm:$0xf]  ;;  %v8275_v8 = vld [vmem:[%s13225_s8 + $0xf8] sm:$0xf0]  ;;  %v10504_v24 = vld [vmem:[%s13225_s8 + $0xb4] sm:$0xf0] }
 0x2b5   : > { %v2325_v19 = vadd.f32 %v2324_v27, %v2312_v3  ;;  %v8161_v27 = vld [vmem:[%s13225_s8 + $0x10] sm:$0xf]  ;;  %v10483_v3 = vld [vmem:[%s13225_s8 + $0x14] sm:$0xf] }
 0x2b6   : > { %2870 = vmatpush.bf16.msrb.mxu0 %v8190_v9  ;;  %v8322_v9 = vor.u32 %v10524_v0, %v8321_v63  ;;  %v8281_v63 = vld [vmem:[%s13225_s8 + $0x100] sm:$0xf]  ;;  %v10514_v0 = vld [vmem:[%s13225_s8 + $0x104] sm:$0xf0] }
 0x2b7   : > { %v2373_v16 = vadd.f32 %v2369_v30, %v2325_v19  ;;  %v8162_v30 = vor.u32 %v10484_v29, %v8161_v27  ;;  %v8163_v19 = vld [vmem:[%s13225_s8 + $0x18] sm:$0xf0]  ;;  %v8441_v29 = vld [vmem:[%s13226_s3 + $0xc0] sm:$0xf] }
 0x2b8   : > { %v2300_v32 = vpop.f32.mrf.mxu2 }
 0x2b9   : > { %v11774_v33 = vmax.f32 %v2373_v16, 0.0  ;;  %v2326_v35 = vpop.f32.mrf.mxu3  ;;  %v8153_v16 = vld [vmem:[%s13225_s8] sm:$0xf]  ;;  %v10482_v32 = vld [vmem:[%s13225_s8 + $0x4] sm:$0xf0] }
 0x2ba   : > { %v2337_v37 = vpop.f32.mrf.mxu1  ;;  %2871 = vmatpush.bf16.msrb.mxu0 %v8182_v15  ;;  %v8166_v35 = vor.u32 %v10483_v3, %v8163_v19  ;;  %v10522_v15 = vld [vmem:[%s13225_s8 + $0x144] sm:$0xf0]  ;;  %v8305_v19 = vld [vmem:[%s13225_s8 + $0x130] sm:$0xf] }
 0x2bb   : > { %2384 = vst [vmem:[#allocation1] sm:$0xff] %v11774_v33  ;;  %v2338_v39 = vadd.f32 %v2337_v37, %v2046_v38  ;;  %v10481_v37 = vld [vmem:[%s13225_s8 + $0x4] sm:$0xf]  ;;  %v8154_v38 = vor.u32 %v10482_v32, %v8153_v16  ;;  %v8314_v27 = vor.u32 %v10522_v15, %v8313_v14  ;;  %v10458_v3 = vld [vmem:[%s13226_s3 + $0xc4] sm:$0xf0] }
 0x2bc   : > { %v10520_v16 = vld [vmem:[%s13225_s8 + $0x134] sm:$0xf0]  ;;  %v8259_v32 = vld [vmem:[%s13225_s8 + $0xd8] sm:$0xf0]  ;;  %v10501_v15 = vld [vmem:[%s13225_s8 + $0xa4] sm:$0xf] }
 0x2be   : > { %2872 = vmatpush.bf16.msrb.mxu0 %v8174_v25 }
 0x2c1   : > { %v2350_v40 = vpop.f32.mrf.mxu2 }
 0x2c2   : > { %v2351_v41 = vadd.f32 %v2350_v40, %v2338_v39  ;;  %v2339_v43 = vpop.f32.mrf.mxu1  ;;  %2873 = vmatpush.bf16.msrb.mxu0 %v8166_v35  ;;  %v8158_v40 = vor.u32 %v10481_v37, %v8155_v36  ;;  %v8242_v37 = vor.u32 %v10504_v24, %v8241_v23  ;;  %v8442_v36 = vor.u32 %v10458_v3, %v8441_v29  ;;  %v8393_v23 = vld [vmem:[%s13226_s3 + $0x60] sm:$0xf]  ;;  %v10446_v24 = vld [vmem:[%s13226_s3 + $0x64] sm:$0xf0] }
 0x2c3   : > { %v8409_v29 = vld [vmem:[%s13226_s3 + $0x80] sm:$0xf]  ;;  %v10450_v3 = vld [vmem:[%s13226_s3 + $0x84] sm:$0xf0] }
 0x2c4   : > { %v2364_v44 = vadd.f32 %v2363_v13, %v2351_v41  ;;  %v8178_v13 = vor.u32 %v10488_v11, %v8177_v10  ;;  %v10506_v10 = vld [vmem:[%s13225_s8 + $0xc4] sm:$0xf0]  ;;  %v8278_v11 = vor.u32 %v10511_v7, %v8275_v8 }
 0x2c5   : > { %v8250_v21 = vor.u32 %v10506_v10, %v8249_v6  ;;  %v8339_v6 = vld [vmem:[%s13225_s8 + $0x178] sm:$0xf0]  ;;  %v10448_v10 = vld [vmem:[%s13226_s3 + $0x74] sm:$0xf0] }
 0x2c6   : > { %v2374_v45 = vadd.f32 %v2370_v42, %v2364_v44  ;;  %2832 = vmatpush.bf16.msrb.mxu3 %v8178_v13  ;;  %2874 = vmatpush.bf16.msrb.mxu0 %v8158_v40  ;;  %v10460_v13 = vld [vmem:[%s13226_s3 + $0xd4] sm:$0xf0]  ;;  %v10502_v40 = vld [vmem:[%s13225_s8 + $0xa4] sm:$0xf0] }
 0x2c8   : > { %v11778_v46 = vmax.f32 %v2374_v45, 0.0 }
 0x2c9   : > { %v2352_v47 = vpop.f32.mrf.mxu2 }
 0x2ca   : > { %2385 = vst [vmem:[#allocation1 + $0x9] sm:$0xff] %v11778_v46  ;;  %v2392_v28 = vrot.slane %v11778_v46, 7  ;;  %2833 = vmatpush.bf16.msrb.mxu3 %v8170_v22  ;;  %3159 = vmatpush.bf16.msra.mxu0 %v8466_v31  ;;  %v8450_v22 = vor.u32 %v10460_v13, %v8449_v12  ;;  %v10498_v31 = vld [vmem:[%s13225_s8 + $0x84] sm:$0xf0]  ;;  %v8417_v12 = vld [vmem:[%s13226_s3 + $0x90] sm:$0xf] }
 0x2cb   : > { %v10452_v13 = vld [vmem:[%s13226_s3 + $0x94] sm:$0xf0] }
 0x2cc   : > { %v2393_v48 = vsel %vm1449_vm2, %v11774_v33, %v2392_v28  ;;  %v8273_v28 = vld [vmem:[%s13225_s8 + $0xf0] sm:$0xf]  ;;  %v8418_v14 = vor.u32 %v10452_v13, %v8417_v12  ;;  %v10476_v13 = vld [vmem:[%s13226_s3 + $0x154] sm:$0xf0] }
 0x2cd   : > { %2394 = vrot.lane.b32.xlu2 %v2393_v48, %s13184_s10  ;;  %v8513_v12 = vld [vmem:[%s13226_s3 + $0x150] sm:$0xf] }
 0x2ce   : > { %2834 = vmatpush.bf16.msrb.mxu3 %v8162_v30  ;;  %v10507_v30 = vld [vmem:[%s13225_s8 + $0xd4] sm:$0xf] }
 0x2cf   : > { %v8262_v35 = vor.u32 %v10507_v30, %v8259_v32  ;;  %v10479_v30 = vld [vmem:[%s13226_s3 + $0x174] sm:$0xf] }
 0x2d0   : > { %v10499_v32 = vld [vmem:[%s13225_s8 + $0x94] sm:$0xf] }
 0x2d1   : > { %v2387_v53 = vld [vmem:[#allocation1 + $0x1] ss:$9 sm:$0xff] }
 0x2d2   : > { %2402 = vst [vmem:[#allocation1] sm:$0xff] %v11774_v33  ;;  %2835 = vmatpush.bf16.msrb.mxu3 %v8154_v38  ;;  %v8306_v38 = vor.u32 %v10520_v16, %v8305_v19  ;;  %v8410_v19 = vor.u32 %v10450_v3, %v8409_v29  ;;  %v8531_v16 = vld [vmem:[%s13226_s3 + $0x178] sm:$0xf0]  ;;  %v8353_v29 = vld [vmem:[%s13226_s3 + $0x10] sm:$0xf] }
 0x2d3   : > { %2403 = vst [vmem:[#allocation1 + $0x9] sm:$0xff] %v11778_v46 }
 0x2d4   : > { %2390 = vst.msk [vmem:[#allocation3 + $0x1] ss:$8 sm:$0x3] %vm11461_vm3, %v2387_v53  ;;  %v10510_v53 = vld [vmem:[%s13225_s8 + $0xe4] sm:$0xf0] }
 0x2d5   : > { %v8266_v55 = vor.u32 %v10510_v53, %v8265_v50 }
 0x2d6   : > { %2880 = vmatpush.bf16.msra.mxu3 %v8278_v11 }
 0x2da   : > { %v2405_v2 = vld [vmem:[#allocation1 + $0x3] ss:$9 sm:$0xff] }
 0x2db   : > { %2410 = vst [vmem:[#allocation1] sm:$0xff] %v11774_v33 }
 0x2dc   : > { %2411 = vst [vmem:[#allocation1 + $0x9] sm:$0xff] %v11778_v46 }
 0x2dd   : > { %2408 = vst.msk [vmem:[#allocation3 + $0x2] ss:$8 sm:$0x3] %vm11461_vm3, %v2405_v2  ;;  %v10462_v2 = vld [vmem:[%s13226_s3 + $0xe4] sm:$0xf0] }
 0x2de   : > { %v8458_v5 = vor.u32 %v10462_v2, %v8457_v1  ;;  %v10503_v1 = vld [vmem:[%s13225_s8 + $0xb4] sm:$0xf]  ;;  %v8282_v2 = vor.u32 %v10514_v0, %v8281_v63  ;;  %v10440_v63 = vld [vmem:[%s13226_s3 + $0x34] sm:$0xf0]  ;;  %v8521_v0 = vld [vmem:[%s13226_s3 + $0x160] sm:$0xf] }
 0x2e0   : > { %3160 = vmatpush.bf16.msra.mxu0 %v8458_v5  ;;  %v10527_v5 = vld [vmem:[%s13225_s8 + $0x174] sm:$0xf] }
 0x2e1   : > { %v8342_v8 = vor.u32 %v10527_v5, %v8339_v6  ;;  %v8507_v5 = vld [vmem:[%s13226_s3 + $0x148] sm:$0xf0] }
 0x2e3   : > { %v2413_v17 = vld [vmem:[#allocation1 + $0x2] ss:$9 sm:$0xff] }
 0x2e4   : > { %2422 = vst [vmem:[#allocation1] sm:$0xff] %v11774_v33  ;;  %2414 = vrot.lane.b32.xlu0 %v2413_v17, %s13184_s10  ;;  %v10509_v17 = vld [vmem:[%s13225_s8 + $0xe4] sm:$0xf]  ;;  %3161 = vmatpush.bf16.msra.mxu0 %v8450_v22  ;;  %v8331_v22 = vld [vmem:[%s13225_s8 + $0x168] sm:$0xf0] }
 0x2e5   : > { %2423 = vst [vmem:[#allocation1 + $0x9] sm:$0xff] %v11778_v46  ;;  %v8270_v25 = vor.u32 %v10509_v17, %v8267_v20  ;;  %v8235_v17 = vld [vmem:[%s13225_s8 + $0xa8] sm:$0xf0]  ;;  %v10525_v20 = vld [vmem:[%s13225_s8 + $0x164] sm:$0xf] }
 0x2e7   : > { %2881 = vmatpush.bf16.msra.mxu3 %v8270_v25  ;;  %v8334_v25 = vor.u32 %v10525_v20, %v8331_v22  ;;  %v8499_v22 = vld [vmem:[%s13226_s3 + $0x138] sm:$0xf0] }
 0x2e8   : > { %3162 = vmatpush.bf16.msra.mxu0 %v8442_v36 }
 0x2eb   : > { %2882 = vmatpush.bf16.msra.mxu3 %v8262_v35  ;;  %v8227_v35 = vld [vmem:[%s13225_s8 + $0x98] sm:$0xf0] }
 0x2ec   : > { %v2425_v39 = vld [vmem:[#allocation1 + $0x5] ss:$9 sm:$0xff]  ;;  %v8230_v36 = vor.u32 %v10499_v32, %v8227_v35 }
 0x2ed   : > { %2430 = vst [vmem:[#allocation1] sm:$0xff] %v11774_v33 }
 0x2ee   : > { %2431 = vst [vmem:[#allocation1 + $0x9] sm:$0xff] %v11778_v46 }
 0x2ef   : > { %2428 = vst.msk [vmem:[#allocation3 + $0x3] ss:$8 sm:$0x3] %vm11461_vm3, %v2425_v39  ;;  %v8233_v39 = vld [vmem:[%s13225_s8 + $0xa0] sm:$0xf] }
 0x2f5   : > { %v2433_v41 = vld [vmem:[#allocation1 + $0x4] ss:$9 sm:$0xff] }
 0x2f6   : > { %2442 = vst [vmem:[#allocation1] sm:$0xff] %v11774_v33  ;;  %2434 = vrot.lane.b32.xlu1 %v2433_v41, %s13184_s10  ;;  %v8297_v41 = vld [vmem:[%s13225_s8 + $0x120] sm:$0xf] }
 0x2f7   : > { %2443 = vst [vmem:[#allocation1 + $0x9] sm:$0xff] %v11778_v46 }
 0x2fe   : > { %v2445_v42 = vld [vmem:[#allocation1 + $0x7] ss:$9 sm:$0xff] }
 0x2ff   : > { %2450 = vst [vmem:[#allocation1] sm:$0xff] %v11774_v33  ;;  %v10512_v33 = vld [vmem:[%s13225_s8 + $0xf4] sm:$0xf0] }
 0x300   : > { %2451 = vst [vmem:[#allocation1 + $0x9] sm:$0xff] %v11778_v46  ;;  %v8274_v48 = vor.u32 %v10512_v33, %v8273_v28  ;;  %v8337_v46 = vld [vmem:[%s13225_s8 + $0x170] sm:$0xf] }
 0x301   : > { %2448 = vst.msk [vmem:[#allocation3 + $0x4] ss:$8 sm:$0x3] %vm11461_vm3, %v2445_v42  ;;  %v8338_v52 = vor.u32 %v10528_v49, %v8337_v46  ;;  %v10518_v42 = vld [vmem:[%s13225_s8 + $0x124] sm:$0xf0] }
 0x302   : > { %2841 = vmatpush.bf16.msrb.mxu1 %v8274_v48  ;;  %v8433_v48 = vld [vmem:[%s13226_s3 + $0xb0] sm:$0xf]  ;;  %v10456_v46 = vld [vmem:[%s13226_s3 + $0xb4] sm:$0xf0] }
 0x303   : > { %2854 = vmatpush.bf16.msrb.mxu2 %v8338_v52  ;;  %v8225_v49 = vld [vmem:[%s13225_s8 + $0x90] sm:$0xf]  ;;  %v8434_v50 = vor.u32 %v10456_v46, %v8433_v48  ;;  %v10516_v52 = vld [vmem:[%s13225_s8 + $0x114] sm:$0xf0]  ;;  %v8219_v48 = vld [vmem:[%s13225_s8 + $0x88] sm:$0xf0] }
 0x304   : > { %v10521_v46 = vld [vmem:[%s13225_s8 + $0x144] sm:$0xf] }
 0x305   : > { %3163 = vmatpush.bf16.msra.mxu0 %v8434_v50  ;;  %v8315_v50 = vld [vmem:[%s13225_s8 + $0x148] sm:$0xf0] }
 0x306   : > { %2842 = vmatpush.bf16.msrb.mxu1 %v8266_v55  ;;  %v10505_v55 = vld [vmem:[%s13225_s8 + $0xc4] sm:$0xf] }
 0x307   : > { %v2453_v43 = vld [vmem:[#allocation1 + $0x6] ss:$9 sm:$0xff]  ;;  %2855 = vmatpush.bf16.msrb.mxu2 %v8330_v60  ;;  %v8254_v34 = vor.u32 %v10505_v55, %v8251_v57  ;;  %v10475_v57 = vld [vmem:[%s13226_s3 + $0x154] sm:$0xf] }
 0x308   : > { %2454 = vrot.lane.b32.xlu2 %v2453_v43, %s13184_s10  ;;  %v2462_v44 = vld [vmem:[#allocation3] sm:$0x1f]  ;;  %v8234_v43 = vor.u32 %v10502_v40, %v8233_v39  ;;  %v8217_v60 = vld [vmem:[%s13225_s8 + $0x80] sm:$0xf]  ;;  %v8385_v40 = vld [vmem:[%s13226_s3 + $0x50] sm:$0xf] }
 0x309   : > { %v11840_v45 = vpack.c.bf16 %v2462_v44, %v2462_v44  ;;  %v8298_v44 = vor.u32 %v10518_v42, %v8297_v41  ;;  %v8218_v62 = vor.u32 %v10498_v31, %v8217_v60  ;;  %2883 = vmatpush.bf16.msra.mxu3 %v8254_v34  ;;  %v8323_v39 = vld [vmem:[%s13225_s8 + $0x158] sm:$0xf0]  ;;  %v10444_v42 = vld [vmem:[%s13226_s3 + $0x54] sm:$0xf0]  ;;  %s13237_s10 = sld [smem:[#allocation21_spill]] }
 0x30a   : > { %2843 = vmatpush.bf16.msrb.mxu1 %v8258_v4  ;;  %v8243_v4 = vld [vmem:[%s13225_s8 + $0xb8] sm:$0xf0]  ;;  %v10480_v55 = vld [vmem:[%s13226_s3 + $0x174] sm:$0xf0] }
 0x30b   : > { %v2567_v47 = vshll.u32 %v11840_v45, 16  ;;  %v2565_v26 = vshrl.u32 %v11840_v45, 16  ;;  %2856 = vmatpush.bf16.msrb.mxu2 %v8322_v9  ;;  %v8246_v7 = vor.u32 %v10503_v1, %v8243_v4  ;;  %v8401_v9 = vld [vmem:[%s13226_s3 + $0x70] sm:$0xf]  ;;  %v8515_v34 = vld [vmem:[%s13226_s3 + $0x158] sm:$0xf0] }
 0x30c   : > { %v8402_v11 = vor.u32 %v10448_v10, %v8401_v9  ;;  %v8307_v60 = vld [vmem:[%s13225_s8 + $0x138] sm:$0xf0]  ;;  %v8518_v31 = vor.u32 %v10475_v57, %v8515_v34  ;;  %v10473_v4 = vld [vmem:[%s13226_s3 + $0x144] sm:$0xf]  ;;  %v8299_v9 = vld [vmem:[%s13225_s8 + $0x128] sm:$0xf0] }
 0x30d   : > { %v2569_v51 = vrot.slane %v2567_v47, 1  ;;  %2884 = vmatpush.bf16.msra.mxu3 %v8246_v7  ;;  %v8510_v7 = vor.u32 %v10473_v4, %v8507_v5  ;;  %v8361_v10 = vld [vmem:[%s13226_s3 + $0x20] sm:$0xf]  ;;  %v8481_v57 = vld [vmem:[%s13226_s3 + $0x110] sm:$0xf] }
 0x30e   : > { %2844 = vmatpush.bf16.msrb.mxu1 %v8250_v21  ;;  %v8238_v21 = vor.u32 %v10501_v15, %v8235_v17  ;;  %v8514_v17 = vor.u32 %v10476_v13, %v8513_v12  ;;  %v10463_v12 = vld [vmem:[%s13226_s3 + $0xf4] sm:$0xf] }
 0x30f   : > { %v2570_v59 = vor.u32 %v2569_v51, %v2565_v26  ;;  %2857 = vmatpush.bf16.msrb.mxu2 %v8314_v27  ;;  %v10500_v26 = vld [vmem:[%s13225_s8 + $0x94] sm:$0xf0]  ;;  %v8289_v51 = vld [vmem:[%s13225_s8 + $0x110] sm:$0xf]  ;;  %v8394_v27 = vor.u32 %v10446_v24, %v8393_v23  ;;  %v10515_v23 = vld [vmem:[%s13225_s8 + $0x114] sm:$0xf] }
 0x310   : > { %v8226_v53 = vor.u32 %v10500_v26, %v8225_v49  ;;  %v8290_v54 = vor.u32 %v10516_v52, %v8289_v51  ;;  %v8377_v26 = vld [vmem:[%s13226_s3 + $0x40] sm:$0xf]  ;;  %v10442_v51 = vld [vmem:[%s13226_s3 + $0x44] sm:$0xf0]  ;;  %v8318_v52 = vor.u32 %v10521_v46, %v8315_v50  ;;  %v10467_v46 = vld [vmem:[%s13226_s3 + $0x114] sm:$0xf] }
 0x311   : > { %2836 = vmatmul.bf16.vlgmr.msrb.gmra.mxu3 %v2570_v59  ;;  %2875 = vmatmul.bf16.vlgmr.msrb.gmra.mxu0 %v2570_v59  ;;  %v10454_v59 = vld [vmem:[%s13226_s3 + $0xa4] sm:$0xf0] }
 0x312   : > { %2845 = vmatpush.bf16.msrb.mxu1 %v8242_v37  ;;  %v8426_v61 = vor.u32 %v10454_v59, %v8425_v58  ;;  %2885 = vmatpush.bf16.msra.mxu3 %v8238_v21  ;;  %v8534_v37 = vor.u32 %v10479_v30, %v8531_v16  ;;  %v10519_v59 = vld [vmem:[%s13225_s8 + $0x134] sm:$0xf]  ;;  %v10436_v30 = vld [vmem:[%s13226_s3 + $0x14] sm:$0xf0]  ;;  %v10474_v16 = vld [vmem:[%s13226_s3 + $0x144] sm:$0xf0] }
 0x313   : > { %2858 = vmatpush.bf16.msrb.mxu2 %v8306_v38  ;;  %v10523_v38 = vld [vmem:[%s13225_s8 + $0x154] sm:$0xf]  ;;  %v8354_v35 = vor.u32 %v10436_v30, %v8353_v29  ;;  %v8459_v29 = vld [vmem:[%s13226_s3 + $0xe8] sm:$0xf0] }
 0x314   : > { %3164 = vmatpush.bf16.msra.mxu0 %v8426_v61  ;;  %v8326_v41 = vor.u32 %v10523_v38, %v8323_v39  ;;  %v8310_v61 = vor.u32 %v10519_v59, %v8307_v60  ;;  %v10471_v21 = vld [vmem:[%s13226_s3 + $0x134] sm:$0xf]  ;;  %v8491_v38 = vld [vmem:[%s13226_s3 + $0x128] sm:$0xf0]  ;;  %v10468_v59 = vld [vmem:[%s13226_s3 + $0x114] sm:$0xf0] }
 0x316   : > { %2846 = vmatpush.bf16.msrb.mxu1 %v8234_v43  ;;  %v8386_v43 = vor.u32 %v10444_v42, %v8385_v40  ;;  %2886 = vmatpush.bf16.msra.mxu3 %v8230_v36  ;;  %v10469_v36 = vld [vmem:[%s13226_s3 + $0x124] sm:$0xf]  ;;  %v8345_v42 = vld [vmem:[%s13226_s3] sm:$0xf] }
 0x317   : > { %2859 = vmatpush.bf16.msrb.mxu2 %v8298_v44  ;;  %v10477_v44 = vld [vmem:[%s13226_s3 + $0x164] sm:$0xf]  ;;  %v8494_v39 = vor.u32 %v10469_v36, %v8491_v38 }
 0x318   : > { %3165 = vmatpush.bf16.msra.mxu0 %v8418_v14  ;;  %v10513_v40 = vld [vmem:[%s13225_s8 + $0x104] sm:$0xf] }
 0x319   : > { %v10441_v38 = vld [vmem:[%s13226_s3 + $0x44] sm:$0xf] }
 0x31a   : > { %2847 = vmatpush.bf16.msrb.mxu1 %v8226_v53  ;;  %v8378_v53 = vor.u32 %v10442_v51, %v8377_v26  ;;  %v8489_v26 = vld [vmem:[%s13226_s3 + $0x120] sm:$0xf]  ;;  %v10470_v51 = vld [vmem:[%s13226_s3 + $0x124] sm:$0xf0] }
 0x31b   : > { %2860 = vmatpush.bf16.msrb.mxu2 %v8290_v54  ;;  %v8529_v54 = vld [vmem:[%s13226_s3 + $0x170] sm:$0xf] }
 0x31c   : > { %3166 = vmatpush.bf16.msra.mxu0 %v8410_v19  ;;  %v8530_v58 = vor.u32 %v10480_v55, %v8529_v54  ;;  %v8505_v19 = vld [vmem:[%s13226_s3 + $0x140] sm:$0xf]  ;;  %v10465_v54 = vld [vmem:[%s13226_s3 + $0x104] sm:$0xf]  ;;  %v8475_v55 = vld [vmem:[%s13226_s3 + $0x108] sm:$0xf0] }
 0x31d   : > { %v8478_v34 = vor.u32 %v10465_v54, %v8475_v55  ;;  %v10435_v55 = vld [vmem:[%s13226_s3 + $0x14] sm:$0xf] }
 0x31e   : > { %2848 = vmatpush.bf16.msrb.mxu1 %v8218_v62  ;;  %v8369_v62 = vld [vmem:[%s13226_s3 + $0x30] sm:$0xf] }
 0x31f   : > { %2861 = vmatpush.bf16.msrb.mxu2 %v8282_v2  ;;  %v8370_v1 = vor.u32 %v10440_v63, %v8369_v62  ;;  %v10478_v2 = vld [vmem:[%s13226_s3 + $0x164] sm:$0xf0] }
 0x320   : > { %3211 = vmatpush.bf16.msrb.mxu0 %v8534_v37  ;;  %v8522_v6 = vor.u32 %v10478_v2, %v8521_v0  ;;  %v8506_v37 = vor.u32 %v10474_v16, %v8505_v19  ;;  %v10466_v62 = vld [vmem:[%s13226_s3 + $0x104] sm:$0xf0]  ;;  %v10443_v19 = vld [vmem:[%s13226_s3 + $0x54] sm:$0xf]  ;;  %v8387_v16 = vld [vmem:[%s13226_s3 + $0x58] sm:$0xf0] }
 0x322   : > { %2893 = vmatpush.bf16.msra.mxu1 %v8342_v8  ;;  %v10517_v8 = vld [vmem:[%s13225_s8 + $0x124] sm:$0xf] }
 0x323   : > { %3146 = vmatpush.bf16.msra.mxu2 %v8402_v11  ;;  %v10438_v11 = vld [vmem:[%s13226_s3 + $0x24] sm:$0xf0]  ;;  %v8302_v14 = vor.u32 %v10517_v8, %v8299_v9 }
 0x324   : > { %v8362_v15 = vor.u32 %v10438_v11, %v8361_v10  ;;  %v10447_v10 = vld [vmem:[%s13226_s3 + $0x74] sm:$0xf]  ;;  %v8403_v11 = vld [vmem:[%s13226_s3 + $0x78] sm:$0xf0] }
 0x326   : > { %2894 = vmatpush.bf16.msra.mxu1 %v8334_v25  ;;  %v8502_v25 = vor.u32 %v10471_v21, %v8499_v22 }
 0x327   : > { %v2395_v47 = vpop.permute.xlu2 %2394  ;;  %3147 = vmatpush.bf16.msra.mxu2 %v8394_v27  ;;  %v8291_v27 = vld [vmem:[%s13225_s8 + $0x118] sm:$0xf0] }
 0x328   : > { %v2396_v28 = vrot.slane %v2395_v47, 7  ;;  %v8294_v3 = vor.u32 %v10515_v23, %v8291_v27  ;;  %v8470_v23 = vor.u32 %v10463_v12, %v8467_v56  ;;  %v10461_v27 = vld [vmem:[%s13226_s3 + $0xe4] sm:$0xf]  ;;  %v8593_v12 = vld [vmem:[%s11180_s19 + $0x70] sm:$0xf] }
 0x329   : > { %v8462_v30 = vor.u32 %v10461_v27, %v8459_v29  ;;  %v10544_v56 = vld [vmem:[%s11180_s19 + $0x74] sm:$0xf0]  ;;  %v8579_v27 = vld [vmem:[%s11180_s19 + $0x58] sm:$0xf0]  ;;  %v10563_v29 = vld [vmem:[%s11180_s19 + $0x114] sm:$0xf] }
 0x32a   : > { %v2397_v33 = vsel %vm1174_vm1, %v2396_v28, %v2395_v47  ;;  %v8523_v47 = vld [vmem:[%s13226_s3 + $0x168] sm:$0xf0]  ;;  %2895 = vmatpush.bf16.msra.mxu1 %v8326_v41 }
 0x32b   : > { %2400 = vst.msk [vmem:[#allocation3 + $0x8] ss:$8 sm:$0x3] %vm11528_vm6, %v2397_v33  ;;  %3148 = vmatpush.bf16.msra.mxu2 %v8386_v43  ;;  %v8526_v28 = vor.u32 %v10477_v44, %v8523_v47  ;;  %v10497_v33 = vld [vmem:[%s13225_s8 + $0x84] sm:$0xf] }
 0x32c   : > { %v8222_v49 = vor.u32 %v10497_v33, %v8219_v48  ;;  %v8283_v41 = vld [vmem:[%s13225_s8 + $0x108] sm:$0xf0]  ;;  %v10434_v44 = vld [vmem:[%s13226_s3 + $0x4] sm:$0xf0]  ;;  %v8497_v47 = vld [vmem:[%s13226_s3 + $0x130] sm:$0xf] }
 0x32d   : > { %3212 = vmatpush.bf16.msrb.mxu0 %v8526_v28  ;;  %v8286_v43 = vor.u32 %v10513_v40, %v8283_v41  ;;  %v10472_v28 = vld [vmem:[%s13226_s3 + $0x134] sm:$0xf0]  ;;  %v8346_v33 = vor.u32 %v10434_v44, %v8345_v42  ;;  %v10457_v40 = vld [vmem:[%s13226_s3 + $0xc4] sm:$0xf]  ;;  %v8443_v41 = vld [vmem:[%s13226_s3 + $0xc8] sm:$0xf0] }
 0x32e   : > { %2887 = vmatpush.bf16.msra.mxu3 %v8222_v49  ;;  %2896 = vmatpush.bf16.msra.mxu1 %v8318_v52  ;;  %v8498_v48 = vor.u32 %v10472_v28, %v8497_v47  ;;  %v8483_v49 = vld [vmem:[%s13226_s3 + $0x118] sm:$0xf0]  ;;  %v8490_v52 = vor.u32 %v10470_v51, %v8489_v26  ;;  %v10439_v44 = vld [vmem:[%s13226_s3 + $0x34] sm:$0xf]  ;;  %v10453_v26 = vld [vmem:[%s13226_s3 + $0xa4] sm:$0xf] }
 0x32f   : > { %3149 = vmatpush.bf16.msra.mxu2 %v8378_v53  ;;  %v8486_v50 = vor.u32 %v10467_v46, %v8483_v49  ;;  %v8371_v47 = vld [vmem:[%s13226_s3 + $0x38] sm:$0xf0]  ;;  %v10455_v28 = vld [vmem:[%s13226_s3 + $0xb4] sm:$0xf]  ;;  %v10437_v49 = vld [vmem:[%s13226_s3 + $0x24] sm:$0xf] }
 0x330   : > { %v8427_v51 = vld [vmem:[%s13226_s3 + $0xa8] sm:$0xf0]  ;;  %s13249_s8 = sand.u32 1, %s11079_s23  }
 0x331   : > { %3213 = vmatpush.bf16.msrb.mxu0 %v8518_v31  ;;  %v8482_v31 = vor.u32 %v10468_v59, %v8481_v57  ;;  %v8430_v54 = vor.u32 %v10453_v26, %v8427_v51  ;;  %v8355_v57 = vld [vmem:[%s13226_s3 + $0x18] sm:$0xf0]  ;;  %s7433_s9 = scalar_lea.sflag [#allocation8], %s13249_s8 }
 0x332   : > { %3172 = vmatpush.bf16.msrb.mxu3 %v8530_v58  ;;  %2897 = vmatpush.bf16.msra.mxu1 %v8310_v61  ;;  %v8473_v61 = vld [vmem:[%s13226_s3 + $0x100] sm:$0xf]  ;;  %v8358_v59 = vor.u32 %v10435_v55, %v8355_v57  ;;  %v10533_v57 = vld [vmem:[%s11180_s19 + $0x24] sm:$0xf] }
 0x333   : > { %3150 = vmatpush.bf16.msra.mxu2 %v8370_v1  ;;  %v8474_v1 = vor.u32 %v10466_v62, %v8473_v61  ;;  %v8347_v61 = vld [vmem:[%s13226_s3 + $0x8] sm:$0xf0]  ;;  %v10449_v62 = vld [vmem:[%s13226_s3 + $0x84] sm:$0xf] }
 0x335   : > { %3214 = vmatpush.bf16.msrb.mxu0 %v8510_v7 }
 0x336   : > { %3173 = vmatpush.bf16.msrb.mxu3 %v8522_v6  ;;  %2898 = vmatpush.bf16.msra.mxu1 %v8302_v14 }
 0x337   : > { %3151 = vmatpush.bf16.msra.mxu2 %v8362_v15 }
 0x339   : > { %3215 = vmatpush.bf16.msrb.mxu0 %v8502_v25  ;;  %v8395_v25 = vld [vmem:[%s13226_s3 + $0x68] sm:$0xf0] }
 0x33a   : > { %3174 = vmatpush.bf16.msrb.mxu3 %v8514_v17  ;;  %2899 = vmatpush.bf16.msra.mxu1 %v8294_v3 }
 0x33b   : > { %3152 = vmatpush.bf16.msra.mxu2 %v8354_v35  ;;  %v8451_v35 = vld [vmem:[%s13226_s3 + $0xd8] sm:$0xf0] }
 0x33d   : > { %3216 = vmatpush.bf16.msrb.mxu0 %v8494_v39  ;;  %v8379_v39 = vld [vmem:[%s13226_s3 + $0x48] sm:$0xf0] }
 0x33e   : > { %3175 = vmatpush.bf16.msrb.mxu3 %v8506_v37  ;;  %2900 = vmatpush.bf16.msra.mxu1 %v8286_v43  ;;  %v8390_v37 = vor.u32 %v10443_v19, %v8387_v16  ;;  %v8382_v42 = vor.u32 %v10441_v38, %v8379_v39  ;;  %v8446_v43 = vor.u32 %v10457_v40, %v8443_v41  ;;  %v8577_v19 = vld [vmem:[%s11180_s19 + $0x50] sm:$0xf]  ;;  %v10540_v16 = vld [vmem:[%s11180_s19 + $0x54] sm:$0xf0]  ;;  %v10561_v39 = vld [vmem:[%s11180_s19 + $0x104] sm:$0xf] }
 0x33f   : > { %3153 = vmatpush.bf16.msra.mxu2 %v8346_v33  ;;  %v8435_v33 = vld [vmem:[%s13226_s3 + $0xb8] sm:$0xf0]  ;;  %v8693_v40 = vld [vmem:[%s11180_s19 + $0x108] sm:$0xf0]  ;;  %v8569_v41 = vld [vmem:[%s11180_s19 + $0x40] sm:$0xf] }
 0x340   : > { %v8438_v46 = vor.u32 %v10455_v28, %v8435_v33  ;;  %v8563_v28 = vld [vmem:[%s11180_s19 + $0x38] sm:$0xf0]  ;;  %v8625_v33 = vld [vmem:[%s11180_s19 + $0xb0] sm:$0xf] }
 0x341   : > { %3217 = vmatpush.bf16.msrb.mxu0 %v8486_v50  ;;  %v8363_v50 = vld [vmem:[%s13226_s3 + $0x28] sm:$0xf0] }
 0x342   : > { %3176 = vmatpush.bf16.msrb.mxu3 %v8498_v48  ;;  %v8374_v48 = vor.u32 %v10439_v44, %v8371_v47  ;;  %v10535_v47 = vld [vmem:[%s11180_s19 + $0x34] sm:$0xf] }
 0x345   : > { %3218 = vmatpush.bf16.msrb.mxu0 %v8478_v34  ;;  %v8419_v34 = vld [vmem:[%s13226_s3 + $0x98] sm:$0xf0] }
 0x346   : > { %3177 = vmatpush.bf16.msrb.mxu3 %v8490_v52  ;;  %v8366_v52 = vor.u32 %v10437_v49, %v8363_v50  ;;  %v10559_v49 = vld [vmem:[%s11180_s19 + $0xf4] sm:$0xf]  ;;  %v8685_v50 = vld [vmem:[%s11180_s19 + $0xf8] sm:$0xf0] }
 0x347   : > { %v8688_v51 = vor.u32 %v10559_v49, %v8685_v50  ;;  %v10597_v49 = vld [vmem:[%s11180_s19 + $0x224] sm:$0xf] }
 0x34a   : > { %3178 = vmatpush.bf16.msrb.mxu3 %v8482_v31  ;;  %v10433_v31 = vld [vmem:[%s13226_s3 + $0x4] sm:$0xf] }
 0x34e   : > { %3179 = vmatpush.bf16.msrb.mxu3 %v8474_v1  ;;  %v8350_v1 = vor.u32 %v10433_v31, %v8347_v61  ;;  %v10557_v61 = vld [vmem:[%s11180_s19 + $0xe4] sm:$0xf] }
 0x356   : > { %v2415_v20 = vpop.permute.xlu0 %2414 }
 0x357   : > { %v2416_v24 = vrot.slane %v2415_v20, 7 }
 0x359   : > { %v2417_v32 = vsel %vm1174_vm1, %v2416_v24, %v2415_v20  ;;  %v8406_v20 = vor.u32 %v10447_v10, %v8403_v11  ;;  %v10445_v24 = vld [vmem:[%s13226_s3 + $0x64] sm:$0xf]  ;;  %v8717_v11 = vld [vmem:[%s11180_s19 + $0x138] sm:$0xf0] }
 0x35a   : > { %2420 = vst.msk [vmem:[#allocation3 + $0x9] ss:$8 sm:$0x3] %vm11528_vm6, %v2417_v32  ;;  %v8398_v3 = vor.u32 %v10445_v24, %v8395_v25  ;;  %v10459_v32 = vld [vmem:[%s13226_s3 + $0xd4] sm:$0xf] }
 0x35b   : > { %v8454_v36 = vor.u32 %v10459_v32, %v8451_v35  ;;  %v10539_v25 = vld [vmem:[%s11180_s19 + $0x54] sm:$0xf]  ;;  %v8578_v35 = vor.u32 %v10540_v16, %v8577_v19  ;;  %v10553_v19 = vld [vmem:[%s11180_s19 + $0xc4] sm:$0xf]  ;;  %v8661_v16 = vld [vmem:[%s11180_s19 + $0xc8] sm:$0xf0] }
 0x362   : > { %v2455_v53 = vpop.permute.xlu2 %2454 }
 0x363   : > { %v2456_v58 = vrot.slane %v2455_v53, 7 }
 0x365   : > { %v2457_v60 = vsel %vm1174_vm1, %v2456_v58, %v2455_v53  ;;  %v10451_v58 = vld [vmem:[%s13226_s3 + $0x94] sm:$0xf] }
 0x366   : > { %2460 = vst.msk [vmem:[#allocation3 + $0xb] ss:$8 sm:$0x3] %vm11528_vm6, %v2457_v60  ;;  %v8422_v60 = vor.u32 %v10451_v58, %v8419_v34  ;;  %v8555_v58 = vld [vmem:[%s11180_s19 + $0x28] sm:$0xf0] }
 0x367   : > { %v8558_v34 = vor.u32 %v10533_v57, %v8555_v58  ;;  %v10571_v57 = vld [vmem:[%s11180_s19 + $0x154] sm:$0xf]  ;;  %v8733_v58 = vld [vmem:[%s11180_s19 + $0x158] sm:$0xf0] }
 0x368   : > { %v2435_v63 = vpop.permute.xlu1 %2434 }
 0x369   : > { %v2436_v0 = vrot.slane %v2435_v63, 7 }
 0x36b   : > { %v2437_v2 = vsel %vm1174_vm1, %v2436_v0, %v2435_v63  ;;  %v8411_v63 = vld [vmem:[%s13226_s3 + $0x88] sm:$0xf0]  ;;  %s13187_s3 = sand.u32 1, %s11079_s23  }
 0x36c   : > { %2440 = vst.msk [vmem:[#allocation3 + $0xa] ss:$8 sm:$0x3] %vm11528_vm6, %v2437_v2 }
 0x373   : > { %v2463_v4 = vld [vmem:[#allocation3 + $0x8] sm:$0x1f]  ;;  %v2464_v5 = vld [vmem:[#allocation3 + $0x10] sm:$0x1f] }
 0x374   : > { %v11984_v6 = vpack.c.bf16 %v2463_v4, %v2463_v4  ;;  %v2515_v7 = vpack.c.bf16 %v2464_v5, %v2464_v5  ;;  %v8414_v4 = vor.u32 %v10449_v62, %v8411_v63  ;;  %v8677_v62 = vld [vmem:[%s11180_s19 + $0xe8] sm:$0xf0] }
 0x375   : > { %v8680_v63 = vor.u32 %v10557_v61, %v8677_v62  ;;  %v10595_v62 = vld [vmem:[%s11180_s19 + $0x214] sm:$0xf] }
 0x376   : > { %3167 = vmatmul.bf16.vlgmr.msra.gmra.mxu0 %v11984_v6  ;;  %v2574_v8 = vshll.u32 %v11984_v6, 16  ;;  %v2581_v9 = vshll.u32 %v2515_v7, 16  ;;  %v2572_v13 = vshrl.u32 %v11984_v6, 16  ;;  %v2579_v15 = vshrl.u32 %v2515_v7, 16 }
 0x378   : > { %v2576_v14 = vrot.slane %v2574_v8, 1  ;;  %v2583_v17 = vrot.slane %v2581_v9, 1  ;;  %v8595_v8 = vld [vmem:[%s11180_s19 + $0x78] sm:$0xf0]  ;;  %v10567_v9 = vld [vmem:[%s11180_s19 + $0x134] sm:$0xf] }
 0x37a   : > { %v2577_v21 = vor.u32 %v2576_v14, %v2572_v13  ;;  %v2584_v22 = vor.u32 %v2583_v17, %v2579_v15  ;;  %v8720_v13 = vor.u32 %v10567_v9, %v8717_v11  ;;  %v8594_v14 = vor.u32 %v10544_v56, %v8593_v12  ;;  %v10541_v15 = vld [vmem:[%s11180_s19 + $0x64] sm:$0xf]  ;;  %v10555_v11 = vld [vmem:[%s11180_s19 + $0xd4] sm:$0xf]  ;;  %v8669_v12 = vld [vmem:[%s11180_s19 + $0xd8] sm:$0xf0] }
 0x37b   : > { %v10565_v17 = vld [vmem:[%s11180_s19 + $0x124] sm:$0xf] }
 0x37c   : > { %2849 = vmatmul.bf16.vlgmr.msrb.gmra.mxu1 %v2577_v21  ;;  %2862 = vmatmul.bf16.vlgmr.msrb.gmra.mxu2 %v2584_v22 }
 0x37d   : > { %2888 = vmatmul.bf16.vlgmr.msra.gmra.mxu3 %v2577_v21  ;;  %3185 = vmatpush.bf16.msrb.mxu1 %v8406_v20  ;;  %v8709_v20 = vld [vmem:[%s11180_s19 + $0x128] sm:$0xf0] }
 0x37e   : > { %3198 = vmatpush.bf16.msrb.mxu2 %v8470_v23  ;;  %3622 = vmatpush.bf16.msra.mxu0 %v8720_v13  ;;  %v8712_v21 = vor.u32 %v10565_v17, %v8709_v20  ;;  %v10542_v23 = vld [vmem:[%s11180_s19 + $0x64] sm:$0xf0]  ;;  %v8672_v13 = vor.u32 %v10555_v11, %v8669_v12  ;;  %v8539_v17 = vld [vmem:[%s11180_s19 + $0x8] sm:$0xf0] }
 0x37f   : > { %3384 = vmatpush.bf16.msra.mxu3 %v8594_v14  ;;  %v8545_v14 = vld [vmem:[%s11180_s19 + $0x10] sm:$0xf]  ;;  %v10562_v12 = vld [vmem:[%s11180_s19 + $0x104] sm:$0xf0] }
 0x381   : > { %3186 = vmatpush.bf16.msrb.mxu1 %v8398_v3  ;;  %v8582_v3 = vor.u32 %v10539_v25, %v8579_v27  ;;  %v8749_v25 = vld [vmem:[%s11180_s19 + $0x178] sm:$0xf0]  ;;  %v8715_v27 = vld [vmem:[%s11180_s19 + $0x130] sm:$0xf] }
 0x382   : > { %3199 = vmatpush.bf16.msrb.mxu2 %v8462_v30  ;;  %3623 = vmatpush.bf16.msra.mxu0 %v8712_v21  ;;  %v8701_v30 = vld [vmem:[%s11180_s19 + $0x118] sm:$0xf0]  ;;  %v8601_v21 = vld [vmem:[%s11180_s19 + $0x80] sm:$0xf] }
 0x383   : > { %v8704_v32 = vor.u32 %v10563_v29, %v8701_v30  ;;  %v10568_v29 = vld [vmem:[%s11180_s19 + $0x134] sm:$0xf0] }
 0x384   : > { %v8716_v30 = vor.u32 %v10568_v29, %v8715_v27  ;;  %v8675_v29 = vld [vmem:[%s11180_s19 + $0xe0] sm:$0xf] }
 0x385   : > { %3187 = vmatpush.bf16.msrb.mxu1 %v8390_v37  ;;  %v10537_v37 = vld [vmem:[%s11180_s19 + $0x44] sm:$0xf] }
 0x386   : > { %3200 = vmatpush.bf16.msrb.mxu2 %v8454_v36  ;;  %3219 = vmatmul.bf16.vlgmr.msrb.gmra.mxu0 %v2515_v7  ;;  %v8571_v36 = vld [vmem:[%s11180_s19 + $0x48] sm:$0xf0] }
 0x387   : > { %3624 = vmatpush.bf16.msra.mxu0 %v8704_v32  ;;  %v8574_v38 = vor.u32 %v10537_v37, %v8571_v36  ;;  %v8537_v32 = vld [vmem:[%s11180_s19] sm:$0xf]  ;;  %v8664_v37 = vor.u32 %v10553_v19, %v8661_v16  ;;  %v10530_v36 = vld [vmem:[%s11180_s19 + $0x4] sm:$0xf0] }
 0x389   : > { %3188 = vmatpush.bf16.msrb.mxu1 %v8382_v42  ;;  %v8696_v42 = vor.u32 %v10561_v39, %v8693_v40  ;;  %v8871_v39 = vld [vmem:[%s11180_s19 + $0x238] sm:$0xf0]  ;;  %v8538_v40 = vor.u32 %v10530_v36, %v8537_v32  ;;  %v10556_v36 = vld [vmem:[%s11180_s19 + $0xd4] sm:$0xf0] }
 0x38a   : > { %3201 = vmatpush.bf16.msrb.mxu2 %v8446_v43  ;;  %v10538_v43 = vld [vmem:[%s11180_s19 + $0x44] sm:$0xf0] }
 0x38b   : > { %v8570_v44 = vor.u32 %v10538_v43, %v8569_v41  ;;  %3625 = vmatpush.bf16.msra.mxu0 %v8696_v42  ;;  %v10551_v42 = vld [vmem:[%s11180_s19 + $0xb4] sm:$0xf]  ;;  %v8627_v43 = vld [vmem:[%s11180_s19 + $0xb8] sm:$0xf0] }
 0x38c   : > { %2901 = vmatmul.bf16.vlgmr.msra.gmra.mxu1 %v2584_v22  ;;  %3154 = vmatmul.bf16.vlgmr.msra.gmra.mxu2 %v11840_v45  ;;  %v8585_v22 = vld [vmem:[%s11180_s19 + $0x60] sm:$0xf] }
 0x38d   : > { %3180 = vmatmul.bf16.vlgmr.msrb.gmra.mxu3 %v2515_v7  ;;  %3189 = vmatpush.bf16.msrb.mxu1 %v8374_v48  ;;  %v10543_v7 = vld [vmem:[%s11180_s19 + $0x74] sm:$0xf]  ;;  %v8586_v24 = vor.u32 %v10542_v23, %v8585_v22  ;;  %v8566_v48 = vor.u32 %v10535_v47, %v8563_v28  ;;  %v10546_v22 = vld [vmem:[%s11180_s19 + $0x84] sm:$0xf0]  ;;  %v10573_v47 = vld [vmem:[%s11180_s19 + $0x164] sm:$0xf] }
 0x38e   : > { %v12014_v53 = vpop.f32.mrf.mxu0  ;;  %3202 = vmatpush.bf16.msrb.mxu2 %v8438_v46  ;;  %v8598_v10 = vor.u32 %v10543_v7, %v8595_v8  ;;  %v10552_v46 = vld [vmem:[%s11180_s19 + $0xb4] sm:$0xf0]  ;;  %v8547_v7 = vld [vmem:[%s11180_s19 + $0x18] sm:$0xf0]  ;;  %v8609_v8 = vld [vmem:[%s11180_s19 + $0x90] sm:$0xf] }
 0x38f   : > { %3385 = vmatpush.bf16.msra.mxu3 %v8586_v24  ;;  %v8626_v26 = vor.u32 %v10552_v46, %v8625_v33  ;;  %3626 = vmatpush.bf16.msra.mxu0 %v8688_v51  ;;  %v10575_v23 = vld [vmem:[%s11180_s19 + $0x174] sm:$0xf]  ;;  %v8602_v24 = vor.u32 %v10546_v22, %v8601_v21  ;;  %v8741_v28 = vld [vmem:[%s11180_s19 + $0x168] sm:$0xf0]  ;;  %v10566_v46 = vld [vmem:[%s11180_s19 + $0x124] sm:$0xf0] }
 0x390   : > { %v8744_v33 = vor.u32 %v10573_v47, %v8741_v28  ;;  %v10549_v51 = vld [vmem:[%s11180_s19 + $0xa4] sm:$0xf]  ;;  %v12130_v28 = vld [vmem:[%s11175_s14] sm:$0x3] }
 0x391   : > { %3190 = vmatpush.bf16.msrb.mxu1 %v8366_v52  ;;  %v8561_v52 = vld [vmem:[%s11180_s19 + $0x30] sm:$0xf] }
 0x392   : > { %3203 = vmatpush.bf16.msrb.mxu2 %v8430_v54  ;;  %v10536_v54 = vld [vmem:[%s11180_s19 + $0x34] sm:$0xf0] }
 0x393   : > { %3386 = vmatpush.bf16.msra.mxu3 %v8578_v35  ;;  %v8562_v55 = vor.u32 %v10536_v54, %v8561_v52  ;;  %3627 = vmatpush.bf16.msra.mxu0 %v8680_v63  ;;  %v8619_v52 = vld [vmem:[%s11180_s19 + $0xa8] sm:$0xf0]  ;;  %v8855_v63 = vld [vmem:[%s11180_s19 + $0x218] sm:$0xf0] }
 0x394   : > { %v12024_v0 = vpop.f32.mrf.mxu3 }
 0x395   : > { %3191 = vmatpush.bf16.msrb.mxu1 %v8358_v59  ;;  %v8617_v59 = vld [vmem:[%s11180_s19 + $0xa0] sm:$0xf] }
 0x396   : > { %v2878_v2 = vpop.f32.mrf.mxu0  ;;  %3204 = vmatpush.bf16.msrb.mxu2 %v8422_v60  ;;  %v10550_v60 = vld [vmem:[%s11180_s19 + $0xa4] sm:$0xf0] }
 0x397   : > { %3387 = vmatpush.bf16.msra.mxu3 %v8570_v44  ;;  %v8618_v31 = vor.u32 %v10550_v60, %v8617_v59  ;;  %v10534_v2 = vld [vmem:[%s11180_s19 + $0x24] sm:$0xf0]  ;;  %3628 = vmatpush.bf16.msra.mxu0 %v8672_v13  ;;  %v8630_v44 = vor.u32 %v10551_v42, %v8627_v43  ;;  %v8736_v59 = vor.u32 %v10571_v57, %v8733_v58  ;;  %v8699_v60 = vld [vmem:[%s11180_s19 + $0x110] sm:$0xf]  ;;  %v10593_v13 = vld [vmem:[%s11180_s19 + $0x204] sm:$0xf] }
 0x398   : > { %v10554_v42 = vld [vmem:[%s11180_s19 + $0xc4] sm:$0xf0] }
 0x399   : > { %3192 = vmatpush.bf16.msrb.mxu1 %v8350_v1  ;;  %v8553_v1 = vld [vmem:[%s11180_s19 + $0x20] sm:$0xf] }
 0x39a   : > { %3205 = vmatpush.bf16.msrb.mxu2 %v8414_v4  ;;  %v8554_v4 = vor.u32 %v10534_v2, %v8553_v1  ;;  %v10547_v1 = vld [vmem:[%s11180_s19 + $0x94] sm:$0xf] }
 0x39b   : > { %3388 = vmatpush.bf16.msra.mxu3 %v8562_v55  ;;  %3629 = vmatpush.bf16.msra.mxu0 %v8664_v37  ;;  %v8622_v55 = vor.u32 %v10549_v51, %v8619_v52  ;;  %v8667_v37 = vld [vmem:[%s11180_s19 + $0xd0] sm:$0xf]  ;;  %v8839_v52 = vld [vmem:[%s11180_s19 + $0x1f8] sm:$0xf0] }
 0x39c   : > { %v2839_v5 = vpop.f32.mrf.mxu3  ;;  %3193 = vmatmul.bf16.vlgmr.msrb.gmra.mxu1 %v11840_v45  ;;  %v8587_v45 = vld [vmem:[%s11180_s19 + $0x68] sm:$0xf0] }
 0x39d   : > { %3206 = vmatmul.bf16.vlgmr.msrb.gmra.mxu2 %v11984_v6  ;;  %v8590_v6 = vor.u32 %v10541_v15, %v8587_v45  ;;  %3401 = vmatpush.bf16.msra.mxu1 %v8626_v26  ;;  %v10531_v5 = vld [vmem:[%s11180_s19 + $0x14] sm:$0xf]  ;;  %v10532_v15 = vld [vmem:[%s11180_s19 + $0x14] sm:$0xf0]  ;;  %v8863_v26 = vld [vmem:[%s11180_s19 + $0x228] sm:$0xf0] }
 0x39e   : > { %3410 = vmatpush.bf16.msra.mxu2 %v8598_v10  ;;  %v8550_v9 = vor.u32 %v10531_v5, %v8547_v7  ;;  %v10548_v10 = vld [vmem:[%s11180_s19 + $0x94] sm:$0xf0]  ;;  %v8546_v45 = vor.u32 %v10532_v15, %v8545_v14  ;;  %v8866_v54 = vor.u32 %v10597_v49, %v8863_v26  ;;  %v8611_v5 = vld [vmem:[%s11180_s19 + $0x98] sm:$0xf0]  ;;  %v8847_v14 = vld [vmem:[%s11180_s19 + $0x208] sm:$0xf0] }
 0x39f   : > { %3389 = vmatpush.bf16.msra.mxu3 %v8554_v4  ;;  %v8610_v56 = vor.u32 %v10548_v10, %v8609_v8  ;;  %v8858_v4 = vor.u32 %v10595_v62, %v8855_v63  ;;  %v8614_v7 = vor.u32 %v10547_v1, %v8611_v5  ;;  %v10569_v8 = vld [vmem:[%s11180_s19 + $0x144] sm:$0xf]  ;;  %v8691_v10 = vld [vmem:[%s11180_s19 + $0x100] sm:$0xf]  ;;  %v10591_v26 = vld [vmem:[%s11180_s19 + $0x1f4] sm:$0xf] }
 0x3a0   : > { %v10589_v62 = vld [vmem:[%s11180_s19 + $0x1e4] sm:$0xf]  ;;  %v8831_v1 = vld [vmem:[%s11180_s19 + $0x1e8] sm:$0xf0] }
 0x3a1   : > { %3402 = vmatpush.bf16.msra.mxu1 %v8618_v31  ;;  %v10564_v31 = vld [vmem:[%s11180_s19 + $0x114] sm:$0xf0] }
 0x3a2   : > { %3411 = vmatpush.bf16.msra.mxu2 %v8590_v6  ;;  %v10529_v6 = vld [vmem:[%s11180_s19 + $0x4] sm:$0xf]  ;;  %v8700_v61 = vor.u32 %v10564_v31, %v8699_v60  ;;  %v8961_v60 = vld [vmem:[%s11180_s19 + $0x2b8] sm:$0xf0]  ;;  %v8842_v31 = vor.u32 %v10591_v26, %v8839_v52  ;;  %v8861_v52 = vld [vmem:[%s11180_s19 + $0x220] sm:$0xf] }
 0x3a3   : > { %v8542_v20 = vor.u32 %v10529_v6, %v8539_v17  ;;  %3390 = vmatpush.bf16.msra.mxu3 %v8546_v45  ;;  %v8850_v45 = vor.u32 %v10593_v13, %v8847_v14  ;;  %v10545_v6 = vld [vmem:[%s11180_s19 + $0x84] sm:$0xf]  ;;  %v8603_v17 = vld [vmem:[%s11180_s19 + $0x88] sm:$0xf0]  ;;  %v10587_v13 = vld [vmem:[%s11180_s19 + $0x1d4] sm:$0xf] }
 0x3a4   : > { %v8606_v21 = vor.u32 %v10545_v6, %v8603_v17  ;;  %v8731_v14 = vld [vmem:[%s11180_s19 + $0x150] sm:$0xf] }
 0x3a5   : > { %3403 = vmatpush.bf16.msra.mxu1 %v8610_v56  ;;  %v8692_v56 = vor.u32 %v10562_v12, %v8691_v10  ;;  %v8953_v10 = vld [vmem:[%s11180_s19 + $0x2a8] sm:$0xf0]  ;;  %v8834_v12 = vor.u32 %v10589_v62, %v8831_v1  ;;  %v10605_v62 = vld [vmem:[%s11180_s19 + $0x264] sm:$0xf] }
 0x3a6   : > { %3412 = vmatpush.bf16.msra.mxu2 %v8582_v3  ;;  %v8752_v3 = vor.u32 %v10575_v23, %v8749_v25  ;;  %v8683_v23 = vld [vmem:[%s11180_s19 + $0xf0] sm:$0xf]  ;;  %v8921_v1 = vld [vmem:[%s11180_s19 + $0x268] sm:$0xf0] }
 0x3a7   : > { %3391 = vmatpush.bf16.msra.mxu3 %v8538_v40 }
 0x3a9   : > { %3404 = vmatpush.bf16.msra.mxu1 %v8602_v24  ;;  %v10560_v24 = vld [vmem:[%s11180_s19 + $0xf4] sm:$0xf0] }
 0x3aa   : > { %3413 = vmatpush.bf16.msra.mxu2 %v8574_v38  ;;  %v10599_v38 = vld [vmem:[%s11180_s19 + $0x234] sm:$0xf]  ;;  %v8684_v25 = vor.u32 %v10560_v24, %v8683_v23  ;;  %v3227_v23 = vperm.slane %v12130_v28, 1 }
 0x3ab   : > { %v8874_v41 = vor.u32 %v10599_v38, %v8871_v39  ;;  %3427 = vmatpush.bf16.msrb.mxu3 %v8630_v44  ;;  %v8668_v38 = vor.u32 %v10556_v36, %v8667_v37  ;;  %v10609_v36 = vld [vmem:[%s11180_s19 + $0x284] sm:$0xf] }
 0x3ad   : > { %3596 = vmatpush.bf16.msrb.mxu1 %v8716_v30  ;;  %3850 = vmatpush.bf16.msrb.mxu0 %v8874_v41  ;;  %v8659_v41 = vld [vmem:[%s11180_s19 + $0xc0] sm:$0xf] }
 0x3ae   : > { %3414 = vmatpush.bf16.msra.mxu2 %v8566_v48  ;;  %v8707_v48 = vld [vmem:[%s11180_s19 + $0x120] sm:$0xf]  ;;  %v8660_v44 = vor.u32 %v10554_v42, %v8659_v41  ;;  %v8869_v42 = vld [vmem:[%s11180_s19 + $0x230] sm:$0xf] }
 0x3af   : > { %v8708_v50 = vor.u32 %v10566_v46, %v8707_v48  ;;  %3428 = vmatpush.bf16.msrb.mxu3 %v8622_v55  ;;  %v10576_v55 = vld [vmem:[%s11180_s19 + $0x174] sm:$0xf0] }
 0x3b1   : > { %3597 = vmatpush.bf16.msrb.mxu1 %v8708_v50  ;;  %3851 = vmatpush.bf16.msrb.mxu0 %v8866_v54  ;;  %v8747_v54 = vld [vmem:[%s11180_s19 + $0x170] sm:$0xf] }
 0x3b2   : > { %3415 = vmatpush.bf16.msra.mxu2 %v8558_v34 }
 0x3b3   : > { %3429 = vmatpush.bf16.msrb.mxu3 %v8614_v7 }
 0x3b5   : > { %3598 = vmatpush.bf16.msrb.mxu1 %v8700_v61  ;;  %3852 = vmatpush.bf16.msrb.mxu0 %v8858_v4  ;;  %v8748_v61 = vor.u32 %v10576_v55, %v8747_v54  ;;  %v10574_v4 = vld [vmem:[%s11180_s19 + $0x164] sm:$0xf0] }
 0x3b6   : > { %3416 = vmatpush.bf16.msra.mxu2 %v8550_v9  ;;  %v8725_v9 = vld [vmem:[%s11180_s19 + $0x148] sm:$0xf0]  ;;  %v10598_v54 = vld [vmem:[%s11180_s19 + $0x224] sm:$0xf0] }
 0x3b7   : > { %v8728_v11 = vor.u32 %v10569_v8, %v8725_v9  ;;  %3430 = vmatpush.bf16.msrb.mxu3 %v8606_v21  ;;  %v10613_v9 = vld [vmem:[%s11180_s19 + $0x2a4] sm:$0xf]  ;;  %v8945_v21 = vld [vmem:[%s11180_s19 + $0x298] sm:$0xf0] }
 0x3b8   : > { %v8956_v6 = vor.u32 %v10613_v9, %v8953_v10  ;;  %v8821_v9 = vld [vmem:[%s11180_s19 + $0x1d0] sm:$0xf]  ;;  %v10588_v10 = vld [vmem:[%s11180_s19 + $0x1d4] sm:$0xf0] }
 0x3b9   : > { %3599 = vmatpush.bf16.msrb.mxu1 %v8692_v56  ;;  %3853 = vmatpush.bf16.msrb.mxu0 %v8850_v45 }
 0x3ba   : > { %3417 = vmatpush.bf16.msra.mxu2 %v8542_v20 }
 0x3bd   : > { %3600 = vmatpush.bf16.msrb.mxu1 %v8684_v25 }
 0x3be   : > { %3639 = vmatpush.bf16.msrb.mxu2 %v8752_v3  ;;  %v10558_v3 = vld [vmem:[%s11180_s19 + $0xe4] sm:$0xf0] }
 0x3bf   : > { %v8676_v30 = vor.u32 %v10558_v3, %v8675_v29  ;;  %v10585_v3 = vld [vmem:[%s11180_s19 + $0x1c4] sm:$0xf] }
 0x3c1   : > { %3601 = vmatpush.bf16.msrb.mxu1 %v8676_v30  ;;  %v8815_v30 = vld [vmem:[%s11180_s19 + $0x1c8] sm:$0xf0] }
 0x3c2   : > { %3640 = vmatpush.bf16.msrb.mxu2 %v8744_v33 }
 0x3c5   : > { %3602 = vmatpush.bf16.msrb.mxu1 %v8668_v38  ;;  %v8937_v38 = vld [vmem:[%s11180_s19 + $0x288] sm:$0xf0] }
 0x3c6   : > { %3641 = vmatpush.bf16.msrb.mxu2 %v8736_v59  ;;  %v10615_v59 = vld [vmem:[%s11180_s19 + $0x2b4] sm:$0xf] }
 0x3c7   : > { %v8964_v7 = vor.u32 %v10615_v59, %v8961_v60  ;;  %v10581_v60 = vld [vmem:[%s11180_s19 + $0x1a4] sm:$0xf] }
 0x3c9   : > { %3603 = vmatpush.bf16.msrb.mxu1 %v8660_v44  ;;  %v8837_v44 = vld [vmem:[%s11180_s19 + $0x1f0] sm:$0xf] }
 0x3ca   : > { %3642 = vmatpush.bf16.msrb.mxu2 %v8728_v11 }
 0x3f3   : > { %v12087_v35 = vpop.f32.mrf.mxu0 }
 0x3f9   : > { %v2850_v34 = vpop.f32.mrf.mxu1 }
 0x3fa   : > { %v2851_v40 = vadd.f32 %v2850_v34, %v12024_v0  ;;  %v3226_v0 = vperm.slane %v12130_v28, 0  ;;  %v8940_v28 = vor.u32 %v10609_v36, %v8937_v38  ;;  %v10584_v36 = vld [vmem:[%s11180_s19 + $0x1b4] sm:$0xf0] }
 0x3fb   : > { %v3170_v2 = vpop.f32.mrf.mxu0 }
 0x3fc   : > { %v8739_v2 = vld [vmem:[%s11180_s19 + $0x160] sm:$0xf] }
 0x3fd   : > { %v8740_v56 = vor.u32 %v10574_v4, %v8739_v2  ;;  %v8853_v4 = vld [vmem:[%s11180_s19 + $0x210] sm:$0xf] }
 0x3ff   : > { %v2863_v15 = vpop.f32.mrf.mxu2 }
 0x400   : > { %v2889_v20 = vpop.f32.mrf.mxu3  ;;  %v2864_v43 = vadd.f32 %v2863_v15, %v2851_v40  ;;  %v10572_v15 = vld [vmem:[%s11180_s19 + $0x154] sm:$0xf0]  ;;  %v8818_v40 = vor.u32 %v10585_v3, %v8815_v30  ;;  %v8905_v3 = vld [vmem:[%s11180_s19 + $0x248] sm:$0xf0] }
 0x401   : > { %v2852_v22 = vpop.f32.mrf.mxu1  ;;  %v2890_v5 = vadd.f32 %v2889_v20, %v12014_v53  ;;  %v8823_v53 = vld [vmem:[%s11180_s19 + $0x1d8] sm:$0xf0]  ;;  %v10611_v20 = vld [vmem:[%s11180_s19 + $0x294] sm:$0xf]  ;;  %v8732_v29 = vor.u32 %v10572_v15, %v8731_v14  ;;  %v8822_v15 = vor.u32 %v10588_v10, %v8821_v9  ;;  %v10624_v9 = vld [vmem:[%s11180_s19 + $0x2f4] sm:$0xf0] }
 0x402   : > { %v8826_v25 = vor.u32 %v10587_v13, %v8823_v53  ;;  %v8948_v37 = vor.u32 %v10611_v20, %v8945_v21  ;;  %v10603_v53 = vld [vmem:[%s11180_s19 + $0x254] sm:$0xf]  ;;  %v8913_v14 = vld [vmem:[%s11180_s19 + $0x258] sm:$0xf0]  ;;  %v8813_v20 = vld [vmem:[%s11180_s19 + $0x1c0] sm:$0xf] }
 0x403   : > { %v12120_v27 = vpop.f32.mrf.mxu0  ;;  %v10586_v21 = vld [vmem:[%s11180_s19 + $0x1c4] sm:$0xf0] }
 0x404   : > { %v8814_v30 = vor.u32 %v10586_v21, %v8813_v20 }
 0x407   : > { %v2865_v19 = vpop.f32.mrf.mxu2 }
 0x408   : > { %v2891_v16 = vpop.f32.mrf.mxu3  ;;  %v8723_v19 = vld [vmem:[%s11180_s19 + $0x140] sm:$0xf] }
 0x409   : > { %v2902_v32 = vpop.f32.mrf.mxu1  ;;  %v10570_v16 = vld [vmem:[%s11180_s19 + $0x144] sm:$0xf0] }
 0x40a   : > { %v2903_v11 = vadd.f32 %v2902_v32, %v2890_v5  ;;  %v8724_v41 = vor.u32 %v10570_v16, %v8723_v19  ;;  %v10596_v5 = vld [vmem:[%s11180_s19 + $0x214] sm:$0xf0]  ;;  %v8959_v19 = vld [vmem:[%s11180_s19 + $0x2b0] sm:$0xf] }
 0x40b   : > { %v3222_v39 = vpop.f32.mrf.mxu0  ;;  %v8854_v13 = vor.u32 %v10596_v5, %v8853_v4  ;;  %v10616_v16 = vld [vmem:[%s11180_s19 + $0x2b4] sm:$0xf0]  ;;  %v10617_v4 = vld [vmem:[%s11180_s19 + $0x2c4] sm:$0xf]  ;;  %v8969_v5 = vld [vmem:[%s11180_s19 + $0x2c8] sm:$0xf0] }
 0x40f   : > { %v3155_v47 = vpop.f32.mrf.mxu2 }
 0x410   : > { %v3156_v33 = vadd.f32 %v3155_v47, %v2864_v43  ;;  %v3181_v48 = vpop.f32.mrf.mxu3  ;;  %v10600_v43 = vld [vmem:[%s11180_s19 + $0x234] sm:$0xf0] }
 0x411   : > { %v2904_v46 = vpop.f32.mrf.mxu1  ;;  %v10592_v47 = vld [vmem:[%s11180_s19 + $0x1f4] sm:$0xf0] }
 0x412   : > { %v3169_v49 = vadd.f32 %v12087_v35, %v3156_v33  ;;  %v10583_v33 = vld [vmem:[%s11180_s19 + $0x1b4] sm:$0xf] }
 0x414   : > { %v3182_v50 = vadd.f32 %v3181_v48, %v3169_v49  ;;  %v8807_v48 = vld [vmem:[%s11180_s19 + $0x1b8] sm:$0xf0]  ;;  %v8870_v49 = vor.u32 %v10600_v43, %v8869_v42  ;;  %v8951_v43 = vld [vmem:[%s11180_s19 + $0x2a0] sm:$0xf] }
 0x415   : > { %v8810_v55 = vor.u32 %v10583_v33, %v8807_v48  ;;  %v10621_v48 = vld [vmem:[%s11180_s19 + $0x2e4] sm:$0xf] }
 0x416   : > { %v3230_v51 = vadd.f32 %v3226_v0, %v3182_v50  ;;  %v10607_v0 = vld [vmem:[%s11180_s19 + $0x274] sm:$0xf]  ;;  %v8929_v50 = vld [vmem:[%s11180_s19 + $0x278] sm:$0xf0] }
 0x417   : > { %v3157_v57 = vpop.f32.mrf.mxu2  ;;  %v8932_v59 = vor.u32 %v10607_v0, %v8929_v50 }
 0x418   : > { %v3232_v58 = vmax.f32 %v3230_v51, 0.0  ;;  %v3183_v34 = vpop.f32.mrf.mxu3  ;;  %v8838_v51 = vor.u32 %v10592_v47, %v8837_v44  ;;  %v8829_v57 = vld [vmem:[%s11180_s19 + $0x1e0] sm:$0xf]  ;;  %v10614_v44 = vld [vmem:[%s11180_s19 + $0x2a4] sm:$0xf0] }
 0x419   : > { %v3194_v35 = vpop.f32.mrf.mxu1  ;;  %v8952_v0 = vor.u32 %v10614_v44, %v8951_v43  ;;  %v10632_v43 = vld [vmem:[%s11190_s30 + $0x38] sm:$0xff]  ;;  %v10631_v44 = vld [vmem:[%s11190_s30 + $0x30] sm:$0xff] }
 0x41a   : > { %v12141_v63 = vpack.c.bf16 %v3232_v58, %v3232_v58  ;;  %v3195_v45 = vadd.f32 %v3194_v35, %v2903_v11  ;;  %v10590_v58 = vld [vmem:[%s11180_s19 + $0x1e4] sm:$0xf0]  ;;  %v8799_v35 = vld [vmem:[%s11180_s19 + $0x1a8] sm:$0xf0]  ;;  %v8924_v11 = vor.u32 %v10605_v62, %v8921_v1  ;;  %v8781_v1 = vld [vmem:[%s11180_s19 + $0x180] sm:$0xf] }
 0x41b   : > { %v8830_v2 = vor.u32 %v10590_v58, %v8829_v57  ;;  %v10619_v57 = vld [vmem:[%s11180_s19 + $0x2d4] sm:$0xf]  ;;  %v8977_v58 = vld [vmem:[%s11180_s19 + $0x2d8] sm:$0xf0] }
 0x41c   : > { %3392 = vmatmul.bf16.vlgmr.msra.gmra.mxu3 %v12141_v63  ;;  %3418 = vmatmul.bf16.vlgmr.msra.gmra.mxu2 %v12141_v63  ;;  %v12150_v8 = vshrl.u32 %v12141_v63, 16  ;;  %v3681_v33 = vrot.slane %v12141_v63, 1  ;;  %v8980_v62 = vor.u32 %v10619_v57, %v8977_v58 }
 0x41d   : > { %3833 = vmatpush.bf16.msra.mxu2 %v8842_v31  ;;  %3613 = vmatpush.bf16.msra.mxu3 %v8748_v61  ;;  %v8862_v61 = vor.u32 %v10598_v54, %v8861_v52  ;;  %v10612_v52 = vld [vmem:[%s11180_s19 + $0x294] sm:$0xf0]  ;;  %v8789_v54 = vld [vmem:[%s11180_s19 + $0x190] sm:$0xf] }
 0x41e   : > { %3630 = vmatmul.bf16.vlgmr.msra.gmra.mxu0 %v12150_v8 }
 0x41f   : > { %4042 = vmatpush.bf16.msra.mxu0 %v8964_v7  ;;  %v8802_v7 = vor.u32 %v10581_v60, %v8799_v35  ;;  %v8935_v35 = vld [vmem:[%s11180_s19 + $0x280] sm:$0xf] }
 0x420   : > { %v3207_v17 = vpop.f32.mrf.mxu2 }
 0x421   : > { %v3208_v22 = vadd.f32 %v3207_v17, %v3195_v45  ;;  %v3196_v24 = vpop.f32.mrf.mxu1  ;;  %3834 = vmatpush.bf16.msra.mxu2 %v8834_v12  ;;  %3614 = vmatpush.bf16.msra.mxu3 %v8740_v56  ;;  %v10579_v12 = vld [vmem:[%s11180_s19 + $0x194] sm:$0xf]  ;;  %v8791_v56 = vld [vmem:[%s11180_s19 + $0x198] sm:$0xf0]  ;;  %v8845_v45 = vld [vmem:[%s11180_s19 + $0x200] sm:$0xf] }
 0x422   : > { %v8794_v17 = vor.u32 %v10579_v12, %v8791_v56  ;;  %v8783_v24 = vld [vmem:[%s11180_s19 + $0x188] sm:$0xf0]  ;;  %v8927_v12 = vld [vmem:[%s11180_s19 + $0x270] sm:$0xf]  ;;  %v10608_v56 = vld [vmem:[%s11180_s19 + $0x274] sm:$0xf0] }
 0x423   : > { %v3221_v32 = vadd.f32 %v12120_v27, %v3208_v22  ;;  %4043 = vmatpush.bf16.msra.mxu0 %v8956_v6  ;;  %v10594_v6 = vld [vmem:[%s11180_s19 + $0x204] sm:$0xf0]  ;;  %v8916_v22 = vor.u32 %v10603_v53, %v8913_v14  ;;  %v8983_v14 = vld [vmem:[%s11180_s19 + $0x2e0] sm:$0xf] }
 0x425   : > { %v3231_v39 = vadd.f32 %v3227_v23, %v3221_v32  ;;  %3835 = vmatpush.bf16.msra.mxu2 %v8826_v25  ;;  %3615 = vmatpush.bf16.msra.mxu3 %v8732_v29  ;;  %v10577_v23 = vld [vmem:[%s11180_s19 + $0x184] sm:$0xf]  ;;  %v8846_v25 = vor.u32 %v10594_v6, %v8845_v45  ;;  %v8928_v45 = vor.u32 %v10608_v56, %v8927_v12  ;;  %v8919_v6 = vld [vmem:[%s11180_s19 + $0x260] sm:$0xf] }
 0x426   : > { %v10601_v29 = vld [vmem:[%s11180_s19 + $0x244] sm:$0xf]  ;;  %v8786_v32 = vor.u32 %v10577_v23, %v8783_v24  ;;  %v10620_v23 = vld [vmem:[%s11180_s19 + $0x2d4] sm:$0xf0] }
 0x427   : > { %v3233_v27 = vmax.f32 %v3231_v39, 0.0  ;;  %4044 = vmatpush.bf16.msra.mxu0 %v8948_v37  ;;  %v8805_v37 = vld [vmem:[%s11180_s19 + $0x1b0] sm:$0xf]  ;;  %v8908_v38 = vor.u32 %v10601_v29, %v8905_v3  ;;  %v10623_v39 = vld [vmem:[%s11180_s19 + $0x2f4] sm:$0xf] }
 0x428   : > { %v3209_v46 = vpop.f32.mrf.mxu2  ;;  %v8806_v42 = vor.u32 %v10584_v36, %v8805_v37  ;;  %v10604_v29 = vld [vmem:[%s11180_s19 + $0x254] sm:$0xf0] }
 0x429   : > { %v12177_v26 = vpack.c.bf16 %v3233_v27, %v3233_v27  ;;  %3836 = vmatpush.bf16.msra.mxu2 %v8818_v40  ;;  %3616 = vmatpush.bf16.msra.mxu3 %v8724_v41  ;;  %v8993_v40 = vld [vmem:[%s11180_s19 + $0x2f8] sm:$0xf0]  ;;  %v8960_v41 = vor.u32 %v10616_v16, %v8959_v19  ;;  %v8797_v27 = vld [vmem:[%s11180_s19 + $0x1a0] sm:$0xf]  ;;  %v8985_v46 = vld [vmem:[%s11180_s19 + $0x2e8] sm:$0xf0] }
 0x42a   : > { %v8996_v47 = vor.u32 %v10623_v39, %v8993_v40  ;;  %v8988_v63 = vor.u32 %v10621_v48, %v8985_v46  ;;  %v10618_v19 = vld [vmem:[%s11180_s19 + $0x2c4] sm:$0xf0]  ;;  %v10629_v46 = vld [vmem:[%s11190_s30 + $0x20] sm:$0xff] }
 0x42b   : > { %8631 = vmatmul.msk.bf16.vlgmr.msra.gmra.mxu1 %vm1174_vm1, %v12177_v26  ;;  %4045 = vmatpush.bf16.msra.mxu0 %v8940_v28  ;;  %v12186_v34 = vshrl.u32 %v12177_v26, 16  ;;  %v3682_v31 = vrot.slane %v12177_v26, 1  ;;  %v10582_v28 = vld [vmem:[%s11180_s19 + $0x1a4] sm:$0xf0] }
 0x42c   : > { %8632 = vmatmul.msk.bf16.vlgmr.msrb.gmra.mxu3 %vm1174_vm1, %v12177_v26  ;;  %3824 = vmatpush.bf16.msra.mxu1 %v8870_v49  ;;  %v3890_v49 = vrot.slane %v12150_v8, 1  ;;  %v8798_v50 = vor.u32 %v10582_v28, %v8797_v27  ;;  %v10602_v16 = vld [vmem:[%s11180_s19 + $0x244] sm:$0xf0] }
 0x42d   : > { %8754 = vmatmul.msk.bf16.vlgmr.msrb.gmra.mxu2 %vm1174_vm1, %v12186_v34  ;;  %3807 = vmatpush.bf16.msrb.mxu3 %v8838_v51  ;;  %v8943_v51 = vld [vmem:[%s11180_s19 + $0x290] sm:$0xf]  ;;  %v3891_v21 = vrot.slane %v12186_v34, 1  ;;  %v10630_v48 = vld [vmem:[%s11190_s30 + $0x28] sm:$0xff] }
 0x42e   : > { %3837 = vmatpush.bf16.msra.mxu2 %v8810_v55  ;;  %8876 = vmatmul.msk.bf16.vlgmr.msrb.gmra.mxu0 %vm1174_vm1, %v3682_v31  ;;  %v10580_v55 = vld [vmem:[%s11180_s19 + $0x194] sm:$0xf0] }
 0x42f   : > { %4046 = vmatpush.bf16.msra.mxu0 %v8932_v59  ;;  %v8944_v59 = vor.u32 %v10612_v52, %v8943_v51  ;;  %v8790_v60 = vor.u32 %v10580_v55, %v8789_v54  ;;  %v10636_v51 = vld [vmem:[%s11190_s30 + $0x58] sm:$0xff]  ;;  %v10627_v55 = vld [vmem:[%s11190_s30 + $0x10] sm:$0xff] }
 0x430   : > { %3825 = vmatpush.bf16.msra.mxu1 %v8862_v61  ;;  %v10610_v61 = vld [vmem:[%s11180_s19 + $0x284] sm:$0xf0]  ;;  %v10628_v52 = vld [vmem:[%s11190_s30 + $0x18] sm:$0xff] }
 0x431   : > { %3808 = vmatpush.bf16.msrb.mxu3 %v8830_v2  ;;  %v10578_v2 = vld [vmem:[%s11180_s19 + $0x184] sm:$0xf0]  ;;  %v8936_v10 = vor.u32 %v10610_v61, %v8935_v35 }
 0x432   : > { %3838 = vmatpush.bf16.msra.mxu2 %v8802_v7  ;;  %v8991_v7 = vld [vmem:[%s11180_s19 + $0x2f0] sm:$0xf]  ;;  %v10626_v35 = vld [vmem:[%s11190_s30 + $0x8] sm:$0xff] }
 0x433   : > { %4047 = vmatpush.bf16.msra.mxu0 %v8924_v11  ;;  %v8782_v11 = vor.u32 %v10578_v2, %v8781_v1  ;;  %v8992_v53 = vor.u32 %v10624_v9, %v8991_v7  ;;  %v10634_v61 = vld [vmem:[%s11190_s30 + $0x48] sm:$0xff]  ;;  %v10625_v1 = vld [vmem:[%s11190_s30] sm:$0xff] }
 0x434   : > { %3826 = vmatpush.bf16.msra.mxu1 %v8854_v13  ;;  %v8972_v13 = vor.u32 %v10617_v4, %v8969_v5  ;;  %v10633_v2 = vld [vmem:[%s11190_s30 + $0x40] sm:$0xff] }
 0x435   : > { %3809 = vmatpush.bf16.msrb.mxu3 %v8822_v15  ;;  %v10622_v15 = vld [vmem:[%s11180_s19 + $0x2e4] sm:$0xf0] }
 0x436   : > { %3839 = vmatpush.bf16.msra.mxu2 %v8794_v17  ;;  %v10606_v17 = vld [vmem:[%s11180_s19 + $0x264] sm:$0xf0]  ;;  %v8984_v20 = vor.u32 %v10622_v15, %v8983_v14 }
 0x437   : > { %4048 = vmatpush.bf16.msra.mxu0 %v8916_v22  ;;  %v8975_v22 = vld [vmem:[%s11180_s19 + $0x2d0] sm:$0xf]  ;;  %v8920_v24 = vor.u32 %v10606_v17, %v8919_v6  ;;  %v3234_v17 = vld [vmem:[%s11185_s24] sm:$0x3] }
 0x438   : > { %3827 = vmatpush.bf16.msra.mxu1 %v8846_v25  ;;  %v8911_v25 = vld [vmem:[%s11180_s19 + $0x250] sm:$0xf]  ;;  %v8976_v3 = vor.u32 %v10620_v23, %v8975_v22 }
 0x439   : > { %3810 = vmatpush.bf16.msrb.mxu3 %v8814_v30  ;;  %v8967_v30 = vld [vmem:[%s11180_s19 + $0x2c0] sm:$0xf]  ;;  %v8912_v26 = vor.u32 %v10604_v29, %v8911_v25 }
 0x43a   : > { %3840 = vmatpush.bf16.msra.mxu2 %v8786_v32 }
 0x43b   : > { %3604 = vmatmul.bf16.vlgmr.msrb.gmra.mxu1 %v12150_v8  ;;  %4049 = vmatpush.bf16.msra.mxu0 %v8908_v38 }
 0x43c   : > { %4016 = vmatpush.bf16.msrb.mxu1 %v8960_v41  ;;  %8753 = vmatmul.msk.bf16.vlgmr.msra.gmra.mxu3 %vm1174_vm1, %v12186_v34  ;;  %v8968_v34 = vor.u32 %v10618_v19, %v8967_v30 }
 0x43d   : > { %3841 = vmatmul.bf16.vlgmr.msra.gmra.mxu2 %v3681_v33  ;;  %3811 = vmatpush.bf16.msrb.mxu3 %v8806_v42 }
 0x43e   : > { %4059 = vmatpush.bf16.msrb.mxu2 %v8996_v47  ;;  %4050 = vmatmul.bf16.vlgmr.msra.gmra.mxu0 %v3890_v49 }
 0x440   : > { %4017 = vmatpush.bf16.msrb.mxu1 %v8952_v0 }
 0x441   : > { %3812 = vmatpush.bf16.msrb.mxu3 %v8798_v50 }
 0x442   : > { %4060 = vmatpush.bf16.msrb.mxu2 %v8988_v63  ;;  %v10635_v63 = vld [vmem:[%s11190_s30 + $0x50] sm:$0xff] }
 0x444   : > { %4018 = vmatpush.bf16.msrb.mxu1 %v8944_v59 }
 0x445   : > { %3813 = vmatpush.bf16.msrb.mxu3 %v8790_v60 }
 0x446   : > { %4061 = vmatpush.bf16.msrb.mxu2 %v8980_v62 }
 0x448   : > { %4019 = vmatpush.bf16.msrb.mxu1 %v8936_v10 }
 0x449   : > { %3814 = vmatpush.bf16.msrb.mxu3 %v8782_v11 }
 0x44a   : > { %4062 = vmatpush.bf16.msrb.mxu2 %v8972_v13 }
 0x44b   : > { %8875 = vmatmul.msk.bf16.vlgmr.msra.gmra.mxu1 %vm1174_vm1, %v3682_v31  ;;  %v8903_v31 = vld [vmem:[%s11180_s19 + $0x240] sm:$0xf] }
 0x44c   : > { %4020 = vmatpush.bf16.msrb.mxu1 %v8928_v45  ;;  %3815 = vmatmul.bf16.vlgmr.msrb.gmra.mxu3 %v3681_v33  ;;  %v8904_v32 = vor.u32 %v10602_v16, %v8903_v31 }
 0x44d   : > { %4033 = vmatpush.bf16.msra.mxu3 %v8992_v53  ;;  %8998 = vmatmul.msk.bf16.vlgmr.msrb.gmra.mxu2 %vm1174_vm1, %v3891_v21 }
 0x450   : > { %4021 = vmatpush.bf16.msrb.mxu1 %v8920_v24 }
 0x451   : > { %4034 = vmatpush.bf16.msra.mxu3 %v8984_v20 }
 0x454   : > { %4022 = vmatpush.bf16.msrb.mxu1 %v8912_v26 }
 0x455   : > { %4035 = vmatpush.bf16.msra.mxu3 %v8976_v3 }
 0x458   : > { %4023 = vmatpush.bf16.msrb.mxu1 %v8904_v32 }
 0x459   : > { %4036 = vmatpush.bf16.msra.mxu3 %v8968_v34 }
 0x45b   : > { %4024 = vmatmul.bf16.vlgmr.msrb.gmra.mxu1 %v3890_v49 }
 0x45c   : > { %8997 = vmatmul.msk.bf16.vlgmr.msra.gmra.mxu3 %vm1174_vm1, %v3891_v21  ;;  %4198 = vmatpush.bf16.msra.mxu1 %v10636_v51  ;;  %v10640_v51 = vld [vmem:[%s13235_s7 + $0x4] sm:$0xf] }
 0x45d   : > { %4181 = vmatpush.bf16.msrb.mxu3 %v10632_v43  ;;  %v10638_v43 = vld [vmem:[%s13223_s12 + $0x8] sm:$0xff] }
 0x460   : > { %4199 = vmatpush.bf16.msra.mxu1 %v10635_v63  ;;  %v9065_v63 = vld [vmem:[%s13235_s7 + $0x8] sm:$0xf0] }
 0x461   : > { %4182 = vmatpush.bf16.msrb.mxu3 %v10631_v44  ;;  %v10637_v44 = vld [vmem:[%s13223_s12] sm:$0xff] }
 0x464   : > { %4200 = vmatpush.bf16.msra.mxu1 %v10634_v61  ;;  %v9089_v61 = vld [vmem:[%s13235_s7 + $0x20] sm:$0xf] }
 0x465   : > { %4183 = vmatpush.bf16.msrb.mxu3 %v10630_v48 }
 0x468   : > { %4201 = vmatpush.bf16.msra.mxu1 %v10633_v2 }
 0x469   : > { %4184 = vmatpush.bf16.msrb.mxu3 %v10629_v46 }
 0x46d   : > { %4185 = vmatpush.bf16.msrb.mxu3 %v10628_v52 }
 0x471   : > { %4186 = vmatpush.bf16.msrb.mxu3 %v10627_v55  ;;  %v10643_v55 = vld [vmem:[%s13235_s7 + $0x14] sm:$0xf0] }
 0x475   : > { %4187 = vmatpush.bf16.msrb.mxu3 %v10626_v35 }
 0x479   : > { %4188 = vmatpush.bf16.msrb.mxu3 %v10625_v1  ;;  %v10644_v1 = vld [vmem:[%s13235_s7 + $0x24] sm:$0xf] }
 0x49b   : > { %v3631_v37 = vpop.f32.mrf.mxu0 }
 0x49f   : > { %v3393_v36 = vpop.f32.mrf.mxu3  ;;  %v3419_v38 = vpop.f32.mrf.mxu2 }
 0x4a3   : > { %v3633_v39 = vpop.f32.mrf.mxu0 }
 0x4a7   : > { %v3395_v40 = vpop.f32.mrf.mxu3  ;;  %v3421_v41 = vpop.f32.mrf.mxu2 }
 0x4a8   : > { %v3406_v42 = vpop.f32.mrf.mxu1 }
 0x4a9   : > { %v3407_v53 = vadd.f32 %v3406_v42, %v3393_v36  ;;  %v10639_v42 = vld [vmem:[%s13223_s12 + $0x10] sm:$0xff] }
 0x4aa   : > { %4242 = vmatpush.bf16.msra.mxu2 %v10639_v42 }
 0x4ab   : > { %v3855_v47 = vpop.f32.mrf.mxu0 }
 0x4ae   : > { %4243 = vmatpush.bf16.msra.mxu2 %v10638_v43  ;;  %v9136_v43 = vld [vmem:[%s13237_s10 + $0x30] sm:$0xf] }
 0x4af   : > { %v3432_v8 = vpop.f32.mrf.mxu3 }
 0x4b0   : > { %v3408_v27 = vpop.f32.mrf.mxu1  ;;  %v3644_v28 = vpop.f32.mrf.mxu2  ;;  %v3433_v11 = vadd.f32 %v3432_v8, %v3419_v38  ;;  %v4105_v8 = vld [vmem:[%s13234_s1] sm:$0x1]  ;;  %s13236_s1 = sld [smem:[#allocation17_spill]] }
 0x4b1   : > { %v3645_v56 = vadd.f32 %v3644_v28, %v3631_v37 }
 0x4b2   : > { %v3438_v12 = vrot.slane %v3433_v11, 7  ;;  %4244 = vmatpush.bf16.msra.mxu2 %v10637_v44  ;;  %v10646_v11 = vld [vmem:[%s13235_s7 + $0x34] sm:$0xf]  ;;  %v10691_v44 = vld [vmem:[%s13237_s10 + $0x38] sm:$0xf0] }
 0x4b3   : > { %v3857_v33 = vpop.f32.mrf.mxu0  ;;  %v3650_v21 = vrot.slane %v3645_v56, 7 }
 0x4b4   : > { %v3439_v20 = vsel %vm1449_vm2, %v3407_v53, %v3438_v12  ;;  %v9104_v12 = vld [vmem:[%s13235_s7 + $0x38] sm:$0xf0] }
 0x4b5   : > { %v3441_v29 = vadd.f32 %v3439_v20, %v3234_v17  ;;  %v9107_v56 = vor.u32 %v10646_v11, %v9104_v12  ;;  %v9184_v20 = vld [vmem:[%s13237_s10 + $0x90] sm:$0xf]  ;;  %v10707_v11 = vld [vmem:[%s13237_s10 + $0xb8] sm:$0xf0] }
 0x4b7   : > { %v3434_v49 = vpop.f32.mrf.mxu3 }
 0x4b8   : > { %v3605_v0 = vpop.f32.mrf.mxu1  ;;  %v3646_v50 = vpop.f32.mrf.mxu2 }
 0x4b9   : > { %v10641_v50 = vld [vmem:[%s13235_s7 + $0x4] sm:$0xf0] }
 0x4bb   : > { %v4051_v54 = vpop.f32.mrf.mxu0 }
 0x4bf   : > { %v3618_v57 = vpop.f32.mrf.mxu3 }
 0x4c0   : > { %v3607_v58 = vpop.f32.mrf.mxu1  ;;  %v3842_v59 = vpop.f32.mrf.mxu2  ;;  %v3619_v14 = vadd.f32 %v3618_v57, %v3605_v0  ;;  %v9063_v0 = vld [vmem:[%s13235_s7] sm:$0xf]  ;;  %v9068_v57 = vor.u32 %v10640_v51, %v9065_v63  ;;  %v10696_v63 = vld [vmem:[%s13237_s10 + $0x64] sm:$0xf] }
 0x4c1   : > { %v3856_v15 = vadd.f32 %v3855_v47, %v3842_v59  ;;  %v9064_v52 = vor.u32 %v10641_v50, %v9063_v0  ;;  %v10642_v59 = vld [vmem:[%s13235_s7 + $0x14] sm:$0xf]  ;;  %v10688_v0 = vld [vmem:[%s13237_s10 + $0x20] sm:$0xf0]  ;;  %v9220_v50 = vld [vmem:[%s13237_s10 + $0xd8] sm:$0xf] }
 0x4c2   : > { %v3651_v23 = vsel %vm1449_vm2, %v3619_v14, %v3650_v21  ;;  %4300 = vmatpush.bf16.msrb.mxu1 %v9068_v57  ;;  %v9196_v14 = vld [vmem:[%s13237_s10 + $0xa8] sm:$0xf]  ;;  %v10703_v21 = vld [vmem:[%s13237_s10 + $0x98] sm:$0xf0] }
 0x4c3   : > { %v4053_v60 = vpop.f32.mrf.mxu0  ;;  %v3861_v24 = vrot.slane %v3856_v15, 7  ;;  %v3653_v30 = vadd.f32 %v3651_v23, %v3441_v29  ;;  %4287 = vmatpush.bf16.msrb.mxu0 %v9064_v52  ;;  %v10706_v15 = vld [vmem:[%s13237_s10 + $0xb0] sm:$0xf0]  ;;  %v10712_v52 = vld [vmem:[%s13237_s10 + $0xe0] sm:$0xf0] }
 0x4c4   : > { %v9078_v60 = vld [vmem:[%s13235_s7 + $0x18] sm:$0xf0]  ;;  %v9197_v17 = vor.u32 %v10706_v15, %v9196_v14  ;;  %v10714_v14 = vld [vmem:[%s13237_s10 + $0xf4] sm:$0xf]  ;;  %v9234_v15 = vld [vmem:[%s13237_s10 + $0xfc] sm:$0xf0] }
 0x4c5   : > { %v9081_v35 = vor.u32 %v10642_v59, %v9078_v60  ;;  %v10685_v59 = vld [vmem:[%s13237_s10 + $0x8] sm:$0xf0]  ;;  %v9208_v60 = vld [vmem:[%s13237_s10 + $0xc0] sm:$0xf] }
 0x4c7   : > { %v3620_v62 = vpop.f32.mrf.mxu3  ;;  %4354 = vmatpush.bf16.msra.mxu3 %v9081_v35 }
 0x4c8   : > { %v3829_v4 = vpop.f32.mrf.mxu1  ;;  %v3844_v5 = vpop.f32.mrf.mxu2  ;;  %v10645_v62 = vld [vmem:[%s13235_s7 + $0x24] sm:$0xf0] }
 0x4c9   : > { %v9090_v2 = vor.u32 %v10645_v62, %v9089_v61  ;;  %v9102_v5 = vld [vmem:[%s13235_s7 + $0x30] sm:$0xf]  ;;  %v10709_v61 = vld [vmem:[%s13237_s10 + $0xc8] sm:$0xf0] }
 0x4ca   : > { %v10717_v62 = vld [vmem:[%s13237_s10 + $0x10c] sm:$0xf] }
 0x4cb   : > { %4395 = vmatpush.bf16.msra.mxu0 %v9090_v2  ;;  %v9209_v2 = vor.u32 %v10709_v61, %v9208_v60  ;;  %v10695_v61 = vld [vmem:[%s13237_s10 + $0x58] sm:$0xf0] }
 0x4cf   : > { %v3816_v7 = vpop.f32.mrf.mxu3 }
 0x4d0   : > { %v3831_v9 = vpop.f32.mrf.mxu1  ;;  %v4064_v10 = vpop.f32.mrf.mxu2  ;;  %v3830_v22 = vadd.f32 %v3829_v4, %v3816_v7  ;;  %v9091_v4 = vld [vmem:[%s13235_s7 + $0x28] sm:$0xf0]  ;;  %v10647_v7 = vld [vmem:[%s13235_s7 + $0x34] sm:$0xf0] }
 0x4d1   : > { %v4065_v25 = vadd.f32 %v4064_v10, %v4051_v54  ;;  %v9076_v54 = vld [vmem:[%s13235_s7 + $0x10] sm:$0xf]  ;;  %v9094_v9 = vor.u32 %v10644_v1, %v9091_v4  ;;  %v9103_v10 = vor.u32 %v10647_v7, %v9102_v5  ;;  %v9246_v1 = vld [vmem:[%s13237_s10 + $0x114] sm:$0xf0]  ;;  %v10693_v5 = vld [vmem:[%s13237_s10 + $0x4c] sm:$0xf] }
 0x4d2   : > { %v3862_v3 = vsel %vm1449_vm2, %v3830_v22, %v3861_v24  ;;  %v9077_v58 = vor.u32 %v10643_v55, %v9076_v54  ;;  %v9185_v22 = vor.u32 %v10703_v21, %v9184_v20  ;;  %v9172_v24 = vld [vmem:[%s13237_s10 + $0x78] sm:$0xf]  ;;  %v9162_v54 = vld [vmem:[%s13237_s10 + $0x6c] sm:$0xf0]  ;;  %v9221_v55 = vor.u32 %v10712_v52, %v9220_v50  ;;  %s13244_s7 = sld [smem:[#allocation24_spill]] }
 0x4d3   : > { %v4070_v26 = vrot.slane %v4065_v25, 7  ;;  %v3864_v34 = vadd.f32 %v3862_v3, %v3653_v30  ;;  %v10700_v25 = vld [vmem:[%s13237_s10 + $0x80] sm:$0xf0]  ;;  %v9160_v3 = vld [vmem:[%s13237_s10 + $0x60] sm:$0xf]  ;;  %v9165_v57 = vor.u32 %v10696_v63, %v9162_v54  ;;  %v9249_v4 = vor.u32 %v10717_v62, %v9246_v1 }
 0x4d4   : > { %4341 = vmatpush.bf16.msrb.mxu2 %v9077_v58  ;;  %v9173_v29 = vor.u32 %v10700_v25, %v9172_v24  ;;  %v10697_v30 = vld [vmem:[%s13237_s10 + $0x68] sm:$0xf0]  ;;  %v9112_v58 = vld [vmem:[%s13237_s10] sm:$0xf]  ;;  %v9150_v7 = vld [vmem:[%s13237_s10 + $0x54] sm:$0xf0] }
 0x4d5   : > { %v9113_v35 = vor.u32 %v10685_v59, %v9112_v58  ;;  %v9192_v21 = vld [vmem:[%s13237_s10 + $0x98] sm:$0xf]  ;;  %v9252_v50 = vld [vmem:[%s13237_s10 + $0x110] sm:$0xf] }
 0x4d7   : > { %v3818_v13 = vpop.f32.mrf.mxu3 }
 0x4d8   : > { %v4025_v45 = vpop.f32.mrf.mxu1  ;;  %v4066_v6 = vpop.f32.mrf.mxu2  ;;  %v4214_v13 = vld [vmem:[%s13236_s1] sm:$0x1]  ;;  %s12321_s1 = scalar_lea.vmem [#allocation7], %s13187_s3  ;;  %s13238_s3 = sld [smem:[#allocation20_spill]] }
 0x4de   : > { %v9343_v12 = vld [vmem:[%s13238_s3 + $0xa8] sm:$0xf]  ;;  %v9331_v24 = vld [vmem:[%s13238_s3 + $0x90] sm:$0xf]  ;;  %v10667_v25 = vld [vmem:[%s13238_s3 + $0x98] sm:$0xf0] }
 0x4df   : > { %v4038_v19 = vpop.f32.mrf.mxu3  ;;  %v9391_v58 = vld [vmem:[%s13238_s3 + $0x108] sm:$0xf]  ;;  %v10682_v60 = vld [vmem:[%s13238_s3 + $0x110] sm:$0xf0] }
 0x4e0   : > { %v4027_v31 = vpop.f32.mrf.mxu1  ;;  %v4039_v16 = vadd.f32 %v4038_v19, %v4025_v45  ;;  %v9161_v19 = vor.u32 %v10697_v30, %v9160_v3  ;;  %v9332_v3 = vor.u32 %v10667_v25, %v9331_v24  ;;  %v10711_v30 = vld [vmem:[%s13237_s10 + $0xdc] sm:$0xf]  ;;  %v9283_v24 = vld [vmem:[%s13238_s3 + $0x30] sm:$0xf] }
 0x4e1   : > { %v9198_v31 = vld [vmem:[%s13237_s10 + $0xb4] sm:$0xf0]  ;;  %v10655_v25 = vld [vmem:[%s13238_s3 + $0x38] sm:$0xf0] }
 0x4e2   : > { %v4071_v32 = vsel %vm1449_vm2, %v4039_v16, %v4070_v26  ;;  %v10705_v26 = vld [vmem:[%s13237_s10 + $0xac] sm:$0xf] }
 0x4e3   : > { %v4073_v37 = vadd.f32 %v4071_v32, %v3864_v34  ;;  %v9201_v16 = vor.u32 %v10705_v26, %v9198_v31  ;;  %v9148_v34 = vld [vmem:[%s13237_s10 + $0x48] sm:$0xf]  ;;  %v10694_v32 = vld [vmem:[%s13237_s10 + $0x50] sm:$0xf0]  ;;  %v10687_v31 = vld [vmem:[%s13237_s10 + $0x1c] sm:$0xf] }
 0x4e5   : > { %v4099_v36 = vperm.slane %v4073_v37, 0  ;;  %v4100_v38 = vperm.slane %v4073_v37, 1  ;;  %v9149_v37 = vor.u32 %v10694_v32, %v9148_v34  ;;  %v9180_v34 = vld [vmem:[%s13237_s10 + $0x80] sm:$0xf] }
 0x4e7   : > { %v4103_v39 = vpack.c.bf16 %v4099_v36, %v4099_v36  ;;  %v4104_v40 = vpack.c.bf16 %v4100_v38, %v4100_v38  ;;  %v4040_v41 = vpop.f32.mrf.mxu3  ;;  %v9244_v36 = vld [vmem:[%s13237_s10 + $0x108] sm:$0xf]  ;;  %v10718_v38 = vld [vmem:[%s13237_s10 + $0x110] sm:$0xf0] }
 0x4e8   : > { %v9186_v41 = vld [vmem:[%s13237_s10 + $0x9c] sm:$0xf0] }
 0x4e9   : > { %4189 = vmatmul.bf16.vlgmr.msrb.gmra.mxu3 %v4103_v39  ;;  %9047 = vmatmul.msk.bf16.vlgmr.msra.gmra.mxu1 %vm1174_vm1, %v4104_v40  ;;  %v9245_v39 = vor.u32 %v10718_v38, %v9244_v36  ;;  %v10702_v40 = vld [vmem:[%s13237_s10 + $0x94] sm:$0xf]  ;;  %v9319_v36 = vld [vmem:[%s13238_s3 + $0x78] sm:$0xf]  ;;  %v10664_v38 = vld [vmem:[%s13238_s3 + $0x80] sm:$0xf0] }
 0x4ea   : > { %4408 = vmatpush.bf16.msra.mxu1 %v9094_v9  ;;  %4462 = vmatpush.bf16.msrb.mxu3 %v9107_v56  ;;  %v9189_v42 = vor.u32 %v10702_v40, %v9186_v41  ;;  %v9204_v9 = vld [vmem:[%s13237_s10 + $0xb0] sm:$0xf]  ;;  %v10670_v56 = vld [vmem:[%s13238_s3 + $0xb0] sm:$0xf0] }
 0x566   : > { %v4203_v47 = vpop.f32.mrf.mxu1 }
 0x56c   : > { %v4190_v27 = vpop.f32.mrf.mxu3 }
 0x56d   : > { %v4191_v28 = vadd.f32 %v4190_v27, %v4105_v8  ;;  %v9137_v8 = vor.u32 %v10691_v44, %v9136_v43  ;;  %v10715_v27 = vld [vmem:[%s13237_s10 + $0xf8] sm:$0xf0]  ;;  %v12382_v43 = vld [vmem:[%s13239_s5 + $0x2] sm:$0x3]  ;;  %v10708_v44 = vld [vmem:[%s13237_s10 + $0xc4] sm:$0xf] }
 0x56e   : > { %v4205_v33 = vpop.f32.mrf.mxu1 }
 0x56f   : > { %v4204_v48 = vadd.f32 %v4203_v47, %v4191_v28  ;;  %v9232_v47 = vld [vmem:[%s13237_s10 + $0xf0] sm:$0xf]  ;;  %v10699_v28 = vld [vmem:[%s13237_s10 + $0x7c] sm:$0xf]  ;;  %v9174_v33 = vld [vmem:[%s13237_s10 + $0x84] sm:$0xf0] }
 0x571   : > { %v4213_v46 = vpack.c.bf16 %v4204_v48, %v4204_v48  ;;  %v9233_v48 = vor.u32 %v10715_v27, %v9232_v47  ;;  %v9210_v47 = vld [vmem:[%s13237_s10 + $0xcc] sm:$0xf0]  ;;  %v10684_v27 = vld [vmem:[%s13237_s10 + $0x4] sm:$0xf] }
 0x573   : > { %9060 = vmatmul.msk.bf16.vlgmr.msra.gmra.mxu2 %vm4233_vm7, %v4213_v46  ;;  %v9177_v46 = vor.u32 %v10699_v28, %v9174_v33  ;;  %v9114_v28 = vld [vmem:[%s13237_s10 + $0xc] sm:$0xf0]  ;;  %v9168_v33 = vld [vmem:[%s13237_s10 + $0x68] sm:$0xf] }
 0x574   : > { %v4192_v49 = vpop.f32.mrf.mxu3  ;;  %4449 = vmatpush.bf16.msra.mxu2 %v9103_v10  ;;  %v9153_v10 = vor.u32 %v10693_v5, %v9150_v7  ;;  %v9240_v5 = vld [vmem:[%s13237_s10 + $0xf8] sm:$0xf]  ;;  %v10716_v7 = vld [vmem:[%s13237_s10 + $0x100] sm:$0xf0] }
 0x575   : > { %v9124_v49 = vld [vmem:[%s13237_s10 + $0x18] sm:$0xf] }
 0x576   : > { %v9125_v51 = vor.u32 %v10688_v0, %v9124_v49  ;;  %v9117_v49 = vor.u32 %v10684_v27, %v9114_v28  ;;  %v10698_v0 = vld [vmem:[%s13237_s10 + $0x70] sm:$0xf0] }
 0x577   : > { %v9169_v63 = vor.u32 %v10698_v0, %v9168_v33  ;;  %v9355_v33 = vld [vmem:[%s13238_s3 + $0xc0] sm:$0xf] }
 0x5f6   : > { %v4246_v53 = vpop.f32.mrf.mxu2 }
 0x5f7   : > { %v4247_v45 = vadd.f32 %v4246_v53, %v4214_v13  ;;  %v9205_v13 = vor.u32 %v10707_v11, %v9204_v9  ;;  %v9344_v53 = vor.u32 %v10670_v56, %v9343_v12  ;;  %v9295_v11 = vld [vmem:[%s13238_s3 + $0x48] sm:$0xf]  ;;  %v10658_v12 = vld [vmem:[%s13238_s3 + $0x50] sm:$0xf0]  ;;  %v9379_v56 = vld [vmem:[%s13238_s3 + $0xf0] sm:$0xf] }
 0x5f9   : > { %v4259_v6 = vpack.c.bf16 %v4247_v45, %v4247_v45  ;;  %4251 = vst.msk [vmem:[%s12321_s1] sm:$0x1] %vm4250_vm9, %v4247_v45  ;;  %v9237_v45 = vor.u32 %v10714_v14, %v9234_v15  ;;  %v10679_v14 = vld [vmem:[%s13238_s3 + $0xf8] sm:$0xf0]  ;;  %v9144_v15 = vld [vmem:[%s13237_s10 + $0x38] sm:$0xf] }
 0x5fb   : > { %9069 = vmatmul.msk.bf16.vlgmr.msrb.gmra.mxu0 %vm4276_vm8, %v4259_v6  ;;  %9070 = vmatmul.msk.bf16.vlgmr.msrb.gmra.mxu1 %vm4276_vm8, %v4259_v6 }
 0x5fc   : > { %9082 = vmatmul.msk.bf16.vlgmr.msrb.gmra.mxu2 %vm4276_vm8, %v4259_v6  ;;  %9083 = vmatmul.msk.bf16.vlgmr.msra.gmra.mxu3 %vm4276_vm8, %v4259_v6 }
 0x5fd   : > { %4786 = vmatpush.bf16.msrb.mxu0 %v9197_v17  ;;  %4812 = vmatpush.bf16.msrb.mxu2 %v9201_v16  ;;  %v9138_v17 = vld [vmem:[%s13237_s10 + $0x3c] sm:$0xf0]  ;;  %v9126_v16 = vld [vmem:[%s13237_s10 + $0x24] sm:$0xf0] }
 0x5fe   : > { %v4248_v23 = vpop.f32.mrf.mxu2  ;;  %4803 = vmatpush.bf16.msrb.mxu1 %v9245_v39  ;;  %4829 = vmatpush.bf16.msra.mxu3 %v9249_v4  ;;  %v9129_v32 = vor.u32 %v10687_v31, %v9126_v16  ;;  %v9392_v4 = vor.u32 %v10682_v60, %v9391_v58  ;;  %v9367_v16 = vld [vmem:[%s13238_s3 + $0xd8] sm:$0xf] }
 0x601   : > { %4787 = vmatpush.bf16.msrb.mxu0 %v9185_v22  ;;  %4813 = vmatpush.bf16.msrb.mxu2 %v9189_v42  ;;  %v10704_v22 = vld [vmem:[%s13237_s10 + $0xa0] sm:$0xf0]  ;;  %v9320_v42 = vor.u32 %v10664_v38, %v9319_v36  ;;  %v10689_v38 = vld [vmem:[%s13237_s10 + $0x28] sm:$0xf0] }
 0x602   : > { %4804 = vmatpush.bf16.msrb.mxu1 %v9233_v48  ;;  %v9193_v23 = vor.u32 %v10704_v22, %v9192_v21  ;;  %4830 = vmatpush.bf16.msra.mxu3 %v9237_v45  ;;  %v10692_v45 = vld [vmem:[%s13237_s10 + $0x40] sm:$0xf0] }
 0x605   : > { %4788 = vmatpush.bf16.msrb.mxu0 %v9173_v29  ;;  %4814 = vmatpush.bf16.msrb.mxu2 %v9177_v46  ;;  %v4260_v29 = vld [vmem:[%s13239_s5] sm:$0x3] }
 0x606   : > { %4805 = vmatpush.bf16.msrb.mxu1 %v9221_v55  ;;  %v4272_v39 = vperm.slane %v4260_v29, 0  ;;  %v4273_v40 = vperm.slane %v4260_v29, 1  ;;  %v9307_v55 = vld [vmem:[%s13238_s3 + $0x60] sm:$0xf] }
 0x609   : > { %4789 = vmatpush.bf16.msrb.mxu0 %v9161_v19  ;;  %4815 = vmatpush.bf16.msrb.mxu2 %v9165_v57  ;;  %v9222_v19 = vld [vmem:[%s13237_s10 + $0xe4] sm:$0xf0]  ;;  %v10661_v57 = vld [vmem:[%s13238_s3 + $0x68] sm:$0xf0] }
 0x60a   : > { %4806 = vmatpush.bf16.msrb.mxu1 %v9209_v2  ;;  %v9225_v26 = vor.u32 %v10711_v30, %v9222_v19  ;;  %v9308_v59 = vor.u32 %v10661_v57, %v9307_v55  ;;  %v4331_v2 = vperm.slane %v12382_v43, 1  ;;  %v9086_v19 = vld [vmem:[%s13239_s5 + $0x4] sm:$0x3] }
 0x60b   : > { %9095 = vmatmul.msk.bf16.vlgmr.msra.gmra.mxu0 %vm4276_vm8, %v4259_v6  ;;  %9096 = vmatmul.msk.bf16.vlgmr.msra.gmra.mxu1 %vm4276_vm8, %v4259_v6  ;;  %v4384_v0 = vperm.slane %v9086_v19, 0 }
 0x60c   : > { %9108 = vmatmul.msk.bf16.vlgmr.msra.gmra.mxu2 %vm4276_vm8, %v4259_v6  ;;  %9109 = vmatmul.msk.bf16.vlgmr.msrb.gmra.mxu3 %vm4276_vm8, %v4259_v6  ;;  %v10690_v6 = vld [vmem:[%s13237_s10 + $0x34] sm:$0xf] }
 0x60d   : > { %4790 = vmatpush.bf16.msrb.mxu0 %v9149_v37  ;;  %4816 = vmatpush.bf16.msrb.mxu2 %v9153_v10  ;;  %v9141_v20 = vor.u32 %v10690_v6, %v9138_v17  ;;  %v10701_v37 = vld [vmem:[%s13237_s10 + $0x88] sm:$0xf0]  ;;  %v9241_v10 = vor.u32 %v10716_v7, %v9240_v5  ;;  %v4330_v6 = vperm.slane %v12382_v43, 0  ;;  %v9380_v17 = vor.u32 %v10679_v14, %v9379_v56  ;;  %v9271_v43 = vld [vmem:[%s13238_s3 + $0x18] sm:$0xf] }
 0x60e   : > { %4838 = vmatpush.bf16.msra.mxu1 %v9205_v13  ;;  %v9181_v41 = vor.u32 %v10701_v37, %v9180_v34  ;;  %4831 = vmatpush.bf16.msra.mxu3 %v9225_v26  ;;  %v9145_v26 = vor.u32 %v10692_v45, %v9144_v15  ;;  %v10676_v34 = vld [vmem:[%s13238_s3 + $0xe0] sm:$0xf0]  ;;  %v9284_v37 = vor.u32 %v10655_v25, %v9283_v24  ;;  %v9351_v25 = vld [vmem:[%s13238_s3 + $0xb0] sm:$0xf] }
 0x60f   : > { %v9368_v36 = vor.u32 %v10676_v34, %v9367_v16 }
 0x611   : > { %4791 = vmatpush.bf16.msrb.mxu0 %v9137_v8  ;;  %4817 = vmatpush.bf16.msrb.mxu2 %v9141_v20  ;;  %v9213_v8 = vor.u32 %v10708_v44, %v9210_v47  ;;  %v9228_v20 = vld [vmem:[%s13237_s10 + $0xe0] sm:$0xf]  ;;  %v10652_v44 = vld [vmem:[%s13238_s3 + $0x20] sm:$0xf0] }
 0x612   : > { %4839 = vmatpush.bf16.msra.mxu1 %v9193_v23  ;;  %v10713_v23 = vld [vmem:[%s13237_s10 + $0xe8] sm:$0xf0]  ;;  %v9272_v28 = vor.u32 %v10652_v44, %v9271_v43  ;;  %v9339_v44 = vld [vmem:[%s13238_s3 + $0x98] sm:$0xf] }
 0x613   : > { %4832 = vmatpush.bf16.msra.mxu3 %v9213_v8  ;;  %v9229_v31 = vor.u32 %v10713_v23, %v9228_v20 }
 0x615   : > { %4792 = vmatpush.bf16.msrb.mxu0 %v9125_v51  ;;  %4818 = vmatpush.bf16.msrb.mxu2 %v9129_v32  ;;  %v10719_v51 = vld [vmem:[%s13237_s10 + $0x118] sm:$0xf0]  ;;  %v9132_v32 = vld [vmem:[%s13237_s10 + $0x20] sm:$0xf] }
 0x616   : > { %4840 = vmatpush.bf16.msra.mxu1 %v9181_v41  ;;  %v9253_v54 = vor.u32 %v10719_v51, %v9252_v50  ;;  %v9133_v27 = vor.u32 %v10689_v38, %v9132_v32  ;;  %v10683_v32 = vld [vmem:[%s13238_s3 + $0x118] sm:$0xf0] }
 0x618   : > { %4855 = vmatpush.bf16.msrb.mxu3 %v9253_v54  ;;  %v9259_v54 = vld [vmem:[%s13238_s3] sm:$0xf] }
 0x619   : > { %4793 = vmatpush.bf16.msrb.mxu0 %v9113_v35  ;;  %v9156_v35 = vld [vmem:[%s13237_s10 + $0x50] sm:$0xf]  ;;  %4819 = vmatpush.bf16.msrb.mxu2 %v9117_v49 }
 0x61a   : > { %4841 = vmatpush.bf16.msra.mxu1 %v9169_v63  ;;  %v9157_v9 = vor.u32 %v10695_v61, %v9156_v35  ;;  %v10686_v63 = vld [vmem:[%s13237_s10 + $0x10] sm:$0xf0]  ;;  %v9099_v35 = vld [vmem:[%s13239_s5 + $0x6] sm:$0x3]  ;;  %s13240_s5 = sld [smem:[#allocation22_spill]] }
 0x61b   : > { %v4438_v5 = vperm.slane %v9099_v35, 0 }
 0x61c   : > { %4856 = vmatpush.bf16.msrb.mxu3 %v9241_v10 }
 0x61d   : > { %5058 = vmatpush.bf16.msra.mxu0 %v9344_v53  ;;  %5075 = vmatpush.bf16.msra.mxu2 %v9392_v4  ;;  %v9296_v53 = vor.u32 %v10658_v12, %v9295_v11 }
 0x61e   : > { %4842 = vmatpush.bf16.msra.mxu1 %v9157_v9 }
 0x620   : > { %4857 = vmatpush.bf16.msrb.mxu3 %v9229_v31 }
 0x621   : > { %5059 = vmatpush.bf16.msra.mxu0 %v9332_v3  ;;  %5076 = vmatpush.bf16.msra.mxu2 %v9380_v17 }
 0x622   : > { %4843 = vmatpush.bf16.msra.mxu1 %v9145_v26 }
 0x625   : > { %5060 = vmatpush.bf16.msra.mxu0 %v9320_v42  ;;  %5077 = vmatpush.bf16.msra.mxu2 %v9368_v36 }
 0x626   : > { %4844 = vmatpush.bf16.msra.mxu1 %v9133_v27  ;;  %v9381_v27 = vld [vmem:[%s13238_s3 + $0xfc] sm:$0xf0] }
 0x629   : > { %5061 = vmatpush.bf16.msra.mxu0 %v9308_v59  ;;  %v10649_v59 = vld [vmem:[%s13238_s3 + $0x8] sm:$0xf0] }
 0x62a   : > { %v9260_v61 = vor.u32 %v10649_v59, %v9259_v54  ;;  %v10675_v54 = vld [vmem:[%s13238_s3 + $0xdc] sm:$0xf] }
 0x62d   : > { %5062 = vmatpush.bf16.msra.mxu0 %v9296_v53 }
 0x631   : > { %5063 = vmatpush.bf16.msra.mxu0 %v9284_v37 }
 0x635   : > { %5064 = vmatpush.bf16.msra.mxu0 %v9272_v28  ;;  %v9387_v28 = vld [vmem:[%s13238_s3 + $0xf8] sm:$0xf] }
 0x639   : > { %5065 = vmatpush.bf16.msra.mxu0 %v9260_v61  ;;  %v9309_v61 = vld [vmem:[%s13238_s3 + $0x6c] sm:$0xf0] }
 0x678   : > { %v4289_v48 = vpop.f32.mrf.mxu0  ;;  %v4302_v46 = vpop.f32.mrf.mxu1 }
 0x679   : > { %v4303_v52 = vadd.f32 %v4302_v46, %v4273_v40  ;;  %v4290_v62 = vadd.f32 %v4289_v48, %v4272_v39  ;;  %v9216_v39 = vld [vmem:[%s13237_s10 + $0xc8] sm:$0xf]  ;;  %v10710_v40 = vld [vmem:[%s13237_s10 + $0xd0] sm:$0xf0]  ;;  %v10673_v48 = vld [vmem:[%s13238_s3 + $0xc8] sm:$0xf0] }
 0x67a   : > { %v9217_v47 = vor.u32 %v10710_v40, %v9216_v39  ;;  %v4385_v46 = vperm.slane %v9086_v19, 1  ;;  %v9356_v49 = vor.u32 %v10673_v48, %v9355_v33  ;;  %v9399_v19 = vld [vmem:[%s13238_s3 + $0x110] sm:$0xf]  ;;  %v10666_v40 = vld [vmem:[%s13238_s3 + $0x94] sm:$0xf] }
 0x67b   : > { %v4308_v1 = vrot.slane %v4303_v52, 7  ;;  %v9120_v52 = vld [vmem:[%s13237_s10 + $0x8] sm:$0xf]  ;;  %v9400_v43 = vor.u32 %v10683_v32, %v9399_v19  ;;  %v10680_v33 = vld [vmem:[%s13238_s3 + $0x100] sm:$0xf0] }
 0x67c   : > { %4858 = vmatpush.bf16.msrb.mxu3 %v9217_v47  ;;  %v9121_v58 = vor.u32 %v10686_v63, %v9120_v52  ;;  %5078 = vmatpush.bf16.msra.mxu2 %v9356_v49  ;;  %v10668_v47 = vld [vmem:[%s13238_s3 + $0xa0] sm:$0xf0]  ;;  %v10663_v49 = vld [vmem:[%s13238_s3 + $0x7c] sm:$0xf]  ;;  %v9327_v52 = vld [vmem:[%s13238_s3 + $0x80] sm:$0xf] }
 0x67d   : > { %v4309_v13 = vsel %vm1449_vm2, %v4290_v62, %v4308_v1  ;;  %v10665_v63 = vld [vmem:[%s13238_s3 + $0x88] sm:$0xf0]  ;;  %v10738_v32 = vld [vmem:[%s13240_s5 + $0x94] sm:$0xf] }
 0x67e   : > { %4312 = vst.msk [vmem:[#allocation4 + $0x1] ss:$8 sm:$0x3] %vm11461_vm3, %v4309_v13  ;;  %4845 = vmatpush.bf16.msra.mxu1 %v9121_v58  ;;  %v10677_v58 = vld [vmem:[%s13238_s3 + $0xe8] sm:$0xf0] }
 0x67f   : > { %v4343_v21 = vpop.f32.mrf.mxu2  ;;  %v4356_v22 = vpop.f32.mrf.mxu3 }
 0x680   : > { %v4357_v29 = vadd.f32 %v4356_v22, %v4331_v2  ;;  %v4291_v3 = vpop.f32.mrf.mxu0  ;;  %v4304_v30 = vpop.f32.mrf.mxu1  ;;  %v4344_v41 = vadd.f32 %v4343_v21, %v4330_v6  ;;  %v4439_v2 = vperm.slane %v9099_v35, 1  ;;  %v10669_v21 = vld [vmem:[%s13238_s3 + $0xac] sm:$0xf]  ;;  %v9345_v22 = vld [vmem:[%s13238_s3 + $0xb4] sm:$0xf0] }
 0x681   : > { %v10681_v3 = vld [vmem:[%s13238_s3 + $0x10c] sm:$0xf]  ;;  %v9393_v30 = vld [vmem:[%s13238_s3 + $0x114] sm:$0xf0]  ;;  %v9348_v38 = vor.u32 %v10669_v21, %v9345_v22  ;;  %v10660_v35 = vld [vmem:[%s13238_s3 + $0x64] sm:$0xf] }
 0x682   : > { %v4362_v42 = vrot.slane %v4357_v29, 7  ;;  %v10671_v29 = vld [vmem:[%s13238_s3 + $0xb8] sm:$0xf0]  ;;  %v10742_v21 = vld [vmem:[%s13240_s5 + $0xb0] sm:$0xf0] }
 0x683   : > { %v9352_v39 = vor.u32 %v10671_v29, %v9351_v25  ;;  %v10741_v22 = vld [vmem:[%s13240_s5 + $0xac] sm:$0xf]  ;;  %v10654_v29 = vld [vmem:[%s13238_s3 + $0x34] sm:$0xf] }
 0x684   : > { %v4363_v8 = vsel %vm1449_vm2, %v4344_v41, %v4362_v42  ;;  %v9333_v41 = vld [vmem:[%s13238_s3 + $0x9c] sm:$0xf0]  ;;  %v9396_v42 = vor.u32 %v10681_v3, %v9393_v30 }
 0x685   : > { %4366 = vst.msk [vmem:[#allocation4 + $0x2] ss:$8 sm:$0x3] %vm11461_vm3, %v4363_v8  ;;  %v10678_v8 = vld [vmem:[%s13238_s3 + $0xf4] sm:$0xf]  ;;  %v9336_v48 = vor.u32 %v10666_v40, %v9333_v41 }
 0x686   : > { %v9285_v3 = vld [vmem:[%s13238_s3 + $0x3c] sm:$0xf0]  ;;  %v10651_v40 = vld [vmem:[%s13238_s3 + $0x1c] sm:$0xf]  ;;  %v9273_v41 = vld [vmem:[%s13238_s3 + $0x24] sm:$0xf0] }
 0x687   : > { %v4345_v50 = vpop.f32.mrf.mxu2  ;;  %v4358_v51 = vpop.f32.mrf.mxu3 }
 0x688   : > { %v4397_v55 = vpop.f32.mrf.mxu0  ;;  %v4410_v57 = vpop.f32.mrf.mxu1  ;;  %v9384_v50 = vor.u32 %v10678_v8, %v9381_v27  ;;  %v9388_v51 = vor.u32 %v10680_v33, %v9387_v28  ;;  %v10736_v8 = vld [vmem:[%s13240_s5 + $0x80] sm:$0xf0]  ;;  %v10735_v27 = vld [vmem:[%s13240_s5 + $0x7c] sm:$0xf]  ;;  %v9468_v28 = vld [vmem:[%s13240_s5 + $0x84] sm:$0xf0]  ;;  %v9276_v33 = vor.u32 %v10651_v40, %v9273_v41 }
 0x689   : > { %v4411_v60 = vadd.f32 %v4410_v57, %v4385_v46  ;;  %v4398_v62 = vadd.f32 %v4397_v55, %v4384_v0  ;;  %v9340_v46 = vor.u32 %v10668_v47, %v9339_v44  ;;  %v9321_v0 = vld [vmem:[%s13238_s3 + $0x84] sm:$0xf0]  ;;  %v9375_v57 = vld [vmem:[%s13238_s3 + $0xe0] sm:$0xf]  ;;  %v9466_v47 = vld [vmem:[%s13240_s5 + $0x78] sm:$0xf] }
 0x68a   : > { %v9369_v55 = vld [vmem:[%s13238_s3 + $0xe4] sm:$0xf0]  ;;  %v9324_v59 = vor.u32 %v10663_v49, %v9321_v0  ;;  %v9279_v44 = vld [vmem:[%s13238_s3 + $0x20] sm:$0xf]  ;;  %v9261_v49 = vld [vmem:[%s13238_s3 + $0xc] sm:$0xf0]  ;;  %v9467_v0 = vor.u32 %v10736_v8, %v9466_v47 }
 0x68b   : > { %v4416_v1 = vrot.slane %v4411_v60, 7  ;;  %v9328_v60 = vor.u32 %v10665_v63, %v9327_v52  ;;  %v10650_v52 = vld [vmem:[%s13238_s3 + $0x10] sm:$0xf0]  ;;  %v9454_v63 = vld [vmem:[%s13240_s5 + $0x60] sm:$0xf] }
 0x68c   : > { %v9498_v40 = vld [vmem:[%s13240_s5 + $0xb0] sm:$0xf]  ;;  %v10743_v41 = vld [vmem:[%s13240_s5 + $0xb8] sm:$0xf0] }
 0x68d   : > { %v4417_v4 = vsel %vm1449_vm2, %v4398_v62, %v4416_v1  ;;  %v9372_v62 = vor.u32 %v10675_v54, %v9369_v55  ;;  %v9376_v1 = vor.u32 %v10677_v58, %v9375_v57  ;;  %v10733_v54 = vld [vmem:[%s13240_s5 + $0x68] sm:$0xf0]  ;;  %v9538_v55 = vld [vmem:[%s13240_s5 + $0x108] sm:$0xf]  ;;  %v10754_v57 = vld [vmem:[%s13240_s5 + $0x110] sm:$0xf0] }
 0x68e   : > { %4420 = vst.msk [vmem:[#allocation4 + $0x3] ss:$8 sm:$0x3] %vm11461_vm3, %v4417_v4  ;;  %v10662_v4 = vld [vmem:[%s13238_s3 + $0x70] sm:$0xf0] }
 0x68f   : > { %v4451_v7 = vpop.f32.mrf.mxu2  ;;  %v4464_v9 = vpop.f32.mrf.mxu3  ;;  %v10732_v58 = vld [vmem:[%s13240_s5 + $0x64] sm:$0xf]  ;;  %v9504_v47 = vld [vmem:[%s13240_s5 + $0xcc] sm:$0xf0] }
 0x690   : > { %v4465_v10 = vadd.f32 %v4464_v9, %v4439_v2  ;;  %v4399_v11 = vpop.f32.mrf.mxu0  ;;  %v4412_v12 = vpop.f32.mrf.mxu1  ;;  %v4452_v56 = vadd.f32 %v4451_v7, %v4438_v5  ;;  %v9315_v2 = vld [vmem:[%s13238_s3 + $0x68] sm:$0xf]  ;;  %v10672_v5 = vld [vmem:[%s13238_s3 + $0xc4] sm:$0xf]  ;;  %v9357_v7 = vld [vmem:[%s13238_s3 + $0xcc] sm:$0xf0] }
 0x691   : > { %v9363_v9 = vld [vmem:[%s13238_s3 + $0xc8] sm:$0xf]  ;;  %v9312_v11 = vor.u32 %v10660_v35, %v9309_v61  ;;  %v9316_v12 = vor.u32 %v10662_v4, %v9315_v2  ;;  %v9455_v61 = vor.u32 %v10733_v54, %v9454_v63  ;;  %v10753_v2 = vld [vmem:[%s13240_s5 + $0x10c] sm:$0xf]  ;;  %v9540_v4 = vld [vmem:[%s13240_s5 + $0x114] sm:$0xf0] }
 0x692   : > { %v4470_v13 = vrot.slane %v4465_v10, 7  ;;  %v10674_v10 = vld [vmem:[%s13238_s3 + $0xd0] sm:$0xf0]  ;;  %v9546_v54 = vld [vmem:[%s13240_s5 + $0x110] sm:$0xf] }
 0x694   : > { %v4471_v53 = vsel %vm1449_vm2, %v4452_v56, %v4470_v13  ;;  %v10657_v56 = vld [vmem:[%s13238_s3 + $0x4c] sm:$0xf]  ;;  %v9297_v13 = vld [vmem:[%s13238_s3 + $0x54] sm:$0xf0] }
 0x695   : > { %4474 = vst.msk [vmem:[#allocation4 + $0x4] ss:$8 sm:$0x3] %vm11461_vm3, %v4471_v53  ;;  %v9360_v53 = vor.u32 %v10672_v5, %v9357_v7  ;;  %v10730_v7 = vld [vmem:[%s13240_s5 + $0x50] sm:$0xf0] }
 0x697   : > { %v4453_v14 = vpop.f32.mrf.mxu2  ;;  %v4466_v15 = vpop.f32.mrf.mxu3 }
 0x698   : > { %v9364_v14 = vor.u32 %v10674_v10, %v9363_v9  ;;  %v9303_v15 = vld [vmem:[%s13238_s3 + $0x50] sm:$0xf]  ;;  %v10751_v10 = vld [vmem:[%s13240_s5 + $0xf8] sm:$0xf0] }
 0x699   : > { %v9526_v9 = vld [vmem:[%s13240_s5 + $0xf0] sm:$0xf] }
 0x69c   : > { %v4476_v45 = vld [vmem:[#allocation4] sm:$0x3f]  ;;  %v4477_v6 = vld [vmem:[#allocation4 + $0x8] sm:$0x3f] }
 0x69d   : > { %v12440_v17 = vpack.c.bf16 %v4476_v45, %v4476_v45  ;;  %v12442_v20 = vpack.c.bf16 %v4477_v6, %v4477_v6  ;;  %v10659_v45 = vld [vmem:[%s13238_s3 + $0x58] sm:$0xf0]  ;;  %v9490_v6 = vld [vmem:[%s13240_s5 + $0xa8] sm:$0xf] }
 0x69e   : > { %v9304_v25 = vor.u32 %v10659_v45, %v9303_v15  ;;  %v9491_v30 = vor.u32 %v10742_v21, %v9490_v6  ;;  %v10750_v15 = vld [vmem:[%s13240_s5 + $0xf4] sm:$0xf]  ;;  %v9528_v45 = vld [vmem:[%s13240_s5 + $0xfc] sm:$0xf0]  ;;  %v10727_v21 = vld [vmem:[%s13240_s5 + $0x38] sm:$0xf0] }
 0x69f   : > { %v4579_v23 = vshll.u32 %v12440_v17, 16  ;;  %v4586_v24 = vshll.u32 %v12442_v20, 16  ;;  %v4577_v26 = vshrl.u32 %v12440_v17, 16  ;;  %v4584_v16 = vshrl.u32 %v12442_v20, 16 }
 0x6a1   : > { %v4581_v31 = vrot.slane %v4579_v23, 1  ;;  %v4588_v34 = vrot.slane %v4586_v24, 1  ;;  %v9492_v23 = vld [vmem:[%s13240_s5 + $0xb4] sm:$0xf0]  ;;  %v9300_v24 = vor.u32 %v10657_v56, %v9297_v13  ;;  %v9543_v56 = vor.u32 %v10753_v2, %v9540_v4  ;;  %v9462_v2 = vld [vmem:[%s13240_s5 + $0x68] sm:$0xf] }
 0x6a2   : > { %v9495_v19 = vor.u32 %v10741_v22, %v9492_v23  ;;  %v9514_v22 = vld [vmem:[%s13240_s5 + $0xd8] sm:$0xf]  ;;  %v10748_v23 = vld [vmem:[%s13240_s5 + $0xe0] sm:$0xf0]  ;;  %v10734_v4 = vld [vmem:[%s13240_s5 + $0x70] sm:$0xf0] }
 0x6a3   : > { %v12456_v37 = vor.u32 %v4581_v31, %v4577_v26  ;;  %v12458_v36 = vor.u32 %v4588_v34, %v4584_v16  ;;  %v9291_v26 = vld [vmem:[%s13238_s3 + $0x38] sm:$0xf]  ;;  %v10656_v31 = vld [vmem:[%s13238_s3 + $0x40] sm:$0xf0]  ;;  %v9478_v16 = vld [vmem:[%s13240_s5 + $0x90] sm:$0xf] }
 0x6a4   : > { %v10739_v34 = vld [vmem:[%s13240_s5 + $0x98] sm:$0xf0] }
 0x6a5   : > { %4794 = vmatmul.bf16.vlgmr.msrb.gmra.mxu0 %v12456_v37  ;;  %9254 = vmatmul.msk.bf16.vlgmr.msrb.gmra.mxu1 %vm1174_vm1, %v12458_v36 }
 0x6a6   : > { %4820 = vmatmul.bf16.vlgmr.msrb.gmra.mxu2 %v12456_v37  ;;  %9255 = vmatmul.msk.bf16.vlgmr.msra.gmra.mxu3 %vm1174_vm1, %v12458_v36 }
 0x6a7   : > { %5084 = vmatpush.bf16.msra.mxu3 %v9348_v38  ;;  %5110 = vmatpush.bf16.msrb.mxu2 %v9352_v39  ;;  %v9480_v38 = vld [vmem:[%s13240_s5 + $0x9c] sm:$0xf0]  ;;  %v9292_v39 = vor.u32 %v10656_v31, %v9291_v26  ;;  %v10724_v26 = vld [vmem:[%s13240_s5 + $0x20] sm:$0xf0]  ;;  %v10747_v31 = vld [vmem:[%s13240_s5 + $0xdc] sm:$0xf] }
 0x6a8   : > { %5101 = vmatpush.bf16.msrb.mxu1 %v9396_v42  ;;  %5127 = vmatpush.bf16.msrb.mxu0 %v9400_v43  ;;  %v9479_v42 = vor.u32 %v10739_v34, %v9478_v16  ;;  %v9483_v43 = vor.u32 %v10738_v32, %v9480_v38  ;;  %v9516_v16 = vld [vmem:[%s13240_s5 + $0xe4] sm:$0xf0]  ;;  %v9502_v32 = vld [vmem:[%s13240_s5 + $0xc0] sm:$0xf]  ;;  %v10745_v38 = vld [vmem:[%s13240_s5 + $0xc8] sm:$0xf0] }
 0x6ab   : > { %5085 = vmatpush.bf16.msra.mxu3 %v9336_v48  ;;  %5111 = vmatpush.bf16.msrb.mxu2 %v9340_v46  ;;  %v10648_v46 = vld [vmem:[%s13238_s3 + $0x4] sm:$0xf] }
 0x6ac   : > { %5102 = vmatpush.bf16.msrb.mxu1 %v9384_v50  ;;  %5128 = vmatpush.bf16.msrb.mxu0 %v9388_v51  ;;  %v9471_v50 = vor.u32 %v10735_v27, %v9468_v28  ;;  %v9267_v51 = vld [vmem:[%s13238_s3 + $0x8] sm:$0xf]  ;;  %v9499_v27 = vor.u32 %v10743_v41, %v9498_v40  ;;  %v9406_v28 = vld [vmem:[%s13240_s5] sm:$0xf] }
 0x6ad   : > { %v9268_v35 = vor.u32 %v10650_v52, %v9267_v51 }
 0x6af   : > { %5086 = vmatpush.bf16.msra.mxu3 %v9324_v59  ;;  %5112 = vmatpush.bf16.msrb.mxu2 %v9328_v60  ;;  %v9456_v59 = vld [vmem:[%s13240_s5 + $0x6c] sm:$0xf0]  ;;  %v9264_v60 = vor.u32 %v10648_v46, %v9261_v49  ;;  %v9486_v49 = vld [vmem:[%s13240_s5 + $0x98] sm:$0xf] }
 0x6b0   : > { %5103 = vmatpush.bf16.msrb.mxu1 %v9372_v62  ;;  %5129 = vmatpush.bf16.msrb.mxu0 %v9376_v1  ;;  %v9539_v62 = vor.u32 %v10754_v57, %v9538_v55  ;;  %v9442_v1 = vld [vmem:[%s13240_s5 + $0x48] sm:$0xf]  ;;  %v9459_v5 = vor.u32 %v10732_v58, %v9456_v59  ;;  %v9408_v46 = vld [vmem:[%s13240_s5 + $0xc] sm:$0xf0]  ;;  %v10755_v55 = vld [vmem:[%s13240_s5 + $0x118] sm:$0xf0] }
 0x6b1   : > { %v9443_v13 = vor.u32 %v10730_v7, %v9442_v1  ;;  %v9474_v57 = vld [vmem:[%s13240_s5 + $0x80] sm:$0xf]  ;;  %v10737_v58 = vld [vmem:[%s13240_s5 + $0x88] sm:$0xf0]  ;;  %v5187_v59 = vrot.slane %v12442_v20, 1 }
 0x6b2   : > { %v10752_v1 = vld [vmem:[%s13240_s5 + $0x100] sm:$0xf0]  ;;  %v10749_v7 = vld [vmem:[%s13240_s5 + $0xe8] sm:$0xf0] }
 0x6b3   : > { %5087 = vmatpush.bf16.msra.mxu3 %v9312_v11  ;;  %5113 = vmatpush.bf16.msrb.mxu2 %v9316_v12  ;;  %v10729_v11 = vld [vmem:[%s13240_s5 + $0x4c] sm:$0xf]  ;;  %v9444_v12 = vld [vmem:[%s13240_s5 + $0x54] sm:$0xf0] }
 0x6b4   : > { %5104 = vmatpush.bf16.msrb.mxu1 %v9360_v53  ;;  %5130 = vmatpush.bf16.msrb.mxu0 %v9364_v14  ;;  %v9527_v53 = vor.u32 %v10751_v10, %v9526_v9  ;;  %v9430_v14 = vld [vmem:[%s13240_s5 + $0x30] sm:$0xf]  ;;  %v9447_v6 = vor.u32 %v10729_v11, %v9444_v12  ;;  %v10731_v10 = vld [vmem:[%s13240_s5 + $0x58] sm:$0xf0] }
 0x6b5   : > { %4846 = vmatmul.bf16.vlgmr.msra.gmra.mxu1 %v12456_v37  ;;  %5066 = vmatmul.bf16.vlgmr.msra.gmra.mxu0 %v12440_v17  ;;  %v9288_v37 = vor.u32 %v10654_v29, %v9285_v3  ;;  %v9531_v29 = vor.u32 %v10750_v15, %v9528_v45  ;;  %v9418_v3 = vld [vmem:[%s13240_s5 + $0x18] sm:$0xf]  ;;  %v9450_v9 = vld [vmem:[%s13240_s5 + $0x50] sm:$0xf] }
 0x6b6   : > { %9256 = vmatmul.msk.bf16.vlgmr.msrb.gmra.mxu3 %vm1174_vm1, %v12458_v36  ;;  %9401 = vmatmul.msk.bf16.vlgmr.msra.gmra.mxu2 %vm1174_vm1, %v12442_v20  ;;  %v10653_v36 = vld [vmem:[%s13238_s3 + $0x28] sm:$0xf0]  ;;  %v9451_v12 = vor.u32 %v10731_v10, %v9450_v9  ;;  %s13241_s3 = sld [smem:[#allocation23_spill]] }
 0x6b7   : > { %5088 = vmatpush.bf16.msra.mxu3 %v9300_v24  ;;  %5114 = vmatpush.bf16.msrb.mxu2 %v9304_v25  ;;  %v9280_v48 = vor.u32 %v10653_v36, %v9279_v44  ;;  %v10726_v24 = vld [vmem:[%s13240_s5 + $0x34] sm:$0xf]  ;;  %v9432_v25 = vld [vmem:[%s13240_s5 + $0x3c] sm:$0xf0]  ;;  %v9503_v44 = vor.u32 %v10745_v38, %v9502_v32  ;;  %v10744_v36 = vld [vmem:[%s13240_s5 + $0xc4] sm:$0xf] }
 0x6b8   : > { %5384 = vmatpush.bf16.msra.mxu1 %v9491_v30  ;;  %5410 = vmatpush.bf16.msra.mxu0 %v9495_v19  ;;  %v9431_v30 = vor.u32 %v10727_v21, %v9430_v14  ;;  %v9515_v19 = vor.u32 %v10748_v23, %v9514_v22  ;;  %v9435_v34 = vor.u32 %v10726_v24, %v9432_v25  ;;  %v10728_v14 = vld [vmem:[%s13240_s5 + $0x40] sm:$0xf0]  ;;  %v10725_v21 = vld [vmem:[%s13240_s5 + $0x28] sm:$0xf0]  ;;  %v9414_v23 = vld [vmem:[%s13240_s5 + $0x8] sm:$0xf] }
 0x6b9   : > { %v10722_v24 = vld [vmem:[%s13240_s5 + $0x10] sm:$0xf0] }
 0x6ba   : > { %v9415_v25 = vor.u32 %v10722_v24, %v9414_v23 }
 0x6bb   : > { %5089 = vmatpush.bf16.msra.mxu3 %v9288_v37  ;;  %5115 = vmatpush.bf16.msrb.mxu2 %v9292_v39  ;;  %v10723_v37 = vld [vmem:[%s13240_s5 + $0x1c] sm:$0xf]  ;;  %v9420_v39 = vld [vmem:[%s13240_s5 + $0x24] sm:$0xf0] }
 0x6bc   : > { %5385 = vmatpush.bf16.msra.mxu1 %v9479_v42  ;;  %5411 = vmatpush.bf16.msra.mxu0 %v9483_v43  ;;  %v9519_v42 = vor.u32 %v10747_v31, %v9516_v16  ;;  %v9419_v43 = vor.u32 %v10724_v26, %v9418_v3  ;;  %v9423_v8 = vor.u32 %v10723_v37, %v9420_v39 }
 0x6bf   : > { %5090 = vmatpush.bf16.msra.mxu3 %v9276_v33  ;;  %5116 = vmatpush.bf16.msrb.mxu2 %v9280_v48  ;;  %v10721_v33 = vld [vmem:[%s13240_s5 + $0x8] sm:$0xf0]  ;;  %v10720_v48 = vld [vmem:[%s13240_s5 + $0x4] sm:$0xf] }
 0x6c0   : > { %5386 = vmatpush.bf16.msra.mxu1 %v9467_v0  ;;  %5412 = vmatpush.bf16.msra.mxu0 %v9471_v50  ;;  %v10740_v0 = vld [vmem:[%s13240_s5 + $0xa0] sm:$0xf0]  ;;  %v9507_v50 = vor.u32 %v10744_v36, %v9504_v47  ;;  %v9407_v51 = vor.u32 %v10721_v33, %v9406_v28  ;;  %v9411_v52 = vor.u32 %v10720_v48, %v9408_v46 }
 0x6c1   : > { %v9487_v63 = vor.u32 %v10740_v0, %v9486_v49 }
 0x6c3   : > { %5091 = vmatpush.bf16.msra.mxu3 %v9264_v60  ;;  %5117 = vmatpush.bf16.msrb.mxu2 %v9268_v35  ;;  %v9547_v60 = vor.u32 %v10755_v55, %v9546_v54  ;;  %v5186_v35 = vrot.slane %v12440_v17, 1 }
 0x6c4   : > { %5387 = vmatpush.bf16.msra.mxu1 %v9455_v61  ;;  %5413 = vmatpush.bf16.msra.mxu0 %v9459_v5  ;;  %v9475_v61 = vor.u32 %v10737_v58, %v9474_v57  ;;  %v9522_v5 = vld [vmem:[%s13240_s5 + $0xe0] sm:$0xf] }
 0x6c5   : > { %9402 = vmatmul.msk.bf16.vlgmr.msrb.gmra.mxu1 %vm1174_vm1, %v12442_v20  ;;  %9403 = vmatmul.msk.bf16.vlgmr.msrb.gmra.mxu0 %vm1174_vm1, %v12442_v20  ;;  %v9523_v11 = vor.u32 %v10749_v7, %v9522_v5 }
 0x6c6   : > { %5092 = vmatmul.bf16.vlgmr.msra.gmra.mxu3 %v12440_v17  ;;  %5118 = vmatmul.bf16.vlgmr.msrb.gmra.mxu2 %v12440_v17  ;;  %v9463_v17 = vor.u32 %v10734_v4, %v9462_v2 }
 0x6c7   : > { %5401 = vmatpush.bf16.msrb.mxu3 %v9539_v62  ;;  %5427 = vmatpush.bf16.msra.mxu2 %v9543_v56  ;;  %v9534_v62 = vld [vmem:[%s13240_s5 + $0xf8] sm:$0xf]  ;;  %v9510_v56 = vld [vmem:[%s13240_s5 + $0xc8] sm:$0xf] }
 0x6c8   : > { %5388 = vmatpush.bf16.msra.mxu1 %v9443_v13  ;;  %5414 = vmatpush.bf16.msra.mxu0 %v9447_v6  ;;  %v9535_v20 = vor.u32 %v10752_v1, %v9534_v62  ;;  %v10746_v13 = vld [vmem:[%s13240_s5 + $0xd0] sm:$0xf0]  ;;  %v9426_v6 = vld [vmem:[%s13240_s5 + $0x20] sm:$0xf] }
 0x6c9   : > { %v9511_v15 = vor.u32 %v10746_v13, %v9510_v56  ;;  %v9427_v22 = vor.u32 %v10725_v21, %v9426_v6 }
 0x6cb   : > { %5402 = vmatpush.bf16.msrb.mxu3 %v9527_v53  ;;  %5428 = vmatpush.bf16.msra.mxu2 %v9531_v29  ;;  %v9438_v53 = vld [vmem:[%s13240_s5 + $0x38] sm:$0xf]  ;;  %s13243_s5 = sld [smem:[#allocation25_spill]] }
 0x6cc   : > { %5389 = vmatpush.bf16.msra.mxu1 %v9431_v30  ;;  %5415 = vmatpush.bf16.msra.mxu0 %v9435_v34  ;;  %v9439_v45 = vor.u32 %v10728_v14, %v9438_v53 }
 0x6cf   : > { %5403 = vmatpush.bf16.msrb.mxu3 %v9515_v19  ;;  %5429 = vmatpush.bf16.msra.mxu2 %v9519_v42 }
 0x6d0   : > { %5390 = vmatpush.bf16.msra.mxu1 %v9419_v43  ;;  %5416 = vmatpush.bf16.msra.mxu0 %v9423_v8 }
 0x6d3   : > { %5404 = vmatpush.bf16.msrb.mxu3 %v9503_v44  ;;  %5430 = vmatpush.bf16.msra.mxu2 %v9507_v50 }
 0x6d4   : > { %5391 = vmatpush.bf16.msra.mxu1 %v9407_v51  ;;  %5417 = vmatpush.bf16.msra.mxu0 %v9411_v52  ;;  %v5465_v52 = vld [vmem:[%s13241_s3] sm:$0x7]  ;;  %s13242_s3 = smov 64  }
 0x6d5   : > { %v5467_v57 = vperm.slane %v5465_v52, 0 }
 0x6d6   : > { %9548 = vmatmul.msk.bf16.vlgmr.msrb.gmra.mxu3 %vm1174_vm1, %v5187_v59  ;;  %9549 = vmatmul.msk.bf16.vlgmr.msra.gmra.mxu2 %vm1174_vm1, %v5187_v59 }
 0x6d7   : > { %5436 = vmatpush.bf16.msra.mxu3 %v9499_v27  ;;  %5392 = vmatmul.bf16.vlgmr.msra.gmra.mxu1 %v5186_v35 }
 0x6d8   : > { %5418 = vmatmul.bf16.vlgmr.msra.gmra.mxu0 %v5186_v35  ;;  %5453 = vmatpush.bf16.msrb.mxu1 %v9547_v60 }
 0x6db   : > { %5437 = vmatpush.bf16.msra.mxu3 %v9487_v63 }
 0x6dc   : > { %5454 = vmatpush.bf16.msrb.mxu1 %v9535_v20 }
 0x6df   : > { %5438 = vmatpush.bf16.msra.mxu3 %v9475_v61  ;;  %v5468_v61 = vperm.slane %v5465_v52, 1 }
 0x6e0   : > { %5455 = vmatpush.bf16.msrb.mxu1 %v9523_v11 }
 0x6e3   : > { %5439 = vmatpush.bf16.msra.mxu3 %v9463_v17 }
 0x6e4   : > { %5456 = vmatpush.bf16.msrb.mxu1 %v9511_v15 }
 0x6e7   : > { %5440 = vmatpush.bf16.msra.mxu3 %v9451_v12  ;;  %9550 = vmatmul.msk.bf16.vlgmr.msrb.gmra.mxu1 %vm1174_vm1, %v5187_v59 }
 0x6eb   : > { %5441 = vmatpush.bf16.msra.mxu3 %v9439_v45 }
 0x6ef   : > { %5442 = vmatpush.bf16.msra.mxu3 %v9427_v22  ;;  %v5469_v22 = vperm.slane %v5465_v52, 2  ;;  %v10823_v52 = vld [vmem:[%s13243_s5 + $0xf8] sm:$0xf0] }
 0x6f3   : > { %5443 = vmatpush.bf16.msra.mxu3 %v9415_v25 }
 0x6f6   : > { %5444 = vmatmul.bf16.vlgmr.msra.gmra.mxu3 %v5186_v35 }
 0x722   : > { %v4795_v29 = vpop.f32.mrf.mxu0  ;;  %v4808_v3 = vpop.f32.mrf.mxu1 }
 0x723   : > { %v4809_v0 = vadd.f32 %v4808_v3, %v4795_v29 }
 0x729   : > { %v4821_v30 = vpop.f32.mrf.mxu2  ;;  %v4834_v19 = vpop.f32.mrf.mxu3 }
 0x72a   : > { %v4797_v26 = vpop.f32.mrf.mxu0  ;;  %v4810_v31 = vpop.f32.mrf.mxu1  ;;  %v4835_v46 = vadd.f32 %v4834_v19, %v4821_v30 }
 0x731   : > { %v4823_v16 = vpop.f32.mrf.mxu2  ;;  %v4836_v34 = vpop.f32.mrf.mxu3 }
 0x732   : > { %v4847_v32 = vpop.f32.mrf.mxu1  ;;  %v5067_v38 = vpop.f32.mrf.mxu0 }
 0x733   : > { %v5068_v63 = vadd.f32 %v5067_v38, %v4809_v0  ;;  %v10814_v38 = vld [vmem:[%s13243_s5 + $0xb0] sm:$0xf0]  ;;  %v9613_v0 = vld [vmem:[%s13243_s5 + $0x78] sm:$0xf] }
 0x739   : > { %v4860_v37 = vpop.f32.mrf.mxu3  ;;  %v5080_v39 = vpop.f32.mrf.mxu2 }
 0x73a   : > { %v4849_v40 = vpop.f32.mrf.mxu1  ;;  %v5069_v41 = vpop.f32.mrf.mxu0  ;;  %v5081_v54 = vadd.f32 %v5080_v39, %v5068_v63  ;;  %v4861_v14 = vadd.f32 %v4860_v37, %v4847_v32  ;;  %v9637_v32 = vld [vmem:[%s13243_s5 + $0xa8] sm:$0xf]  ;;  %v10813_v37 = vld [vmem:[%s13243_s5 + $0xac] sm:$0xf]  ;;  %v10822_v63 = vld [vmem:[%s13243_s5 + $0xf4] sm:$0xf] }
 0x73b   : > { %v9638_v39 = vor.u32 %v10814_v38, %v9637_v32  ;;  %v9639_v40 = vld [vmem:[%s13243_s5 + $0xb4] sm:$0xf0]  ;;  %v9625_v41 = vld [vmem:[%s13243_s5 + $0x90] sm:$0xf]  ;;  %v10799_v32 = vld [vmem:[%s13243_s5 + $0x38] sm:$0xf0] }
 0x73c   : > { %v9772_v38 = vld [vmem:[%s13244_s7 + $0x90] sm:$0xf] }
 0x73d   : > { %5877 = vmatpush.bf16.msrb.mxu2 %v9638_v39  ;;  %v10798_v39 = vld [vmem:[%s13243_s5 + $0x34] sm:$0xf] }
 0x741   : > { %v4862_v42 = vpop.f32.mrf.mxu3  ;;  %v5082_v43 = vpop.f32.mrf.mxu2 }
 0x742   : > { %v5106_v44 = vpop.f32.mrf.mxu1  ;;  %v5132_v36 = vpop.f32.mrf.mxu0  ;;  %v10811_v42 = vld [vmem:[%s13243_s5 + $0x98] sm:$0xf0]  ;;  %v9642_v43 = vor.u32 %v10813_v37, %v9639_v40  ;;  %v9579_v40 = vld [vmem:[%s13243_s5 + $0x3c] sm:$0xf0] }
 0x743   : > { %v10775_v37 = vld [vmem:[%s13244_s7 + $0x98] sm:$0xf0] }
 0x744   : > { %5903 = vmatpush.bf16.msra.mxu1 %v9642_v43  ;;  %v9773_v43 = vor.u32 %v10775_v37, %v9772_v38  ;;  %v9724_v38 = vld [vmem:[%s13244_s7 + $0x30] sm:$0xf]  ;;  %v10763_v37 = vld [vmem:[%s13244_s7 + $0x38] sm:$0xf0] }
 0x749   : > { %v5093_v47 = vpop.f32.mrf.mxu3  ;;  %v5119_v8 = vpop.f32.mrf.mxu2 }
 0x74a   : > { %v5108_v27 = vpop.f32.mrf.mxu1  ;;  %v5134_v28 = vpop.f32.mrf.mxu0  ;;  %v5094_v51 = vadd.f32 %v5093_v47, %v4835_v46  ;;  %v5120_v15 = vadd.f32 %v5119_v8, %v4861_v14  ;;  %v10825_v47 = vld [vmem:[%s13243_s5 + $0x10c] sm:$0xf]  ;;  %v9626_v8 = vor.u32 %v10811_v42, %v9625_v41  ;;  %v9651_v14 = vld [vmem:[%s13243_s5 + $0xcc] sm:$0xf0] }
 0x74b   : > { %v9687_v28 = vld [vmem:[%s13243_s5 + $0x114] sm:$0xf0] }
 0x74c   : > { %v5107_v59 = vadd.f32 %v5106_v44, %v5094_v51  ;;  %v5133_v6 = vadd.f32 %v5132_v36, %v5120_v15  ;;  %v9685_v44 = vld [vmem:[%s13243_s5 + $0x108] sm:$0xf]  ;;  %v10826_v36 = vld [vmem:[%s13243_s5 + $0x110] sm:$0xf0]  ;;  %v9690_v46 = vor.u32 %v10825_v47, %v9687_v28  ;;  %v9673_v51 = vld [vmem:[%s13243_s5 + $0xf0] sm:$0xf]  ;;  %5878 = vmatpush.bf16.msrb.mxu2 %v9626_v8 }
 0x74d   : > { %v9686_v27 = vor.u32 %v10826_v36, %v9685_v44  ;;  %v9582_v44 = vor.u32 %v10798_v39, %v9579_v40  ;;  %v9808_v39 = vld [vmem:[%s13244_s7 + $0xd8] sm:$0xf] }
 0x74e   : > { %5920 = vmatpush.bf16.msrb.mxu3 %v9690_v46 }
 0x74f   : > { %5894 = vmatpush.bf16.msrb.mxu0 %v9686_v27 }
 0x751   : > { %v5095_v33 = vpop.f32.mrf.mxu3  ;;  %v5121_v48 = vpop.f32.mrf.mxu2 }
 0x752   : > { %v10810_v33 = vld [vmem:[%s13243_s5 + $0x94] sm:$0xf]  ;;  %v9627_v48 = vld [vmem:[%s13243_s5 + $0x9c] sm:$0xf0] }
 0x754   : > { %v5393_v49 = vpop.f32.mrf.mxu1 }
 0x755   : > { %v5419_v50 = vpop.f32.mrf.mxu0 }
 0x759   : > { %v5406_v55 = vpop.f32.mrf.mxu3  ;;  %v5432_v58 = vpop.f32.mrf.mxu2 }
 0x75a   : > { %v5407_v60 = vadd.f32 %v5406_v55, %v5393_v49  ;;  %v5433_v35 = vadd.f32 %v5432_v58, %v5419_v50  ;;  %v9630_v49 = vor.u32 %v10810_v33, %v9627_v48  ;;  %v10808_v50 = vld [vmem:[%s13243_s5 + $0x80] sm:$0xf0]  ;;  %v9674_v55 = vor.u32 %v10823_v52, %v9673_v51  ;;  %v10807_v58 = vld [vmem:[%s13243_s5 + $0x7c] sm:$0xf] }
 0x75b   : > { %v10795_v52 = vld [vmem:[%s13243_s5 + $0x1c] sm:$0xf] }
 0x75c   : > { %v5462_v62 = vadd.f32 %v5407_v60, %v5081_v54  ;;  %v5463_v1 = vadd.f32 %v5433_v35, %v5107_v59  ;;  %v5395_v2 = vpop.f32.mrf.mxu1  ;;  %v9675_v54 = vld [vmem:[%s13243_s5 + $0xfc] sm:$0xf0]  ;;  %v9615_v59 = vld [vmem:[%s13243_s5 + $0x84] sm:$0xf0]  ;;  %v9614_v60 = vor.u32 %v10808_v50, %v9613_v0  ;;  %5904 = vmatpush.bf16.msra.mxu1 %v9630_v49  ;;  %5895 = vmatpush.bf16.msrb.mxu0 %v9674_v55  ;;  %v9565_v0 = vld [vmem:[%s13243_s5 + $0x18] sm:$0xf] }
 0x75d   : > { %v5421_v4 = vpop.f32.mrf.mxu0  ;;  %v9601_v35 = vld [vmem:[%s13243_s5 + $0x60] sm:$0xf]  ;;  %v10805_v2 = vld [vmem:[%s13243_s5 + $0x68] sm:$0xf0]  ;;  %v10796_v50 = vld [vmem:[%s13243_s5 + $0x20] sm:$0xf0] }
 0x75e   : > { %v5473_v20 = vadd.f32 %v5467_v57, %v5462_v62  ;;  %v5474_v17 = vadd.f32 %v5468_v61, %v5463_v1  ;;  %v9678_v57 = vor.u32 %v10822_v63, %v9675_v54  ;;  %v9661_v61 = vld [vmem:[%s13243_s5 + $0xd8] sm:$0xf]  ;;  %v10820_v62 = vld [vmem:[%s13243_s5 + $0xe0] sm:$0xf0]  ;;  %v9618_v1 = vor.u32 %v10807_v58, %v9615_v59  ;;  %v10819_v4 = vld [vmem:[%s13243_s5 + $0xdc] sm:$0xf]  ;;  %5879 = vmatpush.bf16.msrb.mxu2 %v9614_v60 }
 0x75f   : > { %v9566_v51 = vor.u32 %v10796_v50, %v9565_v0  ;;  %v9567_v63 = vld [vmem:[%s13243_s5 + $0x24] sm:$0xf0]  ;;  %v9621_v54 = vld [vmem:[%s13243_s5 + $0x80] sm:$0xf]  ;;  %v9760_v58 = vld [vmem:[%s13244_s7 + $0x78] sm:$0xf] }
 0x760   : > { %v5476_v5 = vmax.f32 %v5473_v20, 0.0  ;;  %v5477_v7 = vmax.f32 %v5474_v17, 0.0  ;;  %v9663_v20 = vld [vmem:[%s13243_s5 + $0xe4] sm:$0xf0]  ;;  %v9662_v17 = vor.u32 %v10820_v62, %v9661_v61  ;;  %5921 = vmatpush.bf16.msrb.mxu3 %v9678_v57  ;;  %5905 = vmatpush.bf16.msra.mxu1 %v9618_v1  ;;  %v9570_v55 = vor.u32 %v10795_v52, %v9567_v63  ;;  %v10809_v57 = vld [vmem:[%s13243_s5 + $0x88] sm:$0xf0] }
 0x761   : > { %v5408_v9 = vpop.f32.mrf.mxu3  ;;  %v5434_v10 = vpop.f32.mrf.mxu2  ;;  %v10772_v59 = vld [vmem:[%s13244_s7 + $0x80] sm:$0xf0]  ;;  %v9622_v60 = vor.u32 %v10809_v57, %v9621_v54  ;;  %v9553_v61 = vld [vmem:[%s13243_s5] sm:$0xf]  ;;  %v10793_v62 = vld [vmem:[%s13243_s5 + $0x8] sm:$0xf0] }
 0x762   : > { %5503 = vst [vmem:[#allocation1] sm:$0xff] %v5476_v5  ;;  %v5486_v11 = vrot.slane %v5477_v7, 7  ;;  %v9666_v9 = vor.u32 %v10819_v4, %v9663_v20  ;;  %v9589_v10 = vld [vmem:[%s13243_s5 + $0x48] sm:$0xf]  ;;  %5896 = vmatpush.bf16.msrb.mxu0 %v9662_v17  ;;  %v10792_v1 = vld [vmem:[%s13243_s5 + $0x4] sm:$0xf] }
 0x763   : > { %5504 = vst [vmem:[#allocation1 + $0x9] sm:$0xff] %v5477_v7  ;;  %v9555_v4 = vld [vmem:[%s13243_s5 + $0xc] sm:$0xf0]  ;;  %v9609_v20 = vld [vmem:[%s13243_s5 + $0x68] sm:$0xf] }
 0x764   : > { %v5487_v12 = vsel %vm1449_vm2, %v5476_v5, %v5486_v11  ;;  %v5458_v56 = vpop.f32.mrf.mxu1  ;;  %v9649_v11 = vld [vmem:[%s13243_s5 + $0xc0] sm:$0xf]  ;;  %5922 = vmatpush.bf16.msrb.mxu3 %v9666_v9  ;;  %v10806_v17 = vld [vmem:[%s13243_s5 + $0x70] sm:$0xf0]  ;;  %v9693_v9 = vld [vmem:[%s13243_s5 + $0x110] sm:$0xf] }
 0x765   : > { %5490 = vst.msk [vmem:[#allocation5 + $0x1] ss:$8 sm:$0x3] %vm11461_vm3, %v5487_v12  ;;  %v10817_v12 = vld [vmem:[%s13243_s5 + $0xc8] sm:$0xf0] }
 0x766   : > { %v9796_v0 = vld [vmem:[%s13244_s7 + $0xc0] sm:$0xf]  ;;  %v10781_v50 = vld [vmem:[%s13244_s7 + $0xc8] sm:$0xf0]  ;;  %v9561_v52 = vld [vmem:[%s13243_s5 + $0x8] sm:$0xf] }
 0x767   : > { %v10794_v63 = vld [vmem:[%s13243_s5 + $0x10] sm:$0xf0]  ;;  %v9700_v54 = vld [vmem:[%s13244_s7] sm:$0xf]  ;;  %v10757_v57 = vld [vmem:[%s13244_s7 + $0x8] sm:$0xf0] }
 0x76a   : > { %v5506_v13 = vld [vmem:[#allocation1 + $0x1] ss:$9 sm:$0xff] }
 0x76b   : > { %5511 = vst [vmem:[#allocation1] sm:$0xff] %v5477_v7 }
 0x76c   : > { %5509 = vst.msk [vmem:[#allocation5 + $0x3] ss:$8 sm:$0x3] %vm11461_vm3, %v5506_v13  ;;  %v5460_v53 = vpop.f32.mrf.mxu1  ;;  %v10802_v13 = vld [vmem:[%s13243_s5 + $0x50] sm:$0xf0] }
 0x76d   : > { %v10816_v53 = vld [vmem:[%s13243_s5 + $0xc4] sm:$0xf] }
 0x779   : > { %v5445_v45 = vpop.f32.mrf.mxu3 }
 0x77a   : > { %v5459_v21 = vadd.f32 %v5458_v56, %v5445_v45  ;;  %v9602_v56 = vor.u32 %v10805_v2, %v9601_v35  ;;  %v9645_v45 = vld [vmem:[%s13243_s5 + $0xb0] sm:$0xf]  ;;  %v9761_v35 = vor.u32 %v10772_v59, %v9760_v58  ;;  %v9554_v2 = vor.u32 %v10793_v62, %v9553_v61 }
 0x77b   : > { %v9701_v58 = vor.u32 %v10757_v57, %v9700_v54  ;;  %v9804_v54 = vld [vmem:[%s13244_s7 + $0xc8] sm:$0xf] }
 0x77c   : > { %v5464_v23 = vadd.f32 %v5459_v21, %v5133_v6  ;;  %v10815_v6 = vld [vmem:[%s13243_s5 + $0xb8] sm:$0xf0]  ;;  %v9784_v21 = vld [vmem:[%s13244_s7 + $0xa8] sm:$0xf]  ;;  %5880 = vmatpush.bf16.msrb.mxu2 %v9602_v56  ;;  %v10769_v56 = vld [vmem:[%s13244_s7 + $0x68] sm:$0xf0] }
 0x77e   : > { %v5475_v24 = vadd.f32 %v5469_v22, %v5464_v23  ;;  %v9650_v22 = vor.u32 %v10817_v12, %v9649_v11  ;;  %v10801_v23 = vld [vmem:[%s13243_s5 + $0x4c] sm:$0xf]  ;;  %v9748_v11 = vld [vmem:[%s13244_s7 + $0x60] sm:$0xf] }
 0x780   : > { %v5478_v25 = vmax.f32 %v5475_v24, 0.0  ;;  %v9591_v24 = vld [vmem:[%s13243_s5 + $0x54] sm:$0xf0]  ;;  %5897 = vmatpush.bf16.msrb.mxu0 %v9650_v22 }
 0x781   : > { %v5447_v29 = vpop.f32.mrf.mxu3 }
 0x782   : > { %5512 = vst [vmem:[#allocation1 + $0x9] sm:$0xff] %v5478_v25  ;;  %v5493_v3 = vrot.slane %v5478_v25, 7  ;;  %v9654_v29 = vor.u32 %v10816_v53, %v9651_v14  ;;  %v10790_v53 = vld [vmem:[%s13244_s7 + $0x110] sm:$0xf0]  ;;  %v9749_v14 = vor.u32 %v10769_v56, %v9748_v11  ;;  %v10779_v11 = vld [vmem:[%s13244_s7 + $0xb8] sm:$0xf0] }
 0x783   : > { %v9834_v56 = vld [vmem:[%s13244_s7 + $0x114] sm:$0xf0] }
 0x784   : > { %v5494_v30 = vsel %vm1449_vm2, %v5477_v7, %v5493_v3  ;;  %v9646_v3 = vor.u32 %v10815_v6, %v9645_v45  ;;  %5923 = vmatpush.bf16.msrb.mxu3 %v9654_v29  ;;  %v9597_v45 = vld [vmem:[%s13243_s5 + $0x50] sm:$0xf]  ;;  %v10803_v6 = vld [vmem:[%s13243_s5 + $0x58] sm:$0xf0] }
 0x785   : > { %5495 = vrot.lane.b32.xlu0 %v5494_v30, %s13242_s3  ;;  %v9590_v30 = vor.u32 %v10802_v13, %v9589_v10  ;;  %v10827_v10 = vld [vmem:[%s13243_s5 + $0x118] sm:$0xf0]  ;;  %v9832_v13 = vld [vmem:[%s13244_s7 + $0x108] sm:$0xf]  ;;  %v9598_v22 = vor.u32 %v10803_v6, %v9597_v45 }
 0x786   : > { %5929 = vmatpush.bf16.msra.mxu0 %v9646_v3  ;;  %v9694_v12 = vor.u32 %v10827_v10, %v9693_v9  ;;  %v9792_v10 = vld [vmem:[%s13244_s7 + $0xb0] sm:$0xf]  ;;  %v10791_v6 = vld [vmem:[%s13244_s7 + $0x118] sm:$0xf0] }
 0x787   : > { %5881 = vmatpush.bf16.msrb.mxu2 %v9590_v30  ;;  %v9820_v30 = vld [vmem:[%s13244_s7 + $0xf0] sm:$0xf] }
 0x789   : > { %v5514_v19 = vld [vmem:[#allocation1 + $0x1] ss:$9 sm:$0xff] }
 0x78a   : > { %5523 = vst [vmem:[#allocation1] sm:$0xff] %v5476_v5  ;;  %5515 = vrot.lane.b32.xlu1 %v5514_v19, %s13242_s3 }
 0x78b   : > { %5524 = vst [vmem:[#allocation1 + $0x9] sm:$0xff] %v5477_v7 }
 0x792   : > { %v5526_v26 = vld [vmem:[#allocation1 + $0x2] ss:$9 sm:$0xff] }
 0x793   : > { %5529 = vst.msk [vmem:[#allocation5 + $0x5] ss:$8 sm:$0x3] %vm11461_vm3, %v5526_v26  ;;  %v9577_v26 = vld [vmem:[%s13243_s5 + $0x30] sm:$0xf] }
 0x794   : > { %5531 = vst [vmem:[#allocation1] sm:$0xff] %v5477_v7  ;;  %v9578_v42 = vor.u32 %v10799_v32, %v9577_v26  ;;  %v9585_v26 = vld [vmem:[%s13243_s5 + $0x38] sm:$0xf]  ;;  %v10821_v32 = vld [vmem:[%s13243_s5 + $0xe8] sm:$0xf0] }
 0x795   : > { %5532 = vst [vmem:[#allocation1 + $0x9] sm:$0xff] %v5478_v25 }
 0x796   : > { %5882 = vmatpush.bf16.msrb.mxu2 %v9578_v42  ;;  %v10784_v42 = vld [vmem:[%s13244_s7 + $0xe0] sm:$0xf0] }
 0x79a   : > { %5883 = vmatpush.bf16.msrb.mxu2 %v9566_v51  ;;  %v9797_v51 = vor.u32 %v10781_v50, %v9796_v0  ;;  %v9756_v50 = vld [vmem:[%s13244_s7 + $0x68] sm:$0xf] }
 0x79c   : > { %v5534_v31 = vld [vmem:[#allocation1 + $0x2] ss:$9 sm:$0xff] }
 0x79d   : > { %5535 = vrot.lane.b32.xlu2 %v5534_v31, %s13242_s3  ;;  %5543 = vst [vmem:[#allocation1] sm:$0xff] %v5476_v5  ;;  %v10804_v5 = vld [vmem:[%s13243_s5 + $0x64] sm:$0xf]  ;;  %v9633_v31 = vld [vmem:[%s13243_s5 + $0x98] sm:$0xf] }
 0x79e   : > { %5544 = vst [vmem:[#allocation1 + $0x9] sm:$0xff] %v5477_v7  ;;  %5884 = vmatpush.bf16.msrb.mxu2 %v9554_v2 }
 0x7a2   : > { %5946 = vmatpush.bf16.msra.mxu2 %v9694_v12  ;;  %v10789_v12 = vld [vmem:[%s13244_s7 + $0x10c] sm:$0xf] }
 0x7a5   : > { %v5546_v16 = vld [vmem:[#allocation1 + $0x3] ss:$9 sm:$0xff] }
 0x7a6   : > { %5551 = vst [vmem:[#allocation1] sm:$0xff] %v5477_v7  ;;  %v9603_v7 = vld [vmem:[%s13243_s5 + $0x6c] sm:$0xf0] }
 0x7a7   : > { %5552 = vst [vmem:[#allocation1 + $0x9] sm:$0xff] %v5478_v25  ;;  %v9606_v15 = vor.u32 %v10804_v5, %v9603_v7  ;;  %v10778_v25 = vld [vmem:[%s13244_s7 + $0xb0] sm:$0xf0]  ;;  %v9558_v5 = vor.u32 %v10792_v1, %v9555_v4  ;;  %v9610_v7 = vor.u32 %v10806_v17, %v9609_v20  ;;  %v10777_v17 = vld [vmem:[%s13244_s7 + $0xac] sm:$0xf] }
 0x7a8   : > { %5549 = vst.msk [vmem:[#allocation5 + $0x7] ss:$8 sm:$0x3] %vm11461_vm3, %v5546_v16  ;;  %v9785_v19 = vor.u32 %v10778_v25, %v9784_v21  ;;  %v10812_v16 = vld [vmem:[%s13243_s5 + $0xa0] sm:$0xf0] }
 0x7a9   : > { %5906 = vmatpush.bf16.msra.mxu1 %v9606_v15  ;;  %v9634_v41 = vor.u32 %v10812_v16, %v9633_v31  ;;  %v9833_v15 = vor.u32 %v10790_v53, %v9832_v13  ;;  %v9681_v21 = vld [vmem:[%s13243_s5 + $0xf8] sm:$0xf]  ;;  %v10766_v25 = vld [vmem:[%s13244_s7 + $0x50] sm:$0xf0]  ;;  %v10800_v16 = vld [vmem:[%s13243_s5 + $0x40] sm:$0xf0] }
 0x7aa   : > { %6150 = vmatpush.bf16.msra.mxu3 %v9785_v19  ;;  %v10787_v19 = vld [vmem:[%s13244_s7 + $0xf8] sm:$0xf0]  ;;  %v9586_v40 = vor.u32 %v10800_v16, %v9585_v26  ;;  %v9840_v13 = vld [vmem:[%s13244_s7 + $0x110] sm:$0xf]  ;;  %v10776_v26 = vld [vmem:[%s13244_s7 + $0xa0] sm:$0xf0] }
 0x7ab   : > { %5930 = vmatpush.bf16.msra.mxu0 %v9634_v41  ;;  %v9821_v31 = vor.u32 %v10787_v19, %v9820_v30  ;;  %v9841_v30 = vor.u32 %v10791_v6, %v9840_v13  ;;  %v9780_v19 = vld [vmem:[%s13244_s7 + $0x98] sm:$0xf]  ;;  %v9822_v16 = vld [vmem:[%s13244_s7 + $0xfc] sm:$0xf0]  ;;  %v10762_v13 = vld [vmem:[%s13244_s7 + $0x34] sm:$0xf] }
 0x7ac   : > { %v9732_v6 = vld [vmem:[%s13244_s7 + $0x38] sm:$0xf] }
 0x7ae   : > { %v5554_v34 = vld [vmem:[#allocation1 + $0x3] ss:$9 sm:$0xff]  ;;  %6151 = vmatpush.bf16.msra.mxu3 %v9773_v43 }
 0x7af   : > { %5555 = vrot.lane.b32.xlu0 %v5554_v34, %s13242_s3  ;;  %v9594_v34 = vor.u32 %v10801_v23, %v9591_v24  ;;  %5931 = vmatpush.bf16.msra.mxu0 %v9622_v60  ;;  %v10824_v23 = vld [vmem:[%s13243_s5 + $0x100] sm:$0xf0]  ;;  %v9736_v24 = vld [vmem:[%s13244_s7 + $0x48] sm:$0xf]  ;;  %v9573_v43 = vld [vmem:[%s13243_s5 + $0x20] sm:$0xf] }
 0x7b0   : > { %v9682_v29 = vor.u32 %v10824_v23, %v9681_v21  ;;  %v9737_v3 = vor.u32 %v10766_v25, %v9736_v24  ;;  %v9793_v24 = vor.u32 %v10779_v11, %v9792_v10  ;;  %v10774_v25 = vld [vmem:[%s13244_s7 + $0x94] sm:$0xf] }
 0x7b1   : > { %5907 = vmatpush.bf16.msra.mxu1 %v9594_v34  ;;  %v9669_v34 = vld [vmem:[%s13243_s5 + $0xe0] sm:$0xf] }
 0x7b2   : > { %6152 = vmatpush.bf16.msra.mxu3 %v9761_v35  ;;  %5947 = vmatpush.bf16.msra.mxu2 %v9682_v29  ;;  %v9670_v41 = vor.u32 %v10821_v32, %v9669_v34  ;;  %v9774_v29 = vld [vmem:[%s13244_s7 + $0x9c] sm:$0xf0]  ;;  %v9828_v34 = vld [vmem:[%s13244_s7 + $0xf8] sm:$0xf]  ;;  %v10788_v32 = vld [vmem:[%s13244_s7 + $0x100] sm:$0xf0] }
 0x7b3   : > { %5932 = vmatpush.bf16.msra.mxu0 %v9610_v7 }
 0x7b5   : > { %5908 = vmatpush.bf16.msra.mxu1 %v9582_v44  ;;  %v9725_v44 = vor.u32 %v10763_v37, %v9724_v38  ;;  %v9777_v38 = vor.u32 %v10774_v25, %v9774_v29  ;;  %v9781_v37 = vor.u32 %v10776_v26, %v9780_v19  ;;  %v9720_v26 = vld [vmem:[%s13244_s7 + $0x20] sm:$0xf] }
 0x7b6   : > { %6153 = vmatpush.bf16.msra.mxu3 %v9749_v14  ;;  %5948 = vmatpush.bf16.msra.mxu2 %v9670_v41 }
 0x7b7   : > { %5933 = vmatpush.bf16.msra.mxu0 %v9598_v22 }
 0x7b9   : > { %5909 = vmatpush.bf16.msra.mxu1 %v9570_v55  ;;  %v9562_v55 = vor.u32 %v10794_v63, %v9561_v52  ;;  %v10780_v52 = vld [vmem:[%s13244_s7 + $0xc4] sm:$0xf]  ;;  %v9798_v63 = vld [vmem:[%s13244_s7 + $0xcc] sm:$0xf0] }
 0x7ba   : > { %6154 = vmatpush.bf16.msra.mxu3 %v9737_v3  ;;  %v9837_v3 = vor.u32 %v10789_v12, %v9834_v56 }
 0x7bb   : > { %5934 = vmatpush.bf16.msra.mxu0 %v9586_v40  ;;  %v9762_v40 = vld [vmem:[%s13244_s7 + $0x84] sm:$0xf0] }
 0x7bd   : > { %5910 = vmatpush.bf16.msra.mxu1 %v9558_v5  ;;  %v9786_v5 = vld [vmem:[%s13244_s7 + $0xb4] sm:$0xf0] }
 0x7be   : > { %6155 = vmatpush.bf16.msra.mxu3 %v9725_v44  ;;  %v9789_v23 = vor.u32 %v10777_v17, %v9786_v5  ;;  %v10773_v44 = vld [vmem:[%s13244_s7 + $0x88] sm:$0xf0]  ;;  %v10767_v17 = vld [vmem:[%s13244_s7 + $0x58] sm:$0xf0] }
 0x7c1   : > { %6167 = vmatpush.bf16.msrb.mxu1 %v9833_v15 }
 0x7c5   : > { %6168 = vmatpush.bf16.msrb.mxu1 %v9821_v31  ;;  %v10786_v31 = vld [vmem:[%s13244_s7 + $0xf4] sm:$0xf] }
 0x7c6   : > { %v9825_v41 = vor.u32 %v10786_v31, %v9822_v16  ;;  %v10761_v31 = vld [vmem:[%s13244_s7 + $0x28] sm:$0xf0] }
 0x7f7   : > { %v5536_v36 = vpop.permute.xlu2 %5535  ;;  %v5496_v47 = vpop.permute.xlu0 %5495 }
 0x7f8   : > { %v5537_v8 = vrot.slane %v5536_v36, 1  ;;  %v5497_v27 = vrot.slane %v5496_v47, 1 }
 0x7fa   : > { %v5538_v28 = vsel %vm1174_vm1, %v5536_v36, %v5537_v8  ;;  %v5498_v33 = vsel %vm1174_vm1, %v5496_v47, %v5497_v27  ;;  %v9809_v36 = vor.u32 %v10784_v42, %v9808_v39  ;;  %v10797_v47 = vld [vmem:[%s13243_s5 + $0x28] sm:$0xf0]  ;;  %v9657_v8 = vld [vmem:[%s13243_s5 + $0xc8] sm:$0xf]  ;;  %v10818_v27 = vld [vmem:[%s13243_s5 + $0xd0] sm:$0xf0]  ;;  %v9829_v42 = vor.u32 %v10788_v32, %v9828_v34 }
 0x7fb   : > { %5541 = vst.msk [vmem:[#allocation5 + $0x6] ss:$8 sm:$0x3] %vm11461_vm3, %v5538_v28  ;;  %v9712_v28 = vld [vmem:[%s13244_s7 + $0x18] sm:$0xf]  ;;  %s13245_s5 = sld [smem:[#allocation26_spill]] }
 0x7fc   : > { %5501 = vst.msk [vmem:[#allocation5 + $0x2] ss:$8 sm:$0x3] %vm11461_vm3, %v5498_v33  ;;  %v5516_v48 = vpop.permute.xlu1 %5515  ;;  %v10760_v33 = vld [vmem:[%s13244_s7 + $0x20] sm:$0xf0]  ;;  %6169 = vmatpush.bf16.msrb.mxu1 %v9809_v36 }
 0x7fd   : > { %v5517_v46 = vrot.slane %v5516_v48, 1  ;;  %v10771_v39 = vld [vmem:[%s13244_s7 + $0x7c] sm:$0xf] }
 0x7fe   : > { %v10783_v36 = vld [vmem:[%s13244_s7 + $0xdc] sm:$0xf] }
 0x7ff   : > { %v5518_v49 = vsel %vm1174_vm1, %v5516_v48, %v5517_v46  ;;  %v9574_v48 = vor.u32 %v10797_v47, %v9573_v43  ;;  %v9658_v46 = vor.u32 %v10818_v27, %v9657_v8  ;;  %v9768_v43 = vld [vmem:[%s13244_s7 + $0x80] sm:$0xf]  ;;  %v9810_v47 = vld [vmem:[%s13244_s7 + $0xe4] sm:$0xf0]  ;;  %v10785_v27 = vld [vmem:[%s13244_s7 + $0xe8] sm:$0xf0] }
 0x800   : > { %5521 = vst.msk [vmem:[#allocation5 + $0x4] ss:$8 sm:$0x3] %vm11461_vm3, %v5518_v49  ;;  %v9713_v49 = vor.u32 %v10760_v33, %v9712_v28  ;;  %6170 = vmatpush.bf16.msrb.mxu1 %v9797_v51  ;;  %v9816_v8 = vld [vmem:[%s13244_s7 + $0xe0] sm:$0xf]  ;;  %v9765_v28 = vor.u32 %v10771_v39, %v9762_v40  ;;  %v9769_v33 = vor.u32 %v10773_v44, %v9768_v43 }
 0x801   : > { %5935 = vmatpush.bf16.msra.mxu0 %v9574_v48  ;;  %5949 = vmatpush.bf16.msra.mxu2 %v9658_v46  ;;  %v10768_v48 = vld [vmem:[%s13244_s7 + $0x64] sm:$0xf]  ;;  %v9750_v46 = vld [vmem:[%s13244_s7 + $0x6c] sm:$0xf0]  ;;  %v9817_v0 = vor.u32 %v10785_v27, %v9816_v8  ;;  %v10770_v51 = vld [vmem:[%s13244_s7 + $0x70] sm:$0xf0]  ;;  %v9721_v39 = vor.u32 %v10761_v31, %v9720_v26 }
 0x802   : > { %6156 = vmatpush.bf16.msra.mxu3 %v9713_v49  ;;  %v9813_v49 = vor.u32 %v10783_v36, %v9810_v47  ;;  %v9753_v57 = vor.u32 %v10768_v48, %v9750_v46  ;;  %v9931_v5 = vld [vmem:[%s13245_s5 + $0xa8] sm:$0xf]  ;;  %v9933_v10 = vld [vmem:[%s13245_s5 + $0xb4] sm:$0xf0]  ;;  %v10846_v25 = vld [vmem:[%s13245_s5 + $0x94] sm:$0xf] }
 0x803   : > { %v9907_v16 = vld [vmem:[%s13245_s5 + $0x78] sm:$0xf]  ;;  %v10844_v34 = vld [vmem:[%s13245_s5 + $0x80] sm:$0xf0]  ;;  %v10843_v32 = vld [vmem:[%s13245_s5 + $0x7c] sm:$0xf] }
 0x804   : > { %v10756_v40 = vld [vmem:[%s13244_s7 + $0x4] sm:$0xf]  ;;  %v9708_v44 = vld [vmem:[%s13244_s7 + $0x8] sm:$0xf]  ;;  %v10758_v36 = vld [vmem:[%s13244_s7 + $0x10] sm:$0xf0] }
 0x805   : > { %5936 = vmatpush.bf16.msra.mxu0 %v9562_v55  ;;  %v10782_v55 = vld [vmem:[%s13244_s7 + $0xd0] sm:$0xf0]  ;;  %v9895_v47 = vld [vmem:[%s13245_s5 + $0x60] sm:$0xf]  ;;  %v10841_v8 = vld [vmem:[%s13245_s5 + $0x68] sm:$0xf0] }
 0x806   : > { %6157 = vmatpush.bf16.msra.mxu3 %v9701_v58  ;;  %v9757_v58 = vor.u32 %v10770_v51, %v9756_v50  ;;  %v9979_v27 = vld [vmem:[%s13245_s5 + $0x108] sm:$0xf]  ;;  %v9897_v48 = vld [vmem:[%s13245_s5 + $0x6c] sm:$0xf0]  ;;  %v10852_v31 = vld [vmem:[%s13245_s5 + $0xc4] sm:$0xf] }
 0x807   : > { %v12718_v61 = vld [vmem:[#allocation5] sm:$0xff]  ;;  %v12720_v1 = vld [vmem:[#allocation5 + $0x8] sm:$0xff] }
 0x808   : > { %v12784_v11 = vpack.c.bf16 %v12718_v61, %v12718_v61  ;;  %v9883_v51 = vld [vmem:[%s13245_s5 + $0x48] sm:$0xf] }
 0x821   : > { %v5556_v59 = vpop.permute.xlu0 %5555 }
 0x822   : > { %v5557_v60 = vrot.slane %v5556_v59, 1 }
 0x824   : > { %v5558_v35 = vsel %vm1174_vm1, %v5556_v59, %v5557_v60  ;;  %v10765_v59 = vld [vmem:[%s13244_s7 + $0x4c] sm:$0xf]  ;;  %v9738_v60 = vld [vmem:[%s13244_s7 + $0x54] sm:$0xf0] }
 0x825   : > { %5561 = vst.msk [vmem:[#allocation5 + $0x10] ss:$8 sm:$0x3] %vm11461_vm3, %v5558_v35  ;;  %v9801_v35 = vor.u32 %v10780_v52, %v9798_v63  ;;  %v9741_v12 = vor.u32 %v10765_v59, %v9738_v60  ;;  %v10861_v52 = vld [vmem:[%s13245_s5 + $0x10c] sm:$0xf] }
 0x826   : > { %v9981_v63 = vld [vmem:[%s13245_s5 + $0x114] sm:$0xf0]  ;;  %v10837_v59 = vld [vmem:[%s13245_s5 + $0x4c] sm:$0xf] }
 0x827   : > { %v9885_v60 = vld [vmem:[%s13245_s5 + $0x54] sm:$0xf0] }
 0x82c   : > { %v5565_v62 = vld [vmem:[#allocation5 + $0x10] sm:$0x3]  ;;  %v5566_v2 = vld [vmem:[#allocation5 + $0x18] sm:$0x3] }
 0x82d   : > { %v12723_v4 = vpack.c.bf16 %v5565_v62, %v12718_v61  ;;  %v12726_v20 = vpack.c.bf16 %v5566_v2, %v12720_v1  ;;  %v9805_v62 = vor.u32 %v10782_v55, %v9804_v54  ;;  %v9744_v2 = vld [vmem:[%s13244_s7 + $0x50] sm:$0xf]  ;;  %v10838_v55 = vld [vmem:[%s13245_s5 + $0x50] sm:$0xf0] }
 0x82e   : > { %v9745_v56 = vor.u32 %v10767_v17, %v9744_v2  ;;  %v9919_v61 = vld [vmem:[%s13245_s5 + $0x90] sm:$0xf] }
 0x82f   : > { %v5670_v7 = vshll.u32 %v12723_v4, 16  ;;  %v5677_v9 = vshll.u32 %v12726_v20, 16  ;;  %v5668_v53 = vshrl.u32 %v12723_v4, 16  ;;  %v5675_v15 = vshrl.u32 %v12726_v20, 16  ;;  %v9871_v17 = vld [vmem:[%s13245_s5 + $0x30] sm:$0xf] }
 0x831   : > { %v5672_v14 = vrot.slane %v5670_v7, 1  ;;  %v5679_v45 = vrot.slane %v5677_v9, 1  ;;  %v10850_v7 = vld [vmem:[%s13245_s5 + $0xb0] sm:$0xf0]  ;;  %v10849_v9 = vld [vmem:[%s13245_s5 + $0xac] sm:$0xf] }
 0x833   : > { %v12740_v21 = vor.u32 %v5672_v14, %v5668_v53  ;;  %v12742_v22 = vor.u32 %v5679_v45, %v5675_v15  ;;  %v9726_v53 = vld [vmem:[%s13244_s7 + $0x3c] sm:$0xf0]  ;;  %v12790_v14 = vpack.c.bf16 %v12720_v1, %v12720_v1  ;;  %v9932_v15 = vor.u32 %v10850_v7, %v9931_v5  ;;  %v10858_v5 = vld [vmem:[%s13245_s5 + $0xf4] sm:$0xf] }
 0x834   : > { %v9936_v45 = vor.u32 %v10849_v9, %v9933_v10  ;;  %v9921_v1 = vld [vmem:[%s13245_s5 + $0x9c] sm:$0xf0]  ;;  %v9888_v9 = vor.u32 %v10837_v59, %v9885_v60  ;;  %v10835_v10 = vld [vmem:[%s13245_s5 + $0x38] sm:$0xf0] }
 0x835   : > { %5885 = vmatmul.bf16.vlgmr.msrb.gmra.mxu2 %v12740_v21  ;;  %9695 = vmatmul.msk.bf16.vlgmr.msrb.gmra.mxu0 %vm1174_vm1, %v12742_v22  ;;  %v9924_v19 = vor.u32 %v10846_v25, %v9921_v1  ;;  %v9969_v7 = vld [vmem:[%s13245_s5 + $0xfc] sm:$0xf0] }
 0x836   : > { %5911 = vmatmul.bf16.vlgmr.msra.gmra.mxu1 %v12740_v21  ;;  %9696 = vmatmul.msk.bf16.vlgmr.msrb.gmra.mxu3 %vm1174_vm1, %v12742_v22  ;;  %v9943_v1 = vld [vmem:[%s13245_s5 + $0xc0] sm:$0xf] }
 0x837   : > { %6176 = vmatpush.bf16.msrb.mxu2 %v9789_v23  ;;  %6202 = vmatpush.bf16.msra.mxu1 %v9793_v24  ;;  %v10764_v23 = vld [vmem:[%s13244_s7 + $0x40] sm:$0xf0]  ;;  %v10847_v24 = vld [vmem:[%s13245_s5 + $0x98] sm:$0xf0] }
 0x838   : > { %6193 = vmatpush.bf16.msrb.mxu0 %v9837_v3  ;;  %6219 = vmatpush.bf16.msrb.mxu3 %v9841_v30  ;;  %v9733_v29 = vor.u32 %v10764_v23, %v9732_v6  ;;  %v10759_v3 = vld [vmem:[%s13244_s7 + $0x1c] sm:$0xf]  ;;  %v9920_v30 = vor.u32 %v10847_v24, %v9919_v61  ;;  %v9872_v6 = vor.u32 %v10835_v10, %v9871_v17  ;;  %v10832_v61 = vld [vmem:[%s13245_s5 + $0x20] sm:$0xf0]  ;;  %v9957_v24 = vld [vmem:[%s13245_s5 + $0xe4] sm:$0xf0] }
 0x839   : > { %v10836_v17 = vld [vmem:[%s13245_s5 + $0x40] sm:$0xf0]  ;;  %v10833_v10 = vld [vmem:[%s13245_s5 + $0x28] sm:$0xf0] }
 0x83b   : > { %6177 = vmatpush.bf16.msrb.mxu2 %v9777_v38  ;;  %6203 = vmatpush.bf16.msra.mxu1 %v9781_v37  ;;  %v9909_v38 = vld [vmem:[%s13245_s5 + $0x84] sm:$0xf0] }
 0x83c   : > { %6194 = vmatpush.bf16.msrb.mxu0 %v9825_v41  ;;  %6220 = vmatpush.bf16.msrb.mxu3 %v9829_v42  ;;  %v9702_v41 = vld [vmem:[%s13244_s7 + $0xc] sm:$0xf0]  ;;  %v9908_v42 = vor.u32 %v10844_v34, %v9907_v16  ;;  %v9912_v43 = vor.u32 %v10843_v32, %v9909_v38  ;;  %v9847_v38 = vld [vmem:[%s13245_s5] sm:$0xf] }
 0x83d   : > { %v9705_v46 = vor.u32 %v10756_v40, %v9702_v41  ;;  %v9945_v16 = vld [vmem:[%s13245_s5 + $0xcc] sm:$0xf0]  ;;  %v9927_v41 = vld [vmem:[%s13245_s5 + $0x98] sm:$0xf] }
 0x83e   : > { %v9849_v40 = vld [vmem:[%s13245_s5 + $0xc] sm:$0xf0] }
 0x83f   : > { %6178 = vmatpush.bf16.msrb.mxu2 %v9765_v28  ;;  %6204 = vmatpush.bf16.msra.mxu1 %v9769_v33  ;;  %v10862_v28 = vld [vmem:[%s13245_s5 + $0x110] sm:$0xf0]  ;;  %v10840_v33 = vld [vmem:[%s13245_s5 + $0x64] sm:$0xf] }
 0x840   : > { %6195 = vmatpush.bf16.msrb.mxu0 %v9813_v49  ;;  %6221 = vmatpush.bf16.msrb.mxu3 %v9817_v0  ;;  %v9709_v49 = vor.u32 %v10758_v36, %v9708_v44  ;;  %v9896_v0 = vor.u32 %v10841_v8, %v9895_v47  ;;  %v9980_v50 = vor.u32 %v10862_v28, %v9979_v27  ;;  %v9987_v8 = vld [vmem:[%s13245_s5 + $0x110] sm:$0xf]  ;;  %v10863_v27 = vld [vmem:[%s13245_s5 + $0x118] sm:$0xf0]  ;;  %v9915_v28 = vld [vmem:[%s13245_s5 + $0x80] sm:$0xf] }
 0x841   : > { %v9900_v54 = vor.u32 %v10840_v33, %v9897_v48  ;;  %v10845_v33 = vld [vmem:[%s13245_s5 + $0x88] sm:$0xf0]  ;;  %v6279_v48 = vrot.slane %v12726_v20, 1 }
 0x843   : > { %6179 = vmatpush.bf16.msrb.mxu2 %v9753_v57  ;;  %6205 = vmatpush.bf16.msra.mxu1 %v9757_v58  ;;  %v9967_v57 = vld [vmem:[%s13245_s5 + $0xf0] sm:$0xf]  ;;  %v10859_v58 = vld [vmem:[%s13245_s5 + $0xf8] sm:$0xf0] }
 0x844   : > { %6196 = vmatpush.bf16.msrb.mxu0 %v9801_v35  ;;  %6222 = vmatpush.bf16.msrb.mxu3 %v9805_v62  ;;  %v9984_v35 = vor.u32 %v10861_v52, %v9981_v63  ;;  %v9884_v62 = vor.u32 %v10838_v55, %v9883_v51  ;;  %v9968_v2 = vor.u32 %v10859_v58, %v9967_v57  ;;  %v10860_v51 = vld [vmem:[%s13245_s5 + $0x100] sm:$0xf0]  ;;  %v9903_v52 = vld [vmem:[%s13245_s5 + $0x68] sm:$0xf]  ;;  %v10842_v63 = vld [vmem:[%s13245_s5 + $0x70] sm:$0xf0] }
 0x845   : > { %5937 = vmatmul.bf16.vlgmr.msra.gmra.mxu0 %v12740_v21  ;;  %9697 = vmatmul.msk.bf16.vlgmr.msra.gmra.mxu2 %vm1174_vm1, %v12742_v22  ;;  %v9729_v21 = vor.u32 %v10762_v13, %v9726_v53  ;;  %v9714_v22 = vld [vmem:[%s13244_s7 + $0x24] sm:$0xf0]  ;;  %v10834_v13 = vld [vmem:[%s13245_s5 + $0x34] sm:$0xf]  ;;  %v9873_v53 = vld [vmem:[%s13245_s5 + $0x3c] sm:$0xf0] }
 0x846   : > { %6158 = vmatmul.bf16.vlgmr.msra.gmra.mxu3 %v12784_v11  ;;  %9842 = vmatmul.msk.bf16.vlgmr.msrb.gmra.mxu1 %vm1174_vm1, %v12790_v14  ;;  %v9717_v37 = vor.u32 %v10759_v3, %v9714_v22  ;;  %v9876_v25 = vor.u32 %v10834_v13, %v9873_v53  ;;  %v9939_v3 = vld [vmem:[%s13245_s5 + $0xb0] sm:$0xf]  ;;  %v10851_v22 = vld [vmem:[%s13245_s5 + $0xb8] sm:$0xf0]  ;;  %v10857_v55 = vld [vmem:[%s13245_s5 + $0xe8] sm:$0xf0] }
 0x847   : > { %6180 = vmatpush.bf16.msrb.mxu2 %v9741_v12  ;;  %6206 = vmatpush.bf16.msra.mxu1 %v9745_v56  ;;  %v9955_v12 = vld [vmem:[%s13245_s5 + $0xd8] sm:$0xf]  ;;  %v10856_v56 = vld [vmem:[%s13245_s5 + $0xe0] sm:$0xf0]  ;;  %v9940_v32 = vor.u32 %v10851_v22, %v9939_v3  ;;  %v9891_v57 = vld [vmem:[%s13245_s5 + $0x50] sm:$0xf] }
 0x848   : > { %6476 = vmatpush.bf16.msra.mxu0 %v9932_v15  ;;  %6502 = vmatpush.bf16.msra.mxu3 %v9936_v45  ;;  %v9972_v15 = vor.u32 %v10858_v5, %v9969_v7  ;;  %v9859_v45 = vld [vmem:[%s13245_s5 + $0x18] sm:$0xf]  ;;  %v9956_v23 = vor.u32 %v10856_v56, %v9955_v12  ;;  %v10839_v58 = vld [vmem:[%s13245_s5 + $0x58] sm:$0xf0]  ;;  %v9855_v56 = vld [vmem:[%s13245_s5 + $0x8] sm:$0xf] }
 0x849   : > { %v9892_v60 = vor.u32 %v10839_v58, %v9891_v57  ;;  %v10830_v13 = vld [vmem:[%s13245_s5 + $0x10] sm:$0xf0] }
 0x84a   : > { %v9856_v53 = vor.u32 %v10830_v13, %v9855_v56 }
 0x84b   : > { %6181 = vmatpush.bf16.msrb.mxu2 %v9729_v21  ;;  %6207 = vmatpush.bf16.msra.mxu1 %v9733_v29  ;;  %v10853_v21 = vld [vmem:[%s13245_s5 + $0xc8] sm:$0xf0]  ;;  %v9861_v29 = vld [vmem:[%s13245_s5 + $0x24] sm:$0xf0] }
 0x84c   : > { %6477 = vmatpush.bf16.msra.mxu0 %v9920_v30  ;;  %6503 = vmatpush.bf16.msra.mxu3 %v9924_v19  ;;  %v9860_v19 = vor.u32 %v10832_v61, %v9859_v45  ;;  %v9944_v26 = vor.u32 %v10853_v21, %v9943_v1 }
 0x84f   : > { %6182 = vmatpush.bf16.msrb.mxu2 %v9717_v37  ;;  %6208 = vmatpush.bf16.msra.mxu1 %v9721_v39  ;;  %v10829_v37 = vld [vmem:[%s13245_s5 + $0x8] sm:$0xf0]  ;;  %v10828_v39 = vld [vmem:[%s13245_s5 + $0x4] sm:$0xf] }
 0x850   : > { %6478 = vmatpush.bf16.msra.mxu0 %v9908_v42  ;;  %6504 = vmatpush.bf16.msra.mxu3 %v9912_v43  ;;  %v10848_v42 = vld [vmem:[%s13245_s5 + $0xa0] sm:$0xf0]  ;;  %v9948_v43 = vor.u32 %v10852_v31, %v9945_v16  ;;  %v9848_v44 = vor.u32 %v10829_v37, %v9847_v38  ;;  %v9852_v36 = vor.u32 %v10828_v39, %v9849_v40 }
 0x851   : > { %v9928_v47 = vor.u32 %v10848_v42, %v9927_v41 }
 0x853   : > { %6183 = vmatpush.bf16.msrb.mxu2 %v9705_v46  ;;  %6209 = vmatpush.bf16.msra.mxu1 %v9709_v49  ;;  %v9988_v46 = vor.u32 %v10863_v27, %v9987_v8  ;;  %v6278_v49 = vrot.slane %v12723_v4, 1  ;;  %v9904_v4 = vor.u32 %v10842_v63, %v9903_v52 }
 0x854   : > { %6479 = vmatpush.bf16.msra.mxu0 %v9896_v0  ;;  %6505 = vmatpush.bf16.msra.mxu3 %v9900_v54  ;;  %v9916_v0 = vor.u32 %v10845_v33, %v9915_v28  ;;  %v9963_v54 = vld [vmem:[%s13245_s5 + $0xe0] sm:$0xf] }
 0x855   : > { %9843 = vmatmul.msk.bf16.vlgmr.msrb.gmra.mxu0 %vm1174_vm1, %v12790_v14  ;;  %v9964_v59 = vor.u32 %v10857_v55, %v9963_v54 }
 0x856   : > { %6184 = vmatmul.bf16.vlgmr.msrb.gmra.mxu2 %v12784_v11  ;;  %6210 = vmatmul.bf16.vlgmr.msra.gmra.mxu1 %v12784_v11  ;;  %v10855_v11 = vld [vmem:[%s13245_s5 + $0xdc] sm:$0xf] }
 0x857   : > { %6493 = vmatpush.bf16.msra.mxu2 %v9980_v50  ;;  %9844 = vmatmul.msk.bf16.vlgmr.msrb.gmra.mxu3 %vm1174_vm1, %v12790_v14  ;;  %v10831_v14 = vld [vmem:[%s13245_s5 + $0x1c] sm:$0xf]  ;;  %v9960_v30 = vor.u32 %v10855_v11, %v9957_v24  ;;  %v9975_v50 = vld [vmem:[%s13245_s5 + $0xf8] sm:$0xf] }
 0x858   : > { %6519 = vmatpush.bf16.msrb.mxu1 %v9984_v35  ;;  %6480 = vmatpush.bf16.msra.mxu0 %v9884_v62  ;;  %v9864_v34 = vor.u32 %v10831_v14, %v9861_v29  ;;  %v9976_v20 = vor.u32 %v10860_v51, %v9975_v50  ;;  %v9951_v35 = vld [vmem:[%s13245_s5 + $0xc8] sm:$0xf]  ;;  %v10854_v62 = vld [vmem:[%s13245_s5 + $0xd0] sm:$0xf0] }
 0x859   : > { %6506 = vmatpush.bf16.msra.mxu3 %v9888_v9  ;;  %v9952_v5 = vor.u32 %v10854_v62, %v9951_v35  ;;  %v9867_v9 = vld [vmem:[%s13245_s5 + $0x20] sm:$0xf] }
 0x85a   : > { %v9868_v12 = vor.u32 %v10833_v10, %v9867_v9 }
 0x85b   : > { %6494 = vmatpush.bf16.msra.mxu2 %v9968_v2  ;;  %v9879_v2 = vld [vmem:[%s13245_s5 + $0x38] sm:$0xf]  ;;  %s13246_s5 = sld [smem:[#allocation27_spill]] }
 0x85c   : > { %6520 = vmatpush.bf16.msrb.mxu1 %v9972_v15  ;;  %6481 = vmatpush.bf16.msra.mxu0 %v9872_v6  ;;  %v9880_v7 = vor.u32 %v10836_v17, %v9879_v2 }
 0x85d   : > { %6507 = vmatpush.bf16.msra.mxu3 %v9876_v25 }
 0x85f   : > { %6495 = vmatpush.bf16.msra.mxu2 %v9956_v23 }
 0x860   : > { %6521 = vmatpush.bf16.msrb.mxu1 %v9960_v30  ;;  %6482 = vmatpush.bf16.msra.mxu0 %v9860_v19 }
 0x861   : > { %6508 = vmatpush.bf16.msra.mxu3 %v9864_v34 }
 0x863   : > { %6496 = vmatpush.bf16.msra.mxu2 %v9944_v26 }
 0x864   : > { %6522 = vmatpush.bf16.msrb.mxu1 %v9948_v43  ;;  %6483 = vmatpush.bf16.msra.mxu0 %v9848_v44 }
 0x865   : > { %6509 = vmatpush.bf16.msra.mxu3 %v9852_v36  ;;  %v6557_v36 = vld [vmem:[%s13246_s5] sm:$0x7]  ;;  %s13247_s5 = sld [smem:[#allocation29_spill]] }
 0x866   : > { %9989 = vmatmul.msk.bf16.vlgmr.msra.gmra.mxu2 %vm1174_vm1, %v6279_v48  ;;  %v6559_v33 = vperm.slane %v6557_v36, 0  ;;  %v6560_v51 = vperm.slane %v6557_v36, 1 }
 0x867   : > { %6528 = vmatpush.bf16.msrb.mxu2 %v9940_v32  ;;  %9990 = vmatmul.msk.bf16.vlgmr.msrb.gmra.mxu1 %vm1174_vm1, %v6279_v48 }
 0x868   : > { %6484 = vmatmul.bf16.vlgmr.msra.gmra.mxu0 %v6278_v49  ;;  %6510 = vmatmul.bf16.vlgmr.msra.gmra.mxu3 %v6278_v49 }
 0x869   : > { %6545 = vmatpush.bf16.msrb.mxu0 %v9988_v46 }
 0x86b   : > { %6529 = vmatpush.bf16.msrb.mxu2 %v9928_v47 }
 0x86d   : > { %6546 = vmatpush.bf16.msrb.mxu0 %v9976_v20 }
 0x86f   : > { %6530 = vmatpush.bf16.msrb.mxu2 %v9916_v0 }
 0x871   : > { %6547 = vmatpush.bf16.msrb.mxu0 %v9964_v59 }
 0x873   : > { %6531 = vmatpush.bf16.msrb.mxu2 %v9904_v4 }
 0x875   : > { %6548 = vmatpush.bf16.msrb.mxu0 %v9952_v5 }
 0x877   : > { %6532 = vmatpush.bf16.msrb.mxu2 %v9892_v60 }
 0x878   : > { %9991 = vmatmul.msk.bf16.vlgmr.msrb.gmra.mxu0 %vm1174_vm1, %v6279_v48 }
 0x87b   : > { %6533 = vmatpush.bf16.msrb.mxu2 %v9880_v7 }
 0x87f   : > { %6534 = vmatpush.bf16.msrb.mxu2 %v9868_v12  ;;  %v6561_v12 = vperm.slane %v6557_v36, 2 }
 0x883   : > { %6535 = vmatpush.bf16.msrb.mxu2 %v9856_v53 }
 0x886   : > { %6536 = vmatmul.bf16.vlgmr.msrb.gmra.mxu2 %v6278_v49 }
 0x8b2   : > { %v5899_v15 = vpop.f32.mrf.mxu0 }
 0x8b3   : > { %v5912_v45 = vpop.f32.mrf.mxu1 }
 0x8b8   : > { %v5886_v6 = vpop.f32.mrf.mxu2 }
 0x8b9   : > { %v5925_v23 = vpop.f32.mrf.mxu3  ;;  %v5900_v41 = vadd.f32 %v5899_v15, %v5886_v6 }
 0x8ba   : > { %v5901_v61 = vpop.f32.mrf.mxu0  ;;  %v5926_v43 = vadd.f32 %v5925_v23, %v5912_v45 }
 0x8bb   : > { %v5914_v11 = vpop.f32.mrf.mxu1 }
 0x8c0   : > { %v5888_v24 = vpop.f32.mrf.mxu2 }
 0x8c1   : > { %v5927_v25 = vpop.f32.mrf.mxu3 }
 0x8c2   : > { %v5938_v1 = vpop.f32.mrf.mxu0 }
 0x8c3   : > { %v6172_v21 = vpop.f32.mrf.mxu1 }
 0x8c8   : > { %v5951_v14 = vpop.f32.mrf.mxu2 }
 0x8c9   : > { %v6159_v29 = vpop.f32.mrf.mxu3  ;;  %v5952_v17 = vadd.f32 %v5951_v14, %v5938_v1 }
 0x8ca   : > { %v5940_v3 = vpop.f32.mrf.mxu0  ;;  %v6160_v44 = vadd.f32 %v6159_v29, %v5900_v41 }
 0x8cb   : > { %v6174_v22 = vpop.f32.mrf.mxu1 }
 0x8cc   : > { %v6173_v27 = vadd.f32 %v6172_v21, %v6160_v44  ;;  %v10901_v44 = vld [vmem:[%s13247_s5 + $0x64] sm:$0xf0] }
 0x8d0   : > { %v5953_v30 = vpop.f32.mrf.mxu2 }
 0x8d1   : > { %v6161_v19 = vpop.f32.mrf.mxu3 }
 0x8d2   : > { %v6198_v26 = vpop.f32.mrf.mxu0 }
 0x8d3   : > { %v6211_v31 = vpop.f32.mrf.mxu1 }
 0x8d4   : > { %v6212_v5 = vadd.f32 %v6211_v31, %v5952_v17 }
 0x8d9   : > { %v6185_v16 = vpop.f32.mrf.mxu2 }
 0x8da   : > { %v6224_v34 = vpop.f32.mrf.mxu3  ;;  %v6200_v32 = vpop.f32.mrf.mxu0  ;;  %v6186_v47 = vadd.f32 %v6185_v16, %v5926_v43  ;;  %v10042_v43 = vld [vmem:[%s13247_s5 + $0x60] sm:$0xf] }
 0x8db   : > { %v6213_v38 = vpop.f32.mrf.mxu1  ;;  %v6225_v9 = vadd.f32 %v6224_v34, %v6212_v5  ;;  %v10082_v5 = vld [vmem:[%s13247_s5 + $0xb0] sm:$0xf] }
 0x8dc   : > { %v6199_v49 = vadd.f32 %v6198_v26, %v6186_v47  ;;  %v10900_v47 = vld [vmem:[%s13247_s5 + $0x64] sm:$0xf] }
 0x8e1   : > { %v6187_v37 = vpop.f32.mrf.mxu2 }
 0x8e2   : > { %v6226_v39 = vpop.f32.mrf.mxu3  ;;  %v10050_v37 = vld [vmem:[%s13247_s5 + $0x70] sm:$0xf] }
 0x8e3   : > { %v10903_v39 = vld [vmem:[%s13247_s5 + $0x74] sm:$0xf0] }
 0x8e4   : > { %v6524_v40 = vpop.f32.mrf.mxu1  ;;  %v10051_v41 = vor.u32 %v10903_v39, %v10050_v37  ;;  %v10002_v37 = vld [vmem:[%s13247_s5 + $0x10] sm:$0xf]  ;;  %v10891_v39 = vld [vmem:[%s13247_s5 + $0x14] sm:$0xf0] }
 0x8e5   : > { %v6485_v42 = vpop.f32.mrf.mxu0 }
 0x8e6   : > { %6941 = vmatpush.bf16.msra.mxu1 %v10051_v41  ;;  %v10003_v41 = vor.u32 %v10891_v39, %v10002_v37 }
 0x8e9   : > { %v6498_v8 = vpop.f32.mrf.mxu2 }
 0x8ea   : > { %v6499_v28 = vadd.f32 %v6498_v8, %v6485_v42  ;;  %v10052_v42 = vld [vmem:[%s13247_s5 + $0x78] sm:$0xf0]  ;;  %v10044_v8 = vld [vmem:[%s13247_s5 + $0x68] sm:$0xf0] }
 0x8eb   : > { %v6511_v48 = vpop.f32.mrf.mxu3 }
 0x8ec   : > { %v6526_v46 = vpop.f32.mrf.mxu1  ;;  %v6554_v0 = vadd.f32 %v6499_v28, %v6173_v27  ;;  %v6525_v50 = vadd.f32 %v6524_v40, %v6511_v48  ;;  %v10902_v40 = vld [vmem:[%s13247_s5 + $0x74] sm:$0xf]  ;;  %v10043_v27 = vor.u32 %v10901_v44, %v10042_v43  ;;  %v10047_v28 = vor.u32 %v10900_v47, %v10044_v8  ;;  %v10058_v43 = vld [vmem:[%s13247_s5 + $0x80] sm:$0xf]  ;;  %v10905_v44 = vld [vmem:[%s13247_s5 + $0x84] sm:$0xf0] }
 0x8ed   : > { %v6487_v52 = vpop.f32.mrf.mxu0  ;;  %v10055_v36 = vor.u32 %v10902_v40, %v10052_v42  ;;  %v10890_v40 = vld [vmem:[%s13247_s5 + $0x14] sm:$0xf]  ;;  %v10004_v42 = vld [vmem:[%s13247_s5 + $0x18] sm:$0xf0]  ;;  %v10059_v47 = vor.u32 %v10905_v44, %v10058_v43  ;;  %v10904_v8 = vld [vmem:[%s13247_s5 + $0x84] sm:$0xf] }
 0x8ee   : > { %v6565_v63 = vadd.f32 %v6559_v33, %v6554_v0  ;;  %v6555_v20 = vadd.f32 %v6525_v50, %v6199_v49  ;;  %6942 = vmatpush.bf16.msra.mxu1 %v10043_v27  ;;  %v10060_v27 = vld [vmem:[%s13247_s5 + $0x88] sm:$0xf0] }
 0x8ef   : > { %6969 = vmatpush.bf16.msra.mxu0 %v10055_v36  ;;  %v10007_v36 = vor.u32 %v10890_v40, %v10004_v42 }
 0x8f0   : > { %v12888_v4 = vmax.f32 %v6565_v63, 0.0  ;;  %v6566_v54 = vadd.f32 %v6560_v51, %v6555_v20  ;;  %v10034_v20 = vld [vmem:[%s13247_s5 + $0x50] sm:$0xf] }
 0x8f1   : > { %v6500_v55 = vpop.f32.mrf.mxu2 }
 0x8f2   : > { %6595 = vst [vmem:[#allocation1] sm:$0xff] %v12888_v4  ;;  %v12891_v57 = vmax.f32 %v6566_v54, 0.0  ;;  %v10898_v54 = vld [vmem:[%s13247_s5 + $0x54] sm:$0xf] }
 0x8f3   : > { %v6513_v58 = vpop.f32.mrf.mxu3  ;;  %6970 = vmatpush.bf16.msra.mxu0 %v10047_v28 }
 0x8f4   : > { %6596 = vst [vmem:[#allocation1 + $0x9] sm:$0xff] %v12891_v57  ;;  %v6578_v60 = vrot.slane %v12891_v57, 7  ;;  %v10026_v58 = vld [vmem:[%s13247_s5 + $0x40] sm:$0xf] }
 0x8f5   : > { %v6550_v59 = vpop.f32.mrf.mxu0 }
 0x8f6   : > { %v6579_v35 = vsel %vm1449_vm2, %v12888_v4, %v6578_v60 }
 0x8f7   : > { %6582 = vst.msk [vmem:[#allocation6 + $0x1] ss:$8 sm:$0x3] %vm11461_vm3, %v6579_v35  ;;  %v10896_v35 = vld [vmem:[%s13247_s5 + $0x44] sm:$0xf] }
 0x8fb   : > { %v6598_v62 = vld [vmem:[#allocation1 + $0x1] ss:$9 sm:$0xff] }
 0x8fc   : > { %6603 = vst [vmem:[#allocation1] sm:$0xff] %v12891_v57 }
 0x8fd   : > { %v6552_v2 = vpop.f32.mrf.mxu0  ;;  %6601 = vst.msk [vmem:[#allocation6 + $0x3] ss:$8 sm:$0x3] %vm11461_vm3, %v6598_v62  ;;  %v10028_v62 = vld [vmem:[%s13247_s5 + $0x48] sm:$0xf0] }
 0x8fe   : > { %v10031_v17 = vor.u32 %v10896_v35, %v10028_v62 }
 0x909   : > { %v6537_v7 = vpop.f32.mrf.mxu2 }
 0x90a   : > { %v6551_v10 = vadd.f32 %v6550_v59, %v6537_v7  ;;  %v10897_v59 = vld [vmem:[%s13247_s5 + $0x44] sm:$0xf0]  ;;  %v10911_v7 = vld [vmem:[%s13247_s5 + $0xb4] sm:$0xf0] }
 0x90b   : > { %v10027_v2 = vor.u32 %v10897_v59, %v10026_v58 }
 0x90c   : > { %v6556_v56 = vadd.f32 %v6551_v10, %v6225_v9  ;;  %v10910_v9 = vld [vmem:[%s13247_s5 + $0xb4] sm:$0xf]  ;;  %v10083_v10 = vor.u32 %v10911_v7, %v10082_v5 }
 0x90e   : > { %v6567_v13 = vadd.f32 %v6561_v12, %v6556_v56  ;;  %v10084_v12 = vld [vmem:[%s13247_s5 + $0xb8] sm:$0xf0]  ;;  %6959 = vmatpush.bf16.msrb.mxu3 %v10083_v10 }
 0x90f   : > { %v10087_v56 = vor.u32 %v10910_v9, %v10084_v12 }
 0x910   : > { %v6570_v53 = vmax.f32 %v6567_v13, 0.0  ;;  %v10018_v13 = vld [vmem:[%s13247_s5 + $0x30] sm:$0xf] }
 0x911   : > { %v6539_v15 = vpop.f32.mrf.mxu2  ;;  %6987 = vmatpush.bf16.msra.mxu2 %v10087_v56 }
 0x912   : > { %v6585_v45 = vrot.slane %v6570_v53, 7  ;;  %6604 = vst [vmem:[#allocation1 + $0x9] sm:$0xff] %v6570_v53  ;;  %v10894_v15 = vld [vmem:[%s13247_s5 + $0x34] sm:$0xf] }
 0x914   : > { %v6586_v6 = vsel %vm1449_vm2, %v12891_v57, %v6585_v45 }
 0x915   : > { %6587 = vrot.lane.b32.xlu1 %v6586_v6, %s13242_s3  ;;  %v10020_v6 = vld [vmem:[%s13247_s5 + $0x38] sm:$0xf0] }
 0x919   : > { %v6606_v23 = vld [vmem:[#allocation1 + $0x1] ss:$9 sm:$0xff] }
 0x91a   : > { %6607 = vrot.lane.b32.xlu2 %v6606_v23, %s13242_s3  ;;  %6615 = vst [vmem:[#allocation1] sm:$0xff] %v12888_v4  ;;  %v10074_v23 = vld [vmem:[%s13247_s5 + $0xa0] sm:$0xf] }
 0x91b   : > { %6616 = vst [vmem:[#allocation1 + $0x9] sm:$0xff] %v12891_v57 }
 0x922   : > { %v6618_v61 = vld [vmem:[#allocation1 + $0x2] ss:$9 sm:$0xff] }
 0x923   : > { %6623 = vst [vmem:[#allocation1] sm:$0xff] %v12891_v57 }
 0x924   : > { %6624 = vst [vmem:[#allocation1 + $0x9] sm:$0xff] %v6570_v53 }
 0x925   : > { %6621 = vst.msk [vmem:[#allocation6 + $0x5] ss:$8 sm:$0x3] %vm11461_vm3, %v6618_v61  ;;  %v10909_v61 = vld [vmem:[%s13247_s5 + $0xa4] sm:$0xf0] }
 0x92b   : > { %v6626_v11 = vld [vmem:[#allocation1 + $0x2] ss:$9 sm:$0xff] }
 0x92c   : > { %6627 = vrot.lane.b32.xlu0 %v6626_v11, %s13242_s3  ;;  %6635 = vst [vmem:[#allocation1] sm:$0xff] %v12888_v4  ;;  %v10023_v11 = vor.u32 %v10894_v15, %v10020_v6 }
 0x92d   : > { %6636 = vst [vmem:[#allocation1 + $0x9] sm:$0xff] %v12891_v57 }
 0x934   : > { %v6638_v24 = vld [vmem:[#allocation1 + $0x3] ss:$9 sm:$0xff] }
 0x935   : > { %6643 = vst [vmem:[#allocation1] sm:$0xff] %v12891_v57 }
 0x936   : > { %6644 = vst [vmem:[#allocation1 + $0x9] sm:$0xff] %v6570_v53 }
 0x937   : > { %6641 = vst.msk [vmem:[#allocation6 + $0x7] ss:$8 sm:$0x3] %vm11461_vm3, %v6638_v24  ;;  %v10075_v24 = vor.u32 %v10909_v61, %v10074_v23 }
 0x939   : > { %6960 = vmatpush.bf16.msrb.mxu3 %v10075_v24 }
 0x93d   : > { %v6646_v25 = vld [vmem:[#allocation1 + $0x3] ss:$9 sm:$0xff] }
 0x93e   : > { %6647 = vrot.lane.b32.xlu1 %v6646_v25, %s13242_s3  ;;  %6655 = vst [vmem:[#allocation1] sm:$0xff] %v12888_v4  ;;  %v10908_v25 = vld [vmem:[%s13247_s5 + $0xa4] sm:$0xf] }
 0x93f   : > { %6656 = vst [vmem:[#allocation1 + $0x9] sm:$0xff] %v12891_v57 }
 0x946   : > { %v6658_v1 = vld [vmem:[#allocation1 + $0x4] ss:$9 sm:$0xff] }
 0x947   : > { %6663 = vst [vmem:[#allocation1] sm:$0xff] %v12891_v57 }
 0x948   : > { %6664 = vst [vmem:[#allocation1 + $0x9] sm:$0xff] %v6570_v53 }
 0x949   : > { %6661 = vst.msk [vmem:[#allocation6 + $0x11] ss:$8 sm:$0x3] %vm11461_vm3, %v6658_v1  ;;  %v10076_v1 = vld [vmem:[%s13247_s5 + $0xa8] sm:$0xf0] }
 0x94f   : > { %v6666_v21 = vld [vmem:[#allocation1 + $0x4] ss:$9 sm:$0xff] }
 0x950   : > { %6667 = vrot.lane.b32.xlu2 %v6666_v21, %s13242_s3  ;;  %6675 = vst [vmem:[#allocation1] sm:$0xff] %v12888_v4  ;;  %v10079_v21 = vor.u32 %v10908_v25, %v10076_v1 }
 0x951   : > { %6676 = vst [vmem:[#allocation1 + $0x9] sm:$0xff] %v12891_v57 }
 0x952   : > { %6988 = vmatpush.bf16.msra.mxu2 %v10079_v21 }
 0x958   : > { %v6678_v14 = vld [vmem:[#allocation1 + $0x5] ss:$9 sm:$0xff] }
 0x959   : > { %6683 = vst [vmem:[#allocation1] sm:$0xff] %v12891_v57 }
 0x95a   : > { %6684 = vst [vmem:[#allocation1 + $0x9] sm:$0xff] %v6570_v53 }
 0x95b   : > { %6681 = vst.msk [vmem:[#allocation6 + $0x13] ss:$8 sm:$0x3] %vm11461_vm3, %v6678_v14  ;;  %v10010_v14 = vld [vmem:[%s13247_s5 + $0x20] sm:$0xf] }
 0x961   : > { %v6686_v29 = vld [vmem:[#allocation1 + $0x5] ss:$9 sm:$0xff] }
 0x962   : > { %6687 = vrot.lane.b32.xlu0 %v6686_v29, %s13242_s3  ;;  %6695 = vst [vmem:[#allocation1] sm:$0xff] %v12888_v4  ;;  %v10893_v29 = vld [vmem:[%s13247_s5 + $0x24] sm:$0xf0] }
 0x963   : > { %6696 = vst [vmem:[#allocation1 + $0x9] sm:$0xff] %v12891_v57 }
 0x96a   : > { %v6698_v3 = vld [vmem:[#allocation1 + $0x6] ss:$9 sm:$0xff] }
 0x96b   : > { %6701 = vst.msk [vmem:[#allocation6 + $0x15] ss:$8 sm:$0x3] %vm11461_vm3, %v6698_v3  ;;  %v10892_v3 = vld [vmem:[%s13247_s5 + $0x24] sm:$0xf] }
 0x96c   : > { %6703 = vst [vmem:[#allocation1] sm:$0xff] %v12891_v57 }
 0x96d   : > { %6704 = vst [vmem:[#allocation1 + $0x9] sm:$0xff] %v6570_v53 }
 0x974   : > { %v6706_v22 = vld [vmem:[#allocation1 + $0x6] ss:$9 sm:$0xff]  ;;  %v6608_v30 = vpop.permute.xlu2 %6607 }
 0x975   : > { %6707 = vrot.lane.b32.xlu1 %v6706_v22, %s13242_s3  ;;  %6715 = vst [vmem:[#allocation1] sm:$0xff] %v12888_v4  ;;  %v6609_v19 = vrot.slane %v6608_v30, 1  ;;  %v10899_v4 = vld [vmem:[%s13247_s5 + $0x54] sm:$0xf0]  ;;  %v10011_v22 = vor.u32 %v10893_v29, %v10010_v14 }
 0x976   : > { %6716 = vst [vmem:[#allocation1 + $0x9] sm:$0xff] %v12891_v57  ;;  %v10035_v55 = vor.u32 %v10899_v4, %v10034_v20  ;;  %v9996_v4 = vld [vmem:[%s13247_s5 + $0x8] sm:$0xf0] }
 0x977   : > { %v6610_v26 = vsel %vm1174_vm1, %v6608_v30, %v6609_v19  ;;  %v10012_v30 = vld [vmem:[%s13247_s5 + $0x28] sm:$0xf0] }
 0x978   : > { %6613 = vst.msk [vmem:[#allocation6 + $0x4] ss:$8 sm:$0x3] %vm11461_vm3, %v6610_v26  ;;  %6943 = vmatpush.bf16.msra.mxu1 %v10035_v55  ;;  %v10015_v19 = vor.u32 %v10892_v3, %v10012_v30  ;;  %v10066_v26 = vld [vmem:[%s13247_s5 + $0x90] sm:$0xf] }
 0x97c   : > { %6944 = vmatpush.bf16.msra.mxu1 %v10027_v2 }
 0x97d   : > { %v6718_v31 = vld [vmem:[#allocation1 + $0x7] ss:$9 sm:$0xff] }
 0x97e   : > { %6721 = vst.msk [vmem:[#allocation6 + $0x17] ss:$8 sm:$0x3] %vm11461_vm3, %v6718_v31  ;;  %v10907_v31 = vld [vmem:[%s13247_s5 + $0x94] sm:$0xf0] }
 0x97f   : > { %6723 = vst [vmem:[#allocation1] sm:$0xff] %v12891_v57  ;;  %v10036_v57 = vld [vmem:[%s13247_s5 + $0x58] sm:$0xf0] }
 0x980   : > { %6724 = vst [vmem:[#allocation1 + $0x9] sm:$0xff] %v6570_v53  ;;  %v10039_v60 = vor.u32 %v10898_v54, %v10036_v57  ;;  %v10895_v53 = vld [vmem:[%s13247_s5 + $0x34] sm:$0xf0] }
 0x981   : > { %v10019_v45 = vor.u32 %v10895_v53, %v10018_v13 }
 0x982   : > { %6971 = vmatpush.bf16.msra.mxu0 %v10039_v60 }
 0x983   : > { %6945 = vmatpush.bf16.msra.mxu1 %v10019_v45 }
 0x986   : > { %6972 = vmatpush.bf16.msra.mxu0 %v10031_v17 }
 0x987   : > { %v6726_v16 = vld [vmem:[#allocation1 + $0x7] ss:$9 sm:$0xff]  ;;  %v6588_v34 = vpop.permute.xlu1 %6587  ;;  %6946 = vmatpush.bf16.msra.mxu1 %v10011_v22 }
 0x988   : > { %6727 = vrot.lane.b32.xlu2 %v6726_v16, %s13242_s3  ;;  %v6589_v32 = vrot.slane %v6588_v34, 1  ;;  %v10906_v16 = vld [vmem:[%s13247_s5 + $0x94] sm:$0xf]  ;;  %s13248_s3 = sld [smem:[#allocation28_spill]] }
 0x98a   : > { %v6590_v38 = vsel %vm1174_vm1, %v6588_v34, %v6589_v32  ;;  %6973 = vmatpush.bf16.msra.mxu0 %v10023_v11  ;;  %v10067_v34 = vor.u32 %v10907_v31, %v10066_v26  ;;  %v10068_v32 = vld [vmem:[%s13247_s5 + $0x98] sm:$0xf0] }
 0x98b   : > { %6593 = vst.msk [vmem:[#allocation6 + $0x2] ss:$8 sm:$0x3] %vm11461_vm3, %v6590_v38  ;;  %v10071_v38 = vor.u32 %v10906_v16, %v10068_v32  ;;  %6947 = vmatpush.bf16.msra.mxu1 %v10003_v41 }
 0x98c   : > { %6961 = vmatpush.bf16.msrb.mxu3 %v10067_v34 }
 0x98d   : > { %6989 = vmatpush.bf16.msra.mxu2 %v10071_v38 }
 0x98e   : > { %6974 = vmatpush.bf16.msra.mxu0 %v10015_v19  ;;  %v10148_v28 = vld [vmem:[%s13248_s3 + $0x70] sm:$0xf]  ;;  %v10887_v55 = vld [vmem:[%s13248_s3 + $0xb4] sm:$0xf0]  ;;  %v10886_v59 = vld [vmem:[%s13248_s3 + $0xb4] sm:$0xf] }
 0x98f   : > { %v10180_v54 = vld [vmem:[%s13248_s3 + $0xb0] sm:$0xf]  ;;  %v10182_v60 = vld [vmem:[%s13248_s3 + $0xb8] sm:$0xf0]  ;;  %v10140_v35 = vld [vmem:[%s13248_s3 + $0x60] sm:$0xf] }
 0x990   : > { %6962 = vmatpush.bf16.msrb.mxu3 %v10059_v47  ;;  %v10181_v58 = vor.u32 %v10887_v55, %v10180_v54  ;;  %v10185_v62 = vor.u32 %v10886_v59, %v10182_v60  ;;  %v10877_v2 = vld [vmem:[%s13248_s3 + $0x64] sm:$0xf0]  ;;  %v10876_v17 = vld [vmem:[%s13248_s3 + $0x64] sm:$0xf]  ;;  %v10142_v5 = vld [vmem:[%s13248_s3 + $0x68] sm:$0xf0] }
 0x991   : > { %v10141_v7 = vor.u32 %v10877_v2, %v10140_v35  ;;  %v10145_v9 = vor.u32 %v10876_v17, %v10142_v5  ;;  %v10172_v10 = vld [vmem:[%s13248_s3 + $0xa0] sm:$0xf]  ;;  %v10885_v12 = vld [vmem:[%s13248_s3 + $0xa4] sm:$0xf0]  ;;  %v10884_v56 = vld [vmem:[%s13248_s3 + $0xa4] sm:$0xf] }
 0x992   : > { %6975 = vmatpush.bf16.msra.mxu0 %v10007_v36  ;;  %v10173_v53 = vor.u32 %v10885_v12, %v10172_v10  ;;  %v10174_v15 = vld [vmem:[%s13248_s3 + $0xa8] sm:$0xf0]  ;;  %v10132_v45 = vld [vmem:[%s13248_s3 + $0x50] sm:$0xf]  ;;  %v10875_v6 = vld [vmem:[%s13248_s3 + $0x54] sm:$0xf0] }
 0x993   : > { %v10177_v61 = vor.u32 %v10884_v56, %v10174_v15  ;;  %v10133_v11 = vor.u32 %v10875_v6, %v10132_v45  ;;  %v10874_v24 = vld [vmem:[%s13248_s3 + $0x54] sm:$0xf]  ;;  %v10134_v25 = vld [vmem:[%s13248_s3 + $0x58] sm:$0xf0]  ;;  %v10164_v21 = vld [vmem:[%s13248_s3 + $0x90] sm:$0xf] }
 0x994   : > { %v10137_v1 = vor.u32 %v10874_v24, %v10134_v25  ;;  %v10883_v14 = vld [vmem:[%s13248_s3 + $0x94] sm:$0xf0]  ;;  %v10882_v29 = vld [vmem:[%s13248_s3 + $0x94] sm:$0xf]  ;;  %v10166_v30 = vld [vmem:[%s13248_s3 + $0x98] sm:$0xf0] }
 0x995   : > { %v10165_v22 = vor.u32 %v10883_v14, %v10164_v21  ;;  %v10124_v19 = vld [vmem:[%s13248_s3 + $0x40] sm:$0xf]  ;;  %v10873_v26 = vld [vmem:[%s13248_s3 + $0x44] sm:$0xf0]  ;;  %v10169_v31 = vor.u32 %v10882_v29, %v10166_v30  ;;  %v10872_v16 = vld [vmem:[%s13248_s3 + $0x44] sm:$0xf] }
 0x996   : > { %v10125_v34 = vor.u32 %v10873_v26, %v10124_v19  ;;  %v10126_v32 = vld [vmem:[%s13248_s3 + $0x48] sm:$0xf0]  ;;  %v10156_v37 = vld [vmem:[%s13248_s3 + $0x80] sm:$0xf]  ;;  %v10881_v39 = vld [vmem:[%s13248_s3 + $0x84] sm:$0xf0] }
 0x997   : > { %v10129_v38 = vor.u32 %v10872_v16, %v10126_v32  ;;  %v10880_v40 = vld [vmem:[%s13248_s3 + $0x84] sm:$0xf]  ;;  %v10157_v41 = vor.u32 %v10881_v39, %v10156_v37  ;;  %v10158_v42 = vld [vmem:[%s13248_s3 + $0x88] sm:$0xf0]  ;;  %v10116_v43 = vld [vmem:[%s13248_s3 + $0x30] sm:$0xf] }
 0x998   : > { %v10871_v44 = vld [vmem:[%s13248_s3 + $0x34] sm:$0xf0]  ;;  %v10161_v36 = vor.u32 %v10880_v40, %v10158_v42  ;;  %v10102_v54 = vld [vmem:[%s13248_s3 + $0x18] sm:$0xf0]  ;;  %v10092_v59 = vld [vmem:[%s13248_s3] sm:$0xf] }
 0x999   : > { %v10117_v47 = vor.u32 %v10871_v44, %v10116_v43  ;;  %v10865_v35 = vld [vmem:[%s13248_s3 + $0x4] sm:$0xf0]  ;;  %v10094_v2 = vld [vmem:[%s13248_s3 + $0x8] sm:$0xf0]  ;;  %v10927_v21 = vld [vmem:[%s11270_s27 + $0x74] sm:$0xf0] }
 0x99a   : > { %v10093_v5 = vor.u32 %v10865_v35, %v10092_v59  ;;  %v10926_v14 = vld [vmem:[%s11270_s27 + $0x74] sm:$0xf]  ;;  %v10248_v29 = vld [vmem:[%s11270_s27 + $0x78] sm:$0xf0]  ;;  %v10278_v26 = vld [vmem:[%s11270_s27 + $0xb0] sm:$0xf] }
 0x99b   : > { %v10934_v16 = vld [vmem:[%s11270_s27 + $0xb4] sm:$0xf]  ;;  %v10238_v42 = vld [vmem:[%s11270_s27 + $0x60] sm:$0xf]  ;;  %v10925_v43 = vld [vmem:[%s11270_s27 + $0x64] sm:$0xf0] }
 0x99c   : > { %v10264_v59 = vld [vmem:[%s11270_s27 + $0x98] sm:$0xf0] }
 0x99e   : > { %v6628_v33 = vpop.permute.xlu0 %6627 }
 0x99f   : > { %v6629_v48 = vrot.slane %v6628_v33, 1 }
 0x9a1   : > { %v6630_v46 = vsel %vm1174_vm1, %v6628_v33, %v6629_v48  ;;  %v10063_v33 = vor.u32 %v10904_v8, %v10060_v27  ;;  %v10879_v48 = vld [vmem:[%s13248_s3 + $0x74] sm:$0xf0]  ;;  %v10870_v8 = vld [vmem:[%s13248_s3 + $0x34] sm:$0xf]  ;;  %v10118_v27 = vld [vmem:[%s13248_s3 + $0x38] sm:$0xf0] }
 0x9a2   : > { %6633 = vst.msk [vmem:[#allocation6 + $0x6] ss:$8 sm:$0x3] %vm11461_vm3, %v6630_v46  ;;  %v10878_v46 = vld [vmem:[%s13248_s3 + $0x74] sm:$0xf] }
 0x9a3   : > { %6990 = vmatpush.bf16.msra.mxu2 %v10063_v33  ;;  %v10108_v33 = vld [vmem:[%s13248_s3 + $0x20] sm:$0xf] }
 0x9a9   : > { %v6735_v56 = vld [vmem:[#allocation6] sm:$0xff]  ;;  %v6736_v45 = vld [vmem:[#allocation6 + $0x8] sm:$0xff] }
 0x9aa   : > { %v6668_v49 = vpop.permute.xlu2 %6667 }
 0x9ab   : > { %v6669_v0 = vrot.slane %v6668_v49, 1 }
 0x9ad   : > { %v6670_v50 = vsel %vm1174_vm1, %v6668_v49, %v6669_v0  ;;  %v10150_v49 = vld [vmem:[%s13248_s3 + $0x78] sm:$0xf0]  ;;  %v10149_v0 = vor.u32 %v10879_v48, %v10148_v28  ;;  %v10121_v28 = vor.u32 %v10870_v8, %v10118_v27  ;;  %v10869_v48 = vld [vmem:[%s13248_s3 + $0x24] sm:$0xf0]  ;;  %v10240_v8 = vld [vmem:[%s11270_s27 + $0x68] sm:$0xf0] }
 0x9ae   : > { %6673 = vst.msk [vmem:[#allocation6 + $0x12] ss:$8 sm:$0x3] %vm11461_vm3, %v6670_v50  ;;  %v10153_v50 = vor.u32 %v10878_v46, %v10150_v49  ;;  %v10868_v46 = vld [vmem:[%s13248_s3 + $0x24] sm:$0xf]  ;;  %v10109_v49 = vor.u32 %v10869_v48, %v10108_v33 }
 0x9af   : > { %7119 = vmatpush.bf16.msra.mxu3 %v10149_v0  ;;  %v10110_v0 = vld [vmem:[%s13248_s3 + $0x28] sm:$0xf0]  ;;  %v10270_v33 = vld [vmem:[%s11270_s27 + $0xa0] sm:$0xf]  ;;  %v10933_v48 = vld [vmem:[%s11270_s27 + $0xa4] sm:$0xf0] }
 0x9b0   : > { %v6648_v51 = vpop.permute.xlu1 %6647  ;;  %7147 = vmatpush.bf16.msrb.mxu2 %v10153_v50 }
 0x9b1   : > { %v6649_v52 = vrot.slane %v6648_v51, 1 }
 0x9b3   : > { %v6650_v63 = vsel %vm1174_vm1, %v6648_v51, %v6649_v52  ;;  %v9994_v51 = vld [vmem:[%s13247_s5] sm:$0xf]  ;;  %v10889_v52 = vld [vmem:[%s13247_s5 + $0x4] sm:$0xf0]  ;;  %7120 = vmatpush.bf16.msra.mxu3 %v10141_v7 }
 0x9b4   : > { %6653 = vst.msk [vmem:[#allocation6 + $0x10] ss:$8 sm:$0x3] %vm11461_vm3, %v6650_v63  ;;  %v10888_v63 = vld [vmem:[%s13247_s5 + $0x4] sm:$0xf]  ;;  %v9995_v20 = vor.u32 %v10889_v52, %v9994_v51  ;;  %7148 = vmatpush.bf16.msrb.mxu2 %v10145_v9  ;;  %v10113_v51 = vor.u32 %v10868_v46, %v10110_v0  ;;  %v10239_v0 = vor.u32 %v10925_v43, %v10238_v42  ;;  %s7448_s5 = sshll.u32 %s12321_s1, 4  ;;  %s7449_s5 = int_to_ptr.vmem [resolvable:$true] %s7448_s5 }
 0x9b5   : > { %v9999_v57 = vor.u32 %v10888_v63, %v9996_v4  ;;  %v10100_v52 = vld [vmem:[%s13248_s3 + $0x10] sm:$0xf]  ;;  %v10866_v4 = vld [vmem:[%s13248_s3 + $0x14] sm:$0xf]  ;;  %v10932_v46 = vld [vmem:[%s11270_s27 + $0xa4] sm:$0xf] }
 0x9b6   : > { %6948 = vmatpush.bf16.msra.mxu1 %v9995_v20  ;;  %v10867_v20 = vld [vmem:[%s13248_s3 + $0x14] sm:$0xf0]  ;;  %v10912_v42 = vld [vmem:[%s11270_s27 + $0x4] sm:$0xf]  ;;  %v10192_v43 = vld [vmem:[%s11270_s27 + $0x8] sm:$0xf0] }
 0x9b7   : > { %6976 = vmatpush.bf16.msra.mxu0 %v9999_v57  ;;  %7121 = vmatpush.bf16.msra.mxu3 %v10133_v11  ;;  %v10101_v57 = vor.u32 %v10867_v20, %v10100_v52  ;;  %v10923_v52 = vld [vmem:[%s11270_s27 + $0x54] sm:$0xf0]  ;;  %v10232_v20 = vld [vmem:[%s11270_s27 + $0x58] sm:$0xf0] }
 0x9b8   : > { %7149 = vmatpush.bf16.msrb.mxu2 %v10137_v1  ;;  %v10246_v1 = vld [vmem:[%s11270_s27 + $0x70] sm:$0xf] }
 0x9b9   : > { %v10247_v40 = vor.u32 %v10927_v21, %v10246_v1 }
 0x9ba   : > { %7137 = vmatpush.bf16.msrb.mxu1 %v10181_v58  ;;  %v10105_v58 = vor.u32 %v10866_v4, %v10102_v54  ;;  %v10271_v4 = vor.u32 %v10933_v48, %v10270_v33 }
 0x9bb   : > { %7165 = vmatpush.bf16.msrb.mxu0 %v10185_v62  ;;  %7122 = vmatpush.bf16.msra.mxu3 %v10125_v34  ;;  %v10864_v62 = vld [vmem:[%s13248_s3 + $0x4] sm:$0xf]  ;;  %v10280_v34 = vld [vmem:[%s11270_s27 + $0xb8] sm:$0xf0]  ;;  %s7446_s3 = scalar_lea.hbm %s11280_s6, %s11308_s0 }
 0x9bc   : > { %7150 = vmatpush.bf16.msrb.mxu2 %v10129_v38  ;;  %v10097_v7 = vor.u32 %v10864_v62, %v10094_v2  ;;  %v10222_v62 = vld [vmem:[%s11270_s27 + $0x40] sm:$0xf]  ;;  %v10921_v2 = vld [vmem:[%s11270_s27 + $0x44] sm:$0xf0]  ;;  %s7450_s7 = sshll.u32 %s7446_s3, 4  ;;  %s7451_s7 = int_to_ptr.hbm [resolvable:$true] %s7450_s7 }
 0x9bd   : > { %s11039_s10 = sshra.s32 %s7451_s7, 4  ;;  %s11040_s10 = int_to_ptr.hbm [resolvable:$true] %s11039_s10 }
 0x9be   : > { %7138 = vmatpush.bf16.msrb.mxu1 %v10173_v53  ;;  %s11041_s12 = scalar_lea.hbm %s11040_s10, 1  ;;  %p11046_p0 = scmp.lt.s32.totalorder %s11040_s10, %s11280_s6 }
 0x9bf   : > { %7166 = vmatpush.bf16.msrb.mxu0 %v10177_v61  ;;  %7123 = vmatpush.bf16.msra.mxu3 %v10117_v47  ;;  %v10924_v47 = vld [vmem:[%s11270_s27 + $0x64] sm:$0xf]  ;;  %p11042_p11 = scmp.ne.s32.totalorder %s11040_s10, %s11041_s12  ;;  %p11047_p1 = scmp.lt.s32.totalorder %s11045_s13, %s11041_s12 }
 0x9c0   : > { %7151 = vmatpush.bf16.msrb.mxu2 %v10121_v28  ;;  %v10283_v28 = vor.u32 %v10934_v16, %v10280_v34  ;;  %v10198_v16 = vld [vmem:[%s11270_s27 + $0x10] sm:$0xf]  ;;  %v10915_v34 = vld [vmem:[%s11270_s27 + $0x14] sm:$0xf0] }
 0x9c1   : > { %p11043_p12 = pnand %p11042_p11, %p11325_p5  ;;  %p11048_p2 = por %p11047_p1, %p11046_p0 }
 0x9c2   : > { %7139 = vmatpush.bf16.msrb.mxu1 %v10165_v22 }
 0x9c3   : > { %7167 = vmatpush.bf16.msrb.mxu0 %v10169_v31  ;;  %7124 = vmatpush.bf16.msra.mxu3 %v10109_v49  ;;  %v10935_v31 = vld [vmem:[%s11270_s27 + $0xb4] sm:$0xf0]  ;;  %v10272_v49 = vld [vmem:[%s11270_s27 + $0xa8] sm:$0xf0]  ;;  %p11044_p13 = pneg %p11043_p12 }
 0x9c4   : > { %7152 = vmatpush.bf16.msrb.mxu2 %v10113_v51  ;;  %v10279_v27 = vor.u32 %v10935_v31, %v10278_v26  ;;  %v10230_v51 = vld [vmem:[%s11270_s27 + $0x50] sm:$0xf]  ;;  %v10275_v54 = vor.u32 %v10932_v46, %v10272_v49 }
 0x9c5   : > { %p11049_p3 = pnand %p11048_p2, %p11044_p13 }
 0x9c6   : > { %7140 = vmatpush.bf16.msrb.mxu1 %v10157_v41  ;;  %v10251_v41 = vor.u32 %v10926_v14, %v10248_v29 }
 0x9c7   : > { %7168 = vmatpush.bf16.msrb.mxu0 %v10161_v36  ;;  %7125 = vmatpush.bf16.msra.mxu3 %v10101_v57  ;;  %v10931_v57 = vld [vmem:[%s11270_s27 + $0x94] sm:$0xf0] }
 0x9c8   : > { %7153 = vmatpush.bf16.msrb.mxu2 %v10105_v58  ;;  %v10930_v58 = vld [vmem:[%s11270_s27 + $0x94] sm:$0xf] }
 0x9cb   : > { %7126 = vmatpush.bf16.msra.mxu3 %v10093_v5  ;;  %v10224_v5 = vld [vmem:[%s11270_s27 + $0x48] sm:$0xf0] }
 0x9cc   : > { %7154 = vmatpush.bf16.msrb.mxu2 %v10097_v7 }
 0x9d4   : > { %v6688_v13 = vpop.permute.xlu0 %6687 }
 0x9d5   : > { %v6689_v23 = vrot.slane %v6688_v13, 1 }
 0x9d7   : > { %v6690_v3 = vsel %vm1174_vm1, %v6688_v13, %v6689_v23 }
 0x9d8   : > { %6693 = vst.msk [vmem:[#allocation6 + $0x14] ss:$8 sm:$0x3] %vm11461_vm3, %v6690_v3 }
 0x9e2   : > { %v6728_v50 = vpop.permute.xlu2 %6727 }
 0x9e3   : > { %v6729_v63 = vrot.slane %v6728_v50, 1 }
 0x9e5   : > { %v6730_v55 = vsel %vm1174_vm1, %v6728_v50, %v6729_v63  ;;  %v10243_v50 = vor.u32 %v10924_v47, %v10240_v8  ;;  %v10922_v63 = vld [vmem:[%s11270_s27 + $0x54] sm:$0xf] }
 0x9e6   : > { %6733 = vst.msk [vmem:[#allocation6 + $0x20] ss:$8 sm:$0x3] %vm11461_vm3, %v6730_v55  ;;  %v10262_v55 = vld [vmem:[%s11270_s27 + $0x90] sm:$0xf]  ;;  %v10235_v35 = vor.u32 %v10922_v63, %v10232_v20 }
 0x9e7   : > { %v6708_v60 = vpop.permute.xlu1 %6707  ;;  %v10263_v7 = vor.u32 %v10931_v57, %v10262_v55 }
 0x9e8   : > { %v6709_v17 = vrot.slane %v6708_v60, 1 }
 0x9ea   : > { %v6710_v9 = vsel %vm1174_vm1, %v6708_v60, %v6709_v17  ;;  %v10231_v60 = vor.u32 %v10923_v52, %v10230_v51  ;;  %v10920_v17 = vld [vmem:[%s11270_s27 + $0x44] sm:$0xf] }
 0x9eb   : > { %6713 = vst.msk [vmem:[#allocation6 + $0x16] ss:$8 sm:$0x3] %vm11461_vm3, %v6710_v9  ;;  %v10267_v9 = vor.u32 %v10930_v58, %v10264_v59 }
 0x9ed   : > { %v6739_v10 = vld [vmem:[#allocation6 + $0x20] sm:$0x3]  ;;  %v6740_v12 = vld [vmem:[#allocation6 + $0x28] sm:$0x3] }
 0x9ee   : > { %v13062_v13 = vpack.c.bf16 %v6739_v10, %v6739_v10  ;;  %v13064_v53 = vpack.c.bf16 %v6740_v12, %v6740_v12  ;;  %v10254_v10 = vld [vmem:[%s11270_s27 + $0x80] sm:$0xf]  ;;  %v10929_v12 = vld [vmem:[%s11270_s27 + $0x84] sm:$0xf0] }
 0x9ef   : > { %v10255_v1 = vor.u32 %v10929_v12, %v10254_v10 }
 0x9f0   : > { %v6801_v11 = vshll.u32 %v13062_v13, 16  ;;  %v6813_v25 = vshll.u32 %v13064_v53, 16 }
 0x9f2   : > { %v6737_v15 = vld [vmem:[#allocation6 + $0x10] sm:$0xff]  ;;  %v6738_v6 = vld [vmem:[#allocation6 + $0x18] sm:$0xff]  ;;  %v6803_v38 = vrot.slane %v6801_v11, 1  ;;  %v6815_v39 = vrot.slane %v6813_v25, 1 }
 0x9f3   : > { %v13066_v18 = vpack.c.bf16 %v6737_v15, %v6735_v56  ;;  %v13068_v23 = vpack.c.bf16 %v6738_v6, %v6736_v45  ;;  %v10928_v56 = vld [vmem:[%s11270_s27 + $0x84] sm:$0xf]  ;;  %v10256_v15 = vld [vmem:[%s11270_s27 + $0x88] sm:$0xf0]  ;;  %v10223_v45 = vor.u32 %v10921_v2, %v10222_v62  ;;  %v10227_v6 = vor.u32 %v10920_v17, %v10224_v5  ;;  %v10919_v11 = vld [vmem:[%s11270_s27 + $0x34] sm:$0xf0] }
 0x9f4   : > { %v10216_v25 = vld [vmem:[%s11270_s27 + $0x38] sm:$0xf0]  ;;  %v10259_v21 = vor.u32 %v10928_v56, %v10256_v15 }
 0x9f5   : > { %v6796_v61 = vshll.u32 %v13066_v18, 16  ;;  %v6808_v24 = vshll.u32 %v13068_v23, 16  ;;  %v6794_v3 = vshrl.u32 %v13066_v18, 16  ;;  %v6806_v30 = vshrl.u32 %v13068_v23, 16 }
 0x9f6   : > { %v7207_v47 = vrot.slane %v13068_v23, 1  ;;  %v7204_v8 = vrot.slane %v13066_v18, 1 }
 0x9f7   : > { %v6798_v22 = vrot.slane %v6796_v61, 1  ;;  %v6810_v19 = vrot.slane %v6808_v24, 1  ;;  %v10214_v61 = vld [vmem:[%s11270_s27 + $0x30] sm:$0xf]  ;;  %v10918_v24 = vld [vmem:[%s11270_s27 + $0x34] sm:$0xf] }
 0x9f8   : > { %v10215_v14 = vor.u32 %v10919_v11, %v10214_v61  ;;  %v10219_v29 = vor.u32 %v10918_v24, %v10216_v25 }
 0x9f9   : > { %v6799_v32 = vor.u32 %v6798_v22, %v6794_v3  ;;  %v6811_v37 = vor.u32 %v6810_v19, %v6806_v30  ;;  %v10206_v3 = vld [vmem:[%s11270_s27 + $0x20] sm:$0xf]  ;;  %v10917_v22 = vld [vmem:[%s11270_s27 + $0x24] sm:$0xf0]  ;;  %v10916_v30 = vld [vmem:[%s11270_s27 + $0x24] sm:$0xf] }
 0x9fa   : > { %v10208_v19 = vld [vmem:[%s11270_s27 + $0x28] sm:$0xf0]  ;;  %v10207_v26 = vor.u32 %v10917_v22, %v10206_v3 }
 0x9fb   : > { %v6804_v44 = vsel %vm1028_vm0, %v6799_v32, %v6803_v38  ;;  %v6816_v36 = vsel %vm1028_vm0, %v6811_v37, %v6815_v39  ;;  %v10211_v31 = vor.u32 %v10916_v30, %v10208_v19  ;;  %v10914_v32 = vld [vmem:[%s11270_s27 + $0x14] sm:$0xf]  ;;  %v10200_v38 = vld [vmem:[%s11270_s27 + $0x18] sm:$0xf0]  ;;  %v10199_v37 = vor.u32 %v10915_v34, %v10198_v16 }
 0x9fc   : > { %6949 = vmatmul.bf16.vlgmr.msra.gmra.mxu1 %v6804_v44  ;;  %10088 = vmatmul.msk.bf16.vlgmr.msrb.gmra.mxu3 %vm1174_vm1, %v6816_v36  ;;  %v10203_v39 = vor.u32 %v10914_v32, %v10200_v38 }
 0x9fd   : > { %6977 = vmatmul.bf16.vlgmr.msra.gmra.mxu0 %v6804_v44  ;;  %10089 = vmatmul.msk.bf16.vlgmr.msra.gmra.mxu2 %vm1174_vm1, %v6816_v36  ;;  %v10195_v36 = vor.u32 %v10912_v42, %v10192_v43 }
 0x9fe   : > { %7334 = vmatpush.bf16.msra.mxu1 %v10247_v40  ;;  %7362 = vmatpush.bf16.msra.mxu0 %v10251_v41  ;;  %v10190_v40 = vld [vmem:[%s11270_s27] sm:$0xf]  ;;  %v10913_v41 = vld [vmem:[%s11270_s27 + $0x4] sm:$0xf0] }
 0x9ff   : > { %7352 = vmatpush.bf16.msrb.mxu3 %v10279_v27  ;;  %7380 = vmatpush.bf16.msra.mxu2 %v10283_v28  ;;  %v10191_v44 = vor.u32 %v10913_v41, %v10190_v40  ;;  %v7208_v27 = vrot.slane %v13064_v53, 1  ;;  %v7205_v28 = vrot.slane %v13062_v13, 1 }
 0xa01   : > { %v7209_v33 = vsel %vm7203_vm10, %v7207_v47, %v7208_v27  ;;  %v7206_v48 = vsel %vm7203_vm10, %v7204_v8, %v7205_v28 }
 0xa02   : > { %7335 = vmatpush.bf16.msra.mxu1 %v10239_v0  ;;  %7363 = vmatpush.bf16.msra.mxu0 %v10243_v50 }
 0xa03   : > { %7353 = vmatpush.bf16.msrb.mxu3 %v10271_v4  ;;  %7381 = vmatpush.bf16.msra.mxu2 %v10275_v54 }
 0xa06   : > { %7336 = vmatpush.bf16.msra.mxu1 %v10231_v60  ;;  %7364 = vmatpush.bf16.msra.mxu0 %v10235_v35 }
 0xa07   : > { %7354 = vmatpush.bf16.msrb.mxu3 %v10263_v7  ;;  %7382 = vmatpush.bf16.msra.mxu2 %v10267_v9 }
 0xa0a   : > { %7337 = vmatpush.bf16.msra.mxu1 %v10223_v45  ;;  %7365 = vmatpush.bf16.msra.mxu0 %v10227_v6 }
 0xa0b   : > { %7355 = vmatpush.bf16.msrb.mxu3 %v10255_v1  ;;  %7383 = vmatpush.bf16.msra.mxu2 %v10259_v21 }
 0xa0c   : > { %7127 = vmatmul.bf16.vlgmr.msra.gmra.mxu3 %v13066_v18  ;;  %10186 = vmatmul.msk.bf16.vlgmr.msrb.gmra.mxu1 %vm1174_vm1, %v13068_v23 }
 0xa0d   : > { %7155 = vmatmul.bf16.vlgmr.msrb.gmra.mxu2 %v13066_v18  ;;  %10187 = vmatmul.msk.bf16.vlgmr.msrb.gmra.mxu0 %vm1174_vm1, %v13068_v23 }
 0xa0e   : > { %7338 = vmatpush.bf16.msra.mxu1 %v10215_v14  ;;  %7366 = vmatpush.bf16.msra.mxu0 %v10219_v29 }
 0xa12   : > { %7339 = vmatpush.bf16.msra.mxu1 %v10207_v26  ;;  %7367 = vmatpush.bf16.msra.mxu0 %v10211_v31 }
 0xa16   : > { %7340 = vmatpush.bf16.msra.mxu1 %v10199_v37  ;;  %7368 = vmatpush.bf16.msra.mxu0 %v10203_v39 }
 0xa1a   : > { %7341 = vmatpush.bf16.msra.mxu1 %v10191_v44  ;;  %7369 = vmatpush.bf16.msra.mxu0 %v10195_v36 }
 0xa1c   : > { %10284 = vmatmul.msk.bf16.vlgmr.msrb.gmra.mxu3 %vm1174_vm1, %v7209_v33 }
 0xa1d   : > { %7342 = vmatmul.bf16.vlgmr.msra.gmra.mxu1 %v7206_v48  ;;  %7370 = vmatmul.bf16.vlgmr.msra.gmra.mxu0 %v7206_v48 }
 0xa1e   : > { %10285 = vmatmul.msk.bf16.vlgmr.msra.gmra.mxu2 %vm1174_vm1, %v7209_v33 }
 0xa1f   : > { %11052 = shalt.err (!%p11049_p3)
}
 0xa20   : > { %10937 = dma.vmem_to_hbm [thread:$0]  (%p11325_p5), %s7449_s5, 16, %s7451_s7, %s7433_s9   ;;  %v7394_v62 = vld [vmem:[%s11275_s4] sm:$0x3] }
 0xa21   : > { %v7396_v10 = vperm.slane %v7394_v62, 0  ;;  %v7397_v61 = vperm.slane %v7394_v62, 1  ;;  %s10288_s9 = sshll.u32 %s11383_s18, 5 }
 0xa22   : > { %s968_s13 = scalar_lea.vmem %s11285_s20, %s10288_s9 }
 0xa79   : > { %v6950_v13 = vpop.f32.mrf.mxu1 }
 0xa7a   : > { %v6978_v53 = vpop.f32.mrf.mxu0 }
 0xa7f   : > { %v6964_v18 = vpop.f32.mrf.mxu3 }
 0xa80   : > { %v6992_v23 = vpop.f32.mrf.mxu2  ;;  %v6965_v58 = vadd.f32 %v6964_v18, %v6950_v13 }
 0xa81   : > { %v6952_v46 = vpop.f32.mrf.mxu1  ;;  %v6993_v59 = vadd.f32 %v6992_v23, %v6978_v53 }
 0xa82   : > { %v6980_v49 = vpop.f32.mrf.mxu0 }
 0xa87   : > { %v6966_v0 = vpop.f32.mrf.mxu3 }
 0xa88   : > { %v6994_v50 = vpop.f32.mrf.mxu2  ;;  %v6967_v12 = vadd.f32 %v6966_v0, %v6952_v46 }
 0xa89   : > { %v7142_v51 = vpop.f32.mrf.mxu1  ;;  %v6995_v11 = vadd.f32 %v6994_v50, %v6980_v49 }
 0xa8a   : > { %v7170_v52 = vpop.f32.mrf.mxu0 }
 0xa8f   : > { %v7128_v63 = vpop.f32.mrf.mxu3 }
 0xa90   : > { %v7156_v20 = vpop.f32.mrf.mxu2  ;;  %v7129_v60 = vadd.f32 %v7128_v63, %v6965_v58 }
 0xa91   : > { %v7144_v4 = vpop.f32.mrf.mxu1  ;;  %v7157_v2 = vadd.f32 %v7156_v20, %v6993_v59 }
 0xa92   : > { %v7172_v54 = vpop.f32.mrf.mxu0  ;;  %v7143_v7 = vadd.f32 %v7142_v51, %v7129_v60 }
 0xa93   : > { %v7171_v15 = vadd.f32 %v7170_v52, %v7157_v2 }
 0xa97   : > { %v7130_v55 = vpop.f32.mrf.mxu3 }
 0xa98   : > { %v7158_v57 = vpop.f32.mrf.mxu2  ;;  %v7131_v24 = vadd.f32 %v7130_v55, %v6967_v12 }
 0xa99   : > { %v7159_v21 = vadd.f32 %v7158_v57, %v6995_v11 }
 0xa9a   : > { %v7343_v35 = vpop.f32.mrf.mxu1  ;;  %v7371_v17 = vpop.f32.mrf.mxu0  ;;  %v7145_v30 = vadd.f32 %v7144_v4, %v7131_v24 }
 0xa9b   : > { %v7173_v16 = vadd.f32 %v7172_v54, %v7159_v21 }
 0xa9f   : > { %v7357_v5 = vpop.f32.mrf.mxu3 }
 0xaa0   : > { %v7358_v9 = vadd.f32 %v7357_v5, %v7343_v35 }
 0xaa1   : > { %v7385_v56 = vpop.f32.mrf.mxu2 }
 0xaa2   : > { %v7390_v45 = vadd.f32 %v7358_v9, %v7143_v7  ;;  %v7386_v6 = vadd.f32 %v7385_v56, %v7371_v17  ;;  %v7345_v3 = vpop.f32.mrf.mxu1  ;;  %v7373_v34 = vpop.f32.mrf.mxu0 }
 0xaa4   : > { %v7400_v25 = vadd.f32 %v7396_v10, %v7390_v45  ;;  %v7391_v1 = vadd.f32 %v7386_v6, %v7171_v15 }
 0xaa6   : > { %v7404_v14 = vsub.f32 0.0, %v7400_v25  ;;  %v7401_v29 = vadd.f32 %v7397_v61, %v7391_v1 }
 0xaa7   : > { %v7359_v22 = vpop.f32.mrf.mxu3 }
 0xaa8   : > { %v7408_v19 = vmul.f32 1.442695, %v7404_v14  ;;  %v7405_v26 = vsub.f32 0.0, %v7401_v29  ;;  %v7360_v31 = vadd.f32 %v7359_v22, %v7345_v3 }
 0xaa9   : > { %v7387_v32 = vpop.f32.mrf.mxu2 }
 0xaaa   : > { %11009 = vpow2.f32 %v7408_v19  ;;  %v7410_v38 = vmul.f32 1.442695, %v7405_v26  ;;  %v7392_v37 = vadd.f32 %v7360_v31, %v7145_v30  ;;  %v7388_v39 = vadd.f32 %v7387_v32, %v7373_v34 }
 0xaac   : > { %11011 = vpow2.f32 %v7410_v38  ;;  %v7402_v40 = vadd.f32 %v7396_v10, %v7392_v37  ;;  %v7393_v41 = vadd.f32 %v7388_v39, %v7173_v16 }
 0xaae   : > { %v7406_v42 = vsub.f32 0.0, %v7402_v40  ;;  %v7403_v43 = vadd.f32 %v7397_v61, %v7393_v41 }
 0xab0   : > { %v11010_v44 = vpop.eup %11009  ;;  %v7412_v36 = vmul.f32 1.442695, %v7406_v42  ;;  %v7407_v47 = vsub.f32 0.0, %v7403_v43 }
 0xab1   : > { %v7416_v8 = vadd.f32 1.0, %v11010_v44 }
 0xab2   : > { %v11012_v27 = vpop.eup %11011  ;;  %11013 = vpow2.f32 %v7412_v36  ;;  %v7414_v28 = vmul.f32 1.442695, %v7407_v47 }
 0xab3   : > { %11015 = vrcp.f32 %v7416_v8  ;;  %v7417_v33 = vadd.f32 1.0, %v11012_v27 }
 0xab4   : > { %11017 = vpow2.f32 %v7414_v28 }
 0xab5   : > { %11019 = vrcp.f32 %v7417_v33 }
 0xab8   : > { %v11014_v48 = vpop.eup %11013 }
 0xab9   : > { %v11016_v13 = vpop.eup %11015  ;;  %v7418_v53 = vadd.f32 1.0, %v11014_v48 }
 0xaba   : > { %v11018_v18 = vpop.eup %11017  ;;  %v7424_v23 = vmin.f32 %v11016_v13, 1.0 }
 0xabb   : > { %v11020_v46 = vpop.eup %11019  ;;  %11021 = vrcp.f32 %v7418_v53  ;;  %v7419_v49 = vadd.f32 1.0, %v11018_v18 }
 0xabc   : > { %7428 = vst [vmem:[%s968_s13] sm:$0xff] %v7424_v23  ;;  %v7425_v0 = vmin.f32 %v11020_v46, 1.0 }
 0xabd   : > { %11023 = vrcp.f32 %v7419_v49 }
 0xabe   : > { %7429 = vst.msk [vmem:[%s968_s13 + $0x8] sm:$0xff] %vm1174_vm1, %v7425_v0 }
 0xac1   : > { %v11022_v50 = vpop.eup %11021 }
 0xac2   : > { %v7426_v51 = vmin.f32 %v11022_v50, 1.0 }
 0xac3   : > { %v11024_v52 = vpop.eup %11023 }
 0xac4   : > { %7430 = vst [vmem:[%s968_s13 + $0x10] sm:$0xff] %v7426_v51  ;;  %v7427_v63 = vmin.f32 %v11024_v52, 1.0 }
 0xac6   : > { %7431 = vst.msk [vmem:[%s968_s13 + $0x18] sm:$0xff] %vm1174_vm1, %v7427_v63 }
 0xac7 PF: > { %p10943_p4 = scmp.ge.s32.totalorder %s11087_s28, 2  ;;  %s7465_s8 = sand.u32 1, %s11075_s22  }
 0xac8   : > { %s7466_s12 = scalar_lea.sflag [#allocation8], %s7465_s8 }
 0xac9   : > { %p10940_p5 = pnand %p10943_p4, %p11329_p6 }
 0xacb   : > { %p10941_p7 = pneg %p10940_p5 }
 0xacd   : > { %11070 = dma.done.wait (%p10941_p7), %s7466_s12, 16  }
 0xace   : > { %11072 = vsyncadd (%p10941_p7), %s7466_s12, 4294967280  ;;  %p74_p8 = scmp.ge.s32.totalorder %s11312_s2, 4   ;;  %s13250_s22 = smov %s11079_s23 }
 0xacf   : > { %s13251_s23 = smov %s11083_s26  ;;  %s13252_s26 = smov %s11323_s11 }
 0xad0   : > { %s13253_s28 = smov %s11312_s2  ;;  %76 = sbr.rel (!%p74_p8) target bundleno = 63 (0x3f), region = 325 }
 0xad5   :  { %7479 = vsyncpa [#allocation8], 1 }
 0xad6   :  { %7481 = vsyncpa [#allocation8 + $0x1], 1 }

</bundles_post_ra>
